<compile_context>
chip_gen: v5e
topology: v5e:2x2
jax: 0.10.0
libtpu: 0.0.40
codegen_flags: <defaults>
</compile_context>

<pallas_src>
import jax
import jax.numpy as jnp
from jax import lax
from jax.experimental import pallas as pl
from jax.experimental.pallas import tpu as pltpu

_VMEM = pl.BlockSpec(memory_space=pltpu.MemorySpace.VMEM)
_P_HI = jax.lax.Precision.HIGHEST  # used in the pure-JAX reference only


# ----------------------------------------------------------------------------
# Fused Pallas kernel: lstm1 -> lstm2 -> lstm3 (wavefront) -> dense1..3 head
# ----------------------------------------------------------------------------
def _fused_lstm_mlp_kernel(
    x_ref,                                  # (T*B, F)     time-major, batch-flattened input
    wih1_ref, whh1_ref, b1_ref,             # (F, 512), (128, 512), (1, 512)
    wih2_ref, whh2_ref, b2_ref,             # (128, 256), (64, 256), (1, 256)
    wih3_ref, whh3_ref, b3_ref,             # (64, 128), (32, 128), (1, 128)
    wd1_ref, bd1_ref,                       # (32, 128), (1, 128)   (output padded 96->128)
    wd2_ref, bd2_ref,                       # (128, 128), (1, 128)  (input rows padded 96->128)
    wd3_ref, bd3_ref,                       # (128, 1), (1, 1)
    out_ref,                                # (B, 1)
    g1_ref,                                 # (T*B, 512) scratch: hoisted layer-1 projections
):
    B = out_ref.shape[0]
    T = x_ref.shape[0] // B
    H1 = whh1_ref.shape[0]                  # 128
    H2 = whh2_ref.shape[0]                  # 64
    H3 = whh3_ref.shape[0]                  # 32
    f32 = jnp.float32

    # Hoisted layer-1 input projection for the whole sequence: one MXU matmul,
    # bias folded in.  Off the recurrence critical path.
    # TODO(synk): for long T, chunk this hoist (or grid-tile T, "arbitrary")
    # so g1 scratch stays bounded on v7x's 64 MiB VMEM.
    g1_ref[...] = (
        jnp.dot(x_ref[...], wih1_ref[...], preferred_element_type=f32)
        + b1_ref[...]
    )

    def lstm_step(pre, c, H):
        # pre: (B, 4H) pre-activations, gate column order [i, f, o, g].
        sig = jax.nn.sigmoid(pre[:, : 3 * H])        # one EUP region: i | f | o
        g_g = jnp.tanh(pre[:, 3 * H:])
        i_g = sig[:, 0 * H:1 * H]
        f_g = sig[:, 1 * H:2 * H]
        o_g = sig[:, 2 * H:3 * H]
        c_new = f_g * c + i_g * g_g
        h_new = o_g * jnp.tanh(c_new)
        return h_new, c_new

    h1 = jnp.zeros((B, H1), f32); c1 = jnp.zeros((B, H1), f32)
    h2 = jnp.zeros((B, H2), f32); c2 = jnp.zeros((B, H2), f32)
    h3 = jnp.zeros((B, H3), f32); c3 = jnp.zeros((B, H3), f32)

    # Wavefront: wave s runs layer1 @ t=s, layer2 @ t=s-1, layer3 @ t=s-2.
    # At wave entry h1/h2/h3 hold h1[s-1], h2[s-2], h3[s-3]; all conditions
    # below are static Python so only live stages are traced.
    for s in range(T + 2):
        n1, n2, n3 = h1, h2, h3
        if s < T:                            # layer 1 at t = s
            pre1 = (jnp.dot(h1, whh1_ref[...], preferred_element_type=f32)
                    + g1_ref[s * B:(s + 1) * B, :])
            n1, c1 = lstm_step(pre1, c1, H1)
        if 1 <= s <= T:                      # layer 2 at t = s - 1, input h1[s-1]
            pre2 = (jnp.dot(h2, whh2_ref[...], preferred_element_type=f32)
                    + jnp.dot(h1, wih2_ref[...], preferred_element_type=f32)
                    + b2_ref[...])
            n2, c2 = lstm_step(pre2, c2, H2)
        if 2 <= s <= T + 1:                  # layer 3 at t = s - 2, input h2[s-2]
            pre3 = (jnp.dot(h3, whh3_ref[...], preferred_element_type=f32)
                    + jnp.dot(h2, wih3_ref[...], preferred_element_type=f32)
                    + b3_ref[...])
            n3, c3 = lstm_step(pre3, c3, H3)
        h1, h2, h3 = n1, n2, n3

    # MLP head on layer 3's last hidden state (still in vregs).
    z1 = jnp.dot(h3, wd1_ref[...], preferred_element_type=f32) + bd1_ref[...]
    z1 = jnp.maximum(z1, 0.0)
    z2 = jnp.dot(z1, wd2_ref[...], preferred_element_type=f32) + bd2_ref[...]
    z2 = jnp.maximum(z2, 0.0)
    out_ref[...] = jnp.dot(z2, wd3_ref[...], preferred_element_type=f32) + bd3_ref[...]


# ----------------------------------------------------------------------------
# Weight preparation: transpose to (in, out), merge biases, reorder gates to
# [i, f, o, g] (PyTorch order is [i, f, g, o]).  No hidden/gate padding.
# ----------------------------------------------------------------------------
def _prep_lstm_weights(w_ih, w_hh, b_ih, b_hh):
    def reorder(m):                          # (R, 4H) cols [i,f,g,o] -> [i,f,o,g]
        i, f, g, o = jnp.split(m, 4, axis=1)
        return jnp.concatenate([i, f, o, g], axis=1)

    wih_t = reorder(jnp.transpose(w_ih).astype(jnp.float32))          # (I, 4H)
    whh_t = reorder(jnp.transpose(w_hh).astype(jnp.float32))          # (H, 4H)
    bias = reorder((b_ih + b_hh).astype(jnp.float32).reshape(1, -1))  # (1, 4H)
    return wih_t, whh_t, bias


# ----------------------------------------------------------------------------
# Public forward (PyTorch semantics: x (B, T, 14) -> (B, 1))
# ----------------------------------------------------------------------------
@jax.jit
def lstm_model_forward(x, params):
    B, T, F = x.shape
    Bp = max(8, ((B + 7) // 8) * 8)             # pad batch to a full sublane group

    x = x.astype(jnp.float32)
    x_tbf = jnp.transpose(x, (1, 0, 2))         # (T, B, F): single layout change
    x_tbf = jnp.pad(x_tbf, ((0, 0), (0, Bp - B), (0, 0)))
    x_flat = x_tbf.reshape(T * Bp, F)           # (T*Bp, F)

    wih1, whh1, b1 = _prep_lstm_weights(*params["lstm1"])   # (14,512),(128,512),(1,512)
    wih2, whh2, b2 = _prep_lstm_weights(*params["lstm2"])   # (128,256),(64,256),(1,256)
    wih3, whh3, b3 = _prep_lstm_weights(*params["lstm3"])   # (64,128),(32,128),(1,128)

    w1, bd1 = params["dense1"]                  # (96, 32), (96,)
    w2, bd2 = params["dense2"]                  # (128, 96), (128,)
    w3, bd3 = params["dense3"]                  # (1, 128), (1,)
    D = 128
    # Pad the dense1 path to 128 lanes with zeros (exact: relu(0)=0, 0*w=0).
    wd1 = jnp.pad(jnp.transpose(w1).astype(jnp.float32),
                  ((0, 0), (0, D - w1.shape[0])))            # (32, 128)
    bd1p = jnp.pad(bd1.astype(jnp.float32).reshape(1, -1),
                   ((0, 0), (0, D - bd1.shape[0])))          # (1, 128)
    wd2 = jnp.pad(jnp.transpose(w2).astype(jnp.float32),
                  ((0, D - w2.shape[1]), (0, 0)))            # (128, 128)
    bd2p = bd2.astype(jnp.float32).reshape(1, -1)            # (1, 128)
    wd3 = jnp.transpose(w3).astype(jnp.float32)              # (128, 1)
    bd3p = bd3.astype(jnp.float32).reshape(1, -1)            # (1, 1)

    out = pl.pallas_call(
        _fused_lstm_mlp_kernel,
        out_shape=jax.ShapeDtypeStruct((Bp, 1), jnp.float32),
        in_specs=[_VMEM] * 16,
        out_specs=_VMEM,
        scratch_shapes=[
            pltpu.VMEM((T * Bp, 4 * 128), jnp.float32),      # g1: hoisted layer-1 gates
        ],
        compiler_params=pltpu.CompilerParams(
            vmem_limit_bytes=32 * 1024 * 1024,               # explicit; tiny usage here
        ),
    )(x_flat,
      wih1, whh1, b1,
      wih2, whh2, b2,
      wih3, whh3, b3,
      wd1, bd1p, wd2, bd2p, wd3, bd3p)
    return out[:B]                              # drop padded batch rows, (B, 1)


# ----------------------------------------------------------------------------
# Deterministic parameter init (PyTorch shapes, uniform(-1/sqrt(H), 1/sqrt(H)))
# ----------------------------------------------------------------------------
def init_params(key):
    def uni(k, shape, scale):
        return jax.random.uniform(k, shape, jnp.float32, -scale, scale)

    def lstm_params(k, in_dim, hid):
        s = 1.0 / jnp.sqrt(hid)
        k1, k2, k3, k4 = jax.random.split(k, 4)
        return (uni(k1, (4 * hid, in_dim), s),   # weight_ih
                uni(k2, (4 * hid, hid), s),      # weight_hh
                uni(k3, (4 * hid,), s),          # bias_ih
                uni(k4, (4 * hid,), s))          # bias_hh

    def linear_params(k, in_dim, out_dim):
        s = 1.0 / jnp.sqrt(in_dim)
        k1, k2 = jax.random.split(k)
        return (uni(k1, (out_dim, in_dim), s),   # weight
                uni(k2, (out_dim,), s))          # bias

    ks = jax.random.split(key, 6)
    return {
        "lstm1": lstm_params(ks[0], 14, 128),
        "lstm2": lstm_params(ks[1], 128, 64),
        "lstm3": lstm_params(ks[2], 64, 32),
        "dense1": linear_params(ks[3], 32, 96),
        "dense2": linear_params(ks[4], 96, 128),
        "dense3": linear_params(ks[5], 128, 1),
    }


# ----------------------------------------------------------------------------
# Pure-JAX reference (full-f32 matmuls so the 1e-4 check is meaningful on TPU)
# ----------------------------------------------------------------------------
def _lstm_ref(x, w_ih, w_hh, b_ih, b_hh):
    B, T, _ = x.shape
    H = w_hh.shape[1]

    def step(carry, x_t):
        h, c = carry
        gates = (jnp.dot(x_t, w_ih.T, precision=_P_HI)
                 + jnp.dot(h, w_hh.T, precision=_P_HI) + b_ih + b_hh)
        i = jax.nn.sigmoid(gates[:, 0 * H:1 * H])
        f = jax.nn.sigmoid(gates[:, 1 * H:2 * H])
        g = jnp.tanh(gates[:, 2 * H:3 * H])
        o = jax.nn.sigmoid(gates[:, 3 * H:4 * H])
        c = f * c + i * g
        h = o * jnp.tanh(c)
        return (h, c), h

    init = (jnp.zeros((B, H), jnp.float32), jnp.zeros((B, H), jnp.float32))
    _, hs = lax.scan(step, init, jnp.transpose(x, (1, 0, 2)))
    return jnp.transpose(hs, (1, 0, 2))


def _model_ref(x, params):
    x = _lstm_ref(x, *params["lstm1"])
    x = _lstm_ref(x, *params["lstm2"])
    x = _lstm_ref(x, *params["lstm3"])
    x = x[:, -1, :]
    w1, b1 = params["dense1"]
    w2, b2 = params["dense2"]
    w3, b3 = params["dense3"]
    x = jnp.maximum(jnp.dot(x, w1.T, precision=_P_HI) + b1, 0.0)
    x = jnp.maximum(jnp.dot(x, w2.T, precision=_P_HI) + b2, 0.0)
    return jnp.dot(x, w3.T, precision=_P_HI) + b3


# ----------------------------------------------------------------------------
if __name__ == "__main__":
    key = jax.random.PRNGKey(0)
    k_param, k_x = jax.random.split(key)
    params = init_params(k_param)

    B, T, F = 2, 8, 14                       # batch=2, seq=8, features=14
    x = jax.random.normal(k_x, (B, T, F), jnp.float32)

    out = lstm_model_forward(x, params)
    out = jax.block_until_ready(out)
    assert out.shape == (B, 1), out.shape

    ref = _model_ref(x, params)
    assert jnp.allclose(out, ref, atol=1e-4, rtol=1e-4), (out, ref)

    print("KERNEL_OK")
</pallas_src>

<mosaic_0001>
module attributes {stable_mosaic.version = 11 : i64} {
  func.func @_fused_lstm_mlp_kernel(%arg0: memref<64x14xf32, #tpu.memory_space<vmem>>, %arg1: memref<14x512xf32, #tpu.memory_space<vmem>>, %arg2: memref<128x512xf32, #tpu.memory_space<vmem>>, %arg3: memref<1x512xf32, #tpu.memory_space<vmem>>, %arg4: memref<128x256xf32, #tpu.memory_space<vmem>>, %arg5: memref<64x256xf32, #tpu.memory_space<vmem>>, %arg6: memref<1x256xf32, #tpu.memory_space<vmem>>, %arg7: memref<64x128xf32, #tpu.memory_space<vmem>>, %arg8: memref<32x128xf32, #tpu.memory_space<vmem>>, %arg9: memref<1x128xf32, #tpu.memory_space<vmem>>, %arg10: memref<32x128xf32, #tpu.memory_space<vmem>>, %arg11: memref<1x128xf32, #tpu.memory_space<vmem>>, %arg12: memref<128x128xf32, #tpu.memory_space<vmem>>, %arg13: memref<1x128xf32, #tpu.memory_space<vmem>>, %arg14: memref<128x1xf32, #tpu.memory_space<vmem>>, %arg15: memref<1x1xf32, #tpu.memory_space<vmem>>, %arg16: memref<8x1xf32, #tpu.memory_space<vmem>>, %arg17: memref<64x512xf32, #tpu.memory_space<vmem>>) attributes {dimension_semantics = [], scalar_prefetch = 0 : i64, scratch_operands = 1 : i64, tpu.core_type = #tpu.core_type<tc>} {
    %c0 = arith.constant 0 : index
    %c0_0 = arith.constant 0 : index
    %0 = vector.load %arg0[%c0, %c0_0] : memref<64x14xf32, #tpu.memory_space<vmem>>, vector<64x14xf32>
    %c0_1 = arith.constant 0 : index
    %c0_2 = arith.constant 0 : index
    %1 = vector.load %arg1[%c0_1, %c0_2] : memref<14x512xf32, #tpu.memory_space<vmem>>, vector<14x512xf32>
    %cst = arith.constant dense<0.000000e+00> : vector<64x512xf32>
    %2 = tpu.matmul %0, %1, %cst {dimension_numbers = #tpu.dot_dimension_numbers<[1], [0], [0], [1], [0, 0, 1, 1], [], []>} : vector<64x14xf32>, vector<14x512xf32>, vector<64x512xf32> -> vector<64x512xf32>
    %c0_3 = arith.constant 0 : index
    %c0_4 = arith.constant 0 : index
    %3 = vector.load %arg3[%c0_3, %c0_4] : memref<1x512xf32, #tpu.memory_space<vmem>>, vector<1x512xf32>
    %4 = vector.broadcast %3 : vector<1x512xf32> to vector<64x512xf32>
    %5 = arith.addf %2, %4 : vector<64x512xf32>
    %c0_5 = arith.constant 0 : index
    %c0_6 = arith.constant 0 : index
    %6 = vector.load %arg17[%c0_5, %c0_6] : memref<64x512xf32, #tpu.memory_space<vmem>>, vector<64x512xf32>
    tpu.vector_store %arg17[%c0_5, %c0_6], %5 {strides = array<i32>} : memref<64x512xf32, #tpu.memory_space<vmem>>, vector<64x512xf32>,
    %cst_7 = arith.constant 0.000000e+00 : f32
    %7 = vector.broadcast %cst_7 : f32 to vector<8x128xf32>
    %cst_8 = arith.constant 0.000000e+00 : f32
    %8 = vector.broadcast %cst_8 : f32 to vector<8x128xf32>
    %cst_9 = arith.constant 0.000000e+00 : f32
    %9 = vector.broadcast %cst_9 : f32 to vector<8x64xf32>
    %cst_10 = arith.constant 0.000000e+00 : f32
    %10 = vector.broadcast %cst_10 : f32 to vector<8x64xf32>
    %cst_11 = arith.constant 0.000000e+00 : f32
    %11 = vector.broadcast %cst_11 : f32 to vector<8x32xf32>
    %cst_12 = arith.constant 0.000000e+00 : f32
    %12 = vector.broadcast %cst_12 : f32 to vector<8x32xf32>
    %c0_13 = arith.constant 0 : index
    %c0_14 = arith.constant 0 : index
    %13 = vector.load %arg2[%c0_13, %c0_14] : memref<128x512xf32, #tpu.memory_space<vmem>>, vector<128x512xf32>
    %cst_15 = arith.constant dense<0.000000e+00> : vector<8x512xf32>
    %14 = tpu.matmul %7, %13, %cst_15 {dimension_numbers = #tpu.dot_dimension_numbers<[1], [0], [0], [1], [0, 0, 1, 1], [], []>} : vector<8x128xf32>, vector<128x512xf32>, vector<8x512xf32> -> vector<8x512xf32>
    %c0_16 = arith.constant 0 : index
    %c0_17 = arith.constant 0 : index
    %15 = vector.load %arg17[%c0_16, %c0_17] : memref<64x512xf32, #tpu.memory_space<vmem>>, vector<8x512xf32>
    %16 = arith.addf %14, %15 : vector<8x512xf32>
    %17 = vector.extract_strided_slice %16 {offsets = [0, 0], sizes = [8, 384], strides = [1, 1]} : vector<8x512xf32> to vector<8x384xf32>
    %18 = arith.negf %17 : vector<8x384xf32>
    %19 = math.exp %18 : vector<8x384xf32>
    %cst_18 = arith.constant 1.000000e+00 : f32
    %20 = vector.broadcast %cst_18 : f32 to vector<8x384xf32>
    %21 = arith.addf %20, %19 : vector<8x384xf32>
    %22 = arith.divf %20, %21 : vector<8x384xf32>
    %23 = vector.extract_strided_slice %16 {offsets = [0, 384], sizes = [8, 128], strides = [1, 1]} : vector<8x512xf32> to vector<8x128xf32>
    %24 = math.tanh %23 : vector<8x128xf32>
    %25 = vector.extract_strided_slice %22 {offsets = [0, 0], sizes = [8, 128], strides = [1, 1]} : vector<8x384xf32> to vector<8x128xf32>
    %26 = vector.extract_strided_slice %22 {offsets = [0, 128], sizes = [8, 128], strides = [1, 1]} : vector<8x384xf32> to vector<8x128xf32>
    %27 = vector.extract_strided_slice %22 {offsets = [0, 256], sizes = [8, 128], strides = [1, 1]} : vector<8x384xf32> to vector<8x128xf32>
    %28 = arith.mulf %26, %8 : vector<8x128xf32>
    %29 = arith.mulf %25, %24 : vector<8x128xf32>
    %30 = arith.addf %28, %29 : vector<8x128xf32>
    %31 = math.tanh %30 : vector<8x128xf32>
    %32 = arith.mulf %27, %31 : vector<8x128xf32>
    %c0_19 = arith.constant 0 : index
    %c0_20 = arith.constant 0 : index
    %33 = vector.load %arg2[%c0_19, %c0_20] : memref<128x512xf32, #tpu.memory_space<vmem>>, vector<128x512xf32>
    %cst_21 = arith.constant dense<0.000000e+00> : vector<8x512xf32>
    %34 = tpu.matmul %32, %33, %cst_21 {dimension_numbers = #tpu.dot_dimension_numbers<[1], [0], [0], [1], [0, 0, 1, 1], [], []>} : vector<8x128xf32>, vector<128x512xf32>, vector<8x512xf32> -> vector<8x512xf32>
    %c8 = arith.constant 8 : index
    %c0_22 = arith.constant 0 : index
    %35 = vector.load %arg17[%c8, %c0_22] : memref<64x512xf32, #tpu.memory_space<vmem>>, vector<8x512xf32>
    %36 = arith.addf %34, %35 : vector<8x512xf32>
    %37 = vector.extract_strided_slice %36 {offsets = [0, 0], sizes = [8, 384], strides = [1, 1]} : vector<8x512xf32> to vector<8x384xf32>
    %38 = arith.negf %37 : vector<8x384xf32>
    %39 = math.exp %38 : vector<8x384xf32>
    %cst_23 = arith.constant 1.000000e+00 : f32
    %40 = vector.broadcast %cst_23 : f32 to vector<8x384xf32>
    %41 = arith.addf %40, %39 : vector<8x384xf32>
    %42 = arith.divf %40, %41 : vector<8x384xf32>
    %43 = vector.extract_strided_slice %36 {offsets = [0, 384], sizes = [8, 128], strides = [1, 1]} : vector<8x512xf32> to vector<8x128xf32>
    %44 = math.tanh %43 : vector<8x128xf32>
    %45 = vector.extract_strided_slice %42 {offsets = [0, 0], sizes = [8, 128], strides = [1, 1]} : vector<8x384xf32> to vector<8x128xf32>
    %46 = vector.extract_strided_slice %42 {offsets = [0, 128], sizes = [8, 128], strides = [1, 1]} : vector<8x384xf32> to vector<8x128xf32>
    %47 = vector.extract_strided_slice %42 {offsets = [0, 256], sizes = [8, 128], strides = [1, 1]} : vector<8x384xf32> to vector<8x128xf32>
    %48 = arith.mulf %46, %30 : vector<8x128xf32>
    %49 = arith.mulf %45, %44 : vector<8x128xf32>
    %50 = arith.addf %48, %49 : vector<8x128xf32>
    %51 = math.tanh %50 : vector<8x128xf32>
    %52 = arith.mulf %47, %51 : vector<8x128xf32>
    %c0_24 = arith.constant 0 : index
    %c0_25 = arith.constant 0 : index
    %53 = vector.load %arg5[%c0_24, %c0_25] : memref<64x256xf32, #tpu.memory_space<vmem>>, vector<64x256xf32>
    %cst_26 = arith.constant dense<0.000000e+00> : vector<8x256xf32>
    %54 = tpu.matmul %9, %53, %cst_26 {dimension_numbers = #tpu.dot_dimension_numbers<[1], [0], [0], [1], [0, 0, 1, 1], [], []>} : vector<8x64xf32>, vector<64x256xf32>, vector<8x256xf32> -> vector<8x256xf32>
    %c0_27 = arith.constant 0 : index
    %c0_28 = arith.constant 0 : index
    %55 = vector.load %arg4[%c0_27, %c0_28] : memref<128x256xf32, #tpu.memory_space<vmem>>, vector<128x256xf32>
    %cst_29 = arith.constant dense<0.000000e+00> : vector<8x256xf32>
    %56 = tpu.matmul %32, %55, %cst_29 {dimension_numbers = #tpu.dot_dimension_numbers<[1], [0], [0], [1], [0, 0, 1, 1], [], []>} : vector<8x128xf32>, vector<128x256xf32>, vector<8x256xf32> -> vector<8x256xf32>
    %57 = arith.addf %54, %56 : vector<8x256xf32>
    %c0_30 = arith.constant 0 : index
    %c0_31 = arith.constant 0 : index
    %58 = vector.load %arg6[%c0_30, %c0_31] : memref<1x256xf32, #tpu.memory_space<vmem>>, vector<1x256xf32>
    %59 = vector.broadcast %58 : vector<1x256xf32> to vector<8x256xf32>
    %60 = arith.addf %57, %59 : vector<8x256xf32>
    %61 = vector.extract_strided_slice %60 {offsets = [0, 0], sizes = [8, 192], strides = [1, 1]} : vector<8x256xf32> to vector<8x192xf32>
    %62 = arith.negf %61 : vector<8x192xf32>
    %63 = math.exp %62 : vector<8x192xf32>
    %cst_32 = arith.constant 1.000000e+00 : f32
    %64 = vector.broadcast %cst_32 : f32 to vector<8x192xf32>
    %65 = arith.addf %64, %63 : vector<8x192xf32>
    %66 = arith.divf %64, %65 : vector<8x192xf32>
    %67 = vector.extract_strided_slice %60 {offsets = [0, 192], sizes = [8, 64], strides = [1, 1]} : vector<8x256xf32> to vector<8x64xf32>
    %68 = math.tanh %67 : vector<8x64xf32>
    %69 = vector.extract_strided_slice %66 {offsets = [0, 0], sizes = [8, 64], strides = [1, 1]} : vector<8x192xf32> to vector<8x64xf32>
    %70 = vector.extract_strided_slice %66 {offsets = [0, 64], sizes = [8, 64], strides = [1, 1]} : vector<8x192xf32> to vector<8x64xf32>
    %71 = vector.extract_strided_slice %66 {offsets = [0, 128], sizes = [8, 64], strides = [1, 1]} : vector<8x192xf32> to vector<8x64xf32>
    %72 = arith.mulf %70, %10 : vector<8x64xf32>
    %73 = arith.mulf %69, %68 : vector<8x64xf32>
    %74 = arith.addf %72, %73 : vector<8x64xf32>
    %75 = math.tanh %74 : vector<8x64xf32>
    %76 = arith.mulf %71, %75 : vector<8x64xf32>
    %c0_33 = arith.constant 0 : index
    %c0_34 = arith.constant 0 : index
    %77 = vector.load %arg2[%c0_33, %c0_34] : memref<128x512xf32, #tpu.memory_space<vmem>>, vector<128x512xf32>
    %cst_35 = arith.constant dense<0.000000e+00> : vector<8x512xf32>
    %78 = tpu.matmul %52, %77, %cst_35 {dimension_numbers = #tpu.dot_dimension_numbers<[1], [0], [0], [1], [0, 0, 1, 1], [], []>} : vector<8x128xf32>, vector<128x512xf32>, vector<8x512xf32> -> vector<8x512xf32>
    %c16 = arith.constant 16 : index
    %c0_36 = arith.constant 0 : index
    %79 = vector.load %arg17[%c16, %c0_36] : memref<64x512xf32, #tpu.memory_space<vmem>>, vector<8x512xf32>
    %80 = arith.addf %78, %79 : vector<8x512xf32>
    %81 = vector.extract_strided_slice %80 {offsets = [0, 0], sizes = [8, 384], strides = [1, 1]} : vector<8x512xf32> to vector<8x384xf32>
    %82 = arith.negf %81 : vector<8x384xf32>
    %83 = math.exp %82 : vector<8x384xf32>
    %cst_37 = arith.constant 1.000000e+00 : f32
    %84 = vector.broadcast %cst_37 : f32 to vector<8x384xf32>
    %85 = arith.addf %84, %83 : vector<8x384xf32>
    %86 = arith.divf %84, %85 : vector<8x384xf32>
    %87 = vector.extract_strided_slice %80 {offsets = [0, 384], sizes = [8, 128], strides = [1, 1]} : vector<8x512xf32> to vector<8x128xf32>
    %88 = math.tanh %87 : vector<8x128xf32>
    %89 = vector.extract_strided_slice %86 {offsets = [0, 0], sizes = [8, 128], strides = [1, 1]} : vector<8x384xf32> to vector<8x128xf32>
    %90 = vector.extract_strided_slice %86 {offsets = [0, 128], sizes = [8, 128], strides = [1, 1]} : vector<8x384xf32> to vector<8x128xf32>
    %91 = vector.extract_strided_slice %86 {offsets = [0, 256], sizes = [8, 128], strides = [1, 1]} : vector<8x384xf32> to vector<8x128xf32>
    %92 = arith.mulf %90, %50 : vector<8x128xf32>
    %93 = arith.mulf %89, %88 : vector<8x128xf32>
    %94 = arith.addf %92, %93 : vector<8x128xf32>
    %95 = math.tanh %94 : vector<8x128xf32>
    %96 = arith.mulf %91, %95 : vector<8x128xf32>
    %c0_38 = arith.constant 0 : index
    %c0_39 = arith.constant 0 : index
    %97 = vector.load %arg5[%c0_38, %c0_39] : memref<64x256xf32, #tpu.memory_space<vmem>>, vector<64x256xf32>
    %cst_40 = arith.constant dense<0.000000e+00> : vector<8x256xf32>
    %98 = tpu.matmul %76, %97, %cst_40 {dimension_numbers = #tpu.dot_dimension_numbers<[1], [0], [0], [1], [0, 0, 1, 1], [], []>} : vector<8x64xf32>, vector<64x256xf32>, vector<8x256xf32> -> vector<8x256xf32>
    %c0_41 = arith.constant 0 : index
    %c0_42 = arith.constant 0 : index
    %99 = vector.load %arg4[%c0_41, %c0_42] : memref<128x256xf32, #tpu.memory_space<vmem>>, vector<128x256xf32>
    %cst_43 = arith.constant dense<0.000000e+00> : vector<8x256xf32>
    %100 = tpu.matmul %52, %99, %cst_43 {dimension_numbers = #tpu.dot_dimension_numbers<[1], [0], [0], [1], [0, 0, 1, 1], [], []>} : vector<8x128xf32>, vector<128x256xf32>, vector<8x256xf32> -> vector<8x256xf32>
    %101 = arith.addf %98, %100 : vector<8x256xf32>
    %c0_44 = arith.constant 0 : index
    %c0_45 = arith.constant 0 : index
    %102 = vector.load %arg6[%c0_44, %c0_45] : memref<1x256xf32, #tpu.memory_space<vmem>>, vector<1x256xf32>
    %103 = vector.broadcast %102 : vector<1x256xf32> to vector<8x256xf32>
    %104 = arith.addf %101, %103 : vector<8x256xf32>
    %105 = vector.extract_strided_slice %104 {offsets = [0, 0], sizes = [8, 192], strides = [1, 1]} : vector<8x256xf32> to vector<8x192xf32>
    %106 = arith.negf %105 : vector<8x192xf32>
    %107 = math.exp %106 : vector<8x192xf32>
    %cst_46 = arith.constant 1.000000e+00 : f32
    %108 = vector.broadcast %cst_46 : f32 to vector<8x192xf32>
    %109 = arith.addf %108, %107 : vector<8x192xf32>
    %110 = arith.divf %108, %109 : vector<8x192xf32>
    %111 = vector.extract_strided_slice %104 {offsets = [0, 192], sizes = [8, 64], strides = [1, 1]} : vector<8x256xf32> to vector<8x64xf32>
    %112 = math.tanh %111 : vector<8x64xf32>
    %113 = vector.extract_strided_slice %110 {offsets = [0, 0], sizes = [8, 64], strides = [1, 1]} : vector<8x192xf32> to vector<8x64xf32>
    %114 = vector.extract_strided_slice %110 {offsets = [0, 64], sizes = [8, 64], strides = [1, 1]} : vector<8x192xf32> to vector<8x64xf32>
    %115 = vector.extract_strided_slice %110 {offsets = [0, 128], sizes = [8, 64], strides = [1, 1]} : vector<8x192xf32> to vector<8x64xf32>
    %116 = arith.mulf %114, %74 : vector<8x64xf32>
    %117 = arith.mulf %113, %112 : vector<8x64xf32>
    %118 = arith.addf %116, %117 : vector<8x64xf32>
    %119 = math.tanh %118 : vector<8x64xf32>
    %120 = arith.mulf %115, %119 : vector<8x64xf32>
    %c0_47 = arith.constant 0 : index
    %c0_48 = arith.constant 0 : index
    %121 = vector.load %arg8[%c0_47, %c0_48] : memref<32x128xf32, #tpu.memory_space<vmem>>, vector<32x128xf32>
    %cst_49 = arith.constant dense<0.000000e+00> : vector<8x128xf32>
    %122 = tpu.matmul %11, %121, %cst_49 {dimension_numbers = #tpu.dot_dimension_numbers<[1], [0], [0], [1], [0, 0, 1, 1], [], []>} : vector<8x32xf32>, vector<32x128xf32>, vector<8x128xf32> -> vector<8x128xf32>
    %c0_50 = arith.constant 0 : index
    %c0_51 = arith.constant 0 : index
    %123 = vector.load %arg7[%c0_50, %c0_51] : memref<64x128xf32, #tpu.memory_space<vmem>>, vector<64x128xf32>
    %cst_52 = arith.constant dense<0.000000e+00> : vector<8x128xf32>
    %124 = tpu.matmul %76, %123, %cst_52 {dimension_numbers = #tpu.dot_dimension_numbers<[1], [0], [0], [1], [0, 0, 1, 1], [], []>} : vector<8x64xf32>, vector<64x128xf32>, vector<8x128xf32> -> vector<8x128xf32>
    %125 = arith.addf %122, %124 : vector<8x128xf32>
    %c0_53 = arith.constant 0 : index
    %c0_54 = arith.constant 0 : index
    %126 = vector.load %arg9[%c0_53, %c0_54] : memref<1x128xf32, #tpu.memory_space<vmem>>, vector<1x128xf32>
    %127 = vector.broadcast %126 : vector<1x128xf32> to vector<8x128xf32>
    %128 = arith.addf %125, %127 : vector<8x128xf32>
    %129 = vector.extract_strided_slice %128 {offsets = [0, 0], sizes = [8, 96], strides = [1, 1]} : vector<8x128xf32> to vector<8x96xf32>
    %130 = arith.negf %129 : vector<8x96xf32>
    %131 = math.exp %130 : vector<8x96xf32>
    %cst_55 = arith.constant 1.000000e+00 : f32
    %132 = vector.broadcast %cst_55 : f32 to vector<8x96xf32>
    %133 = arith.addf %132, %131 : vector<8x96xf32>
    %134 = arith.divf %132, %133 : vector<8x96xf32>
    %135 = vector.extract_strided_slice %128 {offsets = [0, 96], sizes = [8, 32], strides = [1, 1]} : vector<8x128xf32> to vector<8x32xf32>
    %136 = math.tanh %135 : vector<8x32xf32>
    %137 = vector.extract_strided_slice %134 {offsets = [0, 0], sizes = [8, 32], strides = [1, 1]} : vector<8x96xf32> to vector<8x32xf32>
    %138 = vector.extract_strided_slice %134 {offsets = [0, 32], sizes = [8, 32], strides = [1, 1]} : vector<8x96xf32> to vector<8x32xf32>
    %139 = vector.extract_strided_slice %134 {offsets = [0, 64], sizes = [8, 32], strides = [1, 1]} : vector<8x96xf32> to vector<8x32xf32>
    %140 = arith.mulf %138, %12 : vector<8x32xf32>
    %141 = arith.mulf %137, %136 : vector<8x32xf32>
    %142 = arith.addf %140, %141 : vector<8x32xf32>
    %143 = math.tanh %142 : vector<8x32xf32>
    %144 = arith.mulf %139, %143 : vector<8x32xf32>
    %c0_56 = arith.constant 0 : index
    %c0_57 = arith.constant 0 : index
    %145 = vector.load %arg2[%c0_56, %c0_57] : memref<128x512xf32, #tpu.memory_space<vmem>>, vector<128x512xf32>
    %cst_58 = arith.constant dense<0.000000e+00> : vector<8x512xf32>
    %146 = tpu.matmul %96, %145, %cst_58 {dimension_numbers = #tpu.dot_dimension_numbers<[1], [0], [0], [1], [0, 0, 1, 1], [], []>} : vector<8x128xf32>, vector<128x512xf32>, vector<8x512xf32> -> vector<8x512xf32>
    %c24 = arith.constant 24 : index
    %c0_59 = arith.constant 0 : index
    %147 = vector.load %arg17[%c24, %c0_59] : memref<64x512xf32, #tpu.memory_space<vmem>>, vector<8x512xf32>
    %148 = arith.addf %146, %147 : vector<8x512xf32>
    %149 = vector.extract_strided_slice %148 {offsets = [0, 0], sizes = [8, 384], strides = [1, 1]} : vector<8x512xf32> to vector<8x384xf32>
    %150 = arith.negf %149 : vector<8x384xf32>
    %151 = math.exp %150 : vector<8x384xf32>
    %cst_60 = arith.constant 1.000000e+00 : f32
    %152 = vector.broadcast %cst_60 : f32 to vector<8x384xf32>
    %153 = arith.addf %152, %151 : vector<8x384xf32>
    %154 = arith.divf %152, %153 : vector<8x384xf32>
    %155 = vector.extract_strided_slice %148 {offsets = [0, 384], sizes = [8, 128], strides = [1, 1]} : vector<8x512xf32> to vector<8x128xf32>
    %156 = math.tanh %155 : vector<8x128xf32>
    %157 = vector.extract_strided_slice %154 {offsets = [0, 0], sizes = [8, 128], strides = [1, 1]} : vector<8x384xf32> to vector<8x128xf32>
    %158 = vector.extract_strided_slice %154 {offsets = [0, 128], sizes = [8, 128], strides = [1, 1]} : vector<8x384xf32> to vector<8x128xf32>
    %159 = vector.extract_strided_slice %154 {offsets = [0, 256], sizes = [8, 128], strides = [1, 1]} : vector<8x384xf32> to vector<8x128xf32>
    %160 = arith.mulf %158, %94 : vector<8x128xf32>
    %161 = arith.mulf %157, %156 : vector<8x128xf32>
    %162 = arith.addf %160, %161 : vector<8x128xf32>
    %163 = math.tanh %162 : vector<8x128xf32>
    %164 = arith.mulf %159, %163 : vector<8x128xf32>
    %c0_61 = arith.constant 0 : index
    %c0_62 = arith.constant 0 : index
    %165 = vector.load %arg5[%c0_61, %c0_62] : memref<64x256xf32, #tpu.memory_space<vmem>>, vector<64x256xf32>
    %cst_63 = arith.constant dense<0.000000e+00> : vector<8x256xf32>
    %166 = tpu.matmul %120, %165, %cst_63 {dimension_numbers = #tpu.dot_dimension_numbers<[1], [0], [0], [1], [0, 0, 1, 1], [], []>} : vector<8x64xf32>, vector<64x256xf32>, vector<8x256xf32> -> vector<8x256xf32>
    %c0_64 = arith.constant 0 : index
    %c0_65 = arith.constant 0 : index
    %167 = vector.load %arg4[%c0_64, %c0_65] : memref<128x256xf32, #tpu.memory_space<vmem>>, vector<128x256xf32>
    %cst_66 = arith.constant dense<0.000000e+00> : vector<8x256xf32>
    %168 = tpu.matmul %96, %167, %cst_66 {dimension_numbers = #tpu.dot_dimension_numbers<[1], [0], [0], [1], [0, 0, 1, 1], [], []>} : vector<8x128xf32>, vector<128x256xf32>, vector<8x256xf32> -> vector<8x256xf32>
    %169 = arith.addf %166, %168 : vector<8x256xf32>
    %c0_67 = arith.constant 0 : index
    %c0_68 = arith.constant 0 : index
    %170 = vector.load %arg6[%c0_67, %c0_68] : memref<1x256xf32, #tpu.memory_space<vmem>>, vector<1x256xf32>
    %171 = vector.broadcast %170 : vector<1x256xf32> to vector<8x256xf32>
    %172 = arith.addf %169, %171 : vector<8x256xf32>
    %173 = vector.extract_strided_slice %172 {offsets = [0, 0], sizes = [8, 192], strides = [1, 1]} : vector<8x256xf32> to vector<8x192xf32>
    %174 = arith.negf %173 : vector<8x192xf32>
    %175 = math.exp %174 : vector<8x192xf32>
    %cst_69 = arith.constant 1.000000e+00 : f32
    %176 = vector.broadcast %cst_69 : f32 to vector<8x192xf32>
    %177 = arith.addf %176, %175 : vector<8x192xf32>
    %178 = arith.divf %176, %177 : vector<8x192xf32>
    %179 = vector.extract_strided_slice %172 {offsets = [0, 192], sizes = [8, 64], strides = [1, 1]} : vector<8x256xf32> to vector<8x64xf32>
    %180 = math.tanh %179 : vector<8x64xf32>
    %181 = vector.extract_strided_slice %178 {offsets = [0, 0], sizes = [8, 64], strides = [1, 1]} : vector<8x192xf32> to vector<8x64xf32>
    %182 = vector.extract_strided_slice %178 {offsets = [0, 64], sizes = [8, 64], strides = [1, 1]} : vector<8x192xf32> to vector<8x64xf32>
    %183 = vector.extract_strided_slice %178 {offsets = [0, 128], sizes = [8, 64], strides = [1, 1]} : vector<8x192xf32> to vector<8x64xf32>
    %184 = arith.mulf %182, %118 : vector<8x64xf32>
    %185 = arith.mulf %181, %180 : vector<8x64xf32>
    %186 = arith.addf %184, %185 : vector<8x64xf32>
    %187 = math.tanh %186 : vector<8x64xf32>
    %188 = arith.mulf %183, %187 : vector<8x64xf32>
    %c0_70 = arith.constant 0 : index
    %c0_71 = arith.constant 0 : index
    %189 = vector.load %arg8[%c0_70, %c0_71] : memref<32x128xf32, #tpu.memory_space<vmem>>, vector<32x128xf32>
    %cst_72 = arith.constant dense<0.000000e+00> : vector<8x128xf32>
    %190 = tpu.matmul %144, %189, %cst_72 {dimension_numbers = #tpu.dot_dimension_numbers<[1], [0], [0], [1], [0, 0, 1, 1], [], []>} : vector<8x32xf32>, vector<32x128xf32>, vector<8x128xf32> -> vector<8x128xf32>
    %c0_73 = arith.constant 0 : index
    %c0_74 = arith.constant 0 : index
    %191 = vector.load %arg7[%c0_73, %c0_74] : memref<64x128xf32, #tpu.memory_space<vmem>>, vector<64x128xf32>
    %cst_75 = arith.constant dense<0.000000e+00> : vector<8x128xf32>
    %192 = tpu.matmul %120, %191, %cst_75 {dimension_numbers = #tpu.dot_dimension_numbers<[1], [0], [0], [1], [0, 0, 1, 1], [], []>} : vector<8x64xf32>, vector<64x128xf32>, vector<8x128xf32> -> vector<8x128xf32>
    %193 = arith.addf %190, %192 : vector<8x128xf32>
    %c0_76 = arith.constant 0 : index
    %c0_77 = arith.constant 0 : index
    %194 = vector.load %arg9[%c0_76, %c0_77] : memref<1x128xf32, #tpu.memory_space<vmem>>, vector<1x128xf32>
    %195 = vector.broadcast %194 : vector<1x128xf32> to vector<8x128xf32>
    %196 = arith.addf %193, %195 : vector<8x128xf32>
    %197 = vector.extract_strided_slice %196 {offsets = [0, 0], sizes = [8, 96], strides = [1, 1]} : vector<8x128xf32> to vector<8x96xf32>
    %198 = arith.negf %197 : vector<8x96xf32>
    %199 = math.exp %198 : vector<8x96xf32>
    %cst_78 = arith.constant 1.000000e+00 : f32
    %200 = vector.broadcast %cst_78 : f32 to vector<8x96xf32>
    %201 = arith.addf %200, %199 : vector<8x96xf32>
    %202 = arith.divf %200, %201 : vector<8x96xf32>
    %203 = vector.extract_strided_slice %196 {offsets = [0, 96], sizes = [8, 32], strides = [1, 1]} : vector<8x128xf32> to vector<8x32xf32>
    %204 = math.tanh %203 : vector<8x32xf32>
    %205 = vector.extract_strided_slice %202 {offsets = [0, 0], sizes = [8, 32], strides = [1, 1]} : vector<8x96xf32> to vector<8x32xf32>
    %206 = vector.extract_strided_slice %202 {offsets = [0, 32], sizes = [8, 32], strides = [1, 1]} : vector<8x96xf32> to vector<8x32xf32>
    %207 = vector.extract_strided_slice %202 {offsets = [0, 64], sizes = [8, 32], strides = [1, 1]} : vector<8x96xf32> to vector<8x32xf32>
    %208 = arith.mulf %206, %142 : vector<8x32xf32>
    %209 = arith.mulf %205, %204 : vector<8x32xf32>
    %210 = arith.addf %208, %209 : vector<8x32xf32>
    %211 = math.tanh %210 : vector<8x32xf32>
    %212 = arith.mulf %207, %211 : vector<8x32xf32>
    %c0_79 = arith.constant 0 : index
    %c0_80 = arith.constant 0 : index
    %213 = vector.load %arg2[%c0_79, %c0_80] : memref<128x512xf32, #tpu.memory_space<vmem>>, vector<128x512xf32>
    %cst_81 = arith.constant dense<0.000000e+00> : vector<8x512xf32>
    %214 = tpu.matmul %164, %213, %cst_81 {dimension_numbers = #tpu.dot_dimension_numbers<[1], [0], [0], [1], [0, 0, 1, 1], [], []>} : vector<8x128xf32>, vector<128x512xf32>, vector<8x512xf32> -> vector<8x512xf32>
    %c32 = arith.constant 32 : index
    %c0_82 = arith.constant 0 : index
    %215 = vector.load %arg17[%c32, %c0_82] : memref<64x512xf32, #tpu.memory_space<vmem>>, vector<8x512xf32>
    %216 = arith.addf %214, %215 : vector<8x512xf32>
    %217 = vector.extract_strided_slice %216 {offsets = [0, 0], sizes = [8, 384], strides = [1, 1]} : vector<8x512xf32> to vector<8x384xf32>
    %218 = arith.negf %217 : vector<8x384xf32>
    %219 = math.exp %218 : vector<8x384xf32>
    %cst_83 = arith.constant 1.000000e+00 : f32
    %220 = vector.broadcast %cst_83 : f32 to vector<8x384xf32>
    %221 = arith.addf %220, %219 : vector<8x384xf32>
    %222 = arith.divf %220, %221 : vector<8x384xf32>
    %223 = vector.extract_strided_slice %216 {offsets = [0, 384], sizes = [8, 128], strides = [1, 1]} : vector<8x512xf32> to vector<8x128xf32>
    %224 = math.tanh %223 : vector<8x128xf32>
    %225 = vector.extract_strided_slice %222 {offsets = [0, 0], sizes = [8, 128], strides = [1, 1]} : vector<8x384xf32> to vector<8x128xf32>
    %226 = vector.extract_strided_slice %222 {offsets = [0, 128], sizes = [8, 128], strides = [1, 1]} : vector<8x384xf32> to vector<8x128xf32>
    %227 = vector.extract_strided_slice %222 {offsets = [0, 256], sizes = [8, 128], strides = [1, 1]} : vector<8x384xf32> to vector<8x128xf32>
    %228 = arith.mulf %226, %162 : vector<8x128xf32>
    %229 = arith.mulf %225, %224 : vector<8x128xf32>
    %230 = arith.addf %228, %229 : vector<8x128xf32>
    %231 = math.tanh %230 : vector<8x128xf32>
    %232 = arith.mulf %227, %231 : vector<8x128xf32>
    %c0_84 = arith.constant 0 : index
    %c0_85 = arith.constant 0 : index
    %233 = vector.load %arg5[%c0_84, %c0_85] : memref<64x256xf32, #tpu.memory_space<vmem>>, vector<64x256xf32>
    %cst_86 = arith.constant dense<0.000000e+00> : vector<8x256xf32>
    %234 = tpu.matmul %188, %233, %cst_86 {dimension_numbers = #tpu.dot_dimension_numbers<[1], [0], [0], [1], [0, 0, 1, 1], [], []>} : vector<8x64xf32>, vector<64x256xf32>, vector<8x256xf32> -> vector<8x256xf32>
    %c0_87 = arith.constant 0 : index
    %c0_88 = arith.constant 0 : index
    %235 = vector.load %arg4[%c0_87, %c0_88] : memref<128x256xf32, #tpu.memory_space<vmem>>, vector<128x256xf32>
    %cst_89 = arith.constant dense<0.000000e+00> : vector<8x256xf32>
    %236 = tpu.matmul %164, %235, %cst_89 {dimension_numbers = #tpu.dot_dimension_numbers<[1], [0], [0], [1], [0, 0, 1, 1], [], []>} : vector<8x128xf32>, vector<128x256xf32>, vector<8x256xf32> -> vector<8x256xf32>
    %237 = arith.addf %234, %236 : vector<8x256xf32>
    %c0_90 = arith.constant 0 : index
    %c0_91 = arith.constant 0 : index
    %238 = vector.load %arg6[%c0_90, %c0_91] : memref<1x256xf32, #tpu.memory_space<vmem>>, vector<1x256xf32>
    %239 = vector.broadcast %238 : vector<1x256xf32> to vector<8x256xf32>
    %240 = arith.addf %237, %239 : vector<8x256xf32>
    %241 = vector.extract_strided_slice %240 {offsets = [0, 0], sizes = [8, 192], strides = [1, 1]} : vector<8x256xf32> to vector<8x192xf32>
    %242 = arith.negf %241 : vector<8x192xf32>
    %243 = math.exp %242 : vector<8x192xf32>
    %cst_92 = arith.constant 1.000000e+00 : f32
    %244 = vector.broadcast %cst_92 : f32 to vector<8x192xf32>
    %245 = arith.addf %244, %243 : vector<8x192xf32>
    %246 = arith.divf %244, %245 : vector<8x192xf32>
    %247 = vector.extract_strided_slice %240 {offsets = [0, 192], sizes = [8, 64], strides = [1, 1]} : vector<8x256xf32> to vector<8x64xf32>
    %248 = math.tanh %247 : vector<8x64xf32>
    %249 = vector.extract_strided_slice %246 {offsets = [0, 0], sizes = [8, 64], strides = [1, 1]} : vector<8x192xf32> to vector<8x64xf32>
    %250 = vector.extract_strided_slice %246 {offsets = [0, 64], sizes = [8, 64], strides = [1, 1]} : vector<8x192xf32> to vector<8x64xf32>
    %251 = vector.extract_strided_slice %246 {offsets = [0, 128], sizes = [8, 64], strides = [1, 1]} : vector<8x192xf32> to vector<8x64xf32>
    %252 = arith.mulf %250, %186 : vector<8x64xf32>
    %253 = arith.mulf %249, %248 : vector<8x64xf32>
    %254 = arith.addf %252, %253 : vector<8x64xf32>
    %255 = math.tanh %254 : vector<8x64xf32>
    %256 = arith.mulf %251, %255 : vector<8x64xf32>
    %c0_93 = arith.constant 0 : index
    %c0_94 = arith.constant 0 : index
    %257 = vector.load %arg8[%c0_93, %c0_94] : memref<32x128xf32, #tpu.memory_space<vmem>>, vector<32x128xf32>
    %cst_95 = arith.constant dense<0.000000e+00> : vector<8x128xf32>
    %258 = tpu.matmul %212, %257, %cst_95 {dimension_numbers = #tpu.dot_dimension_numbers<[1], [0], [0], [1], [0, 0, 1, 1], [], []>} : vector<8x32xf32>, vector<32x128xf32>, vector<8x128xf32> -> vector<8x128xf32>
    %c0_96 = arith.constant 0 : index
    %c0_97 = arith.constant 0 : index
    %259 = vector.load %arg7[%c0_96, %c0_97] : memref<64x128xf32, #tpu.memory_space<vmem>>, vector<64x128xf32>
    %cst_98 = arith.constant dense<0.000000e+00> : vector<8x128xf32>
    %260 = tpu.matmul %188, %259, %cst_98 {dimension_numbers = #tpu.dot_dimension_numbers<[1], [0], [0], [1], [0, 0, 1, 1], [], []>} : vector<8x64xf32>, vector<64x128xf32>, vector<8x128xf32> -> vector<8x128xf32>
    %261 = arith.addf %258, %260 : vector<8x128xf32>
    %c0_99 = arith.constant 0 : index
    %c0_100 = arith.constant 0 : index
    %262 = vector.load %arg9[%c0_99, %c0_100] : memref<1x128xf32, #tpu.memory_space<vmem>>, vector<1x128xf32>
    %263 = vector.broadcast %262 : vector<1x128xf32> to vector<8x128xf32>
    %264 = arith.addf %261, %263 : vector<8x128xf32>
    %265 = vector.extract_strided_slice %264 {offsets = [0, 0], sizes = [8, 96], strides = [1, 1]} : vector<8x128xf32> to vector<8x96xf32>
    %266 = arith.negf %265 : vector<8x96xf32>
    %267 = math.exp %266 : vector<8x96xf32>
    %cst_101 = arith.constant 1.000000e+00 : f32
    %268 = vector.broadcast %cst_101 : f32 to vector<8x96xf32>
    %269 = arith.addf %268, %267 : vector<8x96xf32>
    %270 = arith.divf %268, %269 : vector<8x96xf32>
    %271 = vector.extract_strided_slice %264 {offsets = [0, 96], sizes = [8, 32], strides = [1, 1]} : vector<8x128xf32> to vector<8x32xf32>
    %272 = math.tanh %271 : vector<8x32xf32>
    %273 = vector.extract_strided_slice %270 {offsets = [0, 0], sizes = [8, 32], strides = [1, 1]} : vector<8x96xf32> to vector<8x32xf32>
    %274 = vector.extract_strided_slice %270 {offsets = [0, 32], sizes = [8, 32], strides = [1, 1]} : vector<8x96xf32> to vector<8x32xf32>
    %275 = vector.extract_strided_slice %270 {offsets = [0, 64], sizes = [8, 32], strides = [1, 1]} : vector<8x96xf32> to vector<8x32xf32>
    %276 = arith.mulf %274, %210 : vector<8x32xf32>
    %277 = arith.mulf %273, %272 : vector<8x32xf32>
    %278 = arith.addf %276, %277 : vector<8x32xf32>
    %279 = math.tanh %278 : vector<8x32xf32>
    %280 = arith.mulf %275, %279 : vector<8x32xf32>
    %c0_102 = arith.constant 0 : index
    %c0_103 = arith.constant 0 : index
    %281 = vector.load %arg2[%c0_102, %c0_103] : memref<128x512xf32, #tpu.memory_space<vmem>>, vector<128x512xf32>
    %cst_104 = arith.constant dense<0.000000e+00> : vector<8x512xf32>
    %282 = tpu.matmul %232, %281, %cst_104 {dimension_numbers = #tpu.dot_dimension_numbers<[1], [0], [0], [1], [0, 0, 1, 1], [], []>} : vector<8x128xf32>, vector<128x512xf32>, vector<8x512xf32> -> vector<8x512xf32>
    %c40 = arith.constant 40 : index
    %c0_105 = arith.constant 0 : index
    %283 = vector.load %arg17[%c40, %c0_105] : memref<64x512xf32, #tpu.memory_space<vmem>>, vector<8x512xf32>
    %284 = arith.addf %282, %283 : vector<8x512xf32>
    %285 = vector.extract_strided_slice %284 {offsets = [0, 0], sizes = [8, 384], strides = [1, 1]} : vector<8x512xf32> to vector<8x384xf32>
    %286 = arith.negf %285 : vector<8x384xf32>
    %287 = math.exp %286 : vector<8x384xf32>
    %cst_106 = arith.constant 1.000000e+00 : f32
    %288 = vector.broadcast %cst_106 : f32 to vector<8x384xf32>
    %289 = arith.addf %288, %287 : vector<8x384xf32>
    %290 = arith.divf %288, %289 : vector<8x384xf32>
    %291 = vector.extract_strided_slice %284 {offsets = [0, 384], sizes = [8, 128], strides = [1, 1]} : vector<8x512xf32> to vector<8x128xf32>
    %292 = math.tanh %291 : vector<8x128xf32>
    %293 = vector.extract_strided_slice %290 {offsets = [0, 0], sizes = [8, 128], strides = [1, 1]} : vector<8x384xf32> to vector<8x128xf32>
    %294 = vector.extract_strided_slice %290 {offsets = [0, 128], sizes = [8, 128], strides = [1, 1]} : vector<8x384xf32> to vector<8x128xf32>
    %295 = vector.extract_strided_slice %290 {offsets = [0, 256], sizes = [8, 128], strides = [1, 1]} : vector<8x384xf32> to vector<8x128xf32>
    %296 = arith.mulf %294, %230 : vector<8x128xf32>
    %297 = arith.mulf %293, %292 : vector<8x128xf32>
    %298 = arith.addf %296, %297 : vector<8x128xf32>
    %299 = math.tanh %298 : vector<8x128xf32>
    %300 = arith.mulf %295, %299 : vector<8x128xf32>
    %c0_107 = arith.constant 0 : index
    %c0_108 = arith.constant 0 : index
    %301 = vector.load %arg5[%c0_107, %c0_108] : memref<64x256xf32, #tpu.memory_space<vmem>>, vector<64x256xf32>
    %cst_109 = arith.constant dense<0.000000e+00> : vector<8x256xf32>
    %302 = tpu.matmul %256, %301, %cst_109 {dimension_numbers = #tpu.dot_dimension_numbers<[1], [0], [0], [1], [0, 0, 1, 1], [], []>} : vector<8x64xf32>, vector<64x256xf32>, vector<8x256xf32> -> vector<8x256xf32>
    %c0_110 = arith.constant 0 : index
    %c0_111 = arith.constant 0 : index
    %303 = vector.load %arg4[%c0_110, %c0_111] : memref<128x256xf32, #tpu.memory_space<vmem>>, vector<128x256xf32>
    %cst_112 = arith.constant dense<0.000000e+00> : vector<8x256xf32>
    %304 = tpu.matmul %232, %303, %cst_112 {dimension_numbers = #tpu.dot_dimension_numbers<[1], [0], [0], [1], [0, 0, 1, 1], [], []>} : vector<8x128xf32>, vector<128x256xf32>, vector<8x256xf32> -> vector<8x256xf32>
    %305 = arith.addf %302, %304 : vector<8x256xf32>
    %c0_113 = arith.constant 0 : index
    %c0_114 = arith.constant 0 : index
    %306 = vector.load %arg6[%c0_113, %c0_114] : memref<1x256xf32, #tpu.memory_space<vmem>>, vector<1x256xf32>
    %307 = vector.broadcast %306 : vector<1x256xf32> to vector<8x256xf32>
    %308 = arith.addf %305, %307 : vector<8x256xf32>
    %309 = vector.extract_strided_slice %308 {offsets = [0, 0], sizes = [8, 192], strides = [1, 1]} : vector<8x256xf32> to vector<8x192xf32>
    %310 = arith.negf %309 : vector<8x192xf32>
    %311 = math.exp %310 : vector<8x192xf32>
    %cst_115 = arith.constant 1.000000e+00 : f32
    %312 = vector.broadcast %cst_115 : f32 to vector<8x192xf32>
    %313 = arith.addf %312, %311 : vector<8x192xf32>
    %314 = arith.divf %312, %313 : vector<8x192xf32>
    %315 = vector.extract_strided_slice %308 {offsets = [0, 192], sizes = [8, 64], strides = [1, 1]} : vector<8x256xf32> to vector<8x64xf32>
    %316 = math.tanh %315 : vector<8x64xf32>
    %317 = vector.extract_strided_slice %314 {offsets = [0, 0], sizes = [8, 64], strides = [1, 1]} : vector<8x192xf32> to vector<8x64xf32>
    %318 = vector.extract_strided_slice %314 {offsets = [0, 64], sizes = [8, 64], strides = [1, 1]} : vector<8x192xf32> to vector<8x64xf32>
    %319 = vector.extract_strided_slice %314 {offsets = [0, 128], sizes = [8, 64], strides = [1, 1]} : vector<8x192xf32> to vector<8x64xf32>
    %320 = arith.mulf %318, %254 : vector<8x64xf32>
    %321 = arith.mulf %317, %316 : vector<8x64xf32>
    %322 = arith.addf %320, %321 : vector<8x64xf32>
    %323 = math.tanh %322 : vector<8x64xf32>
    %324 = arith.mulf %319, %323 : vector<8x64xf32>
    %c0_116 = arith.constant 0 : index
    %c0_117 = arith.constant 0 : index
    %325 = vector.load %arg8[%c0_116, %c0_117] : memref<32x128xf32, #tpu.memory_space<vmem>>, vector<32x128xf32>
    %cst_118 = arith.constant dense<0.000000e+00> : vector<8x128xf32>
    %326 = tpu.matmul %280, %325, %cst_118 {dimension_numbers = #tpu.dot_dimension_numbers<[1], [0], [0], [1], [0, 0, 1, 1], [], []>} : vector<8x32xf32>, vector<32x128xf32>, vector<8x128xf32> -> vector<8x128xf32>
    %c0_119 = arith.constant 0 : index
    %c0_120 = arith.constant 0 : index
    %327 = vector.load %arg7[%c0_119, %c0_120] : memref<64x128xf32, #tpu.memory_space<vmem>>, vector<64x128xf32>
    %cst_121 = arith.constant dense<0.000000e+00> : vector<8x128xf32>
    %328 = tpu.matmul %256, %327, %cst_121 {dimension_numbers = #tpu.dot_dimension_numbers<[1], [0], [0], [1], [0, 0, 1, 1], [], []>} : vector<8x64xf32>, vector<64x128xf32>, vector<8x128xf32> -> vector<8x128xf32>
    %329 = arith.addf %326, %328 : vector<8x128xf32>
    %c0_122 = arith.constant 0 : index
    %c0_123 = arith.constant 0 : index
    %330 = vector.load %arg9[%c0_122, %c0_123] : memref<1x128xf32, #tpu.memory_space<vmem>>, vector<1x128xf32>
    %331 = vector.broadcast %330 : vector<1x128xf32> to vector<8x128xf32>
    %332 = arith.addf %329, %331 : vector<8x128xf32>
    %333 = vector.extract_strided_slice %332 {offsets = [0, 0], sizes = [8, 96], strides = [1, 1]} : vector<8x128xf32> to vector<8x96xf32>
    %334 = arith.negf %333 : vector<8x96xf32>
    %335 = math.exp %334 : vector<8x96xf32>
    %cst_124 = arith.constant 1.000000e+00 : f32
    %336 = vector.broadcast %cst_124 : f32 to vector<8x96xf32>
    %337 = arith.addf %336, %335 : vector<8x96xf32>
    %338 = arith.divf %336, %337 : vector<8x96xf32>
    %339 = vector.extract_strided_slice %332 {offsets = [0, 96], sizes = [8, 32], strides = [1, 1]} : vector<8x128xf32> to vector<8x32xf32>
    %340 = math.tanh %339 : vector<8x32xf32>
    %341 = vector.extract_strided_slice %338 {offsets = [0, 0], sizes = [8, 32], strides = [1, 1]} : vector<8x96xf32> to vector<8x32xf32>
    %342 = vector.extract_strided_slice %338 {offsets = [0, 32], sizes = [8, 32], strides = [1, 1]} : vector<8x96xf32> to vector<8x32xf32>
    %343 = vector.extract_strided_slice %338 {offsets = [0, 64], sizes = [8, 32], strides = [1, 1]} : vector<8x96xf32> to vector<8x32xf32>
    %344 = arith.mulf %342, %278 : vector<8x32xf32>
    %345 = arith.mulf %341, %340 : vector<8x32xf32>
    %346 = arith.addf %344, %345 : vector<8x32xf32>
    %347 = math.tanh %346 : vector<8x32xf32>
    %348 = arith.mulf %343, %347 : vector<8x32xf32>
    %c0_125 = arith.constant 0 : index
    %c0_126 = arith.constant 0 : index
    %349 = vector.load %arg2[%c0_125, %c0_126] : memref<128x512xf32, #tpu.memory_space<vmem>>, vector<128x512xf32>
    %cst_127 = arith.constant dense<0.000000e+00> : vector<8x512xf32>
    %350 = tpu.matmul %300, %349, %cst_127 {dimension_numbers = #tpu.dot_dimension_numbers<[1], [0], [0], [1], [0, 0, 1, 1], [], []>} : vector<8x128xf32>, vector<128x512xf32>, vector<8x512xf32> -> vector<8x512xf32>
    %c48 = arith.constant 48 : index
    %c0_128 = arith.constant 0 : index
    %351 = vector.load %arg17[%c48, %c0_128] : memref<64x512xf32, #tpu.memory_space<vmem>>, vector<8x512xf32>
    %352 = arith.addf %350, %351 : vector<8x512xf32>
    %353 = vector.extract_strided_slice %352 {offsets = [0, 0], sizes = [8, 384], strides = [1, 1]} : vector<8x512xf32> to vector<8x384xf32>
    %354 = arith.negf %353 : vector<8x384xf32>
    %355 = math.exp %354 : vector<8x384xf32>
    %cst_129 = arith.constant 1.000000e+00 : f32
    %356 = vector.broadcast %cst_129 : f32 to vector<8x384xf32>
    %357 = arith.addf %356, %355 : vector<8x384xf32>
    %358 = arith.divf %356, %357 : vector<8x384xf32>
    %359 = vector.extract_strided_slice %352 {offsets = [0, 384], sizes = [8, 128], strides = [1, 1]} : vector<8x512xf32> to vector<8x128xf32>
    %360 = math.tanh %359 : vector<8x128xf32>
    %361 = vector.extract_strided_slice %358 {offsets = [0, 0], sizes = [8, 128], strides = [1, 1]} : vector<8x384xf32> to vector<8x128xf32>
    %362 = vector.extract_strided_slice %358 {offsets = [0, 128], sizes = [8, 128], strides = [1, 1]} : vector<8x384xf32> to vector<8x128xf32>
    %363 = vector.extract_strided_slice %358 {offsets = [0, 256], sizes = [8, 128], strides = [1, 1]} : vector<8x384xf32> to vector<8x128xf32>
    %364 = arith.mulf %362, %298 : vector<8x128xf32>
    %365 = arith.mulf %361, %360 : vector<8x128xf32>
    %366 = arith.addf %364, %365 : vector<8x128xf32>
    %367 = math.tanh %366 : vector<8x128xf32>
    %368 = arith.mulf %363, %367 : vector<8x128xf32>
    %c0_130 = arith.constant 0 : index
    %c0_131 = arith.constant 0 : index
    %369 = vector.load %arg5[%c0_130, %c0_131] : memref<64x256xf32, #tpu.memory_space<vmem>>, vector<64x256xf32>
    %cst_132 = arith.constant dense<0.000000e+00> : vector<8x256xf32>
    %370 = tpu.matmul %324, %369, %cst_132 {dimension_numbers = #tpu.dot_dimension_numbers<[1], [0], [0], [1], [0, 0, 1, 1], [], []>} : vector<8x64xf32>, vector<64x256xf32>, vector<8x256xf32> -> vector<8x256xf32>
    %c0_133 = arith.constant 0 : index
    %c0_134 = arith.constant 0 : index
    %371 = vector.load %arg4[%c0_133, %c0_134] : memref<128x256xf32, #tpu.memory_space<vmem>>, vector<128x256xf32>
    %cst_135 = arith.constant dense<0.000000e+00> : vector<8x256xf32>
    %372 = tpu.matmul %300, %371, %cst_135 {dimension_numbers = #tpu.dot_dimension_numbers<[1], [0], [0], [1], [0, 0, 1, 1], [], []>} : vector<8x128xf32>, vector<128x256xf32>, vector<8x256xf32> -> vector<8x256xf32>
    %373 = arith.addf %370, %372 : vector<8x256xf32>
    %c0_136 = arith.constant 0 : index
    %c0_137 = arith.constant 0 : index
    %374 = vector.load %arg6[%c0_136, %c0_137] : memref<1x256xf32, #tpu.memory_space<vmem>>, vector<1x256xf32>
    %375 = vector.broadcast %374 : vector<1x256xf32> to vector<8x256xf32>
    %376 = arith.addf %373, %375 : vector<8x256xf32>
    %377 = vector.extract_strided_slice %376 {offsets = [0, 0], sizes = [8, 192], strides = [1, 1]} : vector<8x256xf32> to vector<8x192xf32>
    %378 = arith.negf %377 : vector<8x192xf32>
    %379 = math.exp %378 : vector<8x192xf32>
    %cst_138 = arith.constant 1.000000e+00 : f32
    %380 = vector.broadcast %cst_138 : f32 to vector<8x192xf32>
    %381 = arith.addf %380, %379 : vector<8x192xf32>
    %382 = arith.divf %380, %381 : vector<8x192xf32>
    %383 = vector.extract_strided_slice %376 {offsets = [0, 192], sizes = [8, 64], strides = [1, 1]} : vector<8x256xf32> to vector<8x64xf32>
    %384 = math.tanh %383 : vector<8x64xf32>
    %385 = vector.extract_strided_slice %382 {offsets = [0, 0], sizes = [8, 64], strides = [1, 1]} : vector<8x192xf32> to vector<8x64xf32>
    %386 = vector.extract_strided_slice %382 {offsets = [0, 64], sizes = [8, 64], strides = [1, 1]} : vector<8x192xf32> to vector<8x64xf32>
    %387 = vector.extract_strided_slice %382 {offsets = [0, 128], sizes = [8, 64], strides = [1, 1]} : vector<8x192xf32> to vector<8x64xf32>
    %388 = arith.mulf %386, %322 : vector<8x64xf32>
    %389 = arith.mulf %385, %384 : vector<8x64xf32>
    %390 = arith.addf %388, %389 : vector<8x64xf32>
    %391 = math.tanh %390 : vector<8x64xf32>
    %392 = arith.mulf %387, %391 : vector<8x64xf32>
    %c0_139 = arith.constant 0 : index
    %c0_140 = arith.constant 0 : index
    %393 = vector.load %arg8[%c0_139, %c0_140] : memref<32x128xf32, #tpu.memory_space<vmem>>, vector<32x128xf32>
    %cst_141 = arith.constant dense<0.000000e+00> : vector<8x128xf32>
    %394 = tpu.matmul %348, %393, %cst_141 {dimension_numbers = #tpu.dot_dimension_numbers<[1], [0], [0], [1], [0, 0, 1, 1], [], []>} : vector<8x32xf32>, vector<32x128xf32>, vector<8x128xf32> -> vector<8x128xf32>
    %c0_142 = arith.constant 0 : index
    %c0_143 = arith.constant 0 : index
    %395 = vector.load %arg7[%c0_142, %c0_143] : memref<64x128xf32, #tpu.memory_space<vmem>>, vector<64x128xf32>
    %cst_144 = arith.constant dense<0.000000e+00> : vector<8x128xf32>
    %396 = tpu.matmul %324, %395, %cst_144 {dimension_numbers = #tpu.dot_dimension_numbers<[1], [0], [0], [1], [0, 0, 1, 1], [], []>} : vector<8x64xf32>, vector<64x128xf32>, vector<8x128xf32> -> vector<8x128xf32>
    %397 = arith.addf %394, %396 : vector<8x128xf32>
    %c0_145 = arith.constant 0 : index
    %c0_146 = arith.constant 0 : index
    %398 = vector.load %arg9[%c0_145, %c0_146] : memref<1x128xf32, #tpu.memory_space<vmem>>, vector<1x128xf32>
    %399 = vector.broadcast %398 : vector<1x128xf32> to vector<8x128xf32>
    %400 = arith.addf %397, %399 : vector<8x128xf32>
    %401 = vector.extract_strided_slice %400 {offsets = [0, 0], sizes = [8, 96], strides = [1, 1]} : vector<8x128xf32> to vector<8x96xf32>
    %402 = arith.negf %401 : vector<8x96xf32>
    %403 = math.exp %402 : vector<8x96xf32>
    %cst_147 = arith.constant 1.000000e+00 : f32
    %404 = vector.broadcast %cst_147 : f32 to vector<8x96xf32>
    %405 = arith.addf %404, %403 : vector<8x96xf32>
    %406 = arith.divf %404, %405 : vector<8x96xf32>
    %407 = vector.extract_strided_slice %400 {offsets = [0, 96], sizes = [8, 32], strides = [1, 1]} : vector<8x128xf32> to vector<8x32xf32>
    %408 = math.tanh %407 : vector<8x32xf32>
    %409 = vector.extract_strided_slice %406 {offsets = [0, 0], sizes = [8, 32], strides = [1, 1]} : vector<8x96xf32> to vector<8x32xf32>
    %410 = vector.extract_strided_slice %406 {offsets = [0, 32], sizes = [8, 32], strides = [1, 1]} : vector<8x96xf32> to vector<8x32xf32>
    %411 = vector.extract_strided_slice %406 {offsets = [0, 64], sizes = [8, 32], strides = [1, 1]} : vector<8x96xf32> to vector<8x32xf32>
    %412 = arith.mulf %410, %346 : vector<8x32xf32>
    %413 = arith.mulf %409, %408 : vector<8x32xf32>
    %414 = arith.addf %412, %413 : vector<8x32xf32>
    %415 = math.tanh %414 : vector<8x32xf32>
    %416 = arith.mulf %411, %415 : vector<8x32xf32>
    %c0_148 = arith.constant 0 : index
    %c0_149 = arith.constant 0 : index
    %417 = vector.load %arg2[%c0_148, %c0_149] : memref<128x512xf32, #tpu.memory_space<vmem>>, vector<128x512xf32>
    %cst_150 = arith.constant dense<0.000000e+00> : vector<8x512xf32>
    %418 = tpu.matmul %368, %417, %cst_150 {dimension_numbers = #tpu.dot_dimension_numbers<[1], [0], [0], [1], [0, 0, 1, 1], [], []>} : vector<8x128xf32>, vector<128x512xf32>, vector<8x512xf32> -> vector<8x512xf32>
    %c56 = arith.constant 56 : index
    %c0_151 = arith.constant 0 : index
    %419 = vector.load %arg17[%c56, %c0_151] : memref<64x512xf32, #tpu.memory_space<vmem>>, vector<8x512xf32>
    %420 = arith.addf %418, %419 : vector<8x512xf32>
    %421 = vector.extract_strided_slice %420 {offsets = [0, 0], sizes = [8, 384], strides = [1, 1]} : vector<8x512xf32> to vector<8x384xf32>
    %422 = arith.negf %421 : vector<8x384xf32>
    %423 = math.exp %422 : vector<8x384xf32>
    %cst_152 = arith.constant 1.000000e+00 : f32
    %424 = vector.broadcast %cst_152 : f32 to vector<8x384xf32>
    %425 = arith.addf %424, %423 : vector<8x384xf32>
    %426 = arith.divf %424, %425 : vector<8x384xf32>
    %427 = vector.extract_strided_slice %420 {offsets = [0, 384], sizes = [8, 128], strides = [1, 1]} : vector<8x512xf32> to vector<8x128xf32>
    %428 = math.tanh %427 : vector<8x128xf32>
    %429 = vector.extract_strided_slice %426 {offsets = [0, 0], sizes = [8, 128], strides = [1, 1]} : vector<8x384xf32> to vector<8x128xf32>
    %430 = vector.extract_strided_slice %426 {offsets = [0, 128], sizes = [8, 128], strides = [1, 1]} : vector<8x384xf32> to vector<8x128xf32>
    %431 = vector.extract_strided_slice %426 {offsets = [0, 256], sizes = [8, 128], strides = [1, 1]} : vector<8x384xf32> to vector<8x128xf32>
    %432 = arith.mulf %430, %366 : vector<8x128xf32>
    %433 = arith.mulf %429, %428 : vector<8x128xf32>
    %434 = arith.addf %432, %433 : vector<8x128xf32>
    %435 = math.tanh %434 : vector<8x128xf32>
    %436 = arith.mulf %431, %435 : vector<8x128xf32>
    %c0_153 = arith.constant 0 : index
    %c0_154 = arith.constant 0 : index
    %437 = vector.load %arg5[%c0_153, %c0_154] : memref<64x256xf32, #tpu.memory_space<vmem>>, vector<64x256xf32>
    %cst_155 = arith.constant dense<0.000000e+00> : vector<8x256xf32>
    %438 = tpu.matmul %392, %437, %cst_155 {dimension_numbers = #tpu.dot_dimension_numbers<[1], [0], [0], [1], [0, 0, 1, 1], [], []>} : vector<8x64xf32>, vector<64x256xf32>, vector<8x256xf32> -> vector<8x256xf32>
    %c0_156 = arith.constant 0 : index
    %c0_157 = arith.constant 0 : index
    %439 = vector.load %arg4[%c0_156, %c0_157] : memref<128x256xf32, #tpu.memory_space<vmem>>, vector<128x256xf32>
    %cst_158 = arith.constant dense<0.000000e+00> : vector<8x256xf32>
    %440 = tpu.matmul %368, %439, %cst_158 {dimension_numbers = #tpu.dot_dimension_numbers<[1], [0], [0], [1], [0, 0, 1, 1], [], []>} : vector<8x128xf32>, vector<128x256xf32>, vector<8x256xf32> -> vector<8x256xf32>
    %441 = arith.addf %438, %440 : vector<8x256xf32>
    %c0_159 = arith.constant 0 : index
    %c0_160 = arith.constant 0 : index
    %442 = vector.load %arg6[%c0_159, %c0_160] : memref<1x256xf32, #tpu.memory_space<vmem>>, vector<1x256xf32>
    %443 = vector.broadcast %442 : vector<1x256xf32> to vector<8x256xf32>
    %444 = arith.addf %441, %443 : vector<8x256xf32>
    %445 = vector.extract_strided_slice %444 {offsets = [0, 0], sizes = [8, 192], strides = [1, 1]} : vector<8x256xf32> to vector<8x192xf32>
    %446 = arith.negf %445 : vector<8x192xf32>
    %447 = math.exp %446 : vector<8x192xf32>
    %cst_161 = arith.constant 1.000000e+00 : f32
    %448 = vector.broadcast %cst_161 : f32 to vector<8x192xf32>
    %449 = arith.addf %448, %447 : vector<8x192xf32>
    %450 = arith.divf %448, %449 : vector<8x192xf32>
    %451 = vector.extract_strided_slice %444 {offsets = [0, 192], sizes = [8, 64], strides = [1, 1]} : vector<8x256xf32> to vector<8x64xf32>
    %452 = math.tanh %451 : vector<8x64xf32>
    %453 = vector.extract_strided_slice %450 {offsets = [0, 0], sizes = [8, 64], strides = [1, 1]} : vector<8x192xf32> to vector<8x64xf32>
    %454 = vector.extract_strided_slice %450 {offsets = [0, 64], sizes = [8, 64], strides = [1, 1]} : vector<8x192xf32> to vector<8x64xf32>
    %455 = vector.extract_strided_slice %450 {offsets = [0, 128], sizes = [8, 64], strides = [1, 1]} : vector<8x192xf32> to vector<8x64xf32>
    %456 = arith.mulf %454, %390 : vector<8x64xf32>
    %457 = arith.mulf %453, %452 : vector<8x64xf32>
    %458 = arith.addf %456, %457 : vector<8x64xf32>
    %459 = math.tanh %458 : vector<8x64xf32>
    %460 = arith.mulf %455, %459 : vector<8x64xf32>
    %c0_162 = arith.constant 0 : index
    %c0_163 = arith.constant 0 : index
    %461 = vector.load %arg8[%c0_162, %c0_163] : memref<32x128xf32, #tpu.memory_space<vmem>>, vector<32x128xf32>
    %cst_164 = arith.constant dense<0.000000e+00> : vector<8x128xf32>
    %462 = tpu.matmul %416, %461, %cst_164 {dimension_numbers = #tpu.dot_dimension_numbers<[1], [0], [0], [1], [0, 0, 1, 1], [], []>} : vector<8x32xf32>, vector<32x128xf32>, vector<8x128xf32> -> vector<8x128xf32>
    %c0_165 = arith.constant 0 : index
    %c0_166 = arith.constant 0 : index
    %463 = vector.load %arg7[%c0_165, %c0_166] : memref<64x128xf32, #tpu.memory_space<vmem>>, vector<64x128xf32>
    %cst_167 = arith.constant dense<0.000000e+00> : vector<8x128xf32>
    %464 = tpu.matmul %392, %463, %cst_167 {dimension_numbers = #tpu.dot_dimension_numbers<[1], [0], [0], [1], [0, 0, 1, 1], [], []>} : vector<8x64xf32>, vector<64x128xf32>, vector<8x128xf32> -> vector<8x128xf32>
    %465 = arith.addf %462, %464 : vector<8x128xf32>
    %c0_168 = arith.constant 0 : index
    %c0_169 = arith.constant 0 : index
    %466 = vector.load %arg9[%c0_168, %c0_169] : memref<1x128xf32, #tpu.memory_space<vmem>>, vector<1x128xf32>
    %467 = vector.broadcast %466 : vector<1x128xf32> to vector<8x128xf32>
    %468 = arith.addf %465, %467 : vector<8x128xf32>
    %469 = vector.extract_strided_slice %468 {offsets = [0, 0], sizes = [8, 96], strides = [1, 1]} : vector<8x128xf32> to vector<8x96xf32>
    %470 = arith.negf %469 : vector<8x96xf32>
    %471 = math.exp %470 : vector<8x96xf32>
    %cst_170 = arith.constant 1.000000e+00 : f32
    %472 = vector.broadcast %cst_170 : f32 to vector<8x96xf32>
    %473 = arith.addf %472, %471 : vector<8x96xf32>
    %474 = arith.divf %472, %473 : vector<8x96xf32>
    %475 = vector.extract_strided_slice %468 {offsets = [0, 96], sizes = [8, 32], strides = [1, 1]} : vector<8x128xf32> to vector<8x32xf32>
    %476 = math.tanh %475 : vector<8x32xf32>
    %477 = vector.extract_strided_slice %474 {offsets = [0, 0], sizes = [8, 32], strides = [1, 1]} : vector<8x96xf32> to vector<8x32xf32>
    %478 = vector.extract_strided_slice %474 {offsets = [0, 32], sizes = [8, 32], strides = [1, 1]} : vector<8x96xf32> to vector<8x32xf32>
    %479 = vector.extract_strided_slice %474 {offsets = [0, 64], sizes = [8, 32], strides = [1, 1]} : vector<8x96xf32> to vector<8x32xf32>
    %480 = arith.mulf %478, %414 : vector<8x32xf32>
    %481 = arith.mulf %477, %476 : vector<8x32xf32>
    %482 = arith.addf %480, %481 : vector<8x32xf32>
    %483 = math.tanh %482 : vector<8x32xf32>
    %484 = arith.mulf %479, %483 : vector<8x32xf32>
    %c0_171 = arith.constant 0 : index
    %c0_172 = arith.constant 0 : index
    %485 = vector.load %arg5[%c0_171, %c0_172] : memref<64x256xf32, #tpu.memory_space<vmem>>, vector<64x256xf32>
    %cst_173 = arith.constant dense<0.000000e+00> : vector<8x256xf32>
    %486 = tpu.matmul %460, %485, %cst_173 {dimension_numbers = #tpu.dot_dimension_numbers<[1], [0], [0], [1], [0, 0, 1, 1], [], []>} : vector<8x64xf32>, vector<64x256xf32>, vector<8x256xf32> -> vector<8x256xf32>
    %c0_174 = arith.constant 0 : index
    %c0_175 = arith.constant 0 : index
    %487 = vector.load %arg4[%c0_174, %c0_175] : memref<128x256xf32, #tpu.memory_space<vmem>>, vector<128x256xf32>
    %cst_176 = arith.constant dense<0.000000e+00> : vector<8x256xf32>
    %488 = tpu.matmul %436, %487, %cst_176 {dimension_numbers = #tpu.dot_dimension_numbers<[1], [0], [0], [1], [0, 0, 1, 1], [], []>} : vector<8x128xf32>, vector<128x256xf32>, vector<8x256xf32> -> vector<8x256xf32>
    %489 = arith.addf %486, %488 : vector<8x256xf32>
    %c0_177 = arith.constant 0 : index
    %c0_178 = arith.constant 0 : index
    %490 = vector.load %arg6[%c0_177, %c0_178] : memref<1x256xf32, #tpu.memory_space<vmem>>, vector<1x256xf32>
    %491 = vector.broadcast %490 : vector<1x256xf32> to vector<8x256xf32>
    %492 = arith.addf %489, %491 : vector<8x256xf32>
    %493 = vector.extract_strided_slice %492 {offsets = [0, 0], sizes = [8, 192], strides = [1, 1]} : vector<8x256xf32> to vector<8x192xf32>
    %494 = arith.negf %493 : vector<8x192xf32>
    %495 = math.exp %494 : vector<8x192xf32>
    %cst_179 = arith.constant 1.000000e+00 : f32
    %496 = vector.broadcast %cst_179 : f32 to vector<8x192xf32>
    %497 = arith.addf %496, %495 : vector<8x192xf32>
    %498 = arith.divf %496, %497 : vector<8x192xf32>
    %499 = vector.extract_strided_slice %492 {offsets = [0, 192], sizes = [8, 64], strides = [1, 1]} : vector<8x256xf32> to vector<8x64xf32>
    %500 = math.tanh %499 : vector<8x64xf32>
    %501 = vector.extract_strided_slice %498 {offsets = [0, 0], sizes = [8, 64], strides = [1, 1]} : vector<8x192xf32> to vector<8x64xf32>
    %502 = vector.extract_strided_slice %498 {offsets = [0, 64], sizes = [8, 64], strides = [1, 1]} : vector<8x192xf32> to vector<8x64xf32>
    %503 = vector.extract_strided_slice %498 {offsets = [0, 128], sizes = [8, 64], strides = [1, 1]} : vector<8x192xf32> to vector<8x64xf32>
    %504 = arith.mulf %502, %458 : vector<8x64xf32>
    %505 = arith.mulf %501, %500 : vector<8x64xf32>
    %506 = arith.addf %504, %505 : vector<8x64xf32>
    %507 = math.tanh %506 : vector<8x64xf32>
    %508 = arith.mulf %503, %507 : vector<8x64xf32>
    %c0_180 = arith.constant 0 : index
    %c0_181 = arith.constant 0 : index
    %509 = vector.load %arg8[%c0_180, %c0_181] : memref<32x128xf32, #tpu.memory_space<vmem>>, vector<32x128xf32>
    %cst_182 = arith.constant dense<0.000000e+00> : vector<8x128xf32>
    %510 = tpu.matmul %484, %509, %cst_182 {dimension_numbers = #tpu.dot_dimension_numbers<[1], [0], [0], [1], [0, 0, 1, 1], [], []>} : vector<8x32xf32>, vector<32x128xf32>, vector<8x128xf32> -> vector<8x128xf32>
    %c0_183 = arith.constant 0 : index
    %c0_184 = arith.constant 0 : index
    %511 = vector.load %arg7[%c0_183, %c0_184] : memref<64x128xf32, #tpu.memory_space<vmem>>, vector<64x128xf32>
    %cst_185 = arith.constant dense<0.000000e+00> : vector<8x128xf32>
    %512 = tpu.matmul %460, %511, %cst_185 {dimension_numbers = #tpu.dot_dimension_numbers<[1], [0], [0], [1], [0, 0, 1, 1], [], []>} : vector<8x64xf32>, vector<64x128xf32>, vector<8x128xf32> -> vector<8x128xf32>
    %513 = arith.addf %510, %512 : vector<8x128xf32>
    %c0_186 = arith.constant 0 : index
    %c0_187 = arith.constant 0 : index
    %514 = vector.load %arg9[%c0_186, %c0_187] : memref<1x128xf32, #tpu.memory_space<vmem>>, vector<1x128xf32>
    %515 = vector.broadcast %514 : vector<1x128xf32> to vector<8x128xf32>
    %516 = arith.addf %513, %515 : vector<8x128xf32>
    %517 = vector.extract_strided_slice %516 {offsets = [0, 0], sizes = [8, 96], strides = [1, 1]} : vector<8x128xf32> to vector<8x96xf32>
    %518 = arith.negf %517 : vector<8x96xf32>
    %519 = math.exp %518 : vector<8x96xf32>
    %cst_188 = arith.constant 1.000000e+00 : f32
    %520 = vector.broadcast %cst_188 : f32 to vector<8x96xf32>
    %521 = arith.addf %520, %519 : vector<8x96xf32>
    %522 = arith.divf %520, %521 : vector<8x96xf32>
    %523 = vector.extract_strided_slice %516 {offsets = [0, 96], sizes = [8, 32], strides = [1, 1]} : vector<8x128xf32> to vector<8x32xf32>
    %524 = math.tanh %523 : vector<8x32xf32>
    %525 = vector.extract_strided_slice %522 {offsets = [0, 0], sizes = [8, 32], strides = [1, 1]} : vector<8x96xf32> to vector<8x32xf32>
    %526 = vector.extract_strided_slice %522 {offsets = [0, 32], sizes = [8, 32], strides = [1, 1]} : vector<8x96xf32> to vector<8x32xf32>
    %527 = vector.extract_strided_slice %522 {offsets = [0, 64], sizes = [8, 32], strides = [1, 1]} : vector<8x96xf32> to vector<8x32xf32>
    %528 = arith.mulf %526, %482 : vector<8x32xf32>
    %529 = arith.mulf %525, %524 : vector<8x32xf32>
    %530 = arith.addf %528, %529 : vector<8x32xf32>
    %531 = math.tanh %530 : vector<8x32xf32>
    %532 = arith.mulf %527, %531 : vector<8x32xf32>
    %c0_189 = arith.constant 0 : index
    %c0_190 = arith.constant 0 : index
    %533 = vector.load %arg8[%c0_189, %c0_190] : memref<32x128xf32, #tpu.memory_space<vmem>>, vector<32x128xf32>
    %cst_191 = arith.constant dense<0.000000e+00> : vector<8x128xf32>
    %534 = tpu.matmul %532, %533, %cst_191 {dimension_numbers = #tpu.dot_dimension_numbers<[1], [0], [0], [1], [0, 0, 1, 1], [], []>} : vector<8x32xf32>, vector<32x128xf32>, vector<8x128xf32> -> vector<8x128xf32>
    %c0_192 = arith.constant 0 : index
    %c0_193 = arith.constant 0 : index
    %535 = vector.load %arg7[%c0_192, %c0_193] : memref<64x128xf32, #tpu.memory_space<vmem>>, vector<64x128xf32>
    %cst_194 = arith.constant dense<0.000000e+00> : vector<8x128xf32>
    %536 = tpu.matmul %508, %535, %cst_194 {dimension_numbers = #tpu.dot_dimension_numbers<[1], [0], [0], [1], [0, 0, 1, 1], [], []>} : vector<8x64xf32>, vector<64x128xf32>, vector<8x128xf32> -> vector<8x128xf32>
    %537 = arith.addf %534, %536 : vector<8x128xf32>
    %c0_195 = arith.constant 0 : index
    %c0_196 = arith.constant 0 : index
    %538 = vector.load %arg9[%c0_195, %c0_196] : memref<1x128xf32, #tpu.memory_space<vmem>>, vector<1x128xf32>
    %539 = vector.broadcast %538 : vector<1x128xf32> to vector<8x128xf32>
    %540 = arith.addf %537, %539 : vector<8x128xf32>
    %541 = vector.extract_strided_slice %540 {offsets = [0, 0], sizes = [8, 96], strides = [1, 1]} : vector<8x128xf32> to vector<8x96xf32>
    %542 = arith.negf %541 : vector<8x96xf32>
    %543 = math.exp %542 : vector<8x96xf32>
    %cst_197 = arith.constant 1.000000e+00 : f32
    %544 = vector.broadcast %cst_197 : f32 to vector<8x96xf32>
    %545 = arith.addf %544, %543 : vector<8x96xf32>
    %546 = arith.divf %544, %545 : vector<8x96xf32>
    %547 = vector.extract_strided_slice %540 {offsets = [0, 96], sizes = [8, 32], strides = [1, 1]} : vector<8x128xf32> to vector<8x32xf32>
    %548 = math.tanh %547 : vector<8x32xf32>
    %549 = vector.extract_strided_slice %546 {offsets = [0, 0], sizes = [8, 32], strides = [1, 1]} : vector<8x96xf32> to vector<8x32xf32>
    %550 = vector.extract_strided_slice %546 {offsets = [0, 32], sizes = [8, 32], strides = [1, 1]} : vector<8x96xf32> to vector<8x32xf32>
    %551 = vector.extract_strided_slice %546 {offsets = [0, 64], sizes = [8, 32], strides = [1, 1]} : vector<8x96xf32> to vector<8x32xf32>
    %552 = arith.mulf %550, %530 : vector<8x32xf32>
    %553 = arith.mulf %549, %548 : vector<8x32xf32>
    %554 = arith.addf %552, %553 : vector<8x32xf32>
    %555 = math.tanh %554 : vector<8x32xf32>
    %556 = arith.mulf %551, %555 : vector<8x32xf32>
    %c0_198 = arith.constant 0 : index
    %c0_199 = arith.constant 0 : index
    %557 = vector.load %arg10[%c0_198, %c0_199] : memref<32x128xf32, #tpu.memory_space<vmem>>, vector<32x128xf32>
    %cst_200 = arith.constant dense<0.000000e+00> : vector<8x128xf32>
    %558 = tpu.matmul %556, %557, %cst_200 {dimension_numbers = #tpu.dot_dimension_numbers<[1], [0], [0], [1], [0, 0, 1, 1], [], []>} : vector<8x32xf32>, vector<32x128xf32>, vector<8x128xf32> -> vector<8x128xf32>
    %c0_201 = arith.constant 0 : index
    %c0_202 = arith.constant 0 : index
    %559 = vector.load %arg11[%c0_201, %c0_202] : memref<1x128xf32, #tpu.memory_space<vmem>>, vector<1x128xf32>
    %560 = vector.broadcast %559 : vector<1x128xf32> to vector<8x128xf32>
    %561 = arith.addf %558, %560 : vector<8x128xf32>
    %cst_203 = arith.constant 0.000000e+00 : f32
    %562 = vector.broadcast %cst_203 : f32 to vector<8x128xf32>
    %563 = arith.maximumf %561, %562 : vector<8x128xf32>
    %c0_204 = arith.constant 0 : index
    %c0_205 = arith.constant 0 : index
    %564 = vector.load %arg12[%c0_204, %c0_205] : memref<128x128xf32, #tpu.memory_space<vmem>>, vector<128x128xf32>
    %cst_206 = arith.constant dense<0.000000e+00> : vector<8x128xf32>
    %565 = tpu.matmul %563, %564, %cst_206 {dimension_numbers = #tpu.dot_dimension_numbers<[1], [0], [0], [1], [0, 0, 1, 1], [], []>} : vector<8x128xf32>, vector<128x128xf32>, vector<8x128xf32> -> vector<8x128xf32>
    %c0_207 = arith.constant 0 : index
    %c0_208 = arith.constant 0 : index
    %566 = vector.load %arg13[%c0_207, %c0_208] : memref<1x128xf32, #tpu.memory_space<vmem>>, vector<1x128xf32>
    %567 = vector.broadcast %566 : vector<1x128xf32> to vector<8x128xf32>
    %568 = arith.addf %565, %567 : vector<8x128xf32>
    %cst_209 = arith.constant 0.000000e+00 : f32
    %569 = vector.broadcast %cst_209 : f32 to vector<8x128xf32>
    %570 = arith.maximumf %568, %569 : vector<8x128xf32>
    %c0_210 = arith.constant 0 : index
    %c0_211 = arith.constant 0 : index
    %571 = vector.load %arg14[%c0_210, %c0_211] : memref<128x1xf32, #tpu.memory_space<vmem>>, vector<128x1xf32>
    %cst_212 = arith.constant dense<0.000000e+00> : vector<8x1xf32>
    %572 = tpu.matmul %570, %571, %cst_212 {dimension_numbers = #tpu.dot_dimension_numbers<[1], [0], [0], [1], [0, 0, 1, 1], [], []>} : vector<8x128xf32>, vector<128x1xf32>, vector<8x1xf32> -> vector<8x1xf32>
    %c0_213 = arith.constant 0 : index
    %c0_214 = arith.constant 0 : index
    %573 = vector.load %arg15[%c0_213, %c0_214] : memref<1x1xf32, #tpu.memory_space<vmem>>, vector<1x1xf32>
    %574 = vector.broadcast %573 : vector<1x1xf32> to vector<8x1xf32>
    %575 = arith.addf %572, %574 : vector<8x1xf32>
    %c0_215 = arith.constant 0 : index
    %c0_216 = arith.constant 0 : index
    %576 = vector.load %arg16[%c0_215, %c0_216] : memref<8x1xf32, #tpu.memory_space<vmem>>, vector<8x1xf32>
    tpu.vector_store %arg16[%c0_215, %c0_216], %575 {strides = array<i32>} : memref<8x1xf32, #tpu.memory_space<vmem>>, vector<8x1xf32>,
    return
  }
}

</mosaic_0001>

<bundles_post_ra>
// kernel: lstm_model_forward.1
= control target key start
LH: loop header
LB: loop body
LE: loop exit
PB: predicated region body
PF: predicated region fallthrough
CT: control target
= control target key end

     0   :  { %vm106_vm0 = vcmask 1045504   ;;  %vm81_vm1 = vcmask 113664   ;;  %s4266_s22 = smov 32   ;;  %s8046_s1 = inlined_call_operand.vmem [shape: f32[14,512], index: 1, kind: input, shape index: {}]   ;;  %s8047_s0 = inlined_call_operand.vmem [shape: f32[64,14], index: 0, kind: input, shape index: {}]   ;;  %s8048_s2 = inlined_call_operand.vmem [shape: f32[128,512], index: 2, kind: input, shape index: {}]   ;;  %s8049_s3 = inlined_call_operand.vmem [shape: f32[1,512], index: 3, kind: input, shape index: {}]   ;;  %s8050_s4 = inlined_call_operand.vmem [shape: f32[128,256], index: 4, kind: input, shape index: {}]   ;;  %s8051_s5 = inlined_call_operand.vmem [shape: f32[64,256], index: 5, kind: input, shape index: {}]   ;;  %s8052_s6 = inlined_call_operand.vmem [shape: f32[1,256], index: 6, kind: input, shape index: {}]   ;;  %s8053_s7 = inlined_call_operand.vmem [shape: f32[64,128], index: 7, kind: input, shape index: {}]   ;;  %s8054_s8 = inlined_call_operand.vmem [shape: f32[32,128], index: 8, kind: input, shape index: {}]   ;;  %s8055_s9 = inlined_call_operand.vmem [shape: f32[1,128], index: 9, kind: input, shape index: {}]   ;;  %s8056_s10 = inlined_call_operand.vmem [shape: f32[32,128], index: 10, kind: input, shape index: {}]   ;;  %s8057_s11 = inlined_call_operand.vmem [shape: f32[1,128], index: 11, kind: input, shape index: {}]   ;;  %s8058_s12 = inlined_call_operand.vmem [shape: f32[128,128], index: 12, kind: input, shape index: {}]   ;;  %s8059_s13 = inlined_call_operand.vmem [shape: f32[1,128], index: 13, kind: input, shape index: {}]   ;;  %s8060_s14 = inlined_call_operand.vmem [shape: f32[128,1], index: 14, kind: input, shape index: {}]   ;;  %s8061_s15 = inlined_call_operand.<no memory space> [shape: f32[1,1], index: 15, kind: input, shape index: {}]   ;;  %s8062_s16 = inlined_call_operand.vmem [shape: f32[8,1], index: 16, kind: output, shape index: {}]  }
   0x1   :  { %8284 = sst [smem:[#allocation93_spill]] %s8046_s1  ;;  %v55_v8 = vld [vmem:[%s8047_s0] sm:$0xff]  ;;  %v4387_v10 = vld [vmem:[%s8048_s2 + $0x1e8] sm:$0xff]  ;;  %v4394_v11 = vld [vmem:[%s8048_s2 + $0x1f0] sm:$0xff] }
   0x2   :  { %s8285_s23 = sld [smem:[#allocation93_spill]]  ;;  %v4382_v9 = vld [vmem:[%s8048_s2 + $0x1e0] sm:$0xff]  ;;  %v4406_v13 = vld [vmem:[%s8048_s2 + $0x1c8] sm:$0xff]  ;;  %v4413_v14 = vld [vmem:[%s8048_s2 + $0x1d0] sm:$0xff] }
   0x3   :  { %v4401_v12 = vld [vmem:[%s8048_s2 + $0x1c0] sm:$0xff]  ;;  %v4418_v15 = vld [vmem:[%s8048_s2 + $0x1f8] sm:$0xff]  ;;  %v4429_v17 = vld [vmem:[%s8048_s2 + $0x1a8] sm:$0xff] }
   0x4   :  { %v4424_v16 = vld [vmem:[%s8048_s2 + $0x1a0] sm:$0xff]  ;;  %v4435_v18 = vld [vmem:[%s8048_s2 + $0x1d8] sm:$0xff]  ;;  %v4442_v19 = vld [vmem:[%s8048_s2 + $0x1b0] sm:$0xff] }
   0x5   :  { %v56_v20 = vld [vmem:[%s8047_s0 + $0x8] sm:$0xff]  ;;  %v4452_v21 = vld [vmem:[%s8048_s2 + $0x1b8] sm:$0xff]  ;;  %v4459_v22 = vld [vmem:[%s8048_s2 + $0x180] sm:$0xff] }
   0x6   :  { %v4464_v23 = vld [vmem:[%s8048_s2 + $0x188] sm:$0xff]  ;;  %v4473_v24 = vld [vmem:[%s8048_s2 + $0x190] sm:$0xff]  ;;  %v4478_v25 = vld [vmem:[%s8048_s2 + $0x198] sm:$0xff] }
   0x7   :  { %v4485_v26 = vld [vmem:[%s8048_s2 + $0x160] sm:$0xff]  ;;  %v4490_v27 = vld [vmem:[%s8048_s2 + $0x168] sm:$0xff]  ;;  %v4497_v28 = vld [vmem:[%s8048_s2 + $0x170] sm:$0xff] }
   0x8   :  { %v67_v0 = vld [vmem:[%s8285_s23 + $0x20] sm:$0x3f]  ;;  %v68_v1 = vld [vmem:[%s8285_s23 + $0x28] sm:$0x3f]  ;;  %v69_v2 = vld [vmem:[%s8285_s23 + $0x30] sm:$0x3f] }
   0x9   :  { %3540 = vmatpush.msk.msra.mxu0 %vm106_vm0, %v67_v0  ;;  %3549 = vmatpush.msk.msra.mxu1 %vm106_vm0, %v68_v1  ;;  %v70_v3 = vld [vmem:[%s8285_s23 + $0x38] sm:$0x3f]  ;;  %v63_v4 = vld [vmem:[%s8285_s23] sm:$0xff]  ;;  %v64_v5 = vld [vmem:[%s8285_s23 + $0x8] sm:$0xff] }
   0xa   :  { %3558 = vmatpush.msk.msra.mxu2 %vm106_vm0, %v69_v2  ;;  %3567 = vmatpush.msk.msra.mxu3 %vm106_vm0, %v70_v3  ;;  %v65_v6 = vld [vmem:[%s8285_s23 + $0x10] sm:$0xff]  ;;  %v66_v7 = vld [vmem:[%s8285_s23 + $0x18] sm:$0xff]  ;;  %v4508_v30 = vld [vmem:[%s8048_s2 + $0x140] sm:$0xff] }
   0xb   :  { %134 = vmatpush.msra.mxu0 %v63_v4  ;;  %175 = vmatpush.msra.mxu1 %v64_v5  ;;  %v4502_v29 = vld [vmem:[%s8048_s2 + $0x178] sm:$0xff]  ;;  %v4513_v31 = vld [vmem:[%s8048_s2 + $0x148] sm:$0xff]  ;;  %v4521_v32 = vld [vmem:[%s8048_s2 + $0x150] sm:$0xff] }
   0xc   :  { %216 = vmatpush.msra.mxu2 %v65_v6  ;;  %257 = vmatpush.msra.mxu3 %v66_v7  ;;  %v4526_v33 = vld [vmem:[%s8048_s2 + $0x158] sm:$0xff]  ;;  %v57_v34 = vld [vmem:[%s8047_s0 + $0x10] sm:$0xff]  ;;  %v4538_v35 = vld [vmem:[%s8048_s2 + $0x120] sm:$0xff] }
   0xd   :  { %3541 = vmatmul.msk.f32.vlgmr.msra.gmra.mxu0 %vm81_vm1, %v55_v8  ;;  %3550 = vmatmul.msk.f32.vlgmr.msra.gmra.mxu1 %vm81_vm1, %v55_v8  ;;  %8286 = vst [vmem:[#allocation4_spill] sm:$0xff] %v4526_v33  ;;  %v4543_v36 = vld [vmem:[%s8048_s2 + $0x128] sm:$0xff]  ;;  %v4552_v37 = vld [vmem:[%s8048_s2 + $0x130] sm:$0xff]  ;;  %v4557_v38 = vld [vmem:[%s8048_s2 + $0x138] sm:$0xff] }
   0xe   :  { %3559 = vmatmul.msk.f32.vlgmr.msra.gmra.mxu2 %vm81_vm1, %v55_v8  ;;  %3568 = vmatmul.msk.f32.vlgmr.msra.gmra.mxu3 %vm81_vm1, %v55_v8  ;;  %8287 = vst [vmem:[#allocation5_spill] sm:$0xff] %v4557_v38  ;;  %v4564_v39 = vld [vmem:[%s8048_s2 + $0x100] sm:$0xff]  ;;  %v4569_v40 = vld [vmem:[%s8048_s2 + $0x108] sm:$0xff]  ;;  %v4576_v41 = vld [vmem:[%s8048_s2 + $0x110] sm:$0xff] }
   0xf   :  { %383 = vmatpush.msrb.mxu0 %v4382_v9  ;;  %403 = vmatpush.msrb.mxu1 %v4387_v10  ;;  %v4581_v42 = vld [vmem:[%s8048_s2 + $0x118] sm:$0xff]  ;;  %v4587_v43 = vld [vmem:[%s8048_s2 + $0xe0] sm:$0xff]  ;;  %v4592_v44 = vld [vmem:[%s8048_s2 + $0xe8] sm:$0xff] }
  0x10   :  { %423 = vmatpush.msrb.mxu2 %v4394_v11  ;;  %443 = vmatpush.msrb.mxu3 %v4418_v15  ;;  %8288 = vst [vmem:[#allocation6_spill] sm:$0xff] %v4581_v42  ;;  %v4600_v45 = vld [vmem:[%s8048_s2 + $0xf0] sm:$0xff]  ;;  %v4605_v46 = vld [vmem:[%s8048_s2 + $0xf8] sm:$0xff]  ;;  %v4617_v48 = vld [vmem:[%s8048_s2 + $0xc0] sm:$0xff] }
  0x11   :  { %384 = vmatpush.msrb.mxu0 %v4401_v12  ;;  %404 = vmatpush.msrb.mxu1 %v4406_v13  ;;  %8289 = vst [vmem:[#allocation7_spill] sm:$0xff] %v4605_v46  ;;  %v58_v47 = vld [vmem:[%s8047_s0 + $0x18] sm:$0xff]  ;;  %v4622_v49 = vld [vmem:[%s8048_s2 + $0xc8] sm:$0xff]  ;;  %v4631_v50 = vld [vmem:[%s8048_s2 + $0xd0] sm:$0xff] }
  0x12   :  { %424 = vmatpush.msrb.mxu2 %v4413_v14  ;;  %444 = vmatpush.msrb.mxu3 %v4435_v18  ;;  %v4636_v51 = vld [vmem:[%s8048_s2 + $0xd8] sm:$0xff]  ;;  %v4643_v52 = vld [vmem:[%s8048_s2 + $0xa0] sm:$0xff]  ;;  %v4648_v53 = vld [vmem:[%s8048_s2 + $0xa8] sm:$0xff] }
  0x13   :  { %385 = vmatpush.msrb.mxu0 %v4424_v16  ;;  %405 = vmatpush.msrb.mxu1 %v4429_v17  ;;  %8290 = vst [vmem:[#allocation8_spill] sm:$0xff] %v4636_v51  ;;  %v4655_v54 = vld [vmem:[%s8048_s2 + $0xb0] sm:$0xff]  ;;  %v4660_v55 = vld [vmem:[%s8048_s2 + $0xb8] sm:$0xff]  ;;  %v4666_v56 = vld [vmem:[%s8048_s2 + $0x80] sm:$0xff] }
  0x14   :  { %425 = vmatpush.msrb.mxu2 %v4442_v19  ;;  %445 = vmatpush.msrb.mxu3 %v4452_v21  ;;  %8291 = vst [vmem:[#allocation9_spill] sm:$0xff] %v4660_v55  ;;  %v4671_v57 = vld [vmem:[%s8048_s2 + $0x88] sm:$0xff]  ;;  %v4679_v58 = vld [vmem:[%s8048_s2 + $0x90] sm:$0xff]  ;;  %v4684_v59 = vld [vmem:[%s8048_s2 + $0x98] sm:$0xff] }
  0x15   :  { %3542 = vmatmul.msk.f32.gmra.mxu0 %vm81_vm1, %v56_v20  ;;  %3551 = vmatmul.msk.f32.gmra.mxu1 %vm81_vm1, %v56_v20  ;;  %8292 = vst [vmem:[#allocation10_spill] sm:$0xff] %v4679_v58  ;;  %v59_v60 = vld [vmem:[%s8047_s0 + $0x20] sm:$0xff]  ;;  %v4701_v62 = vld [vmem:[%s8048_s2 + $0x68] sm:$0xff]  ;;  %v4710_v63 = vld [vmem:[%s8048_s2 + $0x70] sm:$0xff] }
  0x16   :  { %3560 = vmatmul.msk.f32.gmra.mxu2 %vm81_vm1, %v56_v20  ;;  %3569 = vmatmul.msk.f32.gmra.mxu3 %vm81_vm1, %v56_v20  ;;  %8293 = vst [vmem:[#allocation11_spill] sm:$0xff] %v4684_v59  ;;  %v4696_v61 = vld [vmem:[%s8048_s2 + $0x60] sm:$0xff]  ;;  %v4715_v0 = vld [vmem:[%s8048_s2 + $0x78] sm:$0xff]  ;;  %v4727_v2 = vld [vmem:[%s8048_s2 + $0x48] sm:$0xff] }
  0x17   :  { %386 = vmatpush.msrb.mxu0 %v4459_v22  ;;  %406 = vmatpush.msrb.mxu1 %v4464_v23  ;;  %8294 = vst [vmem:[#allocation12_spill] sm:$0xff] %v4701_v62  ;;  %v4722_v1 = vld [vmem:[%s8048_s2 + $0x40] sm:$0xff]  ;;  %v4734_v3 = vld [vmem:[%s8048_s2 + $0x50] sm:$0xff]  ;;  %v4739_v4 = vld [vmem:[%s8048_s2 + $0x58] sm:$0xff] }
  0x18   :  { %426 = vmatpush.msrb.mxu2 %v4473_v24  ;;  %446 = vmatpush.msrb.mxu3 %v4478_v25  ;;  %8295 = vst [vmem:[#allocation13_spill] sm:$0xff] %v4710_v63  ;;  %v4745_v5 = vld [vmem:[%s8048_s2 + $0x20] sm:$0xff]  ;;  %v4750_v6 = vld [vmem:[%s8048_s2 + $0x28] sm:$0xff]  ;;  %v4758_v7 = vld [vmem:[%s8048_s2 + $0x30] sm:$0xff] }
  0x19   :  { %387 = vmatpush.msrb.mxu0 %v4485_v26  ;;  %407 = vmatpush.msrb.mxu1 %v4490_v27  ;;  %8296 = vst [vmem:[#allocation14_spill] sm:$0xff] %v4715_v0  ;;  %v4763_v8 = vld [vmem:[%s8048_s2 + $0x38] sm:$0xff]  ;;  %v60_v20 = vld [vmem:[%s8047_s0 + $0x28] sm:$0xff] }
  0x1a   :  { %427 = vmatpush.msrb.mxu2 %v4497_v28  ;;  %447 = vmatpush.msrb.mxu3 %v4502_v29  ;;  %8297 = vst [vmem:[#allocation15_spill] sm:$0xff] %v4727_v2 }
  0x1b   :  { %388 = vmatpush.msrb.mxu0 %v4508_v30  ;;  %408 = vmatpush.msrb.mxu1 %v4513_v31  ;;  %8298 = vst [vmem:[#allocation16_spill] sm:$0xff] %v4734_v3 }
  0x1c   :  { %428 = vmatpush.msrb.mxu2 %v4521_v32  ;;  %448 = vmatpush.msrb.mxu3 %v4526_v33  ;;  %8299 = vst [vmem:[#allocation17_spill] sm:$0xff] %v4739_v4 }
  0x1d   :  { %3543 = vmatmul.msk.f32.gmra.mxu0 %vm81_vm1, %v57_v34  ;;  %3552 = vmatmul.msk.f32.gmra.mxu1 %vm81_vm1, %v57_v34  ;;  %8300 = vst [vmem:[#allocation18_spill] sm:$0xff] %v4745_v5 }
  0x1e   :  { %3561 = vmatmul.msk.f32.gmra.mxu2 %vm81_vm1, %v57_v34  ;;  %3570 = vmatmul.msk.f32.gmra.mxu3 %vm81_vm1, %v57_v34  ;;  %8301 = vst [vmem:[#allocation19_spill] sm:$0xff] %v4750_v6  ;;  %v4775_v34 = vld [vmem:[%s8048_s2] sm:$0xff] }
  0x1f   :  { %389 = vmatpush.msrb.mxu0 %v4538_v35  ;;  %409 = vmatpush.msrb.mxu1 %v4543_v36  ;;  %8302 = vst [vmem:[#allocation20_spill] sm:$0xff] %v4758_v7 }
  0x20   :  { %429 = vmatpush.msrb.mxu2 %v4552_v37  ;;  %449 = vmatpush.msrb.mxu3 %v4557_v38  ;;  %8303 = vst [vmem:[#allocation21_spill] sm:$0xff] %v4763_v8 }
  0x21   :  { %390 = vmatpush.msrb.mxu0 %v4564_v39  ;;  %410 = vmatpush.msrb.mxu1 %v4569_v40 }
  0x22   :  { %430 = vmatpush.msrb.mxu2 %v4576_v41  ;;  %450 = vmatpush.msrb.mxu3 %v4581_v42 }
  0x23   :  { %391 = vmatpush.msrb.mxu0 %v4587_v43  ;;  %411 = vmatpush.msrb.mxu1 %v4592_v44 }
  0x24   :  { %431 = vmatpush.msrb.mxu2 %v4600_v45  ;;  %451 = vmatpush.msrb.mxu3 %v4605_v46 }
  0x25   :  { %3544 = vmatmul.msk.f32.gmra.mxu0 %vm81_vm1, %v58_v47  ;;  %3553 = vmatmul.msk.f32.gmra.mxu1 %vm81_vm1, %v58_v47 }
  0x26   :  { %3562 = vmatmul.msk.f32.gmra.mxu2 %vm81_vm1, %v58_v47  ;;  %3571 = vmatmul.msk.f32.gmra.mxu3 %vm81_vm1, %v58_v47  ;;  %v4780_v47 = vld [vmem:[%s8048_s2 + $0x8] sm:$0xff] }
  0x27   :  { %392 = vmatpush.msrb.mxu0 %v4617_v48  ;;  %412 = vmatpush.msrb.mxu1 %v4622_v49  ;;  %8304 = vst [vmem:[#allocation22_spill] sm:$0xff] %v4780_v47 }
  0x28   :  { %432 = vmatpush.msrb.mxu2 %v4631_v50  ;;  %452 = vmatpush.msrb.mxu3 %v4636_v51 }
  0x29   :  { %393 = vmatpush.msrb.mxu0 %v4643_v52  ;;  %413 = vmatpush.msrb.mxu1 %v4648_v53 }
  0x2a   :  { %433 = vmatpush.msrb.mxu2 %v4655_v54  ;;  %453 = vmatpush.msrb.mxu3 %v4660_v55 }
  0x2b   :  { %394 = vmatpush.msrb.mxu0 %v4666_v56  ;;  %414 = vmatpush.msrb.mxu1 %v4671_v57 }
  0x2c   :  { %434 = vmatpush.msrb.mxu2 %v4679_v58  ;;  %454 = vmatpush.msrb.mxu3 %v4684_v59 }
  0x2d   :  { %3545 = vmatmul.msk.f32.gmra.mxu0 %vm81_vm1, %v59_v60  ;;  %3554 = vmatmul.msk.f32.gmra.mxu1 %vm81_vm1, %v59_v60 }
  0x2e   :  { %3563 = vmatmul.msk.f32.gmra.mxu2 %vm81_vm1, %v59_v60  ;;  %3572 = vmatmul.msk.f32.gmra.mxu3 %vm81_vm1, %v59_v60  ;;  %v4789_v60 = vld [vmem:[%s8048_s2 + $0x10] sm:$0xff] }
  0x2f   :  { %395 = vmatpush.msrb.mxu0 %v4696_v61  ;;  %415 = vmatpush.msrb.mxu1 %v4701_v62  ;;  %8305 = vst [vmem:[#allocation23_spill] sm:$0xff] %v4789_v60 }
  0x30   :  { %435 = vmatpush.msrb.mxu2 %v4710_v63  ;;  %455 = vmatpush.msrb.mxu3 %v4715_v0 }
  0x31   :  { %396 = vmatpush.msrb.mxu0 %v4722_v1  ;;  %416 = vmatpush.msrb.mxu1 %v4727_v2 }
  0x32   :  { %436 = vmatpush.msrb.mxu2 %v4734_v3  ;;  %456 = vmatpush.msrb.mxu3 %v4739_v4 }
  0x33   :  { %397 = vmatpush.msrb.mxu0 %v4745_v5  ;;  %417 = vmatpush.msrb.mxu1 %v4750_v6  ;;  %v4794_v5 = vld [vmem:[%s8048_s2 + $0x18] sm:$0xff] }
  0x34   :  { %437 = vmatpush.msrb.mxu2 %v4758_v7  ;;  %457 = vmatpush.msrb.mxu3 %v4763_v8  ;;  %8306 = vst [vmem:[#allocation24_spill] sm:$0xff] %v4794_v5  ;;  %v61_v7 = vld [vmem:[%s8047_s0 + $0x30] sm:$0xff] }
  0x35   :  { %3546 = vmatmul.msk.f32.gmra.mxu0 %vm81_vm1, %v60_v20  ;;  %3555 = vmatmul.msk.f32.gmra.mxu1 %vm81_vm1, %v60_v20 }
  0x36   :  { %3564 = vmatmul.msk.f32.gmra.mxu2 %vm81_vm1, %v60_v20  ;;  %3573 = vmatmul.msk.f32.gmra.mxu3 %vm81_vm1, %v60_v20  ;;  %v62_v20 = vld [vmem:[%s8047_s0 + $0x38] sm:$0xff] }
  0x37   :  { %398 = vmatpush.msrb.mxu0 %v4775_v34  ;;  %418 = vmatpush.msrb.mxu1 %v4780_v47 }
  0x38   :  { %438 = vmatpush.msrb.mxu2 %v4789_v60  ;;  %458 = vmatpush.msrb.mxu3 %v4794_v5 }
  0x39   :  { %550 = vmatpush.msra.mxu1 %v4387_v10  ;;  %530 = vmatpush.msra.mxu0 %v4382_v9 }
  0x3a   :  { %590 = vmatpush.msra.mxu3 %v4418_v15  ;;  %570 = vmatpush.msra.mxu2 %v4394_v11 }
  0x3b   :  { %551 = vmatpush.msra.mxu1 %v4406_v13  ;;  %531 = vmatpush.msra.mxu0 %v4401_v12 }
  0x3c   :  { %591 = vmatpush.msra.mxu3 %v4435_v18  ;;  %571 = vmatpush.msra.mxu2 %v4413_v14 }
  0x3d   :  { %3547 = vmatmul.msk.f32.gmra.mxu0 %vm81_vm1, %v61_v7  ;;  %3556 = vmatmul.msk.f32.gmra.mxu1 %vm81_vm1, %v61_v7 }
  0x3e   :  { %3565 = vmatmul.msk.f32.gmra.mxu2 %vm81_vm1, %v61_v7  ;;  %3574 = vmatmul.msk.f32.gmra.mxu3 %vm81_vm1, %v61_v7  ;;  %v8068_v7 = vmov 0.0  }
  0x3f   :  { %552 = vmatpush.msra.mxu1 %v4429_v17  ;;  %532 = vmatpush.msra.mxu0 %v4424_v16 }
  0x40   :  { %592 = vmatpush.msra.mxu3 %v4452_v21  ;;  %572 = vmatpush.msra.mxu2 %v4442_v19 }
  0x41   :  { %553 = vmatpush.msra.mxu1 %v4464_v23  ;;  %533 = vmatpush.msra.mxu0 %v4459_v22 }
  0x42   :  { %593 = vmatpush.msra.mxu3 %v4478_v25  ;;  %573 = vmatpush.msra.mxu2 %v4473_v24 }
  0x43   :  { %554 = vmatpush.msra.mxu1 %v4490_v27  ;;  %534 = vmatpush.msra.mxu0 %v4485_v26 }
  0x44   :  { %594 = vmatpush.msra.mxu3 %v4502_v29  ;;  %574 = vmatpush.msra.mxu2 %v4497_v28 }
  0x45   :  { %3548 = vmatmul.msk.f32.gmra.mxu0 %vm81_vm1, %v62_v20  ;;  %3557 = vmatmul.msk.f32.gmra.mxu1 %vm81_vm1, %v62_v20 }
  0x46   :  { %3566 = vmatmul.msk.f32.gmra.mxu2 %vm81_vm1, %v62_v20  ;;  %3575 = vmatmul.msk.f32.gmra.mxu3 %vm81_vm1, %v62_v20  ;;  %v8307_v20 = vld [vmem:[#allocation18_spill] sm:$0xff] }
  0x47   :  { %555 = vmatpush.msra.mxu1 %v4513_v31  ;;  %535 = vmatpush.msra.mxu0 %v4508_v30 }
  0x48   :  { %595 = vmatpush.msra.mxu3 %v4526_v33  ;;  %575 = vmatpush.msra.mxu2 %v4521_v32 }
  0x49   :  { %556 = vmatpush.msra.mxu1 %v4543_v36  ;;  %536 = vmatpush.msra.mxu0 %v4538_v35 }
  0x4a   :  { %596 = vmatpush.msra.mxu3 %v4557_v38  ;;  %576 = vmatpush.msra.mxu2 %v4552_v37 }
  0x4b   :  { %557 = vmatpush.msra.mxu1 %v4569_v40  ;;  %537 = vmatpush.msra.mxu0 %v4564_v39 }
  0x4c   :  { %597 = vmatpush.msra.mxu3 %v4581_v42  ;;  %577 = vmatpush.msra.mxu2 %v4576_v41 }
  0x4d   :  { %399 = vmatmul.f32.vlgmr.msrb.gmra.mxu0 %v8068_v7  ;;  %419 = vmatmul.f32.vlgmr.msrb.gmra.mxu1 %v8068_v7 }
  0x4e   :  { %439 = vmatmul.f32.vlgmr.msrb.gmra.mxu2 %v8068_v7  ;;  %459 = vmatmul.f32.vlgmr.msrb.gmra.mxu3 %v8068_v7  ;;  %v8308_v7 = vld [vmem:[#allocation20_spill] sm:$0xff] }
  0x4f   :  { %558 = vmatpush.msra.mxu1 %v4592_v44  ;;  %538 = vmatpush.msra.mxu0 %v4587_v43 }
  0x50   :  { %598 = vmatpush.msra.mxu3 %v4605_v46  ;;  %578 = vmatpush.msra.mxu2 %v4600_v45 }
  0x51   :  { %559 = vmatpush.msra.mxu1 %v4622_v49  ;;  %539 = vmatpush.msra.mxu0 %v4617_v48 }
  0x52   :  { %599 = vmatpush.msra.mxu3 %v4636_v51  ;;  %579 = vmatpush.msra.mxu2 %v4631_v50 }
  0x53   :  { %560 = vmatpush.msra.mxu1 %v4648_v53  ;;  %540 = vmatpush.msra.mxu0 %v4643_v52 }
  0x54   :  { %600 = vmatpush.msra.mxu3 %v4660_v55  ;;  %580 = vmatpush.msra.mxu2 %v4655_v54 }
  0x55   :  { %561 = vmatpush.msra.mxu1 %v4671_v57  ;;  %541 = vmatpush.msra.mxu0 %v4666_v56 }
  0x56   :  { %601 = vmatpush.msra.mxu3 %v4684_v59  ;;  %581 = vmatpush.msra.mxu2 %v4679_v58 }
  0x57   :  { %562 = vmatpush.msra.mxu1 %v4701_v62  ;;  %542 = vmatpush.msra.mxu0 %v4696_v61 }
  0x58   :  { %602 = vmatpush.msra.mxu3 %v4715_v0  ;;  %582 = vmatpush.msra.mxu2 %v4710_v63 }
  0x59   :  { %563 = vmatpush.msra.mxu1 %v4727_v2  ;;  %543 = vmatpush.msra.mxu0 %v4722_v1 }
  0x5a   :  { %603 = vmatpush.msra.mxu3 %v4739_v4  ;;  %583 = vmatpush.msra.mxu2 %v4734_v3 }
  0x5b   :  { %564 = vmatpush.msra.mxu1 %v4750_v6  ;;  %544 = vmatpush.msra.mxu0 %v8307_v20 }
  0x5c   :  { %604 = vmatpush.msra.mxu3 %v4763_v8  ;;  %584 = vmatpush.msra.mxu2 %v8308_v7 }
  0x5d   :  { %565 = vmatpush.msra.mxu1 %v4780_v47  ;;  %545 = vmatpush.msra.mxu0 %v4775_v34 }
  0x5e   :  { %605 = vmatpush.msra.mxu3 %v4794_v5  ;;  %585 = vmatpush.msra.mxu2 %v4789_v60 }
  0x60   :  { %873 = vmatpush.msrb.mxu2 %v4382_v9 }
  0x62   :  { %874 = vmatpush.msrb.mxu2 %v4401_v12 }
  0x64   :  { %875 = vmatpush.msrb.mxu2 %v4424_v16 }
  0x66   :  { %876 = vmatpush.msrb.mxu2 %v4459_v22 }
  0x68   :  { %877 = vmatpush.msrb.mxu2 %v4485_v26 }
  0x6a   :  { %878 = vmatpush.msrb.mxu2 %v4508_v30 }
  0x6c   :  { %879 = vmatpush.msrb.mxu2 %v4538_v35 }
  0x6e   :  { %880 = vmatpush.msrb.mxu2 %v4564_v39 }
  0x70   :  { %881 = vmatpush.msrb.mxu2 %v4587_v43 }
  0x72   :  { %882 = vmatpush.msrb.mxu2 %v4617_v48 }
  0x74   :  { %883 = vmatpush.msrb.mxu2 %v4643_v52 }
  0x76   :  { %884 = vmatpush.msrb.mxu2 %v4666_v56 }
  0x78   :  { %885 = vmatpush.msrb.mxu2 %v4696_v61 }
  0x7a   :  { %886 = vmatpush.msrb.mxu2 %v4722_v1 }
  0x7c   :  { %887 = vmatpush.msrb.mxu2 %v8307_v20 }
  0x7e   :  { %888 = vmatpush.msrb.mxu2 %v4775_v34  ;;  %v71_v34 = vld [vmem:[%s8049_s3] sm:$0xf] }
  0x7f   :  { %v4931_v20 = vperm.slane %v71_v34, 2 }
  0x81   :  { %8319 = vst [vmem:[#allocation34_spill] sm:$0xff] %v4931_v20 }
  0x8a   :  { %v4900_v9 = vpop.f32.mrf.mxu0  ;;  %v4902_v12 = vpop.f32.mrf.mxu1 }
  0x91   :  { %v4904_v16 = vpop.f32.mrf.mxu2  ;;  %v4906_v22 = vpop.f32.mrf.mxu3 }
  0x92   :  { %v4908_v26 = vpop.f32.mrf.mxu0  ;;  %v4910_v30 = vpop.f32.mrf.mxu1 }
  0x93   :  { %8309 = vst [vmem:[#allocation18_spill] sm:$0xff] %v4908_v26 }
  0x94   :  { %8310 = vst [vmem:[#allocation25_spill] sm:$0xff] %v4910_v30 }
  0x99   :  { %v4912_v35 = vpop.f32.mrf.mxu2  ;;  %v4914_v39 = vpop.f32.mrf.mxu3 }
  0x9a   :  { %8311 = vst [vmem:[#allocation26_spill] sm:$0xff] %v4912_v35  ;;  %v4916_v43 = vpop.f32.mrf.mxu0  ;;  %v4918_v48 = vpop.f32.mrf.mxu1 }
  0x9b   :  { %8312 = vst [vmem:[#allocation27_spill] sm:$0xff] %v4914_v39 }
  0x9c   :  { %8313 = vst [vmem:[#allocation28_spill] sm:$0xff] %v4916_v43 }
  0x9d   :  { %8314 = vst [vmem:[#allocation29_spill] sm:$0xff] %v4918_v48 }
  0xa1   :  { %v4920_v52 = vpop.f32.mrf.mxu2  ;;  %v4922_v56 = vpop.f32.mrf.mxu3 }
  0xa2   :  { %8315 = vst [vmem:[#allocation30_spill] sm:$0xff] %v4920_v52  ;;  %v4924_v61 = vpop.f32.mrf.mxu0  ;;  %v4926_v1 = vpop.f32.mrf.mxu1 }
  0xa3   :  { %8316 = vst [vmem:[#allocation31_spill] sm:$0xff] %v4922_v56  ;;  %v4942_v56 = vperm.slane %v71_v34, 3 }
  0xa4   :  { %8317 = vst [vmem:[#allocation32_spill] sm:$0xff] %v4924_v61  ;;  %v4944_v61 = vperm.slane %v71_v34, 0 }
  0xa5   :  { %8318 = vst [vmem:[#allocation33_spill] sm:$0xff] %v4926_v1 }
  0xa6   :  { %8324 = vst [vmem:[#allocation39_spill] sm:$0xff] %v4942_v56 }
  0xa7   :  { %8325 = vst [vmem:[#allocation40_spill] sm:$0xff] %v4944_v61 }
  0xa9   :  { %v227_v35 = vpop.f32.mrf.mxu2  ;;  %v4933_v39 = vpop.f32.mrf.mxu3 }
  0xaa   :  { %8320 = vst [vmem:[#allocation35_spill] sm:$0xff] %v4933_v39  ;;  %v4936_v43 = vadd.f32 %v227_v35, %v4931_v20  ;;  %v4938_v48 = vpop.f32.mrf.mxu0  ;;  %v4940_v52 = vpop.f32.mrf.mxu1 }
  0xab   :  { %8322 = vst [vmem:[#allocation37_spill] sm:$0xff] %v4938_v48 }
  0xac   :  { %8321 = vst [vmem:[#allocation36_spill] sm:$0xff] %v4936_v43  ;;  %v4960_v43 = vld [vmem:[%s8050_s4 + $0xf8] sm:$0xff] }
  0xad   :  { %8323 = vst [vmem:[#allocation38_spill] sm:$0xff] %v4940_v52  ;;  %741 = vmatpush.msrb.mxu1 %v4960_v43 }
  0xae   :  { %8330 = vst [vmem:[#allocation45_spill] sm:$0xff] %v4960_v43  ;;  %v5220_v43 = vld [vmem:[%s8051_s5 + $0x18] sm:$0xff] }
  0xaf   :  { %8368 = vst [vmem:[#allocation83_spill] sm:$0xff] %v5220_v43 }
  0xb1   :  { %v230_v1 = vpop.f32.mrf.mxu2  ;;  %v271_v30 = vpop.f32.mrf.mxu3 }
  0xb2   :  { %v4947_v26 = vadd.f32 %v230_v1, %v4931_v20  ;;  %v4950_v5 = vadd.f32 %v271_v30, %v4942_v56  ;;  %v151_v39 = vpop.f32.mrf.mxu0  ;;  %v4952_v8 = vpop.f32.mrf.mxu1 }
  0xb3   :  { %8328 = vst [vmem:[#allocation43_spill] sm:$0xff] %v4952_v8  ;;  %v4955_v35 = vadd.f32 %v151_v39, %v4944_v61 }
  0xb4   :  { %8326 = vst [vmem:[#allocation41_spill] sm:$0xff] %v4947_v26 }
  0xb5   :  { %8327 = vst [vmem:[#allocation42_spill] sm:$0xff] %v4950_v5 }
  0xb6   :  { %8329 = vst [vmem:[#allocation44_spill] sm:$0xff] %v4955_v35  ;;  %v4977_v35 = vld [vmem:[%s8050_s4 + $0xe8] sm:$0xff] }
  0xb7   :  { %8335 = vst [vmem:[#allocation50_spill] sm:$0xff] %v4977_v35  ;;  %742 = vmatpush.msrb.mxu1 %v4977_v35 }
  0xb9   :  { %v233_v48 = vpop.f32.mrf.mxu2  ;;  %v274_v52 = vpop.f32.mrf.mxu3 }
  0xba   :  { %v4963_v4 = vadd.f32 %v233_v48, %v4931_v20  ;;  %v4966_v1 = vadd.f32 %v274_v52, %v4942_v56  ;;  %v154_v30 = vpop.f32.mrf.mxu0  ;;  %v4968_v26 = vpop.f32.mrf.mxu1  ;;  %v4983_v48 = vld [vmem:[%s8050_s4 + $0xd8] sm:$0xff]  ;;  %v4989_v52 = vld [vmem:[%s8050_s4 + $0xc8] sm:$0xff] }
  0xbb   :  { %8333 = vst [vmem:[#allocation48_spill] sm:$0xff] %v4968_v26  ;;  %v4972_v39 = vadd.f32 %v154_v30, %v4944_v61  ;;  %743 = vmatpush.msrb.mxu1 %v4983_v48  ;;  %v4995_v30 = vld [vmem:[%s8050_s4 + $0xf0] sm:$0xff] }
  0xbc   :  { %8331 = vst [vmem:[#allocation46_spill] sm:$0xff] %v4963_v4  ;;  %721 = vmatpush.msrb.mxu0 %v4995_v30  ;;  %v5003_v4 = vld [vmem:[%s8050_s4 + $0xb8] sm:$0xff] }
  0xbd   :  { %8332 = vst [vmem:[#allocation47_spill] sm:$0xff] %v4966_v1  ;;  %744 = vmatpush.msrb.mxu1 %v4989_v52 }
  0xbe   :  { %8334 = vst [vmem:[#allocation49_spill] sm:$0xff] %v4972_v39  ;;  %v4997_v39 = vperm.slane %v71_v34, 1  ;;  %v5015_v34 = vld [vmem:[%s8050_s4 + $0xe0] sm:$0xff] }
  0xbf   :  { %8336 = vst [vmem:[#allocation51_spill] sm:$0xff] %v4983_v48  ;;  %745 = vmatpush.msrb.mxu1 %v5003_v4  ;;  %722 = vmatpush.msrb.mxu0 %v5015_v34 }
  0xc0   :  { %8337 = vst [vmem:[#allocation52_spill] sm:$0xff] %v4989_v52 }
  0xc1   :  { %8338 = vst [vmem:[#allocation53_spill] sm:$0xff] %v4997_v39  ;;  %v236_v26 = vpop.f32.mrf.mxu2  ;;  %v277_v1 = vpop.f32.mrf.mxu3 }
  0xc2   :  { %8339 = vst [vmem:[#allocation54_spill] sm:$0xff] %v5003_v4  ;;  %v5006_v8 = vadd.f32 %v236_v26, %v4931_v20  ;;  %v5009_v5 = vadd.f32 %v277_v1, %v4942_v56  ;;  %v157_v0 = vpop.f32.mrf.mxu0  ;;  %v198_v52 = vpop.f32.mrf.mxu1  ;;  %v5027_v26 = vld [vmem:[%s8050_s4 + $0xa8] sm:$0xff]  ;;  %v5033_v1 = vld [vmem:[%s8050_s4 + $0xd0] sm:$0xff]  ;;  %v5067_v4 = vld [vmem:[%s8050_s4 + $0x78] sm:$0xff] }
  0xc3   :  { %v5018_v59 = vadd.f32 %v157_v0, %v4944_v61  ;;  %v5021_v48 = vadd.f32 %v198_v52, %v4997_v39  ;;  %8344 = vst [vmem:[#allocation59_spill] sm:$0xff] %v5027_v26  ;;  %746 = vmatpush.msrb.mxu1 %v5027_v26  ;;  %723 = vmatpush.msrb.mxu0 %v5033_v1  ;;  %v5039_v0 = vld [vmem:[%s8050_s4 + $0x98] sm:$0xff]  ;;  %v5045_v52 = vld [vmem:[%s8050_s4 + $0xc0] sm:$0xff] }
  0xc4   :  { %8340 = vst [vmem:[#allocation55_spill] sm:$0xff] %v5006_v8  ;;  %v178_v8 = vadd.f32 %v4902_v12, %v4997_v39  ;;  %v5079_v12 = vld [vmem:[%s8050_s4 + $0xa0] sm:$0xff] }
  0xc5   :  { %8341 = vst [vmem:[#allocation56_spill] sm:$0xff] %v5009_v5  ;;  %747 = vmatpush.msrb.mxu1 %v5039_v0  ;;  %724 = vmatpush.msrb.mxu0 %v5045_v52  ;;  %v137_v5 = vadd.f32 %v4900_v9, %v4944_v61 }
  0xc6   :  { %8342 = vst [vmem:[#allocation57_spill] sm:$0xff] %v5018_v59  ;;  %v5051_v59 = vld [vmem:[%s8050_s4 + $0x88] sm:$0xff] }
  0xc7   :  { %8343 = vst [vmem:[#allocation58_spill] sm:$0xff] %v5021_v48  ;;  %748 = vmatpush.msrb.mxu1 %v5051_v59  ;;  %v5057_v48 = vld [vmem:[%s8050_s4 + $0xb0] sm:$0xff] }
  0xc8   :  { %8345 = vst [vmem:[#allocation60_spill] sm:$0xff] %v5039_v0  ;;  %725 = vmatpush.msrb.mxu0 %v5057_v48 }
  0xc9   :  { %8346 = vst [vmem:[#allocation61_spill] sm:$0xff] %v5051_v59  ;;  %v239_v0 = vpop.f32.mrf.mxu2  ;;  %v280_v26 = vpop.f32.mrf.mxu3  ;;  %749 = vmatpush.msrb.mxu1 %v5067_v4 }
  0xca   :  { %8347 = vst [vmem:[#allocation62_spill] sm:$0xff] %v5067_v4  ;;  %v5070_v59 = vadd.f32 %v239_v0, %v4931_v20  ;;  %v5073_v55 = vadd.f32 %v280_v26, %v4942_v56  ;;  %v400_v35 = vpop.f32.mrf.mxu0  ;;  %v420_v9 = vpop.f32.mrf.mxu1  ;;  %726 = vmatpush.msrb.mxu0 %v5079_v12  ;;  %v5085_v0 = vld [vmem:[%s8050_s4 + $0x68] sm:$0xff]  ;;  %v5091_v26 = vld [vmem:[%s8050_s4 + $0x90] sm:$0xff] }
  0xcb   :  { %v401_v39 = vadd.f32 %v400_v35, %v137_v5  ;;  %v421_v61 = vadd.f32 %v420_v9, %v178_v8  ;;  %8350 = vst [vmem:[#allocation65_spill] sm:$0xff] %v5085_v0  ;;  %750 = vmatpush.msrb.mxu1 %v5085_v0  ;;  %v5097_v5 = vld [vmem:[%s8050_s4 + $0x58] sm:$0xff]  ;;  %v5103_v8 = vld [vmem:[%s8050_s4 + $0x80] sm:$0xff]  ;;  %v5108_v35 = vld [vmem:[%s8050_s4 + $0x48] sm:$0xff] }
  0xcc   :  { %8348 = vst [vmem:[#allocation63_spill] sm:$0xff] %v5070_v59  ;;  %727 = vmatpush.msrb.mxu0 %v5091_v26  ;;  %v5124_v9 = vld [vmem:[%s8050_s4 + $0x38] sm:$0xff]  ;;  %v5138_v0 = vld [vmem:[%s8051_s5 + $0x68] sm:$0xff] }
  0xcd   :  { %8349 = vst [vmem:[#allocation64_spill] sm:$0xff] %v5073_v55  ;;  %v3576_v55 = vmul.f32 -1.442695, %v401_v39  ;;  %v3577_v59 = vmul.f32 -1.442695, %v421_v61  ;;  %751 = vmatpush.msrb.mxu1 %v5097_v5  ;;  %v5113_v61 = vld [vmem:[%s8050_s4 + $0x70] sm:$0xff] }
  0xce   :  { %8351 = vst [vmem:[#allocation66_spill] sm:$0xff] %v5097_v5  ;;  %728 = vmatpush.msrb.mxu0 %v5103_v8  ;;  %v5119_v39 = vld [vmem:[%s8051_s5 + $0x78] sm:$0xff]  ;;  %v219_v5 = vadd.f32 %v4904_v16, %v4931_v20 }
  0xcf   :  { %8352 = vst [vmem:[#allocation67_spill] sm:$0xff] %v5108_v35  ;;  %3661 = vpow2.f32 %v3576_v55  ;;  %752 = vmatpush.msrb.mxu1 %v5108_v35  ;;  %793 = vmatpush.msrb.mxu3 %v5119_v39  ;;  %v5133_v55 = vld [vmem:[%s8050_s4 + $0x60] sm:$0xff]  ;;  %v5149_v16 = vld [vmem:[%s8051_s5 + $0x58] sm:$0xff]  ;;  %v5156_v35 = vld [vmem:[%s8050_s4 + $0x50] sm:$0xff] }
  0xd0   :  { %8353 = vst [vmem:[#allocation68_spill] sm:$0xff] %v5119_v39  ;;  %3663 = vpow2.f32 %v3577_v59  ;;  %729 = vmatpush.msrb.mxu0 %v5113_v61  ;;  %v5144_v59 = vld [vmem:[%s8050_s4 + $0x28] sm:$0xff]  ;;  %v5162_v39 = vld [vmem:[%s8050_s4 + $0x18] sm:$0xff] }
  0xd1   :  { %8354 = vst [vmem:[#allocation69_spill] sm:$0xff] %v5124_v9  ;;  %v440_v4 = vpop.f32.mrf.mxu2  ;;  %753 = vmatpush.msrb.mxu1 %v5124_v9  ;;  %794 = vmatpush.msrb.mxu3 %v5138_v0  ;;  %v5174_v9 = vld [vmem:[%s8050_s4 + $0x40] sm:$0xff] }
  0xd2   :  { %8355 = vst [vmem:[#allocation70_spill] sm:$0xff] %v5138_v0  ;;  %v441_v20 = vadd.f32 %v440_v4, %v219_v5  ;;  %730 = vmatpush.msrb.mxu0 %v5133_v55  ;;  %v5167_v4 = vld [vmem:[%s8051_s5 + $0x48] sm:$0xff] }
  0xd3   :  { %8356 = vst [vmem:[#allocation71_spill] sm:$0xff] %v5144_v59  ;;  %754 = vmatpush.msrb.mxu1 %v5144_v59  ;;  %795 = vmatpush.msrb.mxu3 %v5149_v16  ;;  %v5183_v59 = vld [vmem:[%s8050_s4 + $0x8] sm:$0xff] }
  0xd4   :  { %8357 = vst [vmem:[#allocation72_spill] sm:$0xff] %v5149_v16  ;;  %v3578_v5 = vmul.f32 -1.442695, %v441_v20  ;;  %731 = vmatpush.msrb.mxu0 %v5156_v35  ;;  %v260_v16 = vadd.f32 %v4906_v22, %v4942_v56  ;;  %v5232_v22 = vld [vmem:[%s8051_s5 + $0x8] sm:$0xff] }
  0xd5   :  { %8358 = vst [vmem:[#allocation73_spill] sm:$0xff] %v5156_v35  ;;  %v3662_v0 = vpop.eup %3661  ;;  %755 = vmatpush.msrb.mxu1 %v5162_v39  ;;  %796 = vmatpush.msrb.mxu3 %v5167_v4 }
  0xd6   :  { %8359 = vst [vmem:[#allocation74_spill] sm:$0xff] %v5162_v39  ;;  %v3664_v51 = vpop.eup %3663  ;;  %v472_v60 = vadd.f32 1.0, %v3662_v0  ;;  %3665 = vpow2.f32 %v3578_v5  ;;  %732 = vmatpush.msrb.mxu0 %v5174_v9  ;;  %v5189_v0 = vld [vmem:[%s8050_s4 + $0x30] sm:$0xff]  ;;  %v5194_v5 = vld [vmem:[%s8051_s5 + $0x38] sm:$0xff]  ;;  %v460_v39 = vpop.f32.mrf.mxu3 }
  0xd7   :  { %8360 = vst [vmem:[#allocation75_spill] sm:$0xff] %v5167_v4  ;;  %v473_v20 = vadd.f32 1.0, %v3664_v51  ;;  %756 = vmatpush.msrb.mxu1 %v5183_v59  ;;  %797 = vmatpush.msrb.mxu3 %v5194_v5  ;;  %v5201_v51 = vld [vmem:[%s8050_s4 + $0x20] sm:$0xff]  ;;  %v5213_v4 = vld [vmem:[%s8050_s4 + $0x10] sm:$0xff] }
  0xd8   :  { %8361 = vst [vmem:[#allocation76_spill] sm:$0xff] %v5174_v9  ;;  %3667 = vrcp.f32 %v472_v60  ;;  %733 = vmatpush.msrb.mxu0 %v5189_v0  ;;  %v486_v42 = vand.u32 2147483648, %v472_v60  ;;  %vm480_vm4 = vweird.f32 %v472_v60 }
  0xd9   :  { %8362 = vst [vmem:[#allocation77_spill] sm:$0xff] %v5183_v59  ;;  %3669 = vrcp.f32 %v473_v20  ;;  %v5206_v59 = vld [vmem:[%s8051_s5 + $0x28] sm:$0xff]  ;;  %v501_v6 = vand.u32 2147483648, %v473_v20  ;;  %v499_v3 = vand.u32 2147483647, %v473_v20  ;;  %vm495_vm5 = vweird.f32 %v473_v20 }
  0xda   :  { %8363 = vst [vmem:[#allocation78_spill] sm:$0xff] %v5189_v0  ;;  %734 = vmatpush.msrb.mxu0 %v5201_v51  ;;  %798 = vmatpush.msrb.mxu3 %v5206_v59 }
  0xdb   :  { %8364 = vst [vmem:[#allocation79_spill] sm:$0xff] %v5194_v5  ;;  %v502_v63 = vor.u32 1.1754944e-38, %v501_v6  ;;  %vm500_vm9 = vcmp.eq.f32.partialorder %v499_v3, 8.507059e+37 }
  0xdc   :  { %8365 = vst [vmem:[#allocation80_spill] sm:$0xff] %v5201_v51  ;;  %v3666_v5 = vpop.eup %3665  ;;  %735 = vmatpush.msrb.mxu0 %v5213_v4  ;;  %799 = vmatpush.msrb.mxu3 %v5220_v43  ;;  %v461_v51 = vadd.f32 %v460_v39, %v260_v16  ;;  %v484_v39 = vand.u32 2147483647, %v472_v60 }
  0xdd   :  { %8366 = vst [vmem:[#allocation81_spill] sm:$0xff] %v5206_v59  ;;  %v474_v46 = vadd.f32 1.0, %v3666_v5  ;;  %v5227_v59 = vld [vmem:[%s8050_s4] sm:$0xff] }
  0xde   :  { %8367 = vst [vmem:[#allocation82_spill] sm:$0xff] %v5213_v4  ;;  %v3668_v47 = vpop.eup %3667  ;;  %736 = vmatpush.msrb.mxu0 %v5227_v59  ;;  %800 = vmatpush.msrb.mxu3 %v5232_v22  ;;  %vm485_vm7 = vcmp.eq.f32.partialorder %v484_v39, 8.507059e+37  ;;  %v8401_v39 = vld [vmem:[#allocation59_spill] sm:$0xff] }
  0xdf   :  { %8369 = vst [vmem:[#allocation84_spill] sm:$0xff] %v5227_v59  ;;  %v3670_v56 = vpop.eup %3669  ;;  %v476_v7 = vmul.f32 %v3668_v47, %v472_v60  ;;  %3671 = vrcp.f32 %v474_v46  ;;  %vm481_vm2 = vweird.f32 %v3668_v47  ;;  %v487_v59 = vor.u32 1.1754944e-38, %v486_v42 }
  0xe0   :  { %8370 = vst [vmem:[#allocation85_spill] sm:$0xff] %v5232_v22  ;;  %v491_v5 = vmul.f32 %v3670_v56, %v473_v20  ;;  %3673 = vtanh.f32 %v461_v51  ;;  %vm496_vm3 = vweird.f32 %v3670_v56  ;;  %vm482_vm6 = vmor %vm480_vm4, %vm481_vm2  ;;  %v516_v20 = vand.u32 2147483648, %v474_v46 }
  0xe1   :  { %v477_v43 = vsub.f32 1.0, %v476_v7  ;;  %vm497_vm8 = vmor %vm495_vm5, %vm496_vm3  ;;  %vm510_vm11 = vweird.f32 %v474_v46  ;;  %v514_v42 = vand.u32 2147483647, %v474_v46 }
  0xe2   :  { %v492_v4 = vsub.f32 1.0, %v491_v5  ;;  %v517_v6 = vor.u32 1.1754944e-38, %v516_v20  ;;  %v8409_v20 = vld [vmem:[#allocation65_spill] sm:$0xff] }
  0xe3   :  { %v478_v0 = vmul.f32 %v3668_v47, %v477_v43  ;;  %vm515_vm13 = vcmp.eq.f32.partialorder %v514_v42, 8.507059e+37  ;;  %v8410_v42 = vld [vmem:[#allocation72_spill] sm:$0xff] }
  0xe4   :  { %v493_v16 = vmul.f32 %v3670_v56, %v492_v4 }
  0xe5   :  { %v3672_v38 = vpop.eup %3671  ;;  %v479_v2 = vadd.f32 %v3668_v47, %v478_v0 }
  0xe6   :  { %v506_v9 = vmul.f32 %v3672_v38, %v474_v46  ;;  %v494_v22 = vadd.f32 %v3670_v56, %v493_v16  ;;  %v3674_v51 = vpop.eup %3673  ;;  %vm511_vm10 = vweird.f32 %v3672_v38  ;;  %v5247_v46 = vld [vmem:[%s8051_s5 + $0x60] sm:$0xff]  ;;  %v8402_v16 = vld [vmem:[#allocation21_spill] sm:$0xff] }
  0xe7   :  { %v483_v7 = vsel %vm482_vm6, %v3668_v47, %v479_v2  ;;  %vm512_vm12 = vmor %vm510_vm11, %vm511_vm10 }
  0xe8   :  { %v507_v5 = vsub.f32 1.0, %v506_v9  ;;  %v488_v43 = vsel %vm485_vm7, %v487_v59, %v483_v7  ;;  %v498_v33 = vsel %vm497_vm8, %v3670_v56, %v494_v22  ;;  %v8398_v9 = vld [vmem:[#allocation14_spill] sm:$0xff]  ;;  %v8400_v22 = vld [vmem:[#allocation17_spill] sm:$0xff]  ;;  %v8403_v7 = vld [vmem:[#allocation60_spill] sm:$0xff] }
  0xe9   :  { %v503_v4 = vsel %vm500_vm9, %v502_v63, %v498_v33  ;;  %v522_v62 = vmul.f32 %v3674_v51, %v488_v43  ;;  %v5242_v33 = vld [vmem:[%s8051_s5 + $0x70] sm:$0xff]  ;;  %v8396_v63 = vld [vmem:[#allocation11_spill] sm:$0xff]  ;;  %v8404_v51 = vld [vmem:[#allocation24_spill] sm:$0xff] }
  0xea   :  { %v508_v35 = vmul.f32 %v3672_v38, %v507_v5  ;;  %v521_v58 = vmul.f32 0.0, %v503_v4  ;;  %v8399_v59 = vld [vmem:[#allocation54_spill] sm:$0xff]  ;;  %v8405_v5 = vld [vmem:[#allocation61_spill] sm:$0xff]  ;;  %v8406_v43 = vld [vmem:[#allocation68_spill] sm:$0xff] }
  0xeb   :  { %v8407_v4 = vld [vmem:[#allocation62_spill] sm:$0xff] }
  0xec   :  { %v5236_v0 = vadd.f32 %v522_v62, %v521_v58  ;;  %v509_v60 = vadd.f32 %v3672_v38, %v508_v35  ;;  %v5263_v58 = vld [vmem:[%s8051_s5 + $0x40] sm:$0xff] }
  0xed   :  { %v8395_v62 = vld [vmem:[#allocation51_spill] sm:$0xff]  ;;  %v8397_v35 = vld [vmem:[#allocation52_spill] sm:$0xff] }
  0xee   :  { %3675 = vtanh.f32 %v5236_v0  ;;  %v513_v2 = vsel %vm512_vm12, %v3672_v38, %v509_v60  ;;  %v5254_v38 = vld [vmem:[%s8051_s5 + $0x50] sm:$0xff] }
  0xef   :  { %v518_v56 = vsel %vm515_vm13, %v517_v6, %v513_v2  ;;  %v8408_v60 = vld [vmem:[#allocation70_spill] sm:$0xff]  ;;  %v8412_v6 = vld [vmem:[#allocation75_spill] sm:$0xff] }
  0xf0   :  { %v8411_v2 = vld [vmem:[#allocation66_spill] sm:$0xff] }
  0xf4   :  { %v3676_v47 = vpop.eup %3675 }
  0xf5   :  { %v525_v3 = vmul.f32 %v3676_v47, %v518_v56  ;;  %v8413_v47 = vld [vmem:[#allocation67_spill] sm:$0xff] }
  0xf6   :  { %v8414_v56 = vld [vmem:[#allocation79_spill] sm:$0xff] }
  0xf7   :  { %546 = vmatmul.f32.vlgmr.msra.gmra.mxu0 %v525_v3  ;;  %566 = vmatmul.f32.vlgmr.msra.gmra.mxu1 %v525_v3 }
  0xf8   :  { %586 = vmatmul.f32.vlgmr.msra.gmra.mxu2 %v525_v3  ;;  %606 = vmatmul.f32.vlgmr.msra.gmra.mxu3 %v525_v3 }
  0xf9   :  { %773 = vmatpush.msra.mxu1 %v5242_v33  ;;  %893 = vmatpush.msra.mxu3 %v4387_v10  ;;  %v5272_v10 = vld [vmem:[%s8051_s5 + $0x30] sm:$0xff] }
  0xfa   :  { %913 = vmatpush.msra.mxu0 %v4394_v11  ;;  %1016 = vmatpush.msra.mxu2 %v4995_v30  ;;  %v8371_v11 = vmov 0.0  }
  0xfb   :  { %774 = vmatpush.msra.mxu1 %v5247_v46  ;;  %894 = vmatpush.msra.mxu3 %v4406_v13  ;;  %v5281_v13 = vld [vmem:[%s8051_s5 + $0x20] sm:$0xff] }
  0xfc   :  { %914 = vmatpush.msra.mxu0 %v4413_v14  ;;  %1017 = vmatpush.msra.mxu2 %v5015_v34  ;;  %v5288_v14 = vld [vmem:[%s8051_s5 + $0x10] sm:$0xff] }
  0xfd   :  { %775 = vmatpush.msra.mxu1 %v5254_v38  ;;  %895 = vmatpush.msra.mxu3 %v4429_v17  ;;  %v5297_v17 = vld [vmem:[%s8051_s5] sm:$0xff] }
  0xfe   :  { %915 = vmatpush.msra.mxu0 %v4442_v19  ;;  %1018 = vmatpush.msra.mxu2 %v5033_v1  ;;  %v8374_v19 = vld [vmem:[#allocation12_spill] sm:$0xff] }
  0xff   :  { %776 = vmatpush.msra.mxu1 %v5263_v58  ;;  %737 = vmatmul.f32.vlgmr.msrb.gmra.mxu0 %v525_v3 }
 0x100   :  { %757 = vmatmul.f32.vlgmr.msrb.gmra.mxu1 %v525_v3  ;;  %801 = vmatmul.f32.vlgmr.msrb.gmra.mxu3 %v8371_v11  ;;  %v8415_v3 = vld [vmem:[#allocation69_spill] sm:$0xff] }
 0x101   :  { %777 = vmatpush.msra.mxu1 %v5272_v10  ;;  %896 = vmatpush.msra.mxu3 %v4464_v23  ;;  %v8376_v23 = vld [vmem:[#allocation13_spill] sm:$0xff] }
 0x102   :  { %916 = vmatpush.msra.mxu0 %v4473_v24  ;;  %1019 = vmatpush.msra.mxu2 %v5045_v52  ;;  %v8377_v24 = vld [vmem:[#allocation76_spill] sm:$0xff] }
 0x103   :  { %778 = vmatpush.msra.mxu1 %v5281_v13  ;;  %897 = vmatpush.msra.mxu3 %v4490_v27  ;;  %v8379_v27 = vld [vmem:[#allocation5_spill] sm:$0xff] }
 0x104   :  { %917 = vmatpush.msra.mxu0 %v4497_v28  ;;  %1020 = vmatpush.msra.mxu2 %v5057_v48  ;;  %v8380_v28 = vld [vmem:[#allocation16_spill] sm:$0xff] }
 0x105   :  { %779 = vmatpush.msra.mxu1 %v5288_v14  ;;  %898 = vmatpush.msra.mxu3 %v4513_v31  ;;  %v8381_v31 = vld [vmem:[#allocation78_spill] sm:$0xff] }
 0x106   :  { %918 = vmatpush.msra.mxu0 %v4521_v32  ;;  %1021 = vmatpush.msra.mxu2 %v5079_v12  ;;  %v8383_v32 = vld [vmem:[#allocation6_spill] sm:$0xff] }
 0x107   :  { %780 = vmatpush.msra.mxu1 %v5297_v17  ;;  %899 = vmatpush.msra.mxu3 %v4543_v36  ;;  %v8384_v36 = vld [vmem:[#allocation20_spill] sm:$0xff] }
 0x108   :  { %781 = vmatmul.f32.vlgmr.msra.gmra.mxu1 %v8371_v11  ;;  %919 = vmatpush.msra.mxu0 %v4552_v37  ;;  %v8385_v37 = vld [vmem:[#allocation80_spill] sm:$0xff] }
 0x109   :  { %900 = vmatpush.msra.mxu3 %v4569_v40  ;;  %933 = vmatpush.msrb.mxu1 %v4418_v15  ;;  %v8372_v15 = vld [vmem:[#allocation10_spill] sm:$0xff] }
 0x10a   :  { %920 = vmatpush.msra.mxu0 %v4576_v41  ;;  %1022 = vmatpush.msra.mxu2 %v5091_v26  ;;  %v8386_v40 = vld [vmem:[#allocation22_spill] sm:$0xff]  ;;  %v8387_v41 = vld [vmem:[#allocation7_spill] sm:$0xff] }
 0x10b   :  { %901 = vmatpush.msra.mxu3 %v4592_v44  ;;  %934 = vmatpush.msrb.mxu1 %v4435_v18  ;;  %v8373_v18 = vld [vmem:[#allocation73_spill] sm:$0xff] }
 0x10c   :  { %921 = vmatpush.msra.mxu0 %v4600_v45  ;;  %1023 = vmatpush.msra.mxu2 %v5103_v8  ;;  %v8388_v44 = vld [vmem:[#allocation45_spill] sm:$0xff]  ;;  %v8389_v45 = vld [vmem:[#allocation23_spill] sm:$0xff] }
 0x10d   :  { %902 = vmatpush.msra.mxu3 %v4622_v49  ;;  %935 = vmatpush.msrb.mxu1 %v4452_v21  ;;  %v8375_v21 = vld [vmem:[#allocation4_spill] sm:$0xff] }
 0x10e   :  { %922 = vmatpush.msra.mxu0 %v4631_v50  ;;  %1024 = vmatpush.msra.mxu2 %v5113_v61  ;;  %v8390_v49 = vld [vmem:[#allocation8_spill] sm:$0xff]  ;;  %v8391_v50 = vld [vmem:[#allocation82_spill] sm:$0xff] }
 0x10f   :  { %903 = vmatpush.msra.mxu3 %v4648_v53  ;;  %936 = vmatpush.msrb.mxu1 %v4478_v25  ;;  %v8378_v25 = vld [vmem:[#allocation15_spill] sm:$0xff]  ;;  %v8392_v53 = vld [vmem:[#allocation50_spill] sm:$0xff] }
 0x110   :  { %923 = vmatpush.msra.mxu0 %v4655_v54  ;;  %1025 = vmatpush.msra.mxu2 %v5133_v55  ;;  %v8393_v54 = vld [vmem:[#allocation9_spill] sm:$0xff] }
 0x111   :  { %904 = vmatpush.msra.mxu3 %v4671_v57  ;;  %937 = vmatpush.msrb.mxu1 %v4502_v29  ;;  %v8382_v29 = vld [vmem:[#allocation19_spill] sm:$0xff]  ;;  %v8394_v57 = vld [vmem:[#allocation84_spill] sm:$0xff] }
 0x112   :  { %924 = vmatpush.msra.mxu0 %v8372_v15  ;;  %1026 = vmatpush.msra.mxu2 %v8373_v18  ;;  %v8416_v15 = vld [vmem:[#allocation81_spill] sm:$0xff] }
 0x113   :  { %905 = vmatpush.msra.mxu3 %v8374_v19  ;;  %938 = vmatpush.msrb.mxu1 %v8375_v21  ;;  %v8417_v19 = vld [vmem:[#allocation71_spill] sm:$0xff] }
 0x114   :  { %925 = vmatpush.msra.mxu0 %v8376_v23  ;;  %1027 = vmatpush.msra.mxu2 %v8377_v24  ;;  %v8418_v21 = vld [vmem:[#allocation83_spill] sm:$0xff]  ;;  %v8419_v23 = vld [vmem:[#allocation74_spill] sm:$0xff] }
 0x115   :  { %906 = vmatpush.msra.mxu3 %v8378_v25  ;;  %939 = vmatpush.msrb.mxu1 %v8379_v27  ;;  %v8420_v25 = vld [vmem:[#allocation85_spill] sm:$0xff] }
 0x116   :  { %926 = vmatpush.msra.mxu0 %v8380_v28  ;;  %1028 = vmatpush.msra.mxu2 %v8381_v31  ;;  %v8421_v27 = vld [vmem:[#allocation77_spill] sm:$0xff]  ;;  %v8422_v28 = vld [vmem:[#allocation40_spill] sm:$0xff] }
 0x117   :  { %907 = vmatpush.msra.mxu3 %v8382_v29  ;;  %940 = vmatpush.msrb.mxu1 %v8383_v32  ;;  %v8423_v29 = vld [vmem:[#allocation18_spill] sm:$0xff] }
 0x118   :  { %927 = vmatpush.msra.mxu0 %v8384_v36  ;;  %1029 = vmatpush.msra.mxu2 %v8385_v37  ;;  %v140_v32 = vadd.f32 %v8423_v29, %v8422_v28  ;;  %v8424_v36 = vld [vmem:[#allocation53_spill] sm:$0xff] }
 0x119   :  { %908 = vmatpush.msra.mxu3 %v8386_v40  ;;  %941 = vmatpush.msrb.mxu1 %v8387_v41  ;;  %v8425_v40 = vld [vmem:[#allocation25_spill] sm:$0xff] }
 0x11a   :  { %928 = vmatpush.msra.mxu0 %v8389_v45  ;;  %1030 = vmatpush.msra.mxu2 %v8391_v50  ;;  %v181_v41 = vadd.f32 %v8425_v40, %v8424_v36 }
 0x11b   :  { %1036 = vmatpush.msrb.mxu3 %v8388_v44  ;;  %942 = vmatpush.msrb.mxu1 %v8390_v49 }
 0x11c   :  { %1031 = vmatpush.msra.mxu2 %v8394_v57 }
 0x11d   :  { %1037 = vmatpush.msrb.mxu3 %v8392_v53  ;;  %943 = vmatpush.msrb.mxu1 %v8393_v54 }
 0x11f   :  { %1038 = vmatpush.msrb.mxu3 %v8395_v62  ;;  %944 = vmatpush.msrb.mxu1 %v8396_v63  ;;  %v8426_v63 = vld [vmem:[#allocation34_spill] sm:$0xff] }
 0x121   :  { %1039 = vmatpush.msrb.mxu3 %v8397_v35  ;;  %945 = vmatpush.msrb.mxu1 %v8398_v9  ;;  %v8427_v35 = vld [vmem:[#allocation26_spill] sm:$0xff] }
 0x122   :  { %v222_v9 = vadd.f32 %v8427_v35, %v8426_v63 }
 0x123   :  { %1040 = vmatpush.msrb.mxu3 %v8399_v59  ;;  %946 = vmatpush.msrb.mxu1 %v8400_v22 }
 0x125   :  { %1041 = vmatpush.msrb.mxu3 %v8401_v39  ;;  %947 = vmatpush.msrb.mxu1 %v8402_v16 }
 0x127   :  { %1042 = vmatpush.msrb.mxu3 %v8403_v7  ;;  %948 = vmatpush.msrb.mxu1 %v8404_v51  ;;  %v5386_v51 = vld [vmem:[%s8052_s6] sm:$0x3]  ;;  %s4265_s6 = smov 64  }
 0x129   :  { %1043 = vmatpush.msrb.mxu3 %v8405_v5  ;;  %1087 = vmatpush.msra.mxu1 %v8406_v43 }
 0x12b   :  { %1044 = vmatpush.msrb.mxu3 %v8407_v4  ;;  %1088 = vmatpush.msra.mxu1 %v8408_v60  ;;  %v5389_v60 = vperm.slane %v5386_v51, 1 }
 0x12d   :  { %1045 = vmatpush.msrb.mxu3 %v8409_v20  ;;  %1089 = vmatpush.msra.mxu1 %v8410_v42  ;;  %8428 = vst [vmem:[#allocation10_spill] sm:$0xff] %v5389_v60 }
 0x12f   :  { %1046 = vmatpush.msrb.mxu3 %v8411_v2  ;;  %1090 = vmatpush.msra.mxu1 %v8412_v6 }
 0x131   :  { %1047 = vmatpush.msrb.mxu3 %v8413_v47  ;;  %1091 = vmatpush.msra.mxu1 %v8414_v56  ;;  %v8429_v47 = vld [vmem:[#allocation39_spill] sm:$0xff] }
 0x132   :  { %v8430_v56 = vld [vmem:[#allocation27_spill] sm:$0xff] }
 0x133   :  { %1048 = vmatpush.msrb.mxu3 %v8415_v3  ;;  %1092 = vmatpush.msra.mxu1 %v8416_v15  ;;  %v263_v3 = vadd.f32 %v8430_v56, %v8429_v47 }
 0x135   :  { %1049 = vmatpush.msrb.mxu3 %v8417_v19  ;;  %1093 = vmatpush.msra.mxu1 %v8418_v21 }
 0x137   :  { %1050 = vmatpush.msrb.mxu3 %v8419_v23  ;;  %1094 = vmatpush.msra.mxu1 %v8420_v25 }
 0x139   :  { %1051 = vmatpush.msrb.mxu3 %v8421_v27 }
 0x174   :  { %v547_v44 = vpop.f32.mrf.mxu0  ;;  %v567_v45 = vpop.f32.mrf.mxu1 }
 0x175   :  { %v548_v49 = vadd.f32 %v547_v44, %v140_v32  ;;  %v568_v53 = vadd.f32 %v567_v45, %v181_v41 }
 0x177   :  { %v3579_v54 = vmul.f32 -1.442695, %v548_v49  ;;  %v3580_v62 = vmul.f32 -1.442695, %v568_v53 }
 0x179   :  { %3677 = vpow2.f32 %v3579_v54 }
 0x17a   :  { %3679 = vpow2.f32 %v3580_v62 }
 0x17b   :  { %v587_v59 = vpop.f32.mrf.mxu2  ;;  %v607_v22 = vpop.f32.mrf.mxu3 }
 0x17c   :  { %v588_v39 = vadd.f32 %v587_v59, %v222_v9  ;;  %v608_v23 = vadd.f32 %v607_v22, %v263_v3 }
 0x17d   :  { %v758_v20 = vpop.f32.mrf.mxu1 }
 0x17e   :  { %v3581_v16 = vmul.f32 -1.442695, %v588_v39 }
 0x17f   :  { %v3678_v7 = vpop.eup %3677 }
 0x180   :  { %v3680_v5 = vpop.eup %3679  ;;  %v619_v43 = vadd.f32 1.0, %v3678_v7  ;;  %3681 = vpow2.f32 %v3581_v16 }
 0x181   :  { %v620_v4 = vadd.f32 1.0, %v3680_v5 }
 0x182   :  { %3683 = vrcp.f32 %v619_v43  ;;  %v633_v41 = vand.u32 2147483648, %v619_v43  ;;  %v631_v49 = vand.u32 2147483647, %v619_v43  ;;  %vm627_vm0 = vweird.f32 %v619_v43 }
 0x183   :  { %3685 = vrcp.f32 %v620_v4  ;;  %v802_v42 = vpop.f32.mrf.mxu3  ;;  %v648_v44 = vand.u32 2147483648, %v620_v4  ;;  %v646_v62 = vand.u32 2147483647, %v620_v4  ;;  %vm642_vm1 = vweird.f32 %v620_v4 }
 0x184   :  { %v803_v2 = vadd.f32 %v802_v42, %v758_v20  ;;  %v634_v22 = vor.u32 1.1754944e-38, %v633_v41  ;;  %vm632_vm4 = vcmp.eq.f32.partialorder %v631_v49, 8.507059e+37  ;;  %v5467_v49 = vld [vmem:[%s8048_s2 + $0xe0] sm:$0xff] }
 0x185   :  { %v649_v16 = vor.u32 1.1754944e-38, %v648_v44  ;;  %vm647_vm5 = vcmp.eq.f32.partialorder %v646_v62, 8.507059e+37  ;;  %v5419_v44 = vld [vmem:[%s8048_s2 + $0x1a0] sm:$0xff]  ;;  %v5485_v62 = vld [vmem:[%s8048_s2 + $0x1a8] sm:$0xff] }
 0x186   :  { %v3682_v6 = vpop.eup %3681  ;;  %v5394_v15 = vadd.f32 %v5389_v60, %v803_v2 }
 0x187   :  { %v621_v19 = vadd.f32 1.0, %v3682_v6 }
 0x188   :  { %v3684_v21 = vpop.eup %3683  ;;  %3687 = vtanh.f32 %v5394_v15 }
 0x189   :  { %v3686_v25 = vpop.eup %3685  ;;  %v623_v27 = vmul.f32 %v3684_v21, %v619_v43  ;;  %3689 = vrcp.f32 %v621_v19  ;;  %vm628_vm14 = vweird.f32 %v3684_v21  ;;  %vm657_vm7 = vweird.f32 %v621_v19 }
 0x18a   :  { %v638_v29 = vmul.f32 %v3686_v25, %v620_v4  ;;  %3691 = vtanh.f32 %v608_v23  ;;  %vm643_vm15 = vweird.f32 %v3686_v25  ;;  %vm629_vm2 = vmor %vm627_vm0, %vm628_vm14 }
 0x18b   :  { %v624_v32 = vsub.f32 1.0, %v623_v27  ;;  %vm644_vm3 = vmor %vm642_vm1, %vm643_vm15  ;;  %v663_v27 = vand.u32 2147483648, %v621_v19 }
 0x18c   :  { %v639_v40 = vsub.f32 1.0, %v638_v29 }
 0x18d   :  { %v625_v45 = vmul.f32 %v3684_v21, %v624_v32  ;;  %v664_v32 = vor.u32 1.1754944e-38, %v663_v27  ;;  %v5596_v27 = vld [vmem:[%s8048_s2 + $0x48] sm:$0xff] }
 0x18e   :  { %v3688_v53 = vpop.eup %3687  ;;  %v640_v54 = vmul.f32 %v3686_v25, %v639_v40  ;;  %8437 = vst [vmem:[#allocation5_spill] sm:$0xff] %v5596_v27 }
 0x18f   :  { %v3690_v35 = vpop.eup %3689  ;;  %v626_v9 = vadd.f32 %v3684_v21, %v625_v45  ;;  %854 = vrot.lane.b32.xlu0 %v3688_v53, %s4265_s6  ;;  %v5461_v45 = vld [vmem:[%s8048_s2 + $0x1e8] sm:$0xff] }
 0x190   :  { %v653_v59 = vmul.f32 %v3690_v35, %v621_v19  ;;  %v641_v39 = vadd.f32 %v3686_v25, %v640_v54  ;;  %v3692_v5 = vpop.eup %3691  ;;  %vm658_vm6 = vweird.f32 %v3690_v35  ;;  %v5473_v53 = vld [vmem:[%s8048_s2 + $0x1c8] sm:$0xff]  ;;  %v5479_v54 = vld [vmem:[%s8048_s2 + $0xc0] sm:$0xff] }
 0x191   :  { %v630_v7 = vsel %vm629_vm2, %v3684_v21, %v626_v9  ;;  %v661_v21 = vand.u32 2147483647, %v621_v19  ;;  %vm659_vm8 = vmor %vm657_vm7, %vm658_vm6  ;;  %v5412_v19 = vld [vmem:[%s8048_s2 + $0x1c0] sm:$0xff]  ;;  %v5497_v9 = vld [vmem:[%s8048_s2 + $0x188] sm:$0xff] }
 0x192   :  { %v654_v20 = vsub.f32 1.0, %v653_v59  ;;  %v635_v42 = vsel %vm632_vm4, %v634_v22, %v630_v7  ;;  %v645_v2 = vsel %vm644_vm3, %v3686_v25, %v641_v39  ;;  %v5503_v59 = vld [vmem:[%s8048_s2 + $0x80] sm:$0xff]  ;;  %v5509_v22 = vld [vmem:[%s8048_s2 + $0x168] sm:$0xff] }
 0x193   :  { %v650_v6 = vsel %vm647_vm5, %v649_v16, %v645_v2  ;;  %v669_v56 = vmul.f32 %v3692_v5, %v635_v42  ;;  %vm662_vm9 = vcmp.eq.f32.partialorder %v661_v21, 8.507059e+37  ;;  %v5515_v39 = vld [vmem:[%s8048_s2 + $0x60] sm:$0xff]  ;;  %v5521_v16 = vld [vmem:[%s8048_s2 + $0x148] sm:$0xff] }
 0x194   :  { %v655_v43 = vmul.f32 %v3690_v35, %v654_v20  ;;  %v668_v3 = vmul.f32 %v650_v6, %v5236_v0  ;;  %v5405_v0 = vld [vmem:[%s8048_s2 + $0x1e0] sm:$0xff]  ;;  %v5533_v5 = vld [vmem:[%s8048_s2 + $0x128] sm:$0xff] }
 0x195   :  { %v5527_v7 = vld [vmem:[%s8048_s2 + $0x40] sm:$0xff]  ;;  %v5545_v42 = vld [vmem:[%s8048_s2 + $0x108] sm:$0xff] }
 0x196   :  { %v5399_v23 = vadd.f32 %v669_v56, %v668_v3  ;;  %v656_v4 = vadd.f32 %v3690_v35, %v655_v43  ;;  %v5539_v20 = vld [vmem:[%s8048_s2 + $0x20] sm:$0xff]  ;;  %v5558_v6 = vld [vmem:[%s8048_s2 + $0xe8] sm:$0xff]  ;;  %v782_v43 = vpop.f32.mrf.mxu1  ;;  %v738_v3 = vpop.f32.mrf.mxu0 }
 0x197   :  { %v5551_v2 = vld [vmem:[%s8048_s2] sm:$0xff]  ;;  %8431 = vst [vmem:[#allocation73_spill] sm:$0xff] %v5558_v6  ;;  %v5565_v56 = vld [vmem:[%s8048_s2 + $0xc8] sm:$0xff] }
 0x198   :  { %3693 = vtanh.f32 %v5399_v23  ;;  %v660_v29 = vsel %vm659_vm8, %v3690_v35, %v656_v4  ;;  %v5491_v35 = vld [vmem:[%s8048_s2 + $0xa0] sm:$0xff]  ;;  %8432 = vst [vmem:[#allocation12_spill] sm:$0xff] %v5565_v56  ;;  %v783_v4 = vadd.f32 %v782_v43, %v738_v3 }
 0x199   :  { %v665_v40 = vsel %vm662_vm9, %v664_v32, %v660_v29 }
 0x19e   :  { %v3694_v25 = vpop.eup %3693 }
 0x19f   :  { %v672_v41 = vmul.f32 %v3694_v25, %v665_v40 }
 0x1a1   :  { %889 = vmatmul.f32.vlgmr.msrb.gmra.mxu2 %v672_v41  ;;  %909 = vmatmul.f32.vlgmr.msra.gmra.mxu3 %v672_v41 }
 0x1a2   :  { %929 = vmatmul.f32.vlgmr.msra.gmra.mxu0 %v672_v41  ;;  %949 = vmatmul.f32.vlgmr.msrb.gmra.mxu1 %v672_v41 }
 0x1a3   :  { %1258 = vmatpush.msrb.mxu2 %v5405_v0  ;;  %1067 = vmatpush.msra.mxu3 %v5242_v33  ;;  %v5426_v33 = vld [vmem:[%s8048_s2 + $0x180] sm:$0xff] }
 0x1a5   :  { %1259 = vmatpush.msrb.mxu2 %v5412_v19  ;;  %1068 = vmatpush.msra.mxu3 %v5247_v46  ;;  %v5433_v46 = vld [vmem:[%s8048_s2 + $0x160] sm:$0xff] }
 0x1a7   :  { %1260 = vmatpush.msrb.mxu2 %v5419_v44  ;;  %1069 = vmatpush.msra.mxu3 %v5254_v38  ;;  %v5440_v38 = vld [vmem:[%s8048_s2 + $0x140] sm:$0xff] }
 0x1a9   :  { %1032 = vmatmul.f32.vlgmr.msra.gmra.mxu2 %v672_v41  ;;  %1052 = vmatmul.f32.vlgmr.msrb.gmra.mxu3 %v672_v41 }
 0x1aa   :  { %1261 = vmatpush.msrb.mxu2 %v5426_v33  ;;  %1070 = vmatpush.msra.mxu3 %v5263_v58  ;;  %v5447_v58 = vld [vmem:[%s8048_s2 + $0x120] sm:$0xff] }
 0x1ac   :  { %1262 = vmatpush.msrb.mxu2 %v5433_v46  ;;  %1071 = vmatpush.msra.mxu3 %v5272_v10  ;;  %v5454_v10 = vld [vmem:[%s8048_s2 + $0x100] sm:$0xff] }
 0x1ae   :  { %1263 = vmatpush.msrb.mxu2 %v5440_v38  ;;  %1072 = vmatpush.msra.mxu3 %v5281_v13 }
 0x1b0   :  { %1264 = vmatpush.msrb.mxu2 %v5447_v58  ;;  %1073 = vmatpush.msra.mxu3 %v5288_v14 }
 0x1b2   :  { %1265 = vmatpush.msrb.mxu2 %v5454_v10  ;;  %1074 = vmatpush.msra.mxu3 %v5297_v17 }
 0x1b4   :  { %1278 = vmatpush.msrb.mxu3 %v5461_v45  ;;  %1266 = vmatpush.msrb.mxu2 %v5467_v49 }
 0x1b6   :  { %1279 = vmatpush.msrb.mxu3 %v5473_v53  ;;  %1267 = vmatpush.msrb.mxu2 %v5479_v54 }
 0x1b8   :  { %1280 = vmatpush.msrb.mxu3 %v5485_v62  ;;  %1268 = vmatpush.msrb.mxu2 %v5491_v35 }
 0x1ba   :  { %1281 = vmatpush.msrb.mxu3 %v5497_v9  ;;  %1269 = vmatpush.msrb.mxu2 %v5503_v59 }
 0x1bc   :  { %1282 = vmatpush.msrb.mxu3 %v5509_v22  ;;  %1270 = vmatpush.msrb.mxu2 %v5515_v39 }
 0x1be   :  { %1283 = vmatpush.msrb.mxu3 %v5521_v16  ;;  %1271 = vmatpush.msrb.mxu2 %v5527_v7 }
 0x1c0   :  { %1284 = vmatpush.msrb.mxu3 %v5533_v5  ;;  %1272 = vmatpush.msrb.mxu2 %v5539_v20 }
 0x1c2   :  { %1285 = vmatpush.msrb.mxu3 %v5545_v42  ;;  %1273 = vmatpush.msrb.mxu2 %v5551_v2 }
 0x1c4   :  { %1401 = vmatpush.msra.mxu2 %v4995_v30  ;;  %1286 = vmatpush.msrb.mxu3 %v5558_v6  ;;  %v5572_v30 = vld [vmem:[%s8048_s2 + $0xa8] sm:$0xff] }
 0x1c5   :  { %8433 = vst [vmem:[#allocation4_spill] sm:$0xff] %v5572_v30 }
 0x1c6   :  { %1402 = vmatpush.msra.mxu2 %v5015_v34  ;;  %1287 = vmatpush.msrb.mxu3 %v5565_v56  ;;  %v5579_v34 = vld [vmem:[%s8048_s2 + $0x88] sm:$0xff] }
 0x1c7   :  { %8434 = vst [vmem:[#allocation13_spill] sm:$0xff] %v5579_v34 }
 0x1c8   :  { %1403 = vmatpush.msra.mxu2 %v5033_v1  ;;  %1288 = vmatpush.msrb.mxu3 %v5572_v30  ;;  %v5586_v1 = vld [vmem:[%s8048_s2 + $0x68] sm:$0xff] }
 0x1c9   :  { %8435 = vst [vmem:[#allocation76_spill] sm:$0xff] %v5586_v1 }
 0x1ca   :  { %1404 = vmatpush.msra.mxu2 %v5045_v52  ;;  %1289 = vmatpush.msrb.mxu3 %v5579_v34  ;;  %v5590_v52 = vperm.slane %v5386_v51, 0 }
 0x1cc   :  { %1405 = vmatpush.msra.mxu2 %v5057_v48  ;;  %1290 = vmatpush.msrb.mxu3 %v5586_v1  ;;  %8436 = vst [vmem:[#allocation15_spill] sm:$0xff] %v5590_v52  ;;  %v5603_v48 = vld [vmem:[%s8048_s2 + $0x28] sm:$0xff]  ;;  %v811_v51 = vadd.f32 %v5590_v52, %v783_v4  ;;  %v8440_v52 = vld [vmem:[#allocation30_spill] sm:$0xff] }
 0x1cd   :  { %8438 = vst [vmem:[#allocation16_spill] sm:$0xff] %v5603_v48 }
 0x1ce   :  { %1406 = vmatpush.msra.mxu2 %v5079_v12  ;;  %1291 = vmatpush.msrb.mxu3 %v5596_v27  ;;  %v5611_v12 = vld [vmem:[%s8048_s2 + $0x8] sm:$0xff] }
 0x1cf   :  { %8439 = vst [vmem:[#allocation78_spill] sm:$0xff] %v5611_v12 }
 0x1d0   :  { %1407 = vmatpush.msra.mxu2 %v5091_v26  ;;  %1292 = vmatpush.msrb.mxu3 %v5603_v48  ;;  %v3582_v26 = vmul.f32 -1.442695, %v811_v51 }
 0x1d2   :  { %1408 = vmatpush.msra.mxu2 %v5103_v8  ;;  %1293 = vmatpush.msrb.mxu3 %v5611_v12  ;;  %3695 = vpow2.f32 %v3582_v26  ;;  %v8441_v12 = vld [vmem:[#allocation28_spill] sm:$0xff] }
 0x1d4   :  { %1409 = vmatpush.msra.mxu2 %v5113_v61 }
 0x1d6   :  { %1410 = vmatpush.msra.mxu2 %v5133_v55 }
 0x1d8   :  { %1411 = vmatpush.msra.mxu2 %v8373_v18  ;;  %v3696_v8 = vpop.eup %3695 }
 0x1d9   :  { %v819_v21 = vadd.f32 1.0, %v3696_v8 }
 0x1da   :  { %1412 = vmatpush.msra.mxu2 %v8377_v24 }
 0x1db   :  { %3697 = vrcp.f32 %v819_v21  ;;  %v832_v41 = vand.u32 2147483648, %v819_v21  ;;  %vm826_vm11 = vweird.f32 %v819_v21  ;;  %v830_v43 = vand.u32 2147483647, %v819_v21 }
 0x1dc   :  { %1413 = vmatpush.msra.mxu2 %v8381_v31 }
 0x1dd   :  { %v833_v4 = vor.u32 1.1754944e-38, %v832_v41  ;;  %vm831_vm13 = vcmp.eq.f32.partialorder %v830_v43, 8.507059e+37 }
 0x1de   :  { %1414 = vmatpush.msra.mxu2 %v8385_v37 }
 0x1e0   :  { %1415 = vmatpush.msra.mxu2 %v8391_v50 }
 0x1e1   :  { %v3698_v61 = vpop.eup %3697 }
 0x1e2   :  { %1416 = vmatpush.msra.mxu2 %v8394_v57  ;;  %v822_v29 = vmul.f32 %v3698_v61, %v819_v21  ;;  %vm827_vm10 = vweird.f32 %v3698_v61  ;;  %v143_v21 = vadd.f32 %v8441_v12, %v8422_v28 }
 0x1e3   :  { %vm828_vm12 = vmor %vm826_vm11, %vm827_vm10 }
 0x1e4   :  { %v823_v32 = vsub.f32 1.0, %v822_v29  ;;  %v225_v29 = vadd.f32 %v8440_v52, %v8426_v63 }
 0x1e6   :  { %v824_v25 = vmul.f32 %v3698_v61, %v823_v32 }
 0x1e8   :  { %v825_v40 = vadd.f32 %v3698_v61, %v824_v25 }
 0x1ea   :  { %v829_v3 = vsel %vm828_vm12, %v3698_v61, %v825_v40  ;;  %v8442_v61 = vld [vmem:[#allocation29_spill] sm:$0xff] }
 0x1eb   :  { %v5622_v26 = vsel %vm831_vm13, %v833_v4, %v829_v3  ;;  %v184_v40 = vadd.f32 %v8442_v61, %v8424_v36 }
 0x201   :  { %v855_v51 = vpop.permute.xlu0 %854 }
 0x202   :  { %v857_v8 = vmul.f32 %v855_v51, %v5622_v26 }
 0x204   :  { %859 = vrot.lane.b32.xlu0 %v857_v8, %s4265_s6 }
 0x21f   :  { %v930_v32 = vpop.f32.mrf.mxu0  ;;  %v950_v12 = vpop.f32.mrf.mxu1 }
 0x220   :  { %v931_v25 = vadd.f32 %v930_v32, %v225_v29 }
 0x222   :  { %v3586_v60 = vmul.f32 -1.442695, %v931_v25 }
 0x224   :  { %3699 = vpow2.f32 %v3586_v60  ;;  %v890_v41 = vpop.f32.mrf.mxu2  ;;  %v910_v43 = vpop.f32.mrf.mxu3  ;;  %v8443_v60 = vld [vmem:[#allocation31_spill] sm:$0xff] }
 0x225   :  { %v891_v3 = vadd.f32 %v890_v41, %v143_v21  ;;  %v911_v4 = vadd.f32 %v910_v43, %v184_v40  ;;  %v266_v61 = vadd.f32 %v8443_v60, %v8429_v47 }
 0x227   :  { %v3584_v51 = vmul.f32 -1.442695, %v891_v3  ;;  %v3585_v48 = vmul.f32 -1.442695, %v911_v4  ;;  %v951_v40 = vadd.f32 %v950_v12, %v266_v61 }
 0x229   :  { %3701 = vpow2.f32 %v3584_v51 }
 0x22a   :  { %v3700_v8 = vpop.eup %3699  ;;  %3703 = vpow2.f32 %v3585_v48 }
 0x22b   :  { %v964_v63 = vadd.f32 1.0, %v3700_v8 }
 0x22d   :  { %3705 = vrcp.f32 %v964_v63  ;;  %vm1000_vm7 = vweird.f32 %v964_v63 }
 0x22f   :  { %v3702_v52 = vpop.eup %3701 }
 0x230   :  { %v3704_v29 = vpop.eup %3703  ;;  %v962_v32 = vadd.f32 1.0, %v3702_v52 }
 0x231   :  { %v963_v25 = vadd.f32 1.0, %v3704_v29 }
 0x232   :  { %3707 = vrcp.f32 %v962_v32  ;;  %v976_v51 = vand.u32 2147483648, %v962_v32  ;;  %v974_v29 = vand.u32 2147483647, %v962_v32  ;;  %vm970_vm0 = vweird.f32 %v962_v32 }
 0x233   :  { %3709 = vrcp.f32 %v963_v25  ;;  %v3706_v36 = vpop.eup %3705  ;;  %v991_v28 = vand.u32 2147483648, %v963_v25  ;;  %v989_v1 = vand.u32 2147483647, %v963_v25  ;;  %vm985_vm2 = vweird.f32 %v963_v25 }
 0x234   :  { %v996_v4 = vmul.f32 %v3706_v36, %v964_v63  ;;  %3711 = vtanh.f32 %v951_v40  ;;  %v977_v12 = vor.u32 1.1754944e-38, %v976_v51  ;;  %vm975_vm3 = vcmp.eq.f32.partialorder %v974_v29, 8.507059e+37 }
 0x235   :  { %v992_v40 = vor.u32 1.1754944e-38, %v991_v28  ;;  %vm990_vm5 = vcmp.eq.f32.partialorder %v989_v1, 8.507059e+37  ;;  %vm1001_vm6 = vweird.f32 %v3706_v36  ;;  %v1006_v51 = vand.u32 2147483648, %v964_v63 }
 0x236   :  { %v997_v34 = vsub.f32 1.0, %v996_v4  ;;  %vm1002_vm8 = vmor %vm1000_vm7, %vm1001_vm6 }
 0x238   :  { %v3708_v21 = vpop.eup %3707  ;;  %v998_v30 = vmul.f32 %v3706_v36, %v997_v34 }
 0x239   :  { %v3710_v41 = vpop.eup %3709  ;;  %v966_v43 = vmul.f32 %v3708_v21, %v962_v32  ;;  %vm971_vm14 = vweird.f32 %v3708_v21 }
 0x23a   :  { %v981_v3 = vmul.f32 %v3710_v41, %v963_v25  ;;  %vm986_vm15 = vweird.f32 %v3710_v41  ;;  %vm972_vm1 = vmor %vm970_vm0, %vm971_vm14  ;;  %v999_v32 = vadd.f32 %v3706_v36, %v998_v30  ;;  %v1007_v25 = vor.u32 1.1754944e-38, %v1006_v51  ;;  %v5779_v30 = vld [vmem:[%s8048_s2 + $0x158] sm:$0xff] }
 0x23b   :  { %v967_v48 = vsub.f32 1.0, %v966_v43  ;;  %vm987_vm4 = vmor %vm985_vm2, %vm986_vm15  ;;  %v3712_v43 = vpop.eup %3711  ;;  %8450 = vst [vmem:[#allocation45_spill] sm:$0xff] %v5779_v30  ;;  %v5863_v51 = vld [vmem:[%s8048_s2 + $0x18] sm:$0xff]  ;;  %vm761_vm14 = vcmask 523264  }
 0x23c   :  { %v982_v8 = vsub.f32 1.0, %v981_v3  ;;  %v1003_v28 = vsel %vm1002_vm8, %v3706_v36, %v999_v32  ;;  %v5652_v36 = vld [vmem:[%s8053_s7 + $0x38] sm:$0xff]  ;;  %8464 = vst [vmem:[#allocation21_spill] sm:$0xff] %v5863_v51 }
 0x23d   :  { %v968_v52 = vmul.f32 %v3708_v21, %v967_v48  ;;  %1177 = vmatpush.msrb.mxu0 %v5652_v36  ;;  %v5857_v32 = vld [vmem:[%s8048_s2 + $0x38] sm:$0xff] }
 0x23e   :  { %v983_v27 = vmul.f32 %v3710_v41, %v982_v8  ;;  %8463 = vst [vmem:[#allocation59_spill] sm:$0xff] %v5857_v32 }
 0x23f   :  { %v969_v60 = vadd.f32 %v3708_v21, %v968_v52  ;;  %v5809_v52 = vld [vmem:[%s8048_s2 + $0xf8] sm:$0xff] }
 0x240   :  { %v984_v61 = vadd.f32 %v3710_v41, %v983_v27  ;;  %v1004_v27 = vand.u32 2147483647, %v964_v63  ;;  %v5795_v63 = vld [vmem:[%s8048_s2 + $0x138] sm:$0xff]  ;;  %8455 = vst [vmem:[#allocation9_spill] sm:$0xff] %v5809_v52 }
 0x241   :  { %v973_v47 = vsel %vm972_vm1, %v3708_v21, %v969_v60  ;;  %8453 = vst [vmem:[#allocation82_spill] sm:$0xff] %v5795_v63  ;;  %v5802_v21 = vld [vmem:[%s8048_s2 + $0x118] sm:$0xff] }
 0x242   :  { %v978_v3 = vsel %vm975_vm3, %v977_v12, %v973_v47  ;;  %v988_v48 = vsel %vm987_vm4, %v3710_v41, %v984_v61  ;;  %vm1005_vm9 = vcmp.eq.f32.partialorder %v1004_v27, 8.507059e+37  ;;  %8454 = vst [vmem:[#allocation50_spill] sm:$0xff] %v5802_v21  ;;  %v5815_v60 = vld [vmem:[%s8048_s2 + $0xd8] sm:$0xff]  ;;  %v5821_v12 = vld [vmem:[%s8054_s8 + $0x8] sm:$0xff]  ;;  %v5826_v61 = vld [vmem:[%s8054_s8] sm:$0xff] }
 0x243   :  { %v1012_v56 = vmul.f32 %v3712_v43, %v978_v3  ;;  %v993_v8 = vsel %vm990_vm5, %v992_v40, %v988_v48  ;;  %v1008_v1 = vsel %vm1005_vm9, %v1007_v25, %v1003_v28  ;;  %8456 = vst [vmem:[#allocation84_spill] sm:$0xff] %v5815_v60  ;;  %v5832_v40 = vld [vmem:[%s8048_s2 + $0xb8] sm:$0xff] }
 0x244   :  { %v1011_v6 = vmul.f32 %v993_v8, %v5399_v23  ;;  %v5657_v23 = vld [vmem:[%s8053_s7 + $0x30] sm:$0xff]  ;;  %8457 = vst [vmem:[#allocation51_spill] sm:$0xff] %v5821_v12  ;;  %v5839_v43 = vld [vmem:[%s8048_s2 + $0x98] sm:$0xff] }
 0x245   :  { %1178 = vmatpush.msrb.mxu0 %v5657_v23  ;;  %8458 = vst [vmem:[#allocation11_spill] sm:$0xff] %v5826_v61  ;;  %v5845_v3 = vld [vmem:[%s8048_s2 + $0x78] sm:$0xff] }
 0x246   :  { %v5635_v4 = vadd.f32 %v1012_v56, %v1011_v6  ;;  %v5767_v6 = vld [vmem:[%s8048_s2 + $0x198] sm:$0xff]  ;;  %8459 = vst [vmem:[#allocation52_spill] sm:$0xff] %v5832_v40 }
 0x247   :  { %8448 = vst [vmem:[#allocation22_spill] sm:$0xff] %v5767_v6  ;;  %v5773_v56 = vld [vmem:[%s8048_s2 + $0x178] sm:$0xff] }
 0x248   :  { %3713 = vtanh.f32 %v5635_v4  ;;  %8449 = vst [vmem:[#allocation7_spill] sm:$0xff] %v5773_v56  ;;  %v5851_v48 = vld [vmem:[%s8048_s2 + $0x58] sm:$0xff] }
 0x249   :  { %8460 = vst [vmem:[#allocation14_spill] sm:$0xff] %v5839_v43 }
 0x24a   :  { %8461 = vst [vmem:[#allocation54_spill] sm:$0xff] %v5845_v3 }
 0x24b   :  { %8462 = vst [vmem:[#allocation17_spill] sm:$0xff] %v5851_v48 }
 0x24e   :  { %v3714_v47 = vpop.eup %3713 }
 0x24f   :  { %v5638_v34 = vmul.f32 %v3714_v47, %v1008_v1 }
 0x251   :  { %1274 = vmatmul.f32.vlgmr.msrb.gmra.mxu2 %v5638_v34 }
 0x252   :  { %1629 = vmatpush.msrb.mxu2 %v5405_v0  ;;  %v5664_v0 = vld [vmem:[%s8053_s7 + $0x28] sm:$0xff] }
 0x253   :  { %1179 = vmatpush.msrb.mxu0 %v5664_v0 }
 0x254   :  { %1630 = vmatpush.msrb.mxu2 %v5412_v19  ;;  %v3981_v19 = vld [vmem:[%s8050_s4 + $0xf0] sm:$0xff] }
 0x256   :  { %1631 = vmatpush.msrb.mxu2 %v5419_v44  ;;  %v3982_v44 = vld [vmem:[%s8050_s4 + $0xe0] sm:$0xff] }
 0x258   :  { %1632 = vmatpush.msrb.mxu2 %v5426_v33  ;;  %v852_v33 = vmul.f32 0.0, %v5622_v26  ;;  %v5790_v26 = vld [vmem:[%s8054_s8 + $0x10] sm:$0xff] }
 0x259   :  { %1417 = vmatmul.f32.vlgmr.msra.gmra.mxu2 %v5638_v34  ;;  %8452 = vst [vmem:[#allocation8_spill] sm:$0xff] %v5790_v26 }
 0x25a   :  { %1633 = vmatpush.msrb.mxu2 %v5433_v46  ;;  %v3983_v46 = vld [vmem:[%s8050_s4 + $0xd0] sm:$0xff] }
 0x25c   :  { %1634 = vmatpush.msrb.mxu2 %v5440_v38 }
 0x25e   :  { %1635 = vmatpush.msrb.mxu2 %v5447_v58 }
 0x260   :  { %1636 = vmatpush.msrb.mxu2 %v5454_v10  ;;  %v3984_v10 = vld [vmem:[%s8050_s4 + $0xc0] sm:$0xff] }
 0x262   :  { %1637 = vmatpush.msrb.mxu2 %v5467_v49  ;;  %v3985_v49 = vld [vmem:[%s8050_s4 + $0xb0] sm:$0xff] }
 0x264   :  { %1638 = vmatpush.msrb.mxu2 %v5479_v54  ;;  %v3986_v54 = vld [vmem:[%s8050_s4 + $0xa0] sm:$0xff] }
 0x266   :  { %1639 = vmatpush.msrb.mxu2 %v5491_v35  ;;  %v3987_v35 = vld [vmem:[%s8050_s4 + $0x90] sm:$0xff] }
 0x268   :  { %1640 = vmatpush.msrb.mxu2 %v5503_v59 }
 0x26a   :  { %1641 = vmatpush.msrb.mxu2 %v5515_v39  ;;  %v3988_v39 = vld [vmem:[%s8050_s4 + $0x80] sm:$0xff] }
 0x26c   :  { %1642 = vmatpush.msrb.mxu2 %v5527_v7  ;;  %v3989_v7 = vld [vmem:[%s8050_s4 + $0x70] sm:$0xff] }
 0x26e   :  { %1643 = vmatpush.msrb.mxu2 %v5539_v20  ;;  %v5718_v20 = vld [vmem:[%s8053_s7 + $0x20] sm:$0xff] }
 0x26f   :  { %1180 = vmatpush.msrb.mxu0 %v5718_v20 }
 0x270   :  { %1644 = vmatpush.msrb.mxu2 %v5551_v2  ;;  %v3583_v2 = vmul.f32 -1.442695, %v5394_v15  ;;  %v5785_v15 = vld [vmem:[%s8054_s8 + $0x18] sm:$0xff] }
 0x271   :  { %8451 = vst [vmem:[#allocation23_spill] sm:$0xff] %v5785_v15  ;;  %1204 = vmatpush.msrb.mxu1 %v5785_v15 }
 0x272   :  { %1772 = vmatpush.msra.mxu2 %v3981_v19 }
 0x273   :  { %1205 = vmatpush.msrb.mxu1 %v5790_v26 }
 0x274   :  { %1773 = vmatpush.msra.mxu2 %v3982_v44 }
 0x275   :  { %1206 = vmatpush.msrb.mxu1 %v5821_v12 }
 0x276   :  { %1774 = vmatpush.msra.mxu2 %v3983_v46  ;;  %v860_v38 = vpop.permute.xlu0 %859 }
 0x277   :  { %v5686_v58 = vadd.f32 %v860_v38, %v852_v33  ;;  %1207 = vmatpush.msrb.mxu1 %v5826_v61 }
 0x278   :  { %1775 = vmatpush.msra.mxu2 %v3984_v10 }
 0x279   :  { %8444 = vst [vmem:[#allocation19_spill] sm:$0xff] %v5686_v58  ;;  %3715 = vtanh.f32 %v5686_v58  ;;  %v1053_v58 = vpop.f32.mrf.mxu3 }
 0x27a   :  { %1776 = vmatpush.msra.mxu2 %v3985_v49  ;;  %3717 = vpow2.f32 %v3583_v2  ;;  %v5872_v49 = vld [vmem:[%s8048_s2 + $0x1f0] sm:$0xff] }
 0x27b   :  { %v5908_v2 = vld [vmem:[%s8048_s2 + $0x1b0] sm:$0xff] }
 0x27c   :  { %1777 = vmatpush.msra.mxu2 %v3986_v54  ;;  %v5878_v54 = vld [vmem:[%s8050_s4 + $0xf8] sm:$0xff] }
 0x27e   :  { %1778 = vmatpush.msra.mxu2 %v3987_v35  ;;  %v5884_v35 = vld [vmem:[%s8051_s5 + $0x78] sm:$0xff] }
 0x27f   :  { %v3716_v59 = vpop.eup %3715  ;;  %8465 = vst [vmem:[#allocation60_spill] sm:$0xff] %v5884_v35 }
 0x280   :  { %1779 = vmatpush.msra.mxu2 %v3988_v39  ;;  %865 = vrot.lane.b32.xlu1 %v3716_v59, %s4265_s6  ;;  %v3718_v41 = vpop.eup %3717  ;;  %v5890_v59 = vld [vmem:[%s8048_s2 + $0x1d0] sm:$0xff]  ;;  %v5896_v39 = vld [vmem:[%s8050_s4 + $0xe8] sm:$0xff] }
 0x281   :  { %v820_v29 = vadd.f32 1.0, %v3718_v41  ;;  %v5914_v41 = vld [vmem:[%s8050_s4 + $0xd8] sm:$0xff] }
 0x282   :  { %1780 = vmatpush.msra.mxu2 %v3989_v7  ;;  %v5902_v7 = vld [vmem:[%s8051_s5 + $0x68] sm:$0xff] }
 0x283   :  { %3719 = vrcp.f32 %v820_v29  ;;  %v847_v1 = vand.u32 2147483648, %v820_v29  ;;  %vm841_vm11 = vweird.f32 %v820_v29  ;;  %v845_v19 = vand.u32 2147483647, %v820_v29  ;;  %8466 = vst [vmem:[#allocation24_spill] sm:$0xff] %v5902_v7 }
 0x284   :  { %1781 = vmatpush.msra.mxu2 %v5133_v55  ;;  %v5724_v55 = vld [vmem:[%s8053_s7 + $0x18] sm:$0xff] }
 0x285   :  { %1181 = vmatpush.msrb.mxu0 %v5724_v55  ;;  %v848_v33 = vor.u32 1.1754944e-38, %v847_v1  ;;  %vm846_vm13 = vcmp.eq.f32.partialorder %v845_v19, 8.507059e+37  ;;  %v5965_v1 = vld [vmem:[%s8050_s4 + $0xa8] sm:$0xff]  ;;  %v5971_v19 = vld [vmem:[%s8048_s2 + $0x130] sm:$0xff] }
 0x286   :  { %1782 = vmatpush.msra.mxu2 %v8373_v18  ;;  %v5730_v18 = vld [vmem:[%s8053_s7 + $0x10] sm:$0xff]  ;;  %8469 = vst [vmem:[#allocation62_spill] sm:$0xff] %v5965_v1 }
 0x287   :  { %1182 = vmatpush.msrb.mxu0 %v5730_v18 }
 0x288   :  { %1783 = vmatpush.msra.mxu2 %v8377_v24  ;;  %v5736_v24 = vld [vmem:[%s8053_s7 + $0x8] sm:$0xff] }
 0x289   :  { %1183 = vmatpush.msrb.mxu0 %v5736_v24  ;;  %v3720_v8 = vpop.eup %3719 }
 0x28a   :  { %1784 = vmatpush.msra.mxu2 %v8381_v31  ;;  %v5742_v31 = vld [vmem:[%s8053_s7] sm:$0xff]  ;;  %v837_v27 = vmul.f32 %v3720_v8, %v820_v29  ;;  %vm842_vm10 = vweird.f32 %v3720_v8  ;;  %v5920_v29 = vld [vmem:[%s8051_s5 + $0x58] sm:$0xff] }
 0x28b   :  { %1184 = vmatpush.msrb.mxu0 %v5742_v31  ;;  %vm843_vm12 = vmor %vm841_vm11, %vm842_vm10  ;;  %8467 = vst [vmem:[#allocation61_spill] sm:$0xff] %v5920_v29 }
 0x28c   :  { %1785 = vmatpush.msra.mxu2 %v8385_v37  ;;  %v5748_v37 = vld [vmem:[%s8048_s2 + $0x1f8] sm:$0xff]  ;;  %v838_v28 = vsub.f32 1.0, %v837_v27  ;;  %v5932_v27 = vld [vmem:[%s8050_s4 + $0xc8] sm:$0xff] }
 0x28d   :  { %8445 = vst [vmem:[#allocation6_spill] sm:$0xff] %v5748_v37  ;;  %1318 = vmatpush.msra.mxu0 %v5748_v37 }
 0x28e   :  { %1786 = vmatpush.msra.mxu2 %v8391_v50  ;;  %v5754_v50 = vld [vmem:[%s8048_s2 + $0x1d8] sm:$0xff]  ;;  %v839_v25 = vmul.f32 %v3720_v8, %v838_v28  ;;  %v5940_v28 = vld [vmem:[%s8048_s2 + $0x170] sm:$0xff] }
 0x28f   :  { %8446 = vst [vmem:[#allocation20_spill] sm:$0xff] %v5754_v50  ;;  %1319 = vmatpush.msra.mxu0 %v5754_v50 }
 0x290   :  { %1787 = vmatpush.msra.mxu2 %v8394_v57  ;;  %v5760_v57 = vld [vmem:[%s8048_s2 + $0x1b8] sm:$0xff]  ;;  %v840_v47 = vadd.f32 %v3720_v8, %v839_v25 }
 0x291   :  { %8447 = vst [vmem:[#allocation80_spill] sm:$0xff] %v5760_v57  ;;  %1320 = vmatpush.msra.mxu0 %v5760_v57  ;;  %v5947_v25 = vld [vmem:[%s8050_s4 + $0xb8] sm:$0xff] }
 0x292   :  { %v844_v44 = vsel %vm843_vm12, %v3720_v8, %v840_v47  ;;  %v5926_v8 = vld [vmem:[%s8048_s2 + $0x190] sm:$0xff]  ;;  %v5959_v47 = vld [vmem:[%s8051_s5 + $0x48] sm:$0xff] }
 0x293   :  { %1321 = vmatpush.msra.mxu0 %v5767_v6  ;;  %v849_v46 = vsel %vm846_vm13, %v848_v33, %v844_v44  ;;  %8468 = vst [vmem:[#allocation68_spill] sm:$0xff] %v5959_v47  ;;  %v5977_v44 = vld [vmem:[%s8051_s5 + $0x38] sm:$0xff] }
 0x294   :  { %8470 = vst [vmem:[#allocation70_spill] sm:$0xff] %v5977_v44  ;;  %v5983_v33 = vld [vmem:[%s8050_s4 + $0x98] sm:$0xff] }
 0x295   :  { %1322 = vmatpush.msra.mxu0 %v5773_v56  ;;  %8471 = vst [vmem:[#allocation65_spill] sm:$0xff] %v5983_v33  ;;  %v8486_v56 = vld [vmem:[#allocation12_spill] sm:$0xff] }
 0x297   :  { %1323 = vmatpush.msra.mxu0 %v5779_v30  ;;  %v8485_v30 = vld [vmem:[#allocation73_spill] sm:$0xff] }
 0x299   :  { %1324 = vmatpush.msra.mxu0 %v5795_v63  ;;  %v6149_v63 = vld [vmem:[%s8051_s5 + $0x30] sm:$0xff] }
 0x29a   :  { %8484 = vst [vmem:[#allocation18_spill] sm:$0xff] %v6149_v63 }
 0x29b   :  { %1325 = vmatpush.msra.mxu0 %v5802_v21  ;;  %v6142_v21 = vld [vmem:[%s8051_s5 + $0x40] sm:$0xff] }
 0x29d   :  { %1326 = vmatpush.msra.mxu0 %v5809_v52  ;;  %v6128_v52 = vld [vmem:[%s8051_s5 + $0x60] sm:$0xff] }
 0x29f   :  { %1327 = vmatpush.msra.mxu0 %v5815_v60  ;;  %v6121_v60 = vld [vmem:[%s8051_s5 + $0x70] sm:$0xff] }
 0x2a1   :  { %1328 = vmatpush.msra.mxu0 %v5832_v40  ;;  %v6113_v40 = vld [vmem:[%s8050_s4 + $0x8] sm:$0xff] }
 0x2a2   :  { %8483 = vst [vmem:[#allocation77_spill] sm:$0xff] %v6113_v40 }
 0x2a3   :  { %1329 = vmatpush.msra.mxu0 %v5839_v43  ;;  %v6107_v43 = vld [vmem:[%s8048_s2 + $0x10] sm:$0xff] }
 0x2a5   :  { %1330 = vmatpush.msra.mxu0 %v5845_v3  ;;  %v6095_v3 = vld [vmem:[%s8048_s2 + $0x30] sm:$0xff] }
 0x2a7   :  { %1331 = vmatpush.msra.mxu0 %v5851_v48  ;;  %v6089_v48 = vld [vmem:[%s8050_s4 + $0x28] sm:$0xff] }
 0x2a8   :  { %8481 = vst [vmem:[#allocation74_spill] sm:$0xff] %v6089_v48 }
 0x2a9   :  { %1332 = vmatpush.msra.mxu0 %v5857_v32  ;;  %v6076_v32 = vld [vmem:[%s8050_s4 + $0x38] sm:$0xff] }
 0x2aa   :  { %8480 = vst [vmem:[#allocation83_spill] sm:$0xff] %v6076_v32 }
 0x2ab   :  { %1333 = vmatpush.msra.mxu0 %v5863_v51  ;;  %v6063_v51 = vld [vmem:[%s8050_s4 + $0x48] sm:$0xff] }
 0x2ac   :  { %8479 = vst [vmem:[#allocation71_spill] sm:$0xff] %v6063_v51 }
 0x2f2   :  { %v866_v38 = vpop.permute.xlu1 %865 }
 0x2f3   :  { %v868_v10 = vmul.f32 %v866_v38, %v849_v46  ;;  %v5989_v46 = vld [vmem:[%s8048_s2 + $0x110] sm:$0xff]  ;;  %v5995_v38 = vld [vmem:[%s8051_s5 + $0x28] sm:$0xff] }
 0x2f4   :  { %8472 = vst [vmem:[#allocation72_spill] sm:$0xff] %v5995_v38 }
 0x2f5   :  { %3587 = vmatmul.msk.f32.vlgmr.msra.gmra.mxu3 %vm761_vm14, %v868_v10  ;;  %3588 = vmatmul.msk.f32.vlgmr.msra.gmra.mxu1 %vm761_vm14, %v868_v10 }
 0x2f6   :  { %3591 = vmatmul.msk.f32.vlgmr.msrb.gmra.mxu0 %vm761_vm14, %v868_v10  ;;  %1298 = vmatpush.msra.mxu1 %v5872_v49  ;;  %v6001_v10 = vld [vmem:[%s8050_s4 + $0x88] sm:$0xff] }
 0x2f7   :  { %1421 = vmatpush.msra.mxu3 %v5878_v54  ;;  %1472 = vmatpush.msrb.mxu0 %v5884_v35  ;;  %8473 = vst [vmem:[#allocation66_spill] sm:$0xff] %v6001_v10  ;;  %v6044_v35 = vld [vmem:[%s8048_s2 + $0xb0] sm:$0xff] }
 0x2f8   :  { %1299 = vmatpush.msra.mxu1 %v5890_v59 }
 0x2f9   :  { %1422 = vmatpush.msra.mxu3 %v5896_v39  ;;  %1473 = vmatpush.msrb.mxu0 %v5902_v7  ;;  %v6031_v7 = vld [vmem:[%s8051_s5 + $0x8] sm:$0xff] }
 0x2fa   :  { %1300 = vmatpush.msra.mxu1 %v5908_v2  ;;  %8476 = vst [vmem:[#allocation79_spill] sm:$0xff] %v6031_v7 }
 0x2fb   :  { %1423 = vmatpush.msra.mxu3 %v5914_v41  ;;  %1474 = vmatpush.msrb.mxu0 %v5920_v29  ;;  %v6025_v29 = vld [vmem:[%s8048_s2 + $0xd0] sm:$0xff] }
 0x2fc   :  { %1301 = vmatpush.msra.mxu1 %v5926_v8 }
 0x2fd   :  { %1424 = vmatpush.msra.mxu3 %v5932_v27  ;;  %1208 = vmatmul.f32.vlgmr.msrb.gmra.mxu1 %v8371_v11  ;;  %v5953_v11 = vld [vmem:[%s8048_s2 + $0x150] sm:$0xff] }
 0x2fe   :  { %1294 = vmatmul.f32.vlgmr.msrb.gmra.mxu3 %v5638_v34  ;;  %1302 = vmatpush.msra.mxu1 %v5940_v28 }
 0x2ff   :  { %1334 = vmatmul.f32.vlgmr.msra.gmra.mxu0 %v5638_v34  ;;  %1425 = vmatpush.msra.mxu3 %v5947_v25 }
 0x300   :  { %1303 = vmatpush.msra.mxu1 %v5953_v11  ;;  %1475 = vmatpush.msrb.mxu0 %v5959_v47  ;;  %v6013_v47 = vld [vmem:[%s8051_s5 + $0x18] sm:$0xff] }
 0x301   :  { %1426 = vmatpush.msra.mxu3 %v5965_v1  ;;  %8474 = vst [vmem:[#allocation75_spill] sm:$0xff] %v6013_v47 }
 0x302   :  { %1304 = vmatpush.msra.mxu1 %v5971_v19  ;;  %1476 = vmatpush.msrb.mxu0 %v5977_v44  ;;  %v6007_v44 = vld [vmem:[%s8048_s2 + $0xf0] sm:$0xff] }
 0x303   :  { %1427 = vmatpush.msra.mxu3 %v5983_v33 }
 0x304   :  { %1305 = vmatpush.msra.mxu1 %v5989_v46  ;;  %1477 = vmatpush.msrb.mxu0 %v5995_v38  ;;  %v6019_v38 = vld [vmem:[%s8050_s4 + $0x78] sm:$0xff] }
 0x305   :  { %1428 = vmatpush.msra.mxu3 %v6001_v10  ;;  %8475 = vst [vmem:[#allocation67_spill] sm:$0xff] %v6019_v38 }
 0x306   :  { %1306 = vmatpush.msra.mxu1 %v6007_v44  ;;  %1478 = vmatpush.msrb.mxu0 %v6013_v47  ;;  %v6037_v47 = vld [vmem:[%s8050_s4 + $0x68] sm:$0xff] }
 0x307   :  { %1429 = vmatpush.msra.mxu3 %v6019_v38  ;;  %8477 = vst [vmem:[#allocation69_spill] sm:$0xff] %v6037_v47 }
 0x308   :  { %1307 = vmatpush.msra.mxu1 %v6025_v29  ;;  %1479 = vmatpush.msrb.mxu0 %v6031_v7  ;;  %v6050_v7 = vld [vmem:[%s8050_s4 + $0x58] sm:$0xff] }
 0x309   :  { %1430 = vmatpush.msra.mxu3 %v6037_v47  ;;  %8478 = vst [vmem:[#allocation81_spill] sm:$0xff] %v6050_v7 }
 0x30a   :  { %1579 = vmatpush.msra.mxu0 %v5785_v15  ;;  %1308 = vmatpush.msra.mxu1 %v6044_v35  ;;  %v6057_v15 = vld [vmem:[%s8048_s2 + $0x90] sm:$0xff] }
 0x30b   :  { %1431 = vmatpush.msra.mxu3 %v6050_v7 }
 0x30c   :  { %1580 = vmatpush.msra.mxu0 %v5790_v26  ;;  %1309 = vmatpush.msra.mxu1 %v6057_v15  ;;  %v6070_v26 = vld [vmem:[%s8048_s2 + $0x70] sm:$0xff] }
 0x30d   :  { %1432 = vmatpush.msra.mxu3 %v6063_v51 }
 0x30e   :  { %1581 = vmatpush.msra.mxu0 %v5821_v12  ;;  %1310 = vmatpush.msra.mxu1 %v6070_v26  ;;  %v6083_v12 = vld [vmem:[%s8048_s2 + $0x50] sm:$0xff] }
 0x30f   :  { %1433 = vmatpush.msra.mxu3 %v6076_v32 }
 0x310   :  { %1582 = vmatpush.msra.mxu0 %v5826_v61  ;;  %1311 = vmatpush.msra.mxu1 %v6083_v12  ;;  %v6101_v61 = vld [vmem:[%s8050_s4 + $0x18] sm:$0xff] }
 0x311   :  { %1434 = vmatpush.msra.mxu3 %v6089_v48  ;;  %8482 = vst [vmem:[#allocation85_spill] sm:$0xff] %v6101_v61 }
 0x312   :  { %1312 = vmatpush.msra.mxu1 %v6095_v3 }
 0x313   :  { %1435 = vmatpush.msra.mxu3 %v6101_v61 }
 0x314   :  { %1313 = vmatpush.msra.mxu1 %v6107_v43 }
 0x315   :  { %1436 = vmatpush.msra.mxu3 %v6113_v40  ;;  %1314 = vmatmul.f32.vlgmr.msra.gmra.mxu1 %v5638_v34 }
 0x316   :  { %1437 = vmatmul.f32.vlgmr.msra.gmra.mxu3 %v5638_v34  ;;  %1452 = vmatpush.msrb.mxu1 %v6121_v60  ;;  %v6135_v34 = vld [vmem:[%s8051_s5 + $0x50] sm:$0xff] }
 0x317   :  { %1649 = vmatpush.msrb.mxu3 %v5461_v45 }
 0x318   :  { %1453 = vmatpush.msrb.mxu1 %v6128_v52 }
 0x319   :  { %1650 = vmatpush.msrb.mxu3 %v5473_v53 }
 0x31a   :  { %1454 = vmatpush.msrb.mxu1 %v6135_v34 }
 0x31b   :  { %1651 = vmatpush.msrb.mxu3 %v5485_v62 }
 0x31c   :  { %1455 = vmatpush.msrb.mxu1 %v6142_v21 }
 0x31d   :  { %1652 = vmatpush.msrb.mxu3 %v5497_v9 }
 0x31e   :  { %1456 = vmatpush.msrb.mxu1 %v6149_v63 }
 0x31f   :  { %1653 = vmatpush.msrb.mxu3 %v5509_v22 }
 0x320   :  { %1457 = vmatpush.msrb.mxu1 %v5281_v13  ;;  %v8487_v13 = vld [vmem:[#allocation4_spill] sm:$0xff] }
 0x321   :  { %1654 = vmatpush.msrb.mxu3 %v5521_v16 }
 0x322   :  { %1458 = vmatpush.msrb.mxu1 %v5288_v14  ;;  %v8488_v14 = vld [vmem:[#allocation13_spill] sm:$0xff] }
 0x323   :  { %1655 = vmatpush.msrb.mxu3 %v5533_v5 }
 0x324   :  { %1459 = vmatpush.msrb.mxu1 %v5297_v17  ;;  %v8489_v17 = vld [vmem:[#allocation76_spill] sm:$0xff] }
 0x325   :  { %1656 = vmatpush.msrb.mxu3 %v5545_v42 }
 0x326   :  { %1550 = vmatpush.msra.mxu1 %v5652_v36  ;;  %v8490_v36 = vld [vmem:[#allocation5_spill] sm:$0xff] }
 0x327   :  { %1657 = vmatpush.msrb.mxu3 %v8485_v30 }
 0x328   :  { %1551 = vmatpush.msra.mxu1 %v5657_v23  ;;  %v8491_v23 = vld [vmem:[#allocation16_spill] sm:$0xff] }
 0x329   :  { %1658 = vmatpush.msrb.mxu3 %v8486_v56 }
 0x32a   :  { %1552 = vmatpush.msra.mxu1 %v5664_v0  ;;  %v8492_v0 = vld [vmem:[#allocation78_spill] sm:$0xff] }
 0x32b   :  { %1659 = vmatpush.msrb.mxu3 %v8487_v13 }
 0x32c   :  { %1553 = vmatpush.msra.mxu1 %v5718_v20  ;;  %v6187_v20 = vpop.f32.mrf.mxu2 }
 0x32d   :  { %1660 = vmatpush.msrb.mxu3 %v8488_v14 }
 0x32e   :  { %1554 = vmatpush.msra.mxu1 %v5724_v55 }
 0x32f   :  { %1661 = vmatpush.msrb.mxu3 %v8489_v17 }
 0x330   :  { %1555 = vmatpush.msra.mxu1 %v5730_v18  ;;  %v8493_v18 = vld [vmem:[#allocation40_spill] sm:$0xff] }
 0x331   :  { %1662 = vmatpush.msrb.mxu3 %v8490_v36 }
 0x332   :  { %1556 = vmatpush.msra.mxu1 %v5736_v24  ;;  %v8494_v24 = vld [vmem:[#allocation32_spill] sm:$0xff] }
 0x333   :  { %1663 = vmatpush.msrb.mxu3 %v8491_v23 }
 0x334   :  { %1557 = vmatpush.msra.mxu1 %v5742_v31  ;;  %v1275_v55 = vpop.f32.mrf.mxu2  ;;  %v146_v31 = vadd.f32 %v8494_v24, %v8493_v18  ;;  %v8498_v18 = vld [vmem:[#allocation39_spill] sm:$0xff] }
 0x335   :  { %1664 = vmatpush.msrb.mxu3 %v8492_v0 }
 0x336   :  { %v1276_v6 = vadd.f32 %v1275_v55, %v146_v31 }
 0x337   :  { %1792 = vmatpush.msra.mxu3 %v5878_v54 }
 0x338   :  { %v3593_v57 = vmul.f32 -1.442695, %v1276_v6  ;;  %v6202_v6 = vld [vmem:[%s8055_s9] ss:$0 sm:$0xff] }
 0x339   :  { %1793 = vmatpush.msra.mxu3 %v5896_v39  ;;  %8497 = vst [vmem:[#allocation34_spill] sm:$0xff] %v6202_v6 }
 0x33a   :  { %3721 = vpow2.f32 %v3593_v57 }
 0x33b   :  { %1794 = vmatpush.msra.mxu3 %v5914_v41 }
 0x33d   :  { %1795 = vmatpush.msra.mxu3 %v5932_v27 }
 0x33f   :  { %1796 = vmatpush.msra.mxu3 %v5947_v25 }
 0x340   :  { %v3722_v50 = vpop.eup %3721 }
 0x341   :  { %1797 = vmatpush.msra.mxu3 %v5965_v1  ;;  %v1347_v37 = vadd.f32 1.0, %v3722_v50 }
 0x343   :  { %1798 = vmatpush.msra.mxu3 %v5983_v33  ;;  %3723 = vrcp.f32 %v1347_v37  ;;  %v8501_v33 = vld [vmem:[#allocation33_spill] sm:$0xff]  ;;  %vm1355_vm0 = vweird.f32 %v1347_v37 }
 0x345   :  { %1799 = vmatpush.msra.mxu3 %v6001_v10  ;;  %v8500_v10 = vld [vmem:[#allocation53_spill] sm:$0xff] }
 0x346   :  { %v187_v1 = vadd.f32 %v8501_v33, %v8500_v10 }
 0x347   :  { %1800 = vmatpush.msra.mxu3 %v6019_v38 }
 0x349   :  { %1801 = vmatpush.msra.mxu3 %v6037_v47 }
 0x34b   :  { %1802 = vmatpush.msra.mxu3 %v6050_v7  ;;  %v3724_v7 = vpop.eup %3723 }
 0x34c   :  { %vm1356_vm15 = vweird.f32 %v3724_v7 }
 0x34d   :  { %1803 = vmatpush.msra.mxu3 %v6063_v51  ;;  %vm1357_vm1 = vmor %vm1355_vm0, %vm1356_vm15 }
 0x34f   :  { %1804 = vmatpush.msra.mxu3 %v6076_v32 }
 0x351   :  { %1805 = vmatpush.msra.mxu3 %v6089_v48  ;;  %v8495_v48 = vld [vmem:[#allocation10_spill] sm:$0xff] }
 0x353   :  { %1806 = vmatpush.msra.mxu3 %v6101_v61  ;;  %v1351_v61 = vmul.f32 %v3724_v7, %v1347_v37 }
 0x355   :  { %1807 = vmatpush.msra.mxu3 %v6113_v40  ;;  %v1352_v57 = vsub.f32 1.0, %v1351_v61 }
 0x372   :  { %v1096_v51 = vpop.f32.mrf.mxu1 }
 0x373   :  { %v1097_v32 = vadd.f32 %v1096_v51, %v1053_v58  ;;  %v1186_v47 = vpop.f32.mrf.mxu0  ;;  %v8499_v58 = vld [vmem:[#allocation35_spill] sm:$0xff] }
 0x374   :  { %v269_v51 = vadd.f32 %v8499_v58, %v8498_v18  ;;  %v1359_v18 = vand.u32 2147483647, %v1347_v37 }
 0x375   :  { %v6196_v38 = vadd.f32 %v1097_v32, %v8495_v48  ;;  %v1353_v48 = vmul.f32 %v3724_v7, %v1352_v57 }
 0x376   :  { %vm1360_vm2 = vcmp.eq.f32.partialorder %v1359_v18, 8.507059e+37 }
 0x377   :  { %8496 = vst [vmem:[#allocation25_spill] sm:$0xff] %v6196_v38  ;;  %3725 = vtanh.f32 %v6196_v38  ;;  %v1354_v63 = vadd.f32 %v3724_v7, %v1353_v48 }
 0x378   :  { %v1076_v40 = vpop.f32.mrf.mxu3 }
 0x379   :  { %v1358_v57 = vsel %vm1357_vm1, %v3724_v7, %v1354_v63 }
 0x37a   :  { %v1209_v50 = vpop.f32.mrf.mxu1 }
 0x37b   :  { %v1210_v55 = vadd.f32 %v1209_v50, %v1186_v47  ;;  %v1361_v50 = vand.u32 2147483648, %v1347_v37 }
 0x37c   :  { %v1335_v24 = vpop.f32.mrf.mxu0 }
 0x37d   :  { %v3726_v31 = vpop.eup %3725  ;;  %v6207_v32 = vadd.f32 %v6202_v6, %v1210_v55  ;;  %v1336_v38 = vadd.f32 %v1335_v24, %v269_v51 }
 0x37e   :  { %1142 = vrot.lane.b32.xlu2 %v3726_v31, %s4265_s6  ;;  %v1362_v31 = vor.u32 1.1754944e-38, %v1361_v50 }
 0x37f   :  { %3727 = vtanh.f32 %v6207_v32 }
 0x380   :  { %3729 = vtanh.f32 %v1336_v38  ;;  %v1363_v24 = vsel %vm1360_vm2, %v1362_v31, %v1358_v57  ;;  %v8502_v38 = vld [vmem:[#allocation36_spill] sm:$0xff] }
 0x381   :  { %v1295_v61 = vpop.f32.mrf.mxu3 }
 0x382   :  { %v1296_v47 = vadd.f32 %v1295_v61, %v187_v1 }
 0x384   :  { %v3594_v58 = vmul.f32 -1.442695, %v1296_v47 }
 0x385   :  { %v3728_v55 = vpop.eup %3727 }
 0x386   :  { %3731 = vpow2.f32 %v3594_v58  ;;  %1239 = vrot.lane.b32.xlu1 %v3728_v55, %s4266_s22  ;;  %v3730_v33 = vpop.eup %3729 }
 0x387   :  { %v1397_v51 = vmul.f32 %v3730_v33, %v1363_v24 }
 0x38c   :  { %v3732_v48 = vpop.eup %3731 }
 0x38d   :  { %v1348_v6 = vadd.f32 1.0, %v3732_v48 }
 0x38f   :  { %3733 = vrcp.f32 %v1348_v6  ;;  %v1376_v7 = vand.u32 2147483648, %v1348_v6  ;;  %v1374_v58 = vand.u32 2147483647, %v1348_v6  ;;  %vm1370_vm4 = vweird.f32 %v1348_v6 }
 0x391   :  { %v1377_v57 = vor.u32 1.1754944e-38, %v1376_v7  ;;  %vm1375_vm6 = vcmp.eq.f32.partialorder %v1374_v58, 8.507059e+37 }
 0x392   :  { %v1315_v1 = vpop.f32.mrf.mxu1 }
 0x393   :  { %v1316_v61 = vadd.f32 %v1315_v1, %v8502_v38 }
 0x395   :  { %v3734_v37 = vpop.eup %3733  ;;  %v3595_v47 = vmul.f32 -1.442695, %v1316_v61  ;;  %v8503_v61 = vld [vmem:[#allocation15_spill] sm:$0xff] }
 0x396   :  { %v1366_v10 = vmul.f32 %v3734_v37, %v1348_v6  ;;  %vm1371_vm3 = vweird.f32 %v3734_v37 }
 0x397   :  { %3735 = vpow2.f32 %v3595_v47  ;;  %vm1372_vm5 = vmor %vm1370_vm4, %vm1371_vm3 }
 0x398   :  { %v1367_v63 = vsub.f32 1.0, %v1366_v10  ;;  %v1077_v10 = vadd.f32 %v1076_v40, %v6187_v20 }
 0x39a   :  { %v1368_v50 = vmul.f32 %v3734_v37, %v1367_v63  ;;  %v1099_v47 = vadd.f32 %v1077_v10, %v8503_v61 }
 0x39c   :  { %v1369_v55 = vadd.f32 %v3734_v37, %v1368_v50  ;;  %v3589_v7 = vmul.f32 -1.442695, %v1099_v47  ;;  %v8511_v47 = vld [vmem:[#allocation71_spill] sm:$0xff] }
 0x39d   :  { %v3736_v18 = vpop.eup %3735 }
 0x39e   :  { %v1373_v31 = vsel %vm1372_vm5, %v3734_v37, %v1369_v55  ;;  %v1349_v33 = vadd.f32 1.0, %v3736_v18 }
 0x39f   :  { %v1378_v24 = vsel %vm1375_vm6, %v1377_v57, %v1373_v31 }
 0x3a0   :  { %v1396_v48 = vmul.f32 %v1378_v24, %v5635_v4  ;;  %3737 = vrcp.f32 %v1349_v33  ;;  %v1391_v6 = vand.u32 2147483648, %v1349_v33  ;;  %v1389_v58 = vand.u32 2147483647, %v1349_v33  ;;  %v8508_v24 = vld [vmem:[#allocation67_spill] sm:$0xff] }
 0x3a1   :  { %vm1385_vm8 = vweird.f32 %v1349_v33 }
 0x3a2   :  { %v6216_v1 = vadd.f32 %v1397_v51, %v1396_v48  ;;  %v1392_v4 = vor.u32 1.1754944e-38, %v1391_v6  ;;  %vm1390_vm10 = vcmp.eq.f32.partialorder %v1389_v58, 8.507059e+37  ;;  %v8509_v48 = vld [vmem:[#allocation69_spill] sm:$0xff]  ;;  %v8513_v6 = vld [vmem:[#allocation74_spill] sm:$0xff] }
 0x3a3   :  { %v8515_v58 = vld [vmem:[#allocation77_spill] sm:$0xff] }
 0x3a4   :  { %3739 = vtanh.f32 %v6216_v1 }
 0x3a5   :  { %3741 = vpow2.f32 %v3589_v7 }
 0x3a6   :  { %v3738_v38 = vpop.eup %3737 }
 0x3a7   :  { %v1381_v63 = vmul.f32 %v3738_v38, %v1349_v33  ;;  %vm1386_vm7 = vweird.f32 %v3738_v38 }
 0x3a8   :  { %vm1387_vm9 = vmor %vm1385_vm8, %vm1386_vm7  ;;  %vm1189_vm8 = vcmask 261120  }
 0x3a9   :  { %v1382_v50 = vsub.f32 1.0, %v1381_v63 }
 0x3aa   :  { %v3740_v40 = vpop.eup %3739 }
 0x3ab   :  { %v1383_v37 = vmul.f32 %v3738_v38, %v1382_v50  ;;  %v3742_v57 = vpop.eup %3741  ;;  %v8512_v50 = vld [vmem:[#allocation83_spill] sm:$0xff] }
 0x3ac   :  { %v1107_v31 = vadd.f32 1.0, %v3742_v57 }
 0x3ad   :  { %v1384_v55 = vadd.f32 %v3738_v38, %v1383_v37  ;;  %v8514_v37 = vld [vmem:[#allocation85_spill] sm:$0xff] }
 0x3ae   :  { %3743 = vrcp.f32 %v1107_v31  ;;  %vm1114_vm12 = vweird.f32 %v1107_v31 }
 0x3af   :  { %v1388_v51 = vsel %vm1387_vm9, %v3738_v38, %v1384_v55  ;;  %v8510_v38 = vld [vmem:[#allocation81_spill] sm:$0xff] }
 0x3b0   :  { %v1393_v20 = vsel %vm1390_vm10, %v1392_v4, %v1388_v51 }
 0x3b1   :  { %v6221_v18 = vmul.f32 %v3740_v40, %v1393_v20 }
 0x3b3   :  { %1645 = vmatmul.f32.vlgmr.msrb.gmra.mxu2 %v6221_v18  ;;  %1665 = vmatmul.f32.vlgmr.msrb.gmra.mxu3 %v6221_v18 }
 0x3b4   :  { %2020 = vmatpush.msrb.mxu2 %v5461_v45  ;;  %2040 = vmatpush.msrb.mxu3 %v5872_v49  ;;  %v3744_v45 = vpop.eup %3743 }
 0x3b5   :  { %vm1115_vm11 = vweird.f32 %v3744_v45 }
 0x3b6   :  { %2021 = vmatpush.msrb.mxu2 %v5473_v53  ;;  %2041 = vmatpush.msrb.mxu3 %v5890_v59  ;;  %v1110_v53 = vmul.f32 %v3744_v45, %v1107_v31  ;;  %vm1116_vm13 = vmor %vm1114_vm12, %vm1115_vm11 }
 0x3b8   :  { %2022 = vmatpush.msrb.mxu2 %v5485_v62  ;;  %2042 = vmatpush.msrb.mxu3 %v5908_v2  ;;  %v1111_v62 = vsub.f32 1.0, %v1110_v53  ;;  %v8516_v53 = vld [vmem:[#allocation19_spill] sm:$0xff] }
 0x3ba   :  { %2023 = vmatpush.msrb.mxu2 %v5497_v9  ;;  %2043 = vmatpush.msrb.mxu3 %v5926_v8  ;;  %v3592_v9 = vmul.f32 -1.442695, %v6207_v32  ;;  %v6289_v32 = vld [vmem:[%s8051_s5] sm:$0xff] }
 0x3bb   :  { %1788 = vmatmul.f32.vlgmr.msra.gmra.mxu2 %v6221_v18  ;;  %1808 = vmatmul.f32.vlgmr.msra.gmra.mxu3 %v6221_v18 }
 0x3bc   :  { %2024 = vmatpush.msrb.mxu2 %v5509_v22  ;;  %2044 = vmatpush.msrb.mxu3 %v5940_v28  ;;  %v1112_v22 = vmul.f32 %v3744_v45, %v1111_v62  ;;  %3745 = vpow2.f32 %v3592_v9 }
 0x3be   :  { %2025 = vmatpush.msrb.mxu2 %v5521_v16  ;;  %2045 = vmatpush.msrb.mxu3 %v5953_v11  ;;  %v1113_v16 = vadd.f32 %v3744_v45, %v1112_v22 }
 0x3c0   :  { %2026 = vmatpush.msrb.mxu2 %v5533_v5  ;;  %2046 = vmatpush.msrb.mxu3 %v5971_v19  ;;  %v1120_v5 = vand.u32 2147483648, %v1107_v31 }
 0x3c2   :  { %2027 = vmatpush.msrb.mxu2 %v5545_v42  ;;  %2047 = vmatpush.msrb.mxu3 %v5989_v46  ;;  %v1118_v42 = vand.u32 2147483647, %v1107_v31 }
 0x3c4   :  { %2028 = vmatpush.msrb.mxu2 %v8485_v30  ;;  %2048 = vmatpush.msrb.mxu3 %v6007_v44  ;;  %v3746_v30 = vpop.eup %3745  ;;  %vm1119_vm15 = vcmp.eq.f32.partialorder %v1118_v42, 8.507059e+37 }
 0x3c6   :  { %2029 = vmatpush.msrb.mxu2 %v8486_v56  ;;  %2049 = vmatpush.msrb.mxu3 %v6025_v29  ;;  %v1117_v56 = vsel %vm1116_vm13, %v3744_v45, %v1113_v16 }
 0x3c8   :  { %2030 = vmatpush.msrb.mxu2 %v8487_v13  ;;  %2050 = vmatpush.msrb.mxu3 %v6044_v35  ;;  %v1121_v13 = vor.u32 1.1754944e-38, %v1120_v5 }
 0x3ca   :  { %2031 = vmatpush.msrb.mxu2 %v8488_v14  ;;  %2051 = vmatpush.msrb.mxu3 %v6057_v15 }
 0x3cc   :  { %2032 = vmatpush.msrb.mxu2 %v8489_v17  ;;  %2052 = vmatpush.msrb.mxu3 %v6070_v26  ;;  %v1122_v17 = vsel %vm1119_vm15, %v1121_v13, %v1117_v56  ;;  %v8517_v13 = vld [vmem:[#allocation25_spill] sm:$0xff] }
 0x3cd   :  { %v1140_v62 = vmul.f32 %v1122_v17, %v8516_v53  ;;  %v8534_v53 = vld [vmem:[#allocation60_spill] sm:$0xff] }
 0x3ce   :  { %2033 = vmatpush.msrb.mxu2 %v8490_v36  ;;  %2053 = vmatpush.msrb.mxu3 %v6083_v12  ;;  %v1220_v36 = vadd.f32 1.0, %v3746_v30 }
 0x3d0   :  { %2034 = vmatpush.msrb.mxu2 %v8491_v23  ;;  %2054 = vmatpush.msrb.mxu3 %v6095_v3  ;;  %3747 = vrcp.f32 %v1220_v36  ;;  %v1232_v4 = vand.u32 2147483648, %v1220_v36  ;;  %vm1226_vm1 = vweird.f32 %v1220_v36  ;;  %v1230_v51 = vand.u32 2147483647, %v1220_v36 }
 0x3d2   :  { %2035 = vmatpush.msrb.mxu2 %v8492_v0  ;;  %2055 = vmatpush.msrb.mxu3 %v6107_v43  ;;  %v8506_v0 = vld [vmem:[#allocation65_spill] sm:$0xff]  ;;  %v1233_v20 = vor.u32 1.1754944e-38, %v1232_v4  ;;  %vm1231_vm3 = vcmp.eq.f32.partialorder %v1230_v51, 8.507059e+37 }
 0x3d3   :  { %v8523_v4 = vld [vmem:[#allocation45_spill] sm:$0xff] }
 0x3d4   :  { %2163 = vmatpush.msra.mxu2 %v5878_v54  ;;  %2194 = vmatpush.msra.mxu3 %v6121_v60  ;;  %v8504_v54 = vld [vmem:[#allocation18_spill] sm:$0xff]  ;;  %v8531_v51 = vld [vmem:[#allocation17_spill] sm:$0xff] }
 0x3d6   :  { %2164 = vmatpush.msra.mxu2 %v5896_v39  ;;  %2195 = vmatpush.msra.mxu3 %v6128_v52  ;;  %v8505_v39 = vld [vmem:[#allocation62_spill] sm:$0xff]  ;;  %v3748_v33 = vpop.eup %3747 }
 0x3d7   :  { %v1222_v10 = vmul.f32 %v3748_v33, %v1220_v36  ;;  %vm1227_vm0 = vweird.f32 %v3748_v33 }
 0x3d8   :  { %2165 = vmatpush.msra.mxu2 %v5914_v41  ;;  %2196 = vmatpush.msra.mxu3 %v6135_v34  ;;  %v1143_v14 = vpop.permute.xlu2 %1142  ;;  %v6275_v41 = vld [vmem:[%s8051_s5 + $0x20] sm:$0xff]  ;;  %vm1228_vm2 = vmor %vm1226_vm1, %vm1227_vm0 }
 0x3d9   :  { %v1145_v23 = vmul.f32 %v1143_v14, %v1122_v17  ;;  %v1223_v63 = vsub.f32 1.0, %v1222_v10  ;;  %v3590_v14 = vmul.f32 -1.442695, %v8517_v13  ;;  %v8542_v13 = vld [vmem:[#allocation23_spill] sm:$0xff] }
 0x3da   :  { %2166 = vmatpush.msra.mxu2 %v5932_v27  ;;  %2197 = vmatpush.msra.mxu3 %v6142_v21  ;;  %v6282_v27 = vld [vmem:[%s8051_s5 + $0x10] sm:$0xff] }
 0x3db   :  { %1147 = vrot.lane.b32.xlu0 %v1145_v23, %s4265_s6  ;;  %v1224_v7 = vmul.f32 %v3748_v33, %v1223_v63 }
 0x3dc   :  { %2167 = vmatpush.msra.mxu2 %v5947_v25  ;;  %2198 = vmatpush.msra.mxu3 %v8504_v54  ;;  %v8507_v25 = vld [vmem:[#allocation66_spill] sm:$0xff] }
 0x3dd   :  { %v1225_v55 = vadd.f32 %v3748_v33, %v1224_v7  ;;  %v8519_v7 = vld [vmem:[#allocation20_spill] sm:$0xff] }
 0x3de   :  { %2168 = vmatpush.msra.mxu2 %v8505_v39  ;;  %2199 = vmatpush.msra.mxu3 %v6275_v41 }
 0x3df   :  { %v1229_v40 = vsel %vm1228_vm2, %v3748_v33, %v1225_v55  ;;  %v8522_v55 = vld [vmem:[#allocation7_spill] sm:$0xff] }
 0x3e0   :  { %2169 = vmatpush.msra.mxu2 %v8506_v0  ;;  %2200 = vmatpush.msra.mxu3 %v6282_v27  ;;  %v6300_v31 = vsel %vm1231_vm3, %v1233_v20, %v1229_v40  ;;  %v8532_v40 = vld [vmem:[#allocation59_spill] sm:$0xff] }
 0x3e1   :  { %v1237_v16 = vmul.f32 0.0, %v6300_v31 }
 0x3e2   :  { %2170 = vmatpush.msra.mxu2 %v8507_v25  ;;  %2201 = vmatpush.msra.mxu3 %v6289_v32 }
 0x3e4   :  { %2171 = vmatpush.msra.mxu2 %v8508_v24 }
 0x3e6   :  { %2172 = vmatpush.msra.mxu2 %v8509_v48 }
 0x3e8   :  { %2173 = vmatpush.msra.mxu2 %v8510_v38 }
 0x3ea   :  { %2174 = vmatpush.msra.mxu2 %v8511_v47 }
 0x3ec   :  { %2175 = vmatpush.msra.mxu2 %v8512_v50 }
 0x3ee   :  { %2176 = vmatpush.msra.mxu2 %v8513_v6  ;;  %v8518_v6 = vld [vmem:[#allocation6_spill] sm:$0xff] }
 0x3f0   :  { %2177 = vmatpush.msra.mxu2 %v8514_v37  ;;  %v8520_v37 = vld [vmem:[#allocation80_spill] sm:$0xff] }
 0x3f2   :  { %2178 = vmatpush.msra.mxu2 %v8515_v58  ;;  %v8521_v58 = vld [vmem:[#allocation22_spill] sm:$0xff] }
 0x3f8   :  { %v1240_v57 = vpop.permute.xlu1 %1239 }
 0x3f9   :  { %v1242_v45 = vmul.f32 %v1240_v57, %v6300_v31 }
 0x3fb   :  { %1244 = vrot.lane.b32.xlu2 %v1242_v45, %s4266_s22  ;;  %v8533_v45 = vld [vmem:[#allocation21_spill] sm:$0xff] }
 0x44d   :  { %v1148_v9 = vpop.permute.xlu0 %1147 }
 0x44e   :  { %v6305_v22 = vadd.f32 %v1148_v9, %v1140_v62  ;;  %v8535_v62 = vld [vmem:[#allocation24_spill] sm:$0xff]  ;;  %v8536_v9 = vld [vmem:[#allocation61_spill] sm:$0xff] }
 0x450   :  { %3749 = vtanh.f32 %v6305_v22 }
 0x455   :  { %v1245_v42 = vpop.permute.xlu2 %1244 }
 0x456   :  { %v3750_v5 = vpop.eup %3749  ;;  %v6309_v56 = vadd.f32 %v1245_v42, %v1237_v16  ;;  %v8537_v16 = vld [vmem:[#allocation68_spill] sm:$0xff] }
 0x457   :  { %1153 = vrot.lane.b32.xlu2 %v3750_v5, %s4265_s6  ;;  %v8538_v5 = vld [vmem:[#allocation70_spill] sm:$0xff]  ;;  %v8539_v42 = vld [vmem:[#allocation72_spill] sm:$0xff] }
 0x458   :  { %3751 = vtanh.f32 %v6309_v56 }
 0x459   :  { %3753 = vpow2.f32 %v3590_v14  ;;  %v8543_v14 = vld [vmem:[#allocation8_spill] sm:$0xff] }
 0x45e   :  { %v3752_v30 = vpop.eup %3751 }
 0x45f   :  { %1250 = vrot.lane.b32.xlu1 %v3752_v30, %s4266_s22  ;;  %v3754_v17 = vpop.eup %3753  ;;  %v8541_v30 = vld [vmem:[#allocation79_spill] sm:$0xff] }
 0x460   :  { %v1108_v36 = vadd.f32 1.0, %v3754_v17  ;;  %v8544_v17 = vld [vmem:[#allocation51_spill] sm:$0xff] }
 0x462   :  { %3755 = vrcp.f32 %v1108_v36  ;;  %v1135_v24 = vand.u32 2147483648, %v1108_v36  ;;  %vm1129_vm5 = vweird.f32 %v1108_v36  ;;  %v1133_v48 = vand.u32 2147483647, %v1108_v36 }
 0x464   :  { %v1136_v38 = vor.u32 1.1754944e-38, %v1135_v24  ;;  %vm1134_vm7 = vcmp.eq.f32.partialorder %v1133_v48, 8.507059e+37 }
 0x468   :  { %v3756_v23 = vpop.eup %3755 }
 0x469   :  { %v1125_v39 = vmul.f32 %v3756_v23, %v1108_v36  ;;  %vm1130_vm4 = vweird.f32 %v3756_v23  ;;  %v8545_v36 = vld [vmem:[#allocation11_spill] sm:$0xff] }
 0x46a   :  { %vm1131_vm6 = vmor %vm1129_vm5, %vm1130_vm4 }
 0x46b   :  { %v1126_v0 = vsub.f32 1.0, %v1125_v39  ;;  %v6365_v39 = vpop.f32.mrf.mxu2 }
 0x46d   :  { %v1127_v25 = vmul.f32 %v3756_v23, %v1126_v0 }
 0x46f   :  { %v1128_v33 = vadd.f32 %v3756_v23, %v1127_v25  ;;  %v8546_v25 = vld [vmem:[#allocation53_spill] sm:$0xff] }
 0x471   :  { %v1132_v10 = vsel %vm1131_vm6, %v3756_v23, %v1128_v33  ;;  %v1438_v23 = vpop.f32.mrf.mxu3  ;;  %v8547_v33 = vld [vmem:[#allocation38_spill] sm:$0xff] }
 0x472   :  { %v1137_v47 = vsel %vm1134_vm7, %v1136_v38, %v1132_v10  ;;  %v190_v24 = vadd.f32 %v8547_v33, %v8546_v25  ;;  %v8548_v10 = vld [vmem:[#allocation40_spill] sm:$0xff]  ;;  %v8549_v38 = vld [vmem:[#allocation37_spill] sm:$0xff] }
 0x473   :  { %v1646_v48 = vpop.f32.mrf.mxu2 }
 0x479   :  { %v1666_v0 = vpop.f32.mrf.mxu3 }
 0x4b1   :  { %v1154_v63 = vpop.permute.xlu2 %1153 }
 0x4b2   :  { %v1156_v50 = vmul.f32 %v1154_v63, %v1137_v47  ;;  %v149_v47 = vadd.f32 %v8549_v38, %v8548_v10  ;;  %v1667_v63 = vadd.f32 %v1666_v0, %v190_v24  ;;  %v6394_v10 = vld [vmem:[%s8053_s7 + $0x38] sm:$0xff] }
 0x4b4   :  { %3596 = vmatmul.msk.f32.vlgmr.msrb.gmra.mxu1 %vm761_vm14, %v1156_v50  ;;  %3597 = vmatmul.msk.f32.vlgmr.msrb.gmra.mxu0 %vm761_vm14, %v1156_v50 }
 0x4b5   :  { %1689 = vmatpush.msrb.mxu1 %v8518_v6  ;;  %1669 = vmatpush.msrb.mxu0 %v5872_v49  ;;  %v8524_v49 = vld [vmem:[#allocation82_spill] sm:$0xff]  ;;  %v3604_v6 = vmul.f32 -1.442695, %v1667_v63 }
 0x4b6   :  { %v6400_v63 = vld [vmem:[%s8053_s7 + $0x30] sm:$0xff] }
 0x4b7   :  { %1690 = vmatpush.msrb.mxu1 %v8519_v7  ;;  %1670 = vmatpush.msrb.mxu0 %v5890_v59  ;;  %v8525_v59 = vld [vmem:[#allocation50_spill] sm:$0xff]  ;;  %3757 = vpow2.f32 %v3604_v6 }
 0x4b9   :  { %1691 = vmatpush.msrb.mxu1 %v8520_v37  ;;  %1671 = vmatpush.msrb.mxu0 %v5908_v2  ;;  %v8526_v2 = vld [vmem:[#allocation9_spill] sm:$0xff] }
 0x4bb   :  { %1692 = vmatpush.msrb.mxu1 %v8521_v58  ;;  %1672 = vmatpush.msrb.mxu0 %v5926_v8  ;;  %v8527_v8 = vld [vmem:[#allocation84_spill] sm:$0xff] }
 0x4bc   :  { %3600 = vmatmul.msk.f32.vlgmr.msra.gmra.mxu1 %vm761_vm14, %v1156_v50  ;;  %v1647_v50 = vadd.f32 %v1646_v48, %v149_v47 }
 0x4bd   :  { %1693 = vmatpush.msrb.mxu1 %v8522_v55  ;;  %1673 = vmatpush.msrb.mxu0 %v5940_v28  ;;  %v8528_v28 = vld [vmem:[#allocation52_spill] sm:$0xff]  ;;  %v8550_v55 = vld [vmem:[#allocation10_spill] sm:$0xff] }
 0x4be   :  { %v3603_v7 = vmul.f32 -1.442695, %v1647_v50 }
 0x4bf   :  { %1694 = vmatpush.msrb.mxu1 %v8523_v4  ;;  %1674 = vmatpush.msrb.mxu0 %v5953_v11  ;;  %v8529_v11 = vld [vmem:[#allocation14_spill] sm:$0xff] }
 0x4c0   :  { %3759 = vpow2.f32 %v3603_v7  ;;  %v6407_v7 = vld [vmem:[%s8053_s7 + $0x28] sm:$0xff] }
 0x4c1   :  { %1695 = vmatpush.msrb.mxu1 %v8524_v49  ;;  %1675 = vmatpush.msrb.mxu0 %v5971_v19  ;;  %v8530_v19 = vld [vmem:[#allocation54_spill] sm:$0xff]  ;;  %v3758_v49 = vpop.eup %3757 }
 0x4c3   :  { %1696 = vmatpush.msrb.mxu1 %v8525_v59  ;;  %1676 = vmatpush.msrb.mxu0 %v5989_v46 }
 0x4c5   :  { %1697 = vmatpush.msrb.mxu1 %v8526_v2  ;;  %1677 = vmatpush.msrb.mxu0 %v6007_v44  ;;  %v1719_v2 = vadd.f32 1.0, %v3758_v49  ;;  %v6427_v49 = vld [vmem:[%s8053_s7 + $0x10] sm:$0xff] }
 0x4c6   :  { %v3760_v59 = vpop.eup %3759 }
 0x4c7   :  { %1698 = vmatpush.msrb.mxu1 %v8527_v8  ;;  %1678 = vmatpush.msrb.mxu0 %v6025_v29  ;;  %v1718_v8 = vadd.f32 1.0, %v3760_v59  ;;  %vm1741_vm10 = vweird.f32 %v1719_v2  ;;  %v6433_v59 = vld [vmem:[%s8053_s7 + $0x8] sm:$0xff] }
 0x4c9   :  { %1699 = vmatpush.msrb.mxu1 %v8528_v28  ;;  %1679 = vmatpush.msrb.mxu0 %v6044_v35  ;;  %vm1726_vm13 = vweird.f32 %v1718_v8 }
 0x4cb   :  { %1700 = vmatpush.msrb.mxu1 %v8529_v11  ;;  %1680 = vmatpush.msrb.mxu0 %v6057_v15 }
 0x4cd   :  { %1701 = vmatpush.msrb.mxu1 %v8530_v19  ;;  %1681 = vmatpush.msrb.mxu0 %v6070_v26 }
 0x4cf   :  { %1702 = vmatpush.msrb.mxu1 %v8531_v51  ;;  %1682 = vmatpush.msrb.mxu0 %v6083_v12 }
 0x4d1   :  { %1703 = vmatpush.msrb.mxu1 %v8532_v40  ;;  %1683 = vmatpush.msrb.mxu0 %v6095_v3  ;;  %v1251_v20 = vpop.permute.xlu1 %1250 }
 0x4d2   :  { %v1253_v57 = vmul.f32 %v1251_v20, %v6300_v31  ;;  %v8540_v31 = vld [vmem:[#allocation75_spill] sm:$0xff] }
 0x4d3   :  { %1704 = vmatpush.msrb.mxu1 %v8533_v45  ;;  %1684 = vmatpush.msrb.mxu0 %v6107_v43 }
 0x4d4   :  { %1705 = vmatmul.f32.vlgmr.msrb.gmra.mxu1 %v6221_v18  ;;  %1563 = vrot.lane.b32.xlu0 %v1253_v57, %s4265_s6 }
 0x4d5   :  { %1843 = vmatpush.msra.mxu1 %v8534_v53 }
 0x4d7   :  { %1844 = vmatpush.msra.mxu1 %v8535_v62 }
 0x4d9   :  { %1845 = vmatpush.msra.mxu1 %v8536_v9 }
 0x4db   :  { %1846 = vmatpush.msra.mxu1 %v8537_v16 }
 0x4dd   :  { %1847 = vmatpush.msra.mxu1 %v8538_v5 }
 0x4df   :  { %1848 = vmatpush.msra.mxu1 %v8539_v42 }
 0x4e1   :  { %1849 = vmatpush.msra.mxu1 %v8540_v31  ;;  %v1747_v31 = vand.u32 2147483648, %v1719_v2 }
 0x4e3   :  { %1850 = vmatpush.msra.mxu1 %v8541_v30  ;;  %v8551_v30 = vld [vmem:[#allocation42_spill] sm:$0xff]  ;;  %v1748_v0 = vor.u32 1.1754944e-38, %v1747_v31 }
 0x4e5   :  { %1950 = vmatpush.msrb.mxu1 %v8542_v13 }
 0x4e7   :  { %1951 = vmatpush.msrb.mxu1 %v8543_v14 }
 0x4e9   :  { %1952 = vmatpush.msrb.mxu1 %v8544_v17  ;;  %v1745_v17 = vand.u32 2147483647, %v1719_v2 }
 0x4eb   :  { %1953 = vmatpush.msrb.mxu1 %v8545_v36  ;;  %v1732_v36 = vand.u32 2147483648, %v1718_v8  ;;  %vm1746_vm0 = vcmp.eq.f32.partialorder %v1745_v17, 8.507059e+37 }
 0x4ed   :  { %v1733_v24 = vor.u32 1.1754944e-38, %v1732_v36 }
 0x531   :  { %v1481_v37 = vpop.f32.mrf.mxu0  ;;  %v6376_v11 = vpop.f32.mrf.mxu1 }
 0x532   :  { %v1482_v58 = vadd.f32 %v1481_v37, %v1438_v23  ;;  %v1730_v23 = vand.u32 2147483647, %v1718_v8 }
 0x534   :  { %v6372_v4 = vadd.f32 %v1482_v58, %v8550_v55  ;;  %vm1731_vm1 = vcmp.eq.f32.partialorder %v1730_v23, 8.507059e+37  ;;  %v6415_v58 = vld [vmem:[%s8053_s7 + $0x20] sm:$0xff] }
 0x536   :  { %3761 = vtanh.f32 %v6372_v4 }
 0x537   :  { %3763 = vrcp.f32 %v1719_v2 }
 0x538   :  { %3765 = vrcp.f32 %v1718_v8 }
 0x539   :  { %v6379_v53 = vpop.f32.mrf.mxu1 }
 0x53c   :  { %v3762_v28 = vpop.eup %3761 }
 0x53d   :  { %1527 = vrot.lane.b32.xlu2 %v3762_v28, %s4265_s6  ;;  %v3764_v19 = vpop.eup %3763 }
 0x53e   :  { %v3766_v51 = vpop.eup %3765  ;;  %v1737_v40 = vmul.f32 %v3764_v19, %v1719_v2  ;;  %vm1742_vm9 = vweird.f32 %v3764_v19  ;;  %v6439_v2 = vld [vmem:[%s8053_s7] sm:$0xff] }
 0x53f   :  { %v1722_v20 = vmul.f32 %v3766_v51, %v1718_v8  ;;  %vm1727_vm11 = vweird.f32 %v3766_v51  ;;  %vm1743_vm12 = vmor %vm1741_vm10, %vm1742_vm9  ;;  %v1462_v8 = vadd.f32 %v6376_v11, %v6365_v39  ;;  %v8553_v11 = vld [vmem:[#allocation41_spill] sm:$0xff] }
 0x540   :  { %v1738_v45 = vsub.f32 1.0, %v1737_v40  ;;  %vm1728_vm15 = vmor %vm1726_vm13, %vm1727_vm11 }
 0x541   :  { %v1723_v62 = vsub.f32 1.0, %v1722_v20  ;;  %v1484_v28 = vadd.f32 %v1462_v8, %v8503_v61 }
 0x542   :  { %v1739_v9 = vmul.f32 %v3764_v19, %v1738_v45 }
 0x543   :  { %v1724_v16 = vmul.f32 %v3766_v51, %v1723_v62 }
 0x544   :  { %v1740_v42 = vadd.f32 %v3764_v19, %v1739_v9 }
 0x545   :  { %v1725_v14 = vadd.f32 %v3766_v51, %v1724_v16  ;;  %v8552_v16 = vld [vmem:[#allocation34_spill] sm:$0xff] }
 0x546   :  { %v1564_v57 = vpop.permute.xlu0 %1563 }
 0x547   :  { %3601 = vmatmul.msk.f32.vlgmr.msra.gmra.mxu0 %vm1189_vm8, %v1564_v57  ;;  %v1729_v33 = vsel %vm1728_vm15, %v3766_v51, %v1725_v14 }
 0x548   :  { %1823 = vmatpush.msra.mxu0 %v6121_v60  ;;  %v1734_v47 = vsel %vm1731_vm1, %v1733_v24, %v1729_v33 }
 0x54a   :  { %1824 = vmatpush.msra.mxu0 %v6128_v52 }
 0x54c   :  { %1825 = vmatpush.msra.mxu0 %v6135_v34 }
 0x54e   :  { %1826 = vmatpush.msra.mxu0 %v6142_v21 }
 0x54f   :  { %1685 = vmatmul.f32.vlgmr.msrb.gmra.mxu0 %v6221_v18  ;;  %v1744_v18 = vsel %vm1743_vm12, %v3764_v19, %v1740_v42  ;;  %v3598_v19 = vmul.f32 -1.442695, %v1484_v28 }
 0x550   :  { %1827 = vmatpush.msra.mxu0 %v8504_v54  ;;  %v1749_v48 = vsel %vm1746_vm0, %v1748_v0, %v1744_v18 }
 0x551   :  { %v1706_v5 = vpop.f32.mrf.mxu1  ;;  %v1767_v50 = vmul.f32 %v1749_v48, %v6216_v1  ;;  %v6421_v1 = vld [vmem:[%s8053_s7 + $0x18] sm:$0xff] }
 0x552   :  { %v1707_v13 = vadd.f32 %v1706_v5, %v8551_v30  ;;  %1828 = vmatpush.msra.mxu0 %v6275_v41 }
 0x554   :  { %3767 = vtanh.f32 %v1707_v13  ;;  %1829 = vmatpush.msra.mxu0 %v6282_v27 }
 0x555   :  { %3769 = vpow2.f32 %v3598_v19 }
 0x556   :  { %1830 = vmatpush.msra.mxu0 %v6289_v32 }
 0x558   :  { %1921 = vmatpush.msrb.mxu0 %v6394_v10 }
 0x55a   :  { %v3768_v38 = vpop.eup %3767  ;;  %1922 = vmatpush.msrb.mxu0 %v6400_v63 }
 0x55b   :  { %v1768_v6 = vmul.f32 %v3768_v38, %v1734_v47  ;;  %v3770_v51 = vpop.eup %3769 }
 0x55c   :  { %1923 = vmatpush.msrb.mxu0 %v6407_v7  ;;  %v1492_v40 = vadd.f32 1.0, %v3770_v51 }
 0x55d   :  { %v6410_v37 = vadd.f32 %v1768_v6, %v1767_v50 }
 0x55e   :  { %1924 = vmatpush.msrb.mxu0 %v6415_v58  ;;  %3771 = vrcp.f32 %v1492_v40  ;;  %v1505_v14 = vand.u32 2147483648, %v1492_v40  ;;  %vm1499_vm3 = vweird.f32 %v1492_v40  ;;  %v1503_v36 = vand.u32 2147483647, %v1492_v40 }
 0x560   :  { %1925 = vmatpush.msrb.mxu0 %v6421_v1  ;;  %v1506_v18 = vor.u32 1.1754944e-38, %v1505_v14  ;;  %vm1504_vm5 = vcmp.eq.f32.partialorder %v1503_v36, 8.507059e+37 }
 0x562   :  { %1926 = vmatpush.msrb.mxu0 %v6427_v49 }
 0x564   :  { %1927 = vmatpush.msrb.mxu0 %v6433_v59  ;;  %v3772_v20 = vpop.eup %3771 }
 0x565   :  { %v1495_v57 = vmul.f32 %v3772_v20, %v1492_v40  ;;  %vm1500_vm2 = vweird.f32 %v3772_v20 }
 0x566   :  { %1928 = vmatpush.msrb.mxu0 %v6439_v2  ;;  %vm1501_vm4 = vmor %vm1499_vm3, %vm1500_vm2 }
 0x567   :  { %v1496_v9 = vsub.f32 1.0, %v1495_v57 }
 0x569   :  { %v1497_v42 = vmul.f32 %v3772_v20, %v1496_v9  ;;  %v6471_v9 = vld [vmem:[%s8048_s2 + $0x1d0] sm:$0xff] }
 0x56b   :  { %v1498_v30 = vadd.f32 %v3772_v20, %v1497_v42  ;;  %v6485_v42 = vld [vmem:[%s8048_s2 + $0x190] sm:$0xff] }
 0x597   :  { %v1528_v23 = vpop.permute.xlu2 %1527 }
 0x5c4   :  { %v1584_v45 = vpop.f32.mrf.mxu0 }
 0x5c5   :  { %v1585_v62 = vadd.f32 %v1584_v45, %v6379_v53  ;;  %v1502_v53 = vsel %vm1501_vm4, %v3772_v20, %v1498_v30 }
 0x5c6   :  { %v6452_v0 = vsel %vm1504_vm5, %v1506_v18, %v1502_v53 }
 0x5c7   :  { %v6447_v5 = vadd.f32 %v8552_v16, %v1585_v62  ;;  %v1530_v33 = vmul.f32 %v1528_v23, %v6452_v0  ;;  %v6464_v62 = vld [vmem:[%s8048_s2 + $0x1f0] sm:$0xff] }
 0x5c8   :  { %v6478_v16 = vld [vmem:[%s8048_s2 + $0x1b0] sm:$0xff] }
 0x5c9   :  { %3773 = vtanh.f32 %v6447_v5 }
 0x5cc   :  { %v1686_v39 = vpop.f32.mrf.mxu0 }
 0x5cd   :  { %v1687_v31 = vadd.f32 %v1686_v39, %v8553_v11  ;;  %v6493_v39 = vld [vmem:[%s8048_s2 + $0x170] sm:$0xff] }
 0x5ce   :  { %v6500_v11 = vld [vmem:[%s8048_s2 + $0x150] sm:$0xff] }
 0x5cf   :  { %v3774_v13 = vpop.eup %3773  ;;  %v3605_v17 = vmul.f32 -1.442695, %v1687_v31  ;;  %v6507_v31 = vld [vmem:[%s8048_s2 + $0x130] sm:$0xff] }
 0x5d0   :  { %1610 = vrot.lane.b32.xlu1 %v3774_v13, %s4266_s22  ;;  %v3599_v13 = vmul.f32 -1.442695, %v6372_v4 }
 0x5d1   :  { %3775 = vpow2.f32 %v3605_v17 }
 0x5d7   :  { %v3776_v24 = vpop.eup %3775 }
 0x5d8   :  { %v1720_v48 = vadd.f32 1.0, %v3776_v24  ;;  %1532 = vrot.lane.b32.xlu1 %v1530_v33, %s4265_s6 }
 0x5da   :  { %3777 = vrcp.f32 %v1720_v48  ;;  %v1762_v6 = vand.u32 2147483648, %v1720_v48  ;;  %v1760_v28 = vand.u32 2147483647, %v1720_v48  ;;  %vm1756_vm7 = vweird.f32 %v1720_v48 }
 0x5db   :  { %3779 = vtanh.f32 %v6410_v37 }
 0x5dc   :  { %v1763_v51 = vor.u32 1.1754944e-38, %v1762_v6  ;;  %vm1761_vm10 = vcmp.eq.f32.partialorder %v1760_v28, 8.507059e+37  ;;  %v6552_v28 = vld [vmem:[%s8048_s2 + $0x1f8] sm:$0xff] }
 0x5e0   :  { %v3778_v38 = vpop.eup %3777 }
 0x5e1   :  { %v1752_v47 = vmul.f32 %v3778_v38, %v1720_v48  ;;  %vm1757_vm6 = vweird.f32 %v3778_v38  ;;  %v3780_v20 = vpop.eup %3779 }
 0x5e2   :  { %vm1758_vm9 = vmor %vm1756_vm7, %vm1757_vm6 }
 0x5e3   :  { %v1753_v50 = vsub.f32 1.0, %v1752_v47 }
 0x5e5   :  { %v1754_v8 = vmul.f32 %v3778_v38, %v1753_v50 }
 0x5e7   :  { %v1755_v19 = vadd.f32 %v3778_v38, %v1754_v8 }
 0x5e9   :  { %v1759_v40 = vsel %vm1758_vm9, %v3778_v38, %v1755_v19  ;;  %v6558_v19 = vld [vmem:[%s8048_s2 + $0x1e0] sm:$0xff] }
 0x5ea   :  { %v1764_v57 = vsel %vm1761_vm10, %v1763_v51, %v1759_v40  ;;  %v6564_v51 = vld [vmem:[%s8048_s2 + $0x1d8] sm:$0xff]  ;;  %v6570_v40 = vld [vmem:[%s8048_s2 + $0x1c0] sm:$0xff] }
 0x5eb   :  { %v6457_v45 = vmul.f32 %v3780_v20, %v1764_v57  ;;  %v6576_v20 = vld [vmem:[%s8048_s2 + $0x1b8] sm:$0xff]  ;;  %v6582_v57 = vld [vmem:[%s8048_s2 + $0x1a0] sm:$0xff] }
 0x5ed   :  { %2036 = vmatmul.f32.vlgmr.msrb.gmra.mxu2 %v6457_v45  ;;  %2056 = vmatmul.f32.vlgmr.msrb.gmra.mxu3 %v6457_v45 }
 0x5ee   :  { %2411 = vmatpush.msrb.mxu2 %v6464_v62  ;;  %2292 = vmatpush.msrb.mxu3 %v6394_v10 }
 0x5f0   :  { %2412 = vmatpush.msrb.mxu2 %v6471_v9  ;;  %2293 = vmatpush.msrb.mxu3 %v6400_v63 }
 0x5f2   :  { %2413 = vmatpush.msrb.mxu2 %v6478_v16  ;;  %2294 = vmatpush.msrb.mxu3 %v6407_v7 }
 0x5f4   :  { %2414 = vmatpush.msrb.mxu2 %v6485_v42  ;;  %2295 = vmatpush.msrb.mxu3 %v6415_v58 }
 0x5f5   :  { %2179 = vmatmul.f32.vlgmr.msra.gmra.mxu2 %v6457_v45 }
 0x5f6   :  { %2415 = vmatpush.msrb.mxu2 %v6493_v39  ;;  %2296 = vmatpush.msrb.mxu3 %v6421_v1 }
 0x5f8   :  { %2416 = vmatpush.msrb.mxu2 %v6500_v11  ;;  %2297 = vmatpush.msrb.mxu3 %v6427_v49 }
 0x5fa   :  { %2417 = vmatpush.msrb.mxu2 %v6507_v31  ;;  %2298 = vmatpush.msrb.mxu3 %v6433_v59 }
 0x5fc   :  { %2418 = vmatpush.msrb.mxu2 %v5989_v46  ;;  %2299 = vmatpush.msrb.mxu3 %v6439_v2 }
 0x5fe   :  { %2419 = vmatpush.msrb.mxu2 %v6007_v44 }
 0x600   :  { %2420 = vmatpush.msrb.mxu2 %v6025_v29 }
 0x602   :  { %2421 = vmatpush.msrb.mxu2 %v6044_v35  ;;  %v3602_v35 = vmul.f32 -1.442695, %v6447_v5 }
 0x604   :  { %2422 = vmatpush.msrb.mxu2 %v6057_v15  ;;  %3781 = vpow2.f32 %v3602_v35  ;;  %v6588_v35 = vld [vmem:[%s8048_s2 + $0x198] sm:$0xff] }
 0x606   :  { %2423 = vmatpush.msrb.mxu2 %v6070_v26 }
 0x608   :  { %2424 = vmatpush.msrb.mxu2 %v6083_v12 }
 0x60a   :  { %2425 = vmatpush.msrb.mxu2 %v6095_v3  ;;  %v3782_v15 = vpop.eup %3781 }
 0x60b   :  { %v1591_v26 = vadd.f32 1.0, %v3782_v15  ;;  %v6594_v15 = vld [vmem:[%s8048_s2 + $0x180] sm:$0xff] }
 0x60c   :  { %2426 = vmatpush.msrb.mxu2 %v6107_v43 }
 0x60d   :  { %3783 = vrcp.f32 %v1591_v26  ;;  %vm1597_vm12 = vweird.f32 %v1591_v26  ;;  %v1601_v29 = vand.u32 2147483647, %v1591_v26 }
 0x60e   :  { %2565 = vmatpush.msra.mxu2 %v6121_v60 }
 0x60f   :  { %vm1602_vm15 = vcmp.eq.f32.partialorder %v1601_v29, 8.507059e+37  ;;  %v6643_v29 = vld [vmem:[%s8048_s2 + $0x100] sm:$0xff] }
 0x610   :  { %2566 = vmatpush.msra.mxu2 %v6128_v52 }
 0x612   :  { %2567 = vmatpush.msra.mxu2 %v6135_v34 }
 0x613   :  { %v3784_v60 = vpop.eup %3783 }
 0x614   :  { %2568 = vmatpush.msra.mxu2 %v6142_v21  ;;  %v1593_v52 = vmul.f32 %v3784_v60, %v1591_v26  ;;  %vm1598_vm11 = vweird.f32 %v3784_v60  ;;  %v1603_v21 = vand.u32 2147483648, %v1591_v26  ;;  %v6601_v26 = vld [vmem:[%s8048_s2 + $0x178] sm:$0xff] }
 0x615   :  { %vm1599_vm13 = vmor %vm1597_vm12, %vm1598_vm11 }
 0x616   :  { %2569 = vmatpush.msra.mxu2 %v8504_v54  ;;  %v1594_v12 = vsub.f32 1.0, %v1593_v52  ;;  %v1604_v46 = vor.u32 1.1754944e-38, %v1603_v21  ;;  %v6613_v52 = vld [vmem:[%s8048_s2 + $0x158] sm:$0xff] }
 0x617   :  { %v6637_v21 = vld [vmem:[%s8048_s2 + $0x118] sm:$0xff] }
 0x618   :  { %2570 = vmatpush.msra.mxu2 %v6275_v41  ;;  %v1595_v43 = vmul.f32 %v3784_v60, %v1594_v12  ;;  %v6619_v12 = vld [vmem:[%s8048_s2 + $0x140] sm:$0xff] }
 0x61a   :  { %2571 = vmatpush.msra.mxu2 %v6282_v27  ;;  %v1596_v3 = vadd.f32 %v3784_v60, %v1595_v43  ;;  %v1525_v27 = vmul.f32 %v6452_v0, %v6305_v22  ;;  %v6625_v43 = vld [vmem:[%s8048_s2 + $0x138] sm:$0xff] }
 0x61c   :  { %2572 = vmatpush.msra.mxu2 %v6289_v32  ;;  %v1600_v44 = vsel %vm1599_vm13, %v3784_v60, %v1596_v3  ;;  %v6607_v60 = vld [vmem:[%s8048_s2 + $0x160] sm:$0xff] }
 0x61d   :  { %v6530_v54 = vsel %vm1602_vm15, %v1604_v46, %v1600_v44  ;;  %v6631_v3 = vld [vmem:[%s8048_s2 + $0x120] sm:$0xff]  ;;  %v6649_v44 = vld [vmem:[%s8048_s2 + $0xf8] sm:$0xff] }
 0x61e   :  { %v1608_v23 = vmul.f32 %v6530_v54, %v6309_v56  ;;  %v6655_v46 = vld [vmem:[%s8048_s2 + $0xe0] sm:$0xff] }
 0x642   :  { %v1611_v34 = vpop.permute.xlu1 %1610 }
 0x643   :  { %v1613_v41 = vmul.f32 %v1611_v34, %v6530_v54  ;;  %v6661_v34 = vld [vmem:[%s8048_s2 + $0xd8] sm:$0xff] }
 0x644   :  { %8554 = vst [vmem:[#allocation26_spill] sm:$0xff] %v6661_v34 }
 0x645   :  { %1615 = vrot.lane.b32.xlu0 %v1613_v41, %s4266_s22  ;;  %v6667_v41 = vld [vmem:[%s8048_s2 + $0xc0] sm:$0xff] }
 0x646   :  { %8555 = vst [vmem:[#allocation27_spill] sm:$0xff] %v6667_v41 }
 0x64a   :  { %v1533_v32 = vpop.permute.xlu1 %1532 }
 0x64b   :  { %v6536_v5 = vadd.f32 %v1533_v32, %v1525_v27  ;;  %v6673_v27 = vld [vmem:[%s8048_s2 + $0xb8] sm:$0xff]  ;;  %v6679_v32 = vld [vmem:[%s8048_s2 + $0xa0] sm:$0xff] }
 0x64c   :  { %8556 = vst [vmem:[#allocation30_spill] sm:$0xff] %v6673_v27 }
 0x64d   :  { %3785 = vtanh.f32 %v6536_v5  ;;  %8557 = vst [vmem:[#allocation28_spill] sm:$0xff] %v6679_v32 }
 0x64e   :  { %3787 = vpow2.f32 %v3599_v13  ;;  %v6691_v13 = vld [vmem:[%s8048_s2 + $0x80] sm:$0xff] }
 0x64f   :  { %8559 = vst [vmem:[#allocation31_spill] sm:$0xff] %v6691_v13 }
 0x653   :  { %v3786_v30 = vpop.eup %3785 }
 0x654   :  { %1538 = vrot.lane.b32.xlu0 %v3786_v30, %s4265_s6  ;;  %v3788_v14 = vpop.eup %3787  ;;  %v6685_v30 = vld [vmem:[%s8048_s2 + $0x98] sm:$0xff] }
 0x655   :  { %v1493_v17 = vadd.f32 1.0, %v3788_v14  ;;  %8558 = vst [vmem:[#allocation29_spill] sm:$0xff] %v6685_v30  ;;  %v6697_v14 = vld [vmem:[%s8048_s2 + $0x78] sm:$0xff] }
 0x656   :  { %8560 = vst [vmem:[#allocation73_spill] sm:$0xff] %v6697_v14 }
 0x657   :  { %3789 = vrcp.f32 %v1493_v17  ;;  %v1520_v4 = vand.u32 2147483648, %v1493_v17  ;;  %vm1514_vm1 = vweird.f32 %v1493_v17  ;;  %v1518_v38 = vand.u32 2147483647, %v1493_v17 }
 0x659   :  { %v1521_v50 = vor.u32 1.1754944e-38, %v1520_v4  ;;  %vm1519_vm3 = vcmp.eq.f32.partialorder %v1518_v38, 8.507059e+37  ;;  %v6758_v4 = vld [vmem:[%s8051_s5 + $0x58] sm:$0xff]  ;;  %v6764_v38 = vld [vmem:[%s8051_s5 + $0x48] sm:$0xff] }
 0x65a   :  { %8570 = vst [vmem:[#allocation35_spill] sm:$0xff] %v6758_v4 }
 0x65b   :  { %8571 = vst [vmem:[#allocation33_spill] sm:$0xff] %v6764_v38 }
 0x65d   :  { %v3790_v36 = vpop.eup %3789 }
 0x65e   :  { %v1510_v53 = vmul.f32 %v3790_v36, %v1493_v17  ;;  %vm1515_vm0 = vweird.f32 %v3790_v36  ;;  %v6703_v17 = vld [vmem:[%s8048_s2 + $0x60] sm:$0xff] }
 0x65f   :  { %vm1516_vm2 = vmor %vm1514_vm1, %vm1515_vm0  ;;  %8561 = vst [vmem:[#allocation12_spill] sm:$0xff] %v6703_v17 }
 0x660   :  { %v1511_v18 = vsub.f32 1.0, %v1510_v53  ;;  %v6715_v53 = vld [vmem:[%s8048_s2 + $0x40] sm:$0xff] }
 0x661   :  { %8563 = vst [vmem:[#allocation13_spill] sm:$0xff] %v6715_v53 }
 0x662   :  { %v1512_v33 = vmul.f32 %v3790_v36, %v1511_v18  ;;  %v6733_v18 = vld [vmem:[%s8048_s2 + $0x18] sm:$0xff] }
 0x663   :  { %8566 = vst [vmem:[#allocation16_spill] sm:$0xff] %v6733_v18 }
 0x664   :  { %v1513_v24 = vadd.f32 %v3790_v36, %v1512_v33  ;;  %v6739_v33 = vld [vmem:[%s8048_s2] sm:$0xff] }
 0x665   :  { %8567 = vst [vmem:[#allocation78_spill] sm:$0xff] %v6739_v33 }
 0x666   :  { %v1517_v47 = vsel %vm1516_vm2, %v3790_v36, %v1513_v24  ;;  %v6709_v36 = vld [vmem:[%s8048_s2 + $0x58] sm:$0xff] }
 0x667   :  { %v1522_v56 = vsel %vm1519_vm3, %v1521_v50, %v1517_v47  ;;  %8562 = vst [vmem:[#allocation4_spill] sm:$0xff] %v6709_v36  ;;  %v6746_v24 = vld [vmem:[%s8051_s5 + $0x78] sm:$0xff]  ;;  %v6776_v50 = vld [vmem:[%s8051_s5 + $0x28] sm:$0xff] }
 0x668   :  { %8568 = vst [vmem:[#allocation32_spill] sm:$0xff] %v6746_v24  ;;  %v6770_v47 = vld [vmem:[%s8051_s5 + $0x38] sm:$0xff] }
 0x669   :  { %8572 = vst [vmem:[#allocation36_spill] sm:$0xff] %v6770_v47 }
 0x66a   :  { %8573 = vst [vmem:[#allocation18_spill] sm:$0xff] %v6776_v50 }
 0x6b7   :  { %v1616_v22 = vpop.permute.xlu0 %1615 }
 0x6b8   :  { %v6543_v0 = vadd.f32 %v1616_v22, %v1608_v23  ;;  %v6721_v23 = vld [vmem:[%s8048_s2 + $0x38] sm:$0xff]  ;;  %v6727_v22 = vld [vmem:[%s8048_s2 + $0x20] sm:$0xff] }
 0x6b9   :  { %8564 = vst [vmem:[#allocation76_spill] sm:$0xff] %v6721_v23 }
 0x6ba   :  { %3791 = vtanh.f32 %v6543_v0  ;;  %8565 = vst [vmem:[#allocation5_spill] sm:$0xff] %v6727_v22 }
 0x6c0   :  { %v3792_v48 = vpop.eup %3791 }
 0x6c1   :  { %1621 = vrot.lane.b32.xlu2 %v3792_v48, %s4266_s22  ;;  %v6752_v48 = vld [vmem:[%s8051_s5 + $0x68] sm:$0xff] }
 0x6c2   :  { %8569 = vst [vmem:[#allocation39_spill] sm:$0xff] %v6752_v48 }
 0x6c6   :  { %v1539_v6 = vpop.permute.xlu0 %1538 }
 0x6c7   :  { %v1541_v8 = vmul.f32 %v1539_v6, %v1522_v56  ;;  %v6782_v56 = vld [vmem:[%s8051_s5 + $0x18] sm:$0xff]  ;;  %v6788_v6 = vld [vmem:[%s8051_s5 + $0x8] sm:$0xff] }
 0x6c8   :  { %8574 = vst [vmem:[#allocation62_spill] sm:$0xff] %v6782_v56 }
 0x6c9   :  { %3606 = vmatmul.msk.f32.vlgmr.msra.gmra.mxu0 %vm761_vm14, %v1541_v8  ;;  %3607 = vmatmul.msk.f32.vlgmr.msra.gmra.mxu1 %vm761_vm14, %v1541_v8  ;;  %8575 = vst [vmem:[#allocation65_spill] sm:$0xff] %v6788_v6 }
 0x6ca   :  { %2060 = vmatpush.msra.mxu0 %v6552_v28  ;;  %2000 = vmatpush.msra.mxu1 %v6558_v19 }
 0x6cc   :  { %2061 = vmatpush.msra.mxu0 %v6564_v51  ;;  %2001 = vmatpush.msra.mxu1 %v6570_v40 }
 0x6ce   :  { %2062 = vmatpush.msra.mxu0 %v6576_v20  ;;  %2002 = vmatpush.msra.mxu1 %v6582_v57 }
 0x6d0   :  { %2063 = vmatpush.msra.mxu0 %v6588_v35  ;;  %2003 = vmatpush.msra.mxu1 %v6594_v15 }
 0x6d1   :  { %3610 = vmatmul.msk.f32.vlgmr.msrb.gmra.mxu0 %vm761_vm14, %v1541_v8  ;;  %v6794_v8 = vld [vmem:[%s8054_s8 + $0x18] sm:$0xff] }
 0x6d2   :  { %2064 = vmatpush.msra.mxu0 %v6601_v26  ;;  %2004 = vmatpush.msra.mxu1 %v6607_v60  ;;  %8576 = vst [vmem:[#allocation66_spill] sm:$0xff] %v6794_v8 }
 0x6d4   :  { %2065 = vmatpush.msra.mxu0 %v6613_v52  ;;  %2005 = vmatpush.msra.mxu1 %v6619_v12 }
 0x6d6   :  { %2066 = vmatpush.msra.mxu0 %v6625_v43  ;;  %2006 = vmatpush.msra.mxu1 %v6631_v3 }
 0x6d8   :  { %2067 = vmatpush.msra.mxu0 %v6637_v21  ;;  %2007 = vmatpush.msra.mxu1 %v6643_v29 }
 0x6da   :  { %2068 = vmatpush.msra.mxu0 %v6649_v44  ;;  %2008 = vmatpush.msra.mxu1 %v6655_v46 }
 0x6dc   :  { %2069 = vmatpush.msra.mxu0 %v6661_v34  ;;  %2009 = vmatpush.msra.mxu1 %v6667_v41 }
 0x6de   :  { %2070 = vmatpush.msra.mxu0 %v6673_v27  ;;  %2010 = vmatpush.msra.mxu1 %v6679_v32 }
 0x6e0   :  { %2071 = vmatpush.msra.mxu0 %v6685_v30  ;;  %2011 = vmatpush.msra.mxu1 %v6691_v13 }
 0x6e2   :  { %2072 = vmatpush.msra.mxu0 %v6697_v14  ;;  %2012 = vmatpush.msra.mxu1 %v6703_v17 }
 0x6e4   :  { %2073 = vmatpush.msra.mxu0 %v6709_v36  ;;  %2013 = vmatpush.msra.mxu1 %v6715_v53 }
 0x6e6   :  { %2074 = vmatpush.msra.mxu0 %v6721_v23  ;;  %2014 = vmatpush.msra.mxu1 %v6727_v22 }
 0x6e8   :  { %2075 = vmatpush.msra.mxu0 %v6733_v18  ;;  %2015 = vmatpush.msra.mxu1 %v6739_v33  ;;  %v8629_v18 = vld [vmem:[#allocation46_spill] sm:$0xff] }
 0x6e9   :  { %2076 = vmatmul.f32.vlgmr.msra.gmra.mxu0 %v6457_v45 }
 0x6ea   :  { %2214 = vmatpush.msrb.mxu0 %v6746_v24 }
 0x6ec   :  { %2215 = vmatpush.msrb.mxu0 %v6752_v48 }
 0x6ee   :  { %2216 = vmatpush.msrb.mxu0 %v6758_v4 }
 0x6f0   :  { %2217 = vmatpush.msrb.mxu0 %v6764_v38 }
 0x6f2   :  { %2218 = vmatpush.msrb.mxu0 %v6770_v47 }
 0x6f4   :  { %2219 = vmatpush.msrb.mxu0 %v6776_v50  ;;  %v6800_v50 = vld [vmem:[%s8054_s8 + $0x10] sm:$0xff] }
 0x6f5   :  { %8577 = vst [vmem:[#allocation67_spill] sm:$0xff] %v6800_v50 }
 0x6f6   :  { %2220 = vmatpush.msrb.mxu0 %v6782_v56  ;;  %v6806_v56 = vld [vmem:[%s8054_s8 + $0x8] sm:$0xff] }
 0x6f7   :  { %8578 = vst [vmem:[#allocation69_spill] sm:$0xff] %v6806_v56 }
 0x6f8   :  { %2221 = vmatpush.msrb.mxu0 %v6788_v6  ;;  %v6812_v6 = vld [vmem:[%s8054_s8] sm:$0xff] }
 0x6f9   :  { %8579 = vst [vmem:[#allocation81_spill] sm:$0xff] %v6812_v6 }
 0x6fa   :  { %2321 = vmatpush.msra.mxu0 %v6794_v8 }
 0x6fc   :  { %2322 = vmatpush.msra.mxu0 %v6800_v50  ;;  %v1809_v50 = vpop.f32.mrf.mxu3 }
 0x6fe   :  { %2323 = vmatpush.msra.mxu0 %v6806_v56 }
 0x700   :  { %2324 = vmatpush.msra.mxu0 %v6812_v6 }
 0x71b   :  { %v1622_v8 = vpop.permute.xlu2 %1621 }
 0x71c   :  { %v1624_v47 = vmul.f32 %v1622_v8, %v6530_v54  ;;  %v6826_v54 = vld [vmem:[%s8050_s4 + $0xf0] sm:$0xff]  ;;  %v6869_v8 = vld [vmem:[%s8050_s4 + $0x80] sm:$0xff] }
 0x71d   :  { %8580 = vst [vmem:[#allocation71_spill] sm:$0xff] %v6826_v54 }
 0x71e   :  { %1934 = vrot.lane.b32.xlu1 %v1624_v47, %s4265_s6  ;;  %v6851_v47 = vld [vmem:[%s8050_s4 + $0xb0] sm:$0xff]  ;;  %8587 = vst [vmem:[#allocation6_spill] sm:$0xff] %v6869_v8 }
 0x71f   :  { %8584 = vst [vmem:[#allocation77_spill] sm:$0xff] %v6851_v47 }
 0x746   :  { %v1852_v38 = vpop.f32.mrf.mxu1 }
 0x747   :  { %v1853_v4 = vadd.f32 %v1852_v38, %v1809_v50  ;;  %v6838_v38 = vld [vmem:[%s8050_s4 + $0xd0] sm:$0xff]  ;;  %v6857_v50 = vld [vmem:[%s8050_s4 + $0xa0] sm:$0xff] }
 0x748   :  { %8582 = vst [vmem:[#allocation74_spill] sm:$0xff] %v6838_v38 }
 0x749   :  { %v6818_v48 = vadd.f32 %v1853_v4, %v8550_v55  ;;  %v6832_v4 = vld [vmem:[%s8050_s4 + $0xe0] sm:$0xff]  ;;  %8585 = vst [vmem:[#allocation19_spill] sm:$0xff] %v6857_v50 }
 0x74a   :  { %8581 = vst [vmem:[#allocation83_spill] sm:$0xff] %v6832_v4 }
 0x74b   :  { %3793 = vtanh.f32 %v6818_v48 }
 0x751   :  { %v3794_v56 = vpop.eup %3793 }
 0x752   :  { %1898 = vrot.lane.b32.xlu0 %v3794_v56, %s4265_s6  ;;  %v6863_v56 = vld [vmem:[%s8050_s4 + $0x90] sm:$0xff] }
 0x753   :  { %8586 = vst [vmem:[#allocation25_spill] sm:$0xff] %v6863_v56 }
 0x790   :  { %v1935_v24 = vpop.permute.xlu1 %1934 }
 0x791   :  { %3611 = vmatmul.msk.f32.vlgmr.msrb.gmra.mxu1 %vm1189_vm8, %v1935_v24  ;;  %v6844_v24 = vld [vmem:[%s8050_s4 + $0xc0] sm:$0xff] }
 0x792   :  { %2143 = vmatpush.msrb.mxu1 %v6826_v54  ;;  %8583 = vst [vmem:[#allocation85_spill] sm:$0xff] %v6844_v24 }
 0x794   :  { %2144 = vmatpush.msrb.mxu1 %v6832_v4  ;;  %v8628_v4 = vld [vmem:[#allocation43_spill] sm:$0xff] }
 0x795   :  { %v193_v54 = vadd.f32 %v8628_v4, %v8546_v25  ;;  %v7120_v4 = vld [vmem:[%s8055_s9] ss:$0 sm:$0xff] }
 0x796   :  { %2145 = vmatpush.msrb.mxu1 %v6838_v38  ;;  %8630 = vst [vmem:[#allocation43_spill] sm:$0xff] %v7120_v4 }
 0x798   :  { %2146 = vmatpush.msrb.mxu1 %v6844_v24 }
 0x799   :  { %2016 = vmatmul.f32.vlgmr.msra.gmra.mxu1 %v6457_v45 }
 0x79a   :  { %2147 = vmatpush.msrb.mxu1 %v6851_v47  ;;  %v6875_v47 = vld [vmem:[%s8050_s4 + $0x70] sm:$0xff] }
 0x79b   :  { %8588 = vst [vmem:[#allocation20_spill] sm:$0xff] %v6875_v47 }
 0x79c   :  { %2148 = vmatpush.msrb.mxu1 %v6857_v50  ;;  %v6881_v50 = vld [vmem:[%s8050_s4 + $0x60] sm:$0xff] }
 0x79d   :  { %8589 = vst [vmem:[#allocation80_spill] sm:$0xff] %v6881_v50 }
 0x79e   :  { %2149 = vmatpush.msrb.mxu1 %v6863_v56  ;;  %v6887_v56 = vld [vmem:[%s8050_s4 + $0x50] sm:$0xff] }
 0x79f   :  { %8590 = vst [vmem:[#allocation22_spill] sm:$0xff] %v6887_v56 }
 0x7a0   :  { %2150 = vmatpush.msrb.mxu1 %v6869_v8  ;;  %v6893_v8 = vld [vmem:[%s8050_s4 + $0x40] sm:$0xff] }
 0x7a1   :  { %8591 = vst [vmem:[#allocation7_spill] sm:$0xff] %v6893_v8 }
 0x7a2   :  { %2151 = vmatpush.msrb.mxu1 %v6875_v47  ;;  %v6899_v47 = vld [vmem:[%s8050_s4 + $0x30] sm:$0xff] }
 0x7a3   :  { %8592 = vst [vmem:[#allocation45_spill] sm:$0xff] %v6899_v47 }
 0x7a4   :  { %2152 = vmatpush.msrb.mxu1 %v6881_v50  ;;  %v6905_v50 = vld [vmem:[%s8050_s4 + $0x20] sm:$0xff] }
 0x7a5   :  { %8593 = vst [vmem:[#allocation82_spill] sm:$0xff] %v6905_v50 }
 0x7a6   :  { %2153 = vmatpush.msrb.mxu1 %v6887_v56  ;;  %v6911_v56 = vld [vmem:[%s8050_s4 + $0x10] sm:$0xff] }
 0x7a7   :  { %8594 = vst [vmem:[#allocation50_spill] sm:$0xff] %v6911_v56 }
 0x7a8   :  { %2154 = vmatpush.msrb.mxu1 %v6893_v8  ;;  %v6917_v8 = vld [vmem:[%s8050_s4] sm:$0xff] }
 0x7a9   :  { %8595 = vst [vmem:[#allocation9_spill] sm:$0xff] %v6917_v8 }
 0x7aa   :  { %2155 = vmatpush.msrb.mxu1 %v6899_v47  ;;  %v7086_v47 = vld [vmem:[%s8050_s4 + $0x48] sm:$0xff] }
 0x7ab   :  { %8623 = vst [vmem:[#allocation88_spill] sm:$0xff] %v7086_v47 }
 0x7ac   :  { %2156 = vmatpush.msrb.mxu1 %v6905_v50  ;;  %v6924_v50 = vld [vmem:[%s8048_s2 + $0x1e8] sm:$0xff] }
 0x7ad   :  { %8596 = vst [vmem:[#allocation84_spill] sm:$0xff] %v6924_v50 }
 0x7ae   :  { %2157 = vmatpush.msrb.mxu1 %v6911_v56  ;;  %v6930_v56 = vld [vmem:[%s8048_s2 + $0x1c8] sm:$0xff] }
 0x7af   :  { %8597 = vst [vmem:[#allocation52_spill] sm:$0xff] %v6930_v56 }
 0x7b0   :  { %2158 = vmatpush.msrb.mxu1 %v6917_v8  ;;  %v6936_v8 = vld [vmem:[%s8048_s2 + $0x1a8] sm:$0xff] }
 0x7b1   :  { %2159 = vmatmul.f32.vlgmr.msrb.gmra.mxu1 %v6457_v45  ;;  %8598 = vst [vmem:[#allocation14_spill] sm:$0xff] %v6936_v8  ;;  %v6942_v45 = vld [vmem:[%s8048_s2 + $0x188] sm:$0xff] }
 0x7b2   :  { %2391 = vmatpush.msra.mxu1 %v6924_v50  ;;  %8599 = vst [vmem:[#allocation54_spill] sm:$0xff] %v6942_v45  ;;  %v6948_v50 = vld [vmem:[%s8048_s2 + $0x168] sm:$0xff] }
 0x7b3   :  { %8600 = vst [vmem:[#allocation17_spill] sm:$0xff] %v6948_v50 }
 0x7b4   :  { %2392 = vmatpush.msra.mxu1 %v6930_v56  ;;  %v6954_v56 = vld [vmem:[%s8048_s2 + $0x148] sm:$0xff] }
 0x7b5   :  { %8601 = vst [vmem:[#allocation59_spill] sm:$0xff] %v6954_v56 }
 0x7b6   :  { %2393 = vmatpush.msra.mxu1 %v6936_v8  ;;  %v6960_v8 = vld [vmem:[%s8048_s2 + $0x128] sm:$0xff] }
 0x7b7   :  { %8602 = vst [vmem:[#allocation21_spill] sm:$0xff] %v6960_v8 }
 0x7b8   :  { %2394 = vmatpush.msra.mxu1 %v6942_v45  ;;  %v6966_v45 = vld [vmem:[%s8048_s2 + $0x108] sm:$0xff] }
 0x7b9   :  { %8603 = vst [vmem:[#allocation60_spill] sm:$0xff] %v6966_v45 }
 0x7ba   :  { %2395 = vmatpush.msra.mxu1 %v6948_v50  ;;  %v6972_v50 = vld [vmem:[%s8048_s2 + $0xe8] sm:$0xff] }
 0x7bb   :  { %8604 = vst [vmem:[#allocation24_spill] sm:$0xff] %v6972_v50 }
 0x7bc   :  { %2396 = vmatpush.msra.mxu1 %v6954_v56  ;;  %v6978_v56 = vld [vmem:[%s8048_s2 + $0xc8] sm:$0xff] }
 0x7bd   :  { %8605 = vst [vmem:[#allocation61_spill] sm:$0xff] %v6978_v56 }
 0x7be   :  { %2397 = vmatpush.msra.mxu1 %v6960_v8  ;;  %v6984_v8 = vld [vmem:[%s8048_s2 + $0xa8] sm:$0xff] }
 0x7bf   :  { %8606 = vst [vmem:[#allocation68_spill] sm:$0xff] %v6984_v8 }
 0x7c0   :  { %2398 = vmatpush.msra.mxu1 %v6966_v45  ;;  %v6990_v45 = vld [vmem:[%s8048_s2 + $0x88] sm:$0xff] }
 0x7c1   :  { %8607 = vst [vmem:[#allocation70_spill] sm:$0xff] %v6990_v45 }
 0x7c2   :  { %2399 = vmatpush.msra.mxu1 %v6972_v50  ;;  %v6996_v50 = vld [vmem:[%s8048_s2 + $0x68] sm:$0xff] }
 0x7c3   :  { %8608 = vst [vmem:[#allocation72_spill] sm:$0xff] %v6996_v50 }
 0x7c4   :  { %2400 = vmatpush.msra.mxu1 %v6978_v56  ;;  %v7002_v56 = vld [vmem:[%s8048_s2 + $0x48] sm:$0xff] }
 0x7c5   :  { %8609 = vst [vmem:[#allocation75_spill] sm:$0xff] %v7002_v56 }
 0x7c6   :  { %2401 = vmatpush.msra.mxu1 %v6984_v8  ;;  %v7008_v8 = vld [vmem:[%s8048_s2 + $0x28] sm:$0xff] }
 0x7c7   :  { %8610 = vst [vmem:[#allocation79_spill] sm:$0xff] %v7008_v8 }
 0x7c8   :  { %2402 = vmatpush.msra.mxu1 %v6990_v45  ;;  %v7014_v45 = vld [vmem:[%s8048_s2 + $0x8] sm:$0xff] }
 0x7c9   :  { %8611 = vst [vmem:[#allocation23_spill] sm:$0xff] %v7014_v45 }
 0x7ca   :  { %2403 = vmatpush.msra.mxu1 %v6996_v50  ;;  %v7020_v50 = vld [vmem:[%s8050_s4 + $0xf8] sm:$0xff] }
 0x7cb   :  { %8612 = vst [vmem:[#allocation8_spill] sm:$0xff] %v7020_v50 }
 0x7cc   :  { %2404 = vmatpush.msra.mxu1 %v7002_v56  ;;  %v7026_v56 = vld [vmem:[%s8050_s4 + $0xe8] sm:$0xff] }
 0x7cd   :  { %8613 = vst [vmem:[#allocation51_spill] sm:$0xff] %v7026_v56 }
 0x7ce   :  { %2405 = vmatpush.msra.mxu1 %v7008_v8  ;;  %v7032_v8 = vld [vmem:[%s8050_s4 + $0xd8] sm:$0xff] }
 0x7cf   :  { %8614 = vst [vmem:[#allocation11_spill] sm:$0xff] %v7032_v8 }
 0x7d0   :  { %2406 = vmatpush.msra.mxu1 %v7014_v45  ;;  %v7038_v45 = vld [vmem:[%s8050_s4 + $0xc8] sm:$0xff] }
 0x7d1   :  { %8615 = vst [vmem:[#allocation38_spill] sm:$0xff] %v7038_v45 }
 0x7d2   :  { %2534 = vmatpush.msrb.mxu1 %v7020_v50  ;;  %v7044_v50 = vld [vmem:[%s8050_s4 + $0xb8] sm:$0xff] }
 0x7d3   :  { %8616 = vst [vmem:[#allocation40_spill] sm:$0xff] %v7044_v50 }
 0x7d4   :  { %2535 = vmatpush.msrb.mxu1 %v7026_v56  ;;  %v7050_v56 = vld [vmem:[%s8050_s4 + $0xa8] sm:$0xff] }
 0x7d5   :  { %8617 = vst [vmem:[#allocation37_spill] sm:$0xff] %v7050_v56 }
 0x7d6   :  { %2536 = vmatpush.msrb.mxu1 %v7032_v8  ;;  %v7056_v8 = vld [vmem:[%s8050_s4 + $0x98] sm:$0xff] }
 0x7d7   :  { %8618 = vst [vmem:[#allocation42_spill] sm:$0xff] %v7056_v8 }
 0x7d8   :  { %2537 = vmatpush.msrb.mxu1 %v7038_v45  ;;  %v7062_v45 = vld [vmem:[%s8050_s4 + $0x88] sm:$0xff] }
 0x7d9   :  { %8619 = vst [vmem:[#allocation34_spill] sm:$0xff] %v7062_v45 }
 0x7da   :  { %2538 = vmatpush.msrb.mxu1 %v7044_v50  ;;  %v7068_v50 = vld [vmem:[%s8050_s4 + $0x78] sm:$0xff] }
 0x7db   :  { %8620 = vst [vmem:[#allocation41_spill] sm:$0xff] %v7068_v50 }
 0x7dc   :  { %2539 = vmatpush.msrb.mxu1 %v7050_v56  ;;  %v7074_v56 = vld [vmem:[%s8050_s4 + $0x68] sm:$0xff] }
 0x7dd   :  { %8621 = vst [vmem:[#allocation86_spill] sm:$0xff] %v7074_v56 }
 0x7de   :  { %2540 = vmatpush.msrb.mxu1 %v7056_v8  ;;  %v7080_v8 = vld [vmem:[%s8050_s4 + $0x58] sm:$0xff] }
 0x7df   :  { %8622 = vst [vmem:[#allocation87_spill] sm:$0xff] %v7080_v8 }
 0x7e0   :  { %2541 = vmatpush.msrb.mxu1 %v7062_v45  ;;  %v1832_v45 = vpop.f32.mrf.mxu0 }
 0x7e2   :  { %2542 = vmatpush.msrb.mxu1 %v7068_v50  ;;  %v1789_v50 = vpop.f32.mrf.mxu2 }
 0x7e3   :  { %v1833_v24 = vadd.f32 %v1832_v45, %v1789_v50  ;;  %v7111_v50 = vld [vmem:[%s8050_s4 + $0x8] sm:$0xff] }
 0x7e4   :  { %2543 = vmatpush.msrb.mxu1 %v7074_v56  ;;  %v7092_v56 = vld [vmem:[%s8050_s4 + $0x38] sm:$0xff]  ;;  %8627 = vst [vmem:[#allocation92_spill] sm:$0xff] %v7111_v50 }
 0x7e5   :  { %8624 = vst [vmem:[#allocation89_spill] sm:$0xff] %v7092_v56  ;;  %v1855_v38 = vadd.f32 %v1833_v24, %v8503_v61  ;;  %v2057_v24 = vpop.f32.mrf.mxu3 }
 0x7e6   :  { %2544 = vmatpush.msrb.mxu1 %v7080_v8  ;;  %v7098_v8 = vld [vmem:[%s8050_s4 + $0x28] sm:$0xff]  ;;  %v2058_v22 = vadd.f32 %v2057_v24, %v8629_v18 }
 0x7e7   :  { %8625 = vst [vmem:[#allocation90_spill] sm:$0xff] %v7098_v8  ;;  %v3608_v45 = vmul.f32 -1.442695, %v1855_v38 }
 0x7e8   :  { %2545 = vmatpush.msrb.mxu1 %v7086_v47  ;;  %v7104_v47 = vld [vmem:[%s8050_s4 + $0x18] sm:$0xff]  ;;  %v1930_v23 = vpop.f32.mrf.mxu0  ;;  %v3615_v36 = vmul.f32 -1.442695, %v2058_v22 }
 0x7e9   :  { %8626 = vst [vmem:[#allocation91_spill] sm:$0xff] %v7104_v47  ;;  %3795 = vpow2.f32 %v3608_v45 }
 0x7ea   :  { %2546 = vmatpush.msrb.mxu1 %v7092_v56 }
 0x7ec   :  { %2547 = vmatpush.msrb.mxu1 %v7098_v8  ;;  %v2037_v8 = vpop.f32.mrf.mxu2 }
 0x7ed   :  { %v2038_v6 = vadd.f32 %v2037_v8, %v193_v54 }
 0x7ee   :  { %2548 = vmatpush.msrb.mxu1 %v7104_v47 }
 0x7ef   :  { %v3796_v56 = vpop.eup %3795  ;;  %v3614_v47 = vmul.f32 -1.442695, %v2038_v6 }
 0x7f0   :  { %2549 = vmatpush.msrb.mxu1 %v7111_v50  ;;  %v1863_v55 = vadd.f32 1.0, %v3796_v56  ;;  %v8631_v56 = vld [vmem:[#allocation44_spill] sm:$0xff] }
 0x7f2   :  { %3797 = vrcp.f32 %v1863_v55  ;;  %vm1870_vm5 = vweird.f32 %v1863_v55  ;;  %v1874_v24 = vand.u32 2147483647, %v1863_v55 }
 0x7f3   :  { %3799 = vpow2.f32 %v3614_v47 }
 0x7f4   :  { %vm1875_vm7 = vcmp.eq.f32.partialorder %v1874_v24, 8.507059e+37 }
 0x7f8   :  { %v3798_v33 = vpop.eup %3797 }
 0x7f9   :  { %v1866_v61 = vmul.f32 %v3798_v33, %v1863_v55  ;;  %v3800_v50 = vpop.eup %3799  ;;  %vm1871_vm4 = vweird.f32 %v3798_v33 }
 0x7fa   :  { %v2090_v6 = vadd.f32 1.0, %v3800_v50  ;;  %vm1872_vm6 = vmor %vm1870_vm5, %vm1871_vm4 }
 0x7fb   :  { %v1867_v45 = vsub.f32 1.0, %v1866_v61 }
 0x7fc   :  { %vm2112_vm10 = vweird.f32 %v2090_v6 }
 0x7fd   :  { %v1868_v47 = vmul.f32 %v3798_v33, %v1867_v45  ;;  %v1899_v45 = vpop.permute.xlu0 %1898 }
 0x80e   :  { %v1955_v53 = vpop.f32.mrf.mxu1 }
 0x80f   :  { %v1956_v38 = vadd.f32 %v1955_v53, %v1930_v23  ;;  %v1869_v53 = vadd.f32 %v3798_v33, %v1868_v47  ;;  %v1876_v23 = vand.u32 2147483648, %v1863_v55 }
 0x811   :  { %v7123_v54 = vadd.f32 %v7120_v4, %v1956_v38  ;;  %v1873_v4 = vsel %vm1872_vm6, %v3798_v33, %v1869_v53  ;;  %v8632_v53 = vld [vmem:[#allocation47_spill] sm:$0xff] }
 0x813   :  { %3801 = vtanh.f32 %v7123_v54 }
 0x814   :  { %3803 = vpow2.f32 %v3615_v36  ;;  %v1877_v36 = vor.u32 1.1754944e-38, %v1876_v23 }
 0x815   :  { %3805 = vrcp.f32 %v2090_v6 }
 0x816   :  { %v2017_v18 = vpop.f32.mrf.mxu1 }
 0x817   :  { %v2018_v8 = vadd.f32 %v2017_v18, %v8631_v56  ;;  %v7128_v18 = vsel %vm1875_vm7, %v1877_v36, %v1873_v4  ;;  %v2118_v4 = vand.u32 2147483648, %v2090_v6 }
 0x818   :  { %v1901_v47 = vmul.f32 %v1899_v45, %v7128_v18  ;;  %v2116_v45 = vand.u32 2147483647, %v2090_v6 }
 0x819   :  { %v3802_v61 = vpop.eup %3801  ;;  %v3613_v22 = vmul.f32 -1.442695, %v2018_v8  ;;  %v2119_v30 = vor.u32 1.1754944e-38, %v2118_v4 }
 0x81a   :  { %1981 = vrot.lane.b32.xlu2 %v3802_v61, %s4266_s22  ;;  %v3804_v38 = vpop.eup %3803  ;;  %vm2117_vm13 = vcmp.eq.f32.partialorder %v2116_v45, 8.507059e+37 }
 0x81b   :  { %3807 = vpow2.f32 %v3613_v22  ;;  %v3806_v50 = vpop.eup %3805  ;;  %v2091_v17 = vadd.f32 1.0, %v3804_v38  ;;  %v2077_v22 = vpop.f32.mrf.mxu0 }
 0x81c   :  { %v2108_v25 = vmul.f32 %v3806_v50, %v2090_v6  ;;  %v2078_v23 = vadd.f32 %v2077_v22, %v8632_v53  ;;  %vm2113_vm9 = vweird.f32 %v3806_v50 }
 0x81d   :  { %3809 = vrcp.f32 %v2091_v17  ;;  %vm2114_vm11 = vmor %vm2112_vm10, %vm2113_vm9  ;;  %vm2127_vm3 = vweird.f32 %v2091_v17 }
 0x81e   :  { %v2109_v55 = vsub.f32 1.0, %v2108_v25 }
 0x820   :  { %v2110_v61 = vmul.f32 %v3806_v50, %v2109_v55 }
 0x821   :  { %v3808_v56 = vpop.eup %3807 }
 0x822   :  { %v2089_v8 = vadd.f32 1.0, %v3808_v56  ;;  %1903 = vrot.lane.b32.xlu2 %v1901_v47, %s4265_s6  ;;  %v2111_v24 = vadd.f32 %v3806_v50, %v2110_v61 }
 0x823   :  { %v3810_v14 = vpop.eup %3809 }
 0x824   :  { %3811 = vrcp.f32 %v2089_v8  ;;  %v2123_v36 = vmul.f32 %v3810_v14, %v2091_v17  ;;  %v2103_v47 = vand.u32 2147483648, %v2089_v8  ;;  %v2115_v25 = vsel %vm2114_vm11, %v3806_v50, %v2111_v24 }
 0x825   :  { %3813 = vtanh.f32 %v2078_v23  ;;  %v2101_v55 = vand.u32 2147483647, %v2089_v8  ;;  %vm2097_vm15 = vweird.f32 %v2089_v8  ;;  %v2120_v61 = vsel %vm2117_vm13, %v2119_v30, %v2115_v25  ;;  %v7224_v25 = vld [vmem:[%s8051_s5 + $0x10] sm:$0xff] }
 0x826   :  { %v2124_v32 = vsub.f32 1.0, %v2123_v36  ;;  %v2104_v22 = vor.u32 1.1754944e-38, %v2103_v47  ;;  %v2138_v23 = vmul.f32 %v2120_v61, %v6410_v37  ;;  %vm2128_vm2 = vweird.f32 %v3810_v14  ;;  %v7218_v36 = vld [vmem:[%s8051_s5 + $0x20] sm:$0xff] }
 0x827   :  { %vm2102_vm1 = vcmp.eq.f32.partialorder %v2101_v55, 8.507059e+37  ;;  %v2133_v24 = vand.u32 2147483648, %v2091_v17  ;;  %vm2129_vm4 = vmor %vm2127_vm3, %vm2128_vm2  ;;  %v3612_v37 = vmul.f32 -1.442695, %v7123_v54  ;;  %v7212_v54 = vld [vmem:[%s8051_s5 + $0x30] sm:$0xff]  ;;  %v7230_v55 = vld [vmem:[%s8051_s5] sm:$0xff] }
 0x828   :  { %v2125_v6 = vmul.f32 %v3810_v14, %v2124_v32 }
 0x829   :  { %v2134_v4 = vor.u32 1.1754944e-38, %v2133_v24 }
 0x82a   :  { %v3812_v33 = vpop.eup %3811 }
 0x82b   :  { %v2093_v38 = vmul.f32 %v3812_v33, %v2089_v8  ;;  %vm2098_vm12 = vweird.f32 %v3812_v33  ;;  %v3814_v41 = vpop.eup %3813  ;;  %v2131_v8 = vand.u32 2147483647, %v2091_v17 }
 0x82c   :  { %vm2099_vm0 = vmor %vm2097_vm15, %vm2098_vm12 }
 0x82d   :  { %v2094_v13 = vsub.f32 1.0, %v2093_v38  ;;  %vm2132_vm5 = vcmp.eq.f32.partialorder %v2131_v8, 8.507059e+37 }
 0x82f   :  { %v2095_v56 = vmul.f32 %v3812_v33, %v2094_v13  ;;  %v2126_v13 = vadd.f32 %v3810_v14, %v2125_v6 }
 0x831   :  { %v2096_v27 = vadd.f32 %v3812_v33, %v2095_v56  ;;  %v2130_v30 = vsel %vm2129_vm4, %v3810_v14, %v2126_v13  ;;  %v7206_v14 = vld [vmem:[%s8051_s5 + $0x40] sm:$0xff] }
 0x833   :  { %v2100_v53 = vsel %vm2099_vm0, %v3812_v33, %v2096_v27  ;;  %v2135_v33 = vsel %vm2132_vm5, %v2134_v4, %v2130_v30  ;;  %v3609_v30 = vmul.f32 -1.442695, %v6818_v48 }
 0x834   :  { %v2105_v38 = vsel %vm2102_vm1, %v2104_v22, %v2100_v53 }
 0x835   :  { %v2139_v34 = vmul.f32 %v3814_v41, %v2105_v38  ;;  %v7200_v41 = vld [vmem:[%s8051_s5 + $0x50] sm:$0xff] }
 0x837   :  { %v7134_v50 = vadd.f32 %v2139_v34, %v2138_v23  ;;  %v1896_v23 = vmul.f32 %v7128_v18, %v6536_v5 }
 0x839   :  { %3815 = vtanh.f32 %v7134_v50 }
 0x83a   :  { %3817 = vpow2.f32 %v3612_v37 }
 0x83f   :  { %v3816_v27 = vpop.eup %3815 }
 0x840   :  { %v7137_v32 = vmul.f32 %v3816_v27, %v2135_v33 }
 0x842   :  { %2407 = vmatmul.f32.vlgmr.msra.gmra.mxu1 %v7137_v32  ;;  %2427 = vmatmul.f32.vlgmr.msrb.gmra.mxu2 %v7137_v32 }
 0x843   :  { %2782 = vmatpush.msra.mxu1 %v6464_v62  ;;  %2663 = vmatpush.msrb.mxu2 %v6394_v10  ;;  %v3818_v10 = vpop.eup %3817  ;;  %v4168_v62 = vld [vmem:[%s8048_s2 + $0x50] sm:$0xff] }
 0x845   :  { %2783 = vmatpush.msra.mxu1 %v6471_v9  ;;  %2664 = vmatpush.msrb.mxu2 %v6400_v63  ;;  %v4162_v63 = vld [vmem:[%s8048_s2 + $0x110] sm:$0xff] }
 0x847   :  { %2784 = vmatpush.msra.mxu1 %v6478_v16  ;;  %2665 = vmatpush.msrb.mxu2 %v6407_v7  ;;  %v4163_v7 = vld [vmem:[%s8048_s2 + $0xf0] sm:$0xff] }
 0x848   :  { %v4169_v16 = vld [vmem:[%s8048_s2 + $0x30] sm:$0xff] }
 0x849   :  { %2785 = vmatpush.msra.mxu1 %v6485_v42  ;;  %2666 = vmatpush.msrb.mxu2 %v6415_v58  ;;  %v1962_v58 = vadd.f32 1.0, %v3818_v10 }
 0x84a   :  { %2550 = vmatmul.f32.vlgmr.msrb.gmra.mxu1 %v7137_v32 }
 0x84b   :  { %2786 = vmatpush.msra.mxu1 %v6493_v39  ;;  %2667 = vmatpush.msrb.mxu2 %v6421_v1  ;;  %v4164_v1 = vld [vmem:[%s8048_s2 + $0xd0] sm:$0xff]  ;;  %3819 = vrcp.f32 %v1962_v58  ;;  %v1974_v47 = vand.u32 2147483648, %v1962_v58  ;;  %vm1968_vm7 = vweird.f32 %v1962_v58  ;;  %v1972_v56 = vand.u32 2147483647, %v1962_v58 }
 0x84c   :  { %v4170_v39 = vld [vmem:[%s8048_s2 + $0x10] sm:$0xff] }
 0x84d   :  { %2787 = vmatpush.msra.mxu1 %v6500_v11  ;;  %2668 = vmatpush.msrb.mxu2 %v6427_v49  ;;  %v4165_v49 = vld [vmem:[%s8048_s2 + $0xb0] sm:$0xff]  ;;  %v1975_v22 = vor.u32 1.1754944e-38, %v1974_v47  ;;  %vm1973_vm10 = vcmp.eq.f32.partialorder %v1972_v56, 8.507059e+37 }
 0x84e   :  { %v7188_v11 = vld [vmem:[%s8051_s5 + $0x70] sm:$0xff] }
 0x84f   :  { %2788 = vmatpush.msra.mxu1 %v6507_v31  ;;  %2669 = vmatpush.msrb.mxu2 %v6433_v59  ;;  %v4166_v59 = vld [vmem:[%s8048_s2 + $0x90] sm:$0xff]  ;;  %v7194_v31 = vld [vmem:[%s8051_s5 + $0x60] sm:$0xff] }
 0x850   :  { %v8657_v47 = vld [vmem:[#allocation69_spill] sm:$0xff] }
 0x851   :  { %2789 = vmatpush.msra.mxu1 %v4162_v63  ;;  %2670 = vmatpush.msrb.mxu2 %v6439_v2  ;;  %v4167_v2 = vld [vmem:[%s8048_s2 + $0x70] sm:$0xff]  ;;  %v3820_v9 = vpop.eup %3819 }
 0x852   :  { %v1964_v42 = vmul.f32 %v3820_v9, %v1962_v58  ;;  %vm1969_vm6 = vweird.f32 %v3820_v9  ;;  %v8658_v56 = vld [vmem:[#allocation81_spill] sm:$0xff] }
 0x853   :  { %2790 = vmatpush.msra.mxu1 %v4163_v7  ;;  %vm1970_vm9 = vmor %vm1968_vm7, %vm1969_vm6 }
 0x854   :  { %v1965_v34 = vsub.f32 1.0, %v1964_v42  ;;  %v8652_v42 = vld [vmem:[#allocation18_spill] sm:$0xff] }
 0x855   :  { %2791 = vmatpush.msra.mxu1 %v4164_v1 }
 0x856   :  { %v1966_v17 = vmul.f32 %v3820_v9, %v1965_v34  ;;  %v8654_v34 = vld [vmem:[#allocation65_spill] sm:$0xff] }
 0x857   :  { %2792 = vmatpush.msra.mxu1 %v4165_v49 }
 0x858   :  { %v1967_v45 = vadd.f32 %v3820_v9, %v1966_v17  ;;  %v8655_v17 = vld [vmem:[#allocation66_spill] sm:$0xff] }
 0x859   :  { %2793 = vmatpush.msra.mxu1 %v4166_v59 }
 0x85a   :  { %v1971_v61 = vsel %vm1970_vm9, %v3820_v9, %v1967_v45  ;;  %v8656_v45 = vld [vmem:[#allocation67_spill] sm:$0xff] }
 0x85b   :  { %2794 = vmatpush.msra.mxu1 %v4167_v2  ;;  %v7233_v6 = vsel %vm1973_vm10, %v1975_v22, %v1971_v61 }
 0x85c   :  { %v1979_v10 = vmul.f32 %v7233_v6, %v6543_v0 }
 0x85d   :  { %2795 = vmatpush.msra.mxu1 %v4168_v62 }
 0x85f   :  { %2796 = vmatpush.msra.mxu1 %v4169_v16  ;;  %v8651_v16 = vld [vmem:[#allocation36_spill] sm:$0xff] }
 0x861   :  { %2797 = vmatpush.msra.mxu1 %v4170_v39  ;;  %v8653_v39 = vld [vmem:[#allocation62_spill] sm:$0xff] }
 0x863   :  { %2936 = vmatpush.msrb.mxu1 %v7188_v11 }
 0x865   :  { %2937 = vmatpush.msrb.mxu1 %v7194_v31 }
 0x867   :  { %2938 = vmatpush.msrb.mxu1 %v7200_v41 }
 0x869   :  { %2939 = vmatpush.msrb.mxu1 %v7206_v14 }
 0x86b   :  { %2940 = vmatpush.msrb.mxu1 %v7212_v54 }
 0x86d   :  { %2941 = vmatpush.msrb.mxu1 %v7218_v36 }
 0x86f   :  { %2942 = vmatpush.msrb.mxu1 %v7224_v25 }
 0x871   :  { %2943 = vmatpush.msrb.mxu1 %v7230_v55 }
 0x874   :  { %v1982_v53 = vpop.permute.xlu2 %1981 }
 0x875   :  { %v1984_v38 = vmul.f32 %v1982_v53, %v7233_v6  ;;  %v2180_v53 = vpop.f32.mrf.mxu2 }
 0x877   :  { %1986 = vrot.lane.b32.xlu1 %v1984_v38, %s4266_s22 }
 0x87c   :  { %v1904_v13 = vpop.permute.xlu2 %1903 }
 0x87d   :  { %v7239_v24 = vadd.f32 %v1904_v13, %v1896_v23  ;;  %v8659_v13 = vld [vmem:[#allocation10_spill] sm:$0xff] }
 0x87f   :  { %3821 = vtanh.f32 %v7239_v24 }
 0x880   :  { %3823 = vpow2.f32 %v3609_v30 }
 0x885   :  { %v3822_v8 = vpop.eup %3821 }
 0x886   :  { %1909 = vrot.lane.b32.xlu1 %v3822_v8, %s4265_s6  ;;  %v3824_v4 = vpop.eup %3823 }
 0x887   :  { %v1864_v27 = vadd.f32 1.0, %v3824_v4 }
 0x889   :  { %3825 = vrcp.f32 %v1864_v27  ;;  %v1891_v48 = vand.u32 2147483648, %v1864_v27  ;;  %vm1885_vm12 = vweird.f32 %v1864_v27  ;;  %v1889_v49 = vand.u32 2147483647, %v1864_v27 }
 0x88b   :  { %v1892_v2 = vor.u32 1.1754944e-38, %v1891_v48  ;;  %vm1890_vm15 = vcmp.eq.f32.partialorder %v1889_v49, 8.507059e+37  ;;  %v8670_v48 = vld [vmem:[#allocation22_spill] sm:$0xff]  ;;  %v8671_v49 = vld [vmem:[#allocation7_spill] sm:$0xff] }
 0x88f   :  { %v3826_v33 = vpop.eup %3825 }
 0x890   :  { %v1881_v37 = vmul.f32 %v3826_v33, %v1864_v27  ;;  %vm1886_vm11 = vweird.f32 %v3826_v33  ;;  %v8660_v27 = vld [vmem:[#allocation71_spill] sm:$0xff] }
 0x891   :  { %vm1887_vm13 = vmor %vm1885_vm12, %vm1886_vm11 }
 0x892   :  { %v1882_v18 = vsub.f32 1.0, %v1881_v37  ;;  %v8663_v37 = vld [vmem:[#allocation85_spill] sm:$0xff] }
 0x894   :  { %v1883_v7 = vmul.f32 %v3826_v33, %v1882_v18  ;;  %v8666_v18 = vld [vmem:[#allocation25_spill] sm:$0xff] }
 0x896   :  { %v1884_v58 = vadd.f32 %v3826_v33, %v1883_v7  ;;  %v8667_v7 = vld [vmem:[#allocation6_spill] sm:$0xff] }
 0x898   :  { %v1888_v59 = vsel %vm1887_vm13, %v3826_v33, %v1884_v58  ;;  %v8661_v33 = vld [vmem:[#allocation83_spill] sm:$0xff]  ;;  %v8668_v58 = vld [vmem:[#allocation20_spill] sm:$0xff] }
 0x899   :  { %v1893_v0 = vsel %vm1890_vm15, %v1892_v2, %v1888_v59  ;;  %v8672_v59 = vld [vmem:[#allocation45_spill] sm:$0xff]  ;;  %v8673_v2 = vld [vmem:[#allocation82_spill] sm:$0xff] }
 0x8e9   :  { %v1987_v5 = vpop.permute.xlu1 %1986 }
 0x8ea   :  { %v7246_v63 = vadd.f32 %v1987_v5, %v1979_v10  ;;  %v8664_v10 = vld [vmem:[#allocation77_spill] sm:$0xff]  ;;  %v8665_v5 = vld [vmem:[#allocation19_spill] sm:$0xff] }
 0x8ec   :  { %3827 = vtanh.f32 %v7246_v63 }
 0x8f2   :  { %v3828_v1 = vpop.eup %3827 }
 0x8f3   :  { %1992 = vrot.lane.b32.xlu0 %v3828_v1, %s4266_s22  ;;  %v8669_v1 = vld [vmem:[#allocation80_spill] sm:$0xff] }
 0x8f8   :  { %v1910_v62 = vpop.permute.xlu1 %1909 }
 0x8f9   :  { %v1912_v9 = vmul.f32 %v1910_v62, %v1893_v0  ;;  %v8674_v0 = vld [vmem:[#allocation50_spill] sm:$0xff]  ;;  %v8675_v62 = vld [vmem:[#allocation9_spill] sm:$0xff] }
 0x8fb   :  { %3616 = vmatmul.msk.f32.vlgmr.msra.gmra.mxu3 %vm761_vm14, %v1912_v9  ;;  %3617 = vmatmul.msk.f32.vlgmr.msrb.gmra.mxu0 %vm761_vm14, %v1912_v9 }
 0x8fc   :  { %2431 = vmatpush.msra.mxu3 %v6552_v28  ;;  %2371 = vmatpush.msrb.mxu0 %v6558_v19  ;;  %v8633_v28 = vld [vmem:[#allocation26_spill] sm:$0xff]  ;;  %v8634_v19 = vld [vmem:[#allocation27_spill] sm:$0xff] }
 0x8fe   :  { %2432 = vmatpush.msra.mxu3 %v6564_v51  ;;  %2372 = vmatpush.msrb.mxu0 %v6570_v40  ;;  %v8635_v51 = vld [vmem:[#allocation30_spill] sm:$0xff]  ;;  %v8636_v40 = vld [vmem:[#allocation28_spill] sm:$0xff] }
 0x900   :  { %2433 = vmatpush.msra.mxu3 %v6576_v20  ;;  %2373 = vmatpush.msrb.mxu0 %v6582_v57  ;;  %v8637_v20 = vld [vmem:[#allocation29_spill] sm:$0xff]  ;;  %v8638_v57 = vld [vmem:[#allocation31_spill] sm:$0xff] }
 0x902   :  { %2434 = vmatpush.msra.mxu3 %v6588_v35  ;;  %2374 = vmatpush.msrb.mxu0 %v6594_v15  ;;  %v8639_v35 = vld [vmem:[#allocation73_spill] sm:$0xff]  ;;  %v8640_v15 = vld [vmem:[#allocation12_spill] sm:$0xff] }
 0x903   :  { %3620 = vmatmul.msk.f32.vlgmr.msrb.gmra.mxu3 %vm761_vm14, %v1912_v9  ;;  %v8676_v9 = vld [vmem:[#allocation84_spill] sm:$0xff] }
 0x904   :  { %2435 = vmatpush.msra.mxu3 %v6601_v26  ;;  %2375 = vmatpush.msrb.mxu0 %v6607_v60  ;;  %v8641_v26 = vld [vmem:[#allocation4_spill] sm:$0xff]  ;;  %v8642_v60 = vld [vmem:[#allocation13_spill] sm:$0xff] }
 0x906   :  { %2436 = vmatpush.msra.mxu3 %v6613_v52  ;;  %2376 = vmatpush.msrb.mxu0 %v6619_v12  ;;  %v8643_v52 = vld [vmem:[#allocation76_spill] sm:$0xff]  ;;  %v8644_v12 = vld [vmem:[#allocation5_spill] sm:$0xff] }
 0x908   :  { %2437 = vmatpush.msra.mxu3 %v6625_v43  ;;  %2377 = vmatpush.msrb.mxu0 %v6631_v3  ;;  %v8645_v43 = vld [vmem:[#allocation16_spill] sm:$0xff]  ;;  %v8646_v3 = vld [vmem:[#allocation78_spill] sm:$0xff] }
 0x90a   :  { %2438 = vmatpush.msra.mxu3 %v6637_v21  ;;  %2378 = vmatpush.msrb.mxu0 %v6643_v29  ;;  %v8647_v21 = vld [vmem:[#allocation32_spill] sm:$0xff]  ;;  %v8648_v29 = vld [vmem:[#allocation39_spill] sm:$0xff] }
 0x90c   :  { %2439 = vmatpush.msra.mxu3 %v6649_v44  ;;  %2379 = vmatpush.msrb.mxu0 %v6655_v46  ;;  %v8649_v44 = vld [vmem:[#allocation35_spill] sm:$0xff]  ;;  %v8650_v46 = vld [vmem:[#allocation33_spill] sm:$0xff] }
 0x90e   :  { %2440 = vmatpush.msra.mxu3 %v8633_v28  ;;  %2380 = vmatpush.msrb.mxu0 %v8634_v19  ;;  %v8677_v28 = vld [vmem:[#allocation52_spill] sm:$0xff]  ;;  %v8678_v19 = vld [vmem:[#allocation14_spill] sm:$0xff] }
 0x910   :  { %2441 = vmatpush.msra.mxu3 %v8635_v51  ;;  %2381 = vmatpush.msrb.mxu0 %v8636_v40  ;;  %v8679_v51 = vld [vmem:[#allocation54_spill] sm:$0xff]  ;;  %v8680_v40 = vld [vmem:[#allocation17_spill] sm:$0xff] }
 0x912   :  { %2442 = vmatpush.msra.mxu3 %v8637_v20  ;;  %2382 = vmatpush.msrb.mxu0 %v8638_v57  ;;  %v8681_v20 = vld [vmem:[#allocation59_spill] sm:$0xff]  ;;  %v8682_v57 = vld [vmem:[#allocation21_spill] sm:$0xff] }
 0x914   :  { %2443 = vmatpush.msra.mxu3 %v8639_v35  ;;  %2383 = vmatpush.msrb.mxu0 %v8640_v15  ;;  %v8683_v35 = vld [vmem:[#allocation60_spill] sm:$0xff] }
 0x915   :  { %v8684_v15 = vld [vmem:[#allocation24_spill] sm:$0xff] }
 0x916   :  { %2444 = vmatpush.msra.mxu3 %v8641_v26  ;;  %2384 = vmatpush.msrb.mxu0 %v8642_v60  ;;  %v8685_v26 = vld [vmem:[#allocation61_spill] sm:$0xff]  ;;  %v8687_v60 = vld [vmem:[#allocation70_spill] sm:$0xff] }
 0x918   :  { %2445 = vmatpush.msra.mxu3 %v8643_v52  ;;  %2385 = vmatpush.msrb.mxu0 %v8644_v12  ;;  %v8688_v52 = vld [vmem:[#allocation72_spill] sm:$0xff]  ;;  %v8689_v12 = vld [vmem:[#allocation75_spill] sm:$0xff] }
 0x91a   :  { %2446 = vmatpush.msra.mxu3 %v8645_v43  ;;  %2386 = vmatpush.msrb.mxu0 %v8646_v3  ;;  %v8690_v43 = vld [vmem:[#allocation79_spill] sm:$0xff] }
 0x91b   :  { %2447 = vmatmul.f32.vlgmr.msra.gmra.mxu3 %v7137_v32  ;;  %v8691_v3 = vld [vmem:[#allocation23_spill] sm:$0xff] }
 0x91c   :  { %2585 = vmatpush.msrb.mxu3 %v8647_v21  ;;  %v8692_v21 = vld [vmem:[#allocation8_spill] sm:$0xff] }
 0x91e   :  { %2586 = vmatpush.msrb.mxu3 %v8648_v29  ;;  %v8693_v29 = vld [vmem:[#allocation51_spill] sm:$0xff] }
 0x920   :  { %2587 = vmatpush.msrb.mxu3 %v8649_v44  ;;  %v8694_v44 = vld [vmem:[#allocation11_spill] sm:$0xff] }
 0x922   :  { %2588 = vmatpush.msrb.mxu3 %v8650_v46  ;;  %v8695_v46 = vld [vmem:[#allocation38_spill] sm:$0xff] }
 0x924   :  { %2589 = vmatpush.msrb.mxu3 %v8651_v16  ;;  %v8696_v16 = vld [vmem:[#allocation40_spill] sm:$0xff] }
 0x926   :  { %2590 = vmatpush.msrb.mxu3 %v8652_v42  ;;  %v8697_v42 = vld [vmem:[#allocation37_spill] sm:$0xff] }
 0x928   :  { %2591 = vmatpush.msrb.mxu3 %v8653_v39  ;;  %v8698_v39 = vld [vmem:[#allocation42_spill] sm:$0xff] }
 0x92a   :  { %2592 = vmatpush.msrb.mxu3 %v8654_v34  ;;  %v8699_v34 = vld [vmem:[#allocation34_spill] sm:$0xff] }
 0x92c   :  { %2692 = vmatpush.msra.mxu3 %v8655_v17  ;;  %v8700_v17 = vld [vmem:[#allocation41_spill] sm:$0xff] }
 0x92e   :  { %2693 = vmatpush.msra.mxu3 %v8656_v45  ;;  %v8701_v45 = vld [vmem:[#allocation86_spill] sm:$0xff] }
 0x930   :  { %2694 = vmatpush.msra.mxu3 %v8657_v47  ;;  %v8702_v47 = vld [vmem:[#allocation87_spill] sm:$0xff] }
 0x932   :  { %2695 = vmatpush.msra.mxu3 %v8658_v56 }
 0x965   :  { %v1993_v61 = vpop.permute.xlu0 %1992 }
 0x966   :  { %v1995_v22 = vmul.f32 %v1993_v61, %v7233_v6  ;;  %v8662_v6 = vld [vmem:[#allocation74_spill] sm:$0xff]  ;;  %v8703_v61 = vld [vmem:[#allocation88_spill] sm:$0xff] }
 0x968   :  { %2305 = vrot.lane.b32.xlu2 %v1995_v22, %s4265_s6  ;;  %v2160_v22 = vpop.f32.mrf.mxu1 }
 0x978   :  { %v2223_v38 = vpop.f32.mrf.mxu0 }
 0x979   :  { %v2224_v23 = vadd.f32 %v2223_v38, %v2180_v53  ;;  %v8704_v53 = vld [vmem:[#allocation89_spill] sm:$0xff] }
 0x97b   :  { %v7301_v8 = vadd.f32 %v2224_v23, %v8659_v13  ;;  %v8705_v23 = vld [vmem:[#allocation90_spill] sm:$0xff] }
 0x97d   :  { %3829 = vtanh.f32 %v7301_v8 }
 0x97e   :  { %v2203_v56 = vpop.f32.mrf.mxu3 }
 0x97f   :  { %v2204_v38 = vadd.f32 %v2203_v56, %v2160_v22 }
 0x983   :  { %v3830_v30 = vpop.eup %3829 }
 0x984   :  { %2269 = vrot.lane.b32.xlu1 %v3830_v30, %s4265_s6  ;;  %v8706_v30 = vld [vmem:[#allocation91_spill] sm:$0xff] }
 0x9c2   :  { %v2306_v4 = vpop.permute.xlu2 %2305 }
 0x9c3   :  { %3621 = vmatmul.msk.f32.vlgmr.msra.gmra.mxu0 %vm1189_vm8, %v2306_v4  ;;  %v8707_v4 = vld [vmem:[#allocation15_spill] sm:$0xff] }
 0x9c4   :  { %2514 = vmatpush.msra.mxu0 %v8660_v27  ;;  %v2226_v27 = vadd.f32 %v2204_v38, %v8707_v4 }
 0x9c6   :  { %2515 = vmatpush.msra.mxu0 %v8661_v33  ;;  %v8708_v33 = vld [vmem:[#allocation92_spill] sm:$0xff] }
 0x9c8   :  { %2516 = vmatpush.msra.mxu0 %v8662_v6  ;;  %v3618_v6 = vmul.f32 -1.442695, %v2226_v27  ;;  %v8714_v27 = vld [vmem:[#allocation56_spill] sm:$0xff] }
 0x9ca   :  { %2517 = vmatpush.msra.mxu0 %v8663_v37  ;;  %3831 = vpow2.f32 %v3618_v6 }
 0x9cb   :  { %2387 = vmatmul.f32.vlgmr.msrb.gmra.mxu0 %v7137_v32 }
 0x9cc   :  { %2518 = vmatpush.msra.mxu0 %v8664_v10  ;;  %v2408_v10 = vpop.f32.mrf.mxu1 }
 0x9ce   :  { %2519 = vmatpush.msra.mxu0 %v8665_v5  ;;  %v8709_v5 = vld [vmem:[#allocation53_spill] sm:$0xff] }
 0x9d0   :  { %2520 = vmatpush.msra.mxu0 %v8666_v18  ;;  %v3832_v37 = vpop.eup %3831  ;;  %v8710_v18 = vld [vmem:[#allocation48_spill] sm:$0xff] }
 0x9d2   :  { %2521 = vmatpush.msra.mxu0 %v8667_v7  ;;  %v196_v7 = vadd.f32 %v8710_v18, %v8709_v5 }
 0x9d4   :  { %2522 = vmatpush.msra.mxu0 %v8668_v58  ;;  %v2234_v58 = vadd.f32 1.0, %v3832_v37 }
 0x9d6   :  { %2523 = vmatpush.msra.mxu0 %v8669_v1  ;;  %v2409_v1 = vadd.f32 %v2408_v10, %v196_v7  ;;  %3833 = vrcp.f32 %v2234_v58  ;;  %vm2241_vm1 = vweird.f32 %v2234_v58 }
 0x9d8   :  { %2524 = vmatpush.msra.mxu0 %v8670_v48  ;;  %v3624_v48 = vmul.f32 -1.442695, %v2409_v1 }
 0x9da   :  { %2525 = vmatpush.msra.mxu0 %v8671_v49  ;;  %3835 = vpow2.f32 %v3624_v48 }
 0x9dc   :  { %2526 = vmatpush.msra.mxu0 %v8672_v59  ;;  %v3834_v49 = vpop.eup %3833  ;;  %v2428_v59 = vpop.f32.mrf.mxu2 }
 0x9dd   :  { %vm2242_vm0 = vweird.f32 %v3834_v49 }
 0x9de   :  { %2527 = vmatpush.msra.mxu0 %v8673_v2  ;;  %v2237_v2 = vmul.f32 %v3834_v49, %v2234_v58  ;;  %vm2243_vm2 = vmor %vm2241_vm1, %vm2242_vm0 }
 0x9e0   :  { %2528 = vmatpush.msra.mxu0 %v8674_v0  ;;  %v8711_v0 = vld [vmem:[#allocation55_spill] sm:$0xff] }
 0x9e2   :  { %2529 = vmatpush.msra.mxu0 %v8675_v62  ;;  %v2429_v62 = vadd.f32 %v2428_v59, %v8711_v0 }
 0x9e3   :  { %2530 = vmatmul.f32.vlgmr.msra.gmra.mxu0 %v7137_v32  ;;  %v8686_v32 = vld [vmem:[#allocation68_spill] sm:$0xff] }
 0x9e4   :  { %2762 = vmatpush.msrb.mxu0 %v8676_v9  ;;  %v2301_v9 = vpop.f32.mrf.mxu3 }
 0x9e6   :  { %2763 = vmatpush.msrb.mxu0 %v8677_v28 }
 0x9e8   :  { %2764 = vmatpush.msrb.mxu0 %v8678_v19  ;;  %v3836_v19 = vpop.eup %3835 }
 0x9ea   :  { %2765 = vmatpush.msrb.mxu0 %v8679_v51 }
 0x9ec   :  { %2766 = vmatpush.msrb.mxu0 %v8680_v40  ;;  %v2238_v40 = vsub.f32 1.0, %v2237_v2  ;;  %v2448_v38 = vpop.f32.mrf.mxu3 }
 0x9ee   :  { %2767 = vmatpush.msrb.mxu0 %v8681_v20  ;;  %v3625_v20 = vmul.f32 -1.442695, %v2429_v62 }
 0x9f0   :  { %2768 = vmatpush.msrb.mxu0 %v8682_v57  ;;  %v8712_v57 = vld [vmem:[#allocation43_spill] sm:$0xff] }
 0x9f2   :  { %2769 = vmatpush.msrb.mxu0 %v8683_v35 }
 0x9f4   :  { %2770 = vmatpush.msrb.mxu0 %v8684_v15  ;;  %v2461_v15 = vadd.f32 1.0, %v3836_v19 }
 0x9f6   :  { %2771 = vmatpush.msrb.mxu0 %v8685_v26  ;;  %v2239_v26 = vmul.f32 %v3834_v49, %v2238_v40  ;;  %v2489_v10 = vand.u32 2147483648, %v2461_v15  ;;  %vm2483_vm5 = vweird.f32 %v2461_v15  ;;  %v2487_v18 = vand.u32 2147483647, %v2461_v15 }
 0x9f8   :  { %2772 = vmatpush.msrb.mxu0 %v8686_v32  ;;  %v2490_v59 = vor.u32 1.1754944e-38, %v2489_v10  ;;  %vm2488_vm9 = vcmp.eq.f32.partialorder %v2487_v18, 8.507059e+37 }
 0x9fa   :  { %2773 = vmatpush.msrb.mxu0 %v8687_v60  ;;  %v8713_v60 = vld [vmem:[#allocation49_spill] sm:$0xff] }
 0x9fc   :  { %2774 = vmatpush.msrb.mxu0 %v8688_v52 }
 0x9fe   :  { %2775 = vmatpush.msrb.mxu0 %v8689_v12  ;;  %v2240_v12 = vadd.f32 %v3834_v49, %v2239_v26 }
 0xa00   :  { %2776 = vmatpush.msrb.mxu0 %v8690_v43 }
 0xa02   :  { %2777 = vmatpush.msrb.mxu0 %v8691_v3  ;;  %v2247_v3 = vand.u32 2147483648, %v2234_v58 }
 0xa04   :  { %2905 = vmatpush.msra.mxu0 %v8692_v21 }
 0xa06   :  { %2906 = vmatpush.msra.mxu0 %v8693_v29  ;;  %v2245_v29 = vand.u32 2147483647, %v2234_v58 }
 0xa08   :  { %2907 = vmatpush.msra.mxu0 %v8694_v44  ;;  %vm2246_vm3 = vcmp.eq.f32.partialorder %v2245_v29, 8.507059e+37  ;;  %v7389_v29 = vld [vmem:[%s8053_s7 + $0x30] sm:$0xff] }
 0xa0a   :  { %2908 = vmatpush.msra.mxu0 %v8695_v46 }
 0xa0c   :  { %2909 = vmatpush.msra.mxu0 %v8696_v16  ;;  %v2244_v16 = vsel %vm2243_vm2, %v3834_v49, %v2240_v12 }
 0xa0e   :  { %2910 = vmatpush.msra.mxu0 %v8697_v42  ;;  %v2270_v42 = vpop.permute.xlu1 %2269 }
 0xa10   :  { %2911 = vmatpush.msra.mxu0 %v8698_v39  ;;  %v2248_v39 = vor.u32 1.1754944e-38, %v2247_v3 }
 0xa12   :  { %2912 = vmatpush.msra.mxu0 %v8699_v34 }
 0xa14   :  { %2913 = vmatpush.msra.mxu0 %v8700_v17 }
 0xa16   :  { %2914 = vmatpush.msra.mxu0 %v8701_v45  ;;  %v7366_v45 = vsel %vm2246_vm3, %v2248_v39, %v2244_v16 }
 0xa18   :  { %2915 = vmatpush.msra.mxu0 %v8702_v47  ;;  %v2272_v47 = vmul.f32 %v2270_v42, %v7366_v45 }
 0xa1a   :  { %2916 = vmatpush.msra.mxu0 %v8703_v61 }
 0xa1c   :  { %2917 = vmatpush.msra.mxu0 %v8704_v53 }
 0xa1e   :  { %2918 = vmatpush.msra.mxu0 %v8705_v23 }
 0xa20   :  { %2919 = vmatpush.msra.mxu0 %v8706_v30 }
 0xa22   :  { %2920 = vmatpush.msra.mxu0 %v8708_v33  ;;  %v2449_v33 = vadd.f32 %v2448_v38, %v8714_v27  ;;  %v2267_v38 = vmul.f32 %v7366_v45, %v7239_v24 }
 0xa40   :  { %v2326_v28 = vpop.f32.mrf.mxu0 }
 0xa41   :  { %v2327_v51 = vadd.f32 %v2326_v28, %v2301_v9 }
 0xa43   :  { %v7361_v35 = vadd.f32 %v8712_v57, %v2327_v51 }
 0xa45   :  { %3837 = vtanh.f32 %v7361_v35 }
 0xa46   :  { %3839 = vpow2.f32 %v3625_v20 }
 0xa47   :  { %3841 = vrcp.f32 %v2461_v15 }
 0xa48   :  { %v2388_v32 = vpop.f32.mrf.mxu0 }
 0xa49   :  { %v2389_v52 = vadd.f32 %v2388_v32, %v8713_v60 }
 0xa4b   :  { %v3838_v43 = vpop.eup %3837  ;;  %v3623_v21 = vmul.f32 -1.442695, %v2389_v52 }
 0xa4c   :  { %2352 = vrot.lane.b32.xlu0 %v3838_v43, %s4266_s22  ;;  %v3840_v44 = vpop.eup %3839 }
 0xa4d   :  { %3843 = vpow2.f32 %v3623_v21  ;;  %v3842_v46 = vpop.eup %3841  ;;  %v2462_v17 = vadd.f32 1.0, %v3840_v44  ;;  %v7396_v44 = vld [vmem:[%s8053_s7 + $0x28] sm:$0xff] }
 0xa4e   :  { %v2479_v34 = vmul.f32 %v3842_v46, %v2461_v15  ;;  %vm2484_vm4 = vweird.f32 %v3842_v46  ;;  %8715 = vst [vmem:[#allocation46_spill] sm:$0xff] %v7396_v44 }
 0xa4f   :  { %3845 = vrcp.f32 %v2462_v17  ;;  %vm2485_vm6 = vmor %vm2483_vm5, %vm2484_vm4  ;;  %v2504_v32 = vand.u32 2147483648, %v2462_v17  ;;  %vm2498_vm15 = vweird.f32 %v2462_v17  ;;  %v2502_v60 = vand.u32 2147483647, %v2462_v17 }
 0xa50   :  { %v2480_v22 = vsub.f32 1.0, %v2479_v34 }
 0xa51   :  { %v2505_v12 = vor.u32 1.1754944e-38, %v2504_v32  ;;  %vm2503_vm1 = vcmp.eq.f32.partialorder %v2502_v60, 8.507059e+37  ;;  %v4195_v32 = vld [vmem:[%s8048_s2 + $0x178] sm:$0xff]  ;;  %v4196_v60 = vld [vmem:[%s8048_s2 + $0x160] sm:$0xff] }
 0xa52   :  { %v2481_v53 = vmul.f32 %v3842_v46, %v2480_v22 }
 0xa53   :  { %v3844_v56 = vpop.eup %3843 }
 0xa54   :  { %v2460_v61 = vadd.f32 1.0, %v3844_v56  ;;  %2274 = vrot.lane.b32.xlu0 %v2272_v47, %s4265_s6  ;;  %v2482_v6 = vadd.f32 %v3842_v46, %v2481_v53 }
 0xa55   :  { %v3846_v23 = vpop.eup %3845 }
 0xa56   :  { %3847 = vrcp.f32 %v2460_v61  ;;  %v2494_v5 = vmul.f32 %v3846_v23, %v2462_v17  ;;  %v2474_v58 = vand.u32 2147483648, %v2460_v61  ;;  %v2486_v1 = vsel %vm2485_vm6, %v3842_v46, %v2482_v6 }
 0xa57   :  { %3849 = vtanh.f32 %v2449_v33  ;;  %v2472_v49 = vand.u32 2147483647, %v2460_v61  ;;  %vm2468_vm10 = vweird.f32 %v2460_v61  ;;  %v2491_v62 = vsel %vm2488_vm9, %v2490_v59, %v2486_v1 }
 0xa58   :  { %v2495_v2 = vsub.f32 1.0, %v2494_v5  ;;  %v2475_v9 = vor.u32 1.1754944e-38, %v2474_v58  ;;  %v2509_v20 = vmul.f32 %v2491_v62, %v7134_v50  ;;  %vm2499_vm13 = vweird.f32 %v3846_v23  ;;  %v7382_v50 = vld [vmem:[%s8053_s7 + $0x38] sm:$0xff] }
 0xa59   :  { %vm2473_vm12 = vcmp.eq.f32.partialorder %v2472_v49, 8.507059e+37  ;;  %vm2500_vm0 = vmor %vm2498_vm15, %vm2499_vm13  ;;  %v3619_v33 = vmul.f32 -1.442695, %v7301_v8 }
 0xa5a   :  { %v2496_v51 = vmul.f32 %v3846_v23, %v2495_v2 }
 0xa5c   :  { %v3848_v30 = vpop.eup %3847  ;;  %v2497_v26 = vadd.f32 %v3846_v23, %v2496_v51  ;;  %v4190_v51 = vld [vmem:[%s8048_s2 + $0x1c0] sm:$0xff] }
 0xa5d   :  { %v2464_v37 = vmul.f32 %v3848_v30, %v2460_v61  ;;  %vm2469_vm7 = vweird.f32 %v3848_v30  ;;  %v3850_v19 = vpop.eup %3849 }
 0xa5e   :  { %vm2470_vm11 = vmor %vm2468_vm10, %vm2469_vm7  ;;  %v2501_v52 = vsel %vm2500_vm0, %v3846_v23, %v2497_v26  ;;  %v4194_v26 = vld [vmem:[%s8048_s2 + $0x180] sm:$0xff] }
 0xa5f   :  { %v2465_v7 = vsub.f32 1.0, %v2464_v37  ;;  %v2506_v3 = vsel %vm2503_vm1, %v2505_v12, %v2501_v52  ;;  %v4197_v52 = vld [vmem:[%s8048_s2 + $0x158] sm:$0xff]  ;;  %v4198_v12 = vld [vmem:[%s8048_s2 + $0x140] sm:$0xff] }
 0xa61   :  { %v2466_v48 = vmul.f32 %v3848_v30, %v2465_v7 }
 0xa63   :  { %v2467_v0 = vadd.f32 %v3848_v30, %v2466_v48 }
 0xa65   :  { %v2471_v28 = vsel %vm2470_vm11, %v3848_v30, %v2467_v0 }
 0xa66   :  { %v2476_v40 = vsel %vm2473_vm12, %v2475_v9, %v2471_v28  ;;  %v4187_v9 = vld [vmem:[%s8048_s2 + $0x1f8] sm:$0xff]  ;;  %v4188_v28 = vld [vmem:[%s8048_s2 + $0x1e0] sm:$0xff] }
 0xa67   :  { %v2510_v57 = vmul.f32 %v3850_v19, %v2476_v40  ;;  %v4189_v19 = vld [vmem:[%s8048_s2 + $0x1d8] sm:$0xff] }
 0xa68   :  { %v4191_v40 = vld [vmem:[%s8048_s2 + $0x1b8] sm:$0xff] }
 0xa69   :  { %v7372_v15 = vadd.f32 %v2510_v57, %v2509_v20  ;;  %v4192_v20 = vld [vmem:[%s8048_s2 + $0x1a0] sm:$0xff]  ;;  %v4193_v57 = vld [vmem:[%s8048_s2 + $0x198] sm:$0xff] }
 0xa6b   :  { %3851 = vtanh.f32 %v7372_v15 }
 0xa71   :  { %v3852_v43 = vpop.eup %3851 }
 0xa72   :  { %v7375_v21 = vmul.f32 %v3852_v43, %v2506_v3  ;;  %v4199_v43 = vld [vmem:[%s8048_s2 + $0x138] sm:$0xff]  ;;  %v4200_v3 = vld [vmem:[%s8048_s2 + $0x120] sm:$0xff] }
 0xa74   :  { %2778 = vmatmul.f32.vlgmr.msrb.gmra.mxu0 %v7375_v21  ;;  %2798 = vmatmul.f32.vlgmr.msra.gmra.mxu1 %v7375_v21 }
 0xa75   :  { %3034 = vmatpush.msra.mxu1 %v7382_v50  ;;  %3160 = vmatpush.msrb.mxu0 %v7188_v11  ;;  %v7403_v11 = vld [vmem:[%s8053_s7 + $0x20] sm:$0xff] }
 0xa76   :  { %8716 = vst [vmem:[#allocation44_spill] sm:$0xff] %v7403_v11 }
 0xa77   :  { %3035 = vmatpush.msra.mxu1 %v7389_v29  ;;  %3161 = vmatpush.msrb.mxu0 %v7194_v31  ;;  %v7411_v31 = vld [vmem:[%s8053_s7 + $0x18] sm:$0xff] }
 0xa78   :  { %8717 = vst [vmem:[#allocation47_spill] sm:$0xff] %v7411_v31 }
 0xa79   :  { %3036 = vmatpush.msra.mxu1 %v7396_v44  ;;  %3162 = vmatpush.msrb.mxu0 %v7200_v41  ;;  %v7418_v41 = vld [vmem:[%s8053_s7 + $0x10] sm:$0xff] }
 0xa7a   :  { %8718 = vst [vmem:[#allocation26_spill] sm:$0xff] %v7418_v41 }
 0xa7b   :  { %3037 = vmatpush.msra.mxu1 %v7403_v11  ;;  %3163 = vmatpush.msrb.mxu0 %v7206_v14  ;;  %v7425_v14 = vld [vmem:[%s8053_s7 + $0x8] sm:$0xff] }
 0xa7c   :  { %2921 = vmatmul.f32.vlgmr.msra.gmra.mxu0 %v7375_v21  ;;  %8719 = vst [vmem:[#allocation27_spill] sm:$0xff] %v7425_v14 }
 0xa7d   :  { %3038 = vmatpush.msra.mxu1 %v7411_v31  ;;  %3164 = vmatpush.msrb.mxu0 %v7212_v54  ;;  %v7432_v54 = vld [vmem:[%s8053_s7] sm:$0xff] }
 0xa7e   :  { %8720 = vst [vmem:[#allocation30_spill] sm:$0xff] %v7432_v54 }
 0xa7f   :  { %3039 = vmatpush.msra.mxu1 %v7418_v41  ;;  %3165 = vmatpush.msrb.mxu0 %v7218_v36  ;;  %v3622_v36 = vmul.f32 -1.442695, %v7361_v35 }
 0xa81   :  { %3040 = vmatpush.msra.mxu1 %v7425_v14  ;;  %3166 = vmatpush.msrb.mxu0 %v7224_v25  ;;  %3853 = vpow2.f32 %v3622_v36  ;;  %v4201_v36 = vld [vmem:[%s8048_s2 + $0x118] sm:$0xff] }
 0xa83   :  { %3041 = vmatpush.msra.mxu1 %v7432_v54  ;;  %3167 = vmatpush.msrb.mxu0 %v7230_v55 }
 0xa85   :  { %3258 = vmatpush.msra.mxu0 %v7382_v50 }
 0xa87   :  { %3259 = vmatpush.msra.mxu0 %v7389_v29  ;;  %v3854_v25 = vpop.eup %3853 }
 0xa88   :  { %v2333_v55 = vadd.f32 1.0, %v3854_v25  ;;  %v4202_v25 = vld [vmem:[%s8048_s2 + $0x100] sm:$0xff] }
 0xa89   :  { %3260 = vmatpush.msra.mxu0 %v7396_v44 }
 0xa8a   :  { %3855 = vrcp.f32 %v2333_v55  ;;  %v2345_v17 = vand.u32 2147483648, %v2333_v55  ;;  %vm2339_vm3 = vweird.f32 %v2333_v55  ;;  %v2343_v47 = vand.u32 2147483647, %v2333_v55 }
 0xa8b   :  { %3261 = vmatpush.msra.mxu0 %v7403_v11 }
 0xa8c   :  { %v2346_v61 = vor.u32 1.1754944e-38, %v2345_v17  ;;  %vm2344_vm5 = vcmp.eq.f32.partialorder %v2343_v47, 8.507059e+37  ;;  %v4209_v17 = vld [vmem:[%s8048_s2 + $0x98] sm:$0xff]  ;;  %v4210_v47 = vld [vmem:[%s8048_s2 + $0x80] sm:$0xff] }
 0xa8d   :  { %3262 = vmatpush.msra.mxu0 %v7411_v31 }
 0xa8f   :  { %3263 = vmatpush.msra.mxu0 %v7418_v41 }
 0xa90   :  { %v3856_v46 = vpop.eup %3855 }
 0xa91   :  { %3264 = vmatpush.msra.mxu0 %v7425_v14  ;;  %v2335_v16 = vmul.f32 %v3856_v46, %v2333_v55  ;;  %vm2340_vm2 = vweird.f32 %v3856_v46  ;;  %v4203_v55 = vld [vmem:[%s8048_s2 + $0xf8] sm:$0xff] }
 0xa92   :  { %vm2341_vm4 = vmor %vm2339_vm3, %vm2340_vm2 }
 0xa93   :  { %3265 = vmatpush.msra.mxu0 %v7432_v54  ;;  %v2336_v42 = vsub.f32 1.0, %v2335_v16  ;;  %v4205_v16 = vld [vmem:[%s8048_s2 + $0xd8] sm:$0xff] }
 0xa95   :  { %v2337_v39 = vmul.f32 %v3856_v46, %v2336_v42  ;;  %v4206_v42 = vld [vmem:[%s8048_s2 + $0xc0] sm:$0xff] }
 0xa97   :  { %v2338_v34 = vadd.f32 %v3856_v46, %v2337_v39  ;;  %v4207_v39 = vld [vmem:[%s8048_s2 + $0xb8] sm:$0xff] }
 0xa99   :  { %v2342_v56 = vsel %vm2341_vm4, %v3856_v46, %v2338_v34  ;;  %v4204_v46 = vld [vmem:[%s8048_s2 + $0xe0] sm:$0xff] }
 0xa9a   :  { %v7445_v22 = vsel %vm2344_vm5, %v2346_v61, %v2342_v56  ;;  %v4208_v34 = vld [vmem:[%s8048_s2 + $0xa0] sm:$0xff]  ;;  %v4211_v56 = vld [vmem:[%s8048_s2 + $0x78] sm:$0xff] }
 0xa9b   :  { %v2350_v18 = vmul.f32 %v7445_v22, %v7246_v63  ;;  %v4212_v61 = vld [vmem:[%s8048_s2 + $0x60] sm:$0xff] }
 0xabe   :  { %v2353_v35 = vpop.permute.xlu0 %2352 }
 0xabf   :  { %v2355_v53 = vmul.f32 %v2353_v35, %v7445_v22  ;;  %v4213_v35 = vld [vmem:[%s8048_s2 + $0x58] sm:$0xff] }
 0xac1   :  { %2357 = vrot.lane.b32.xlu2 %v2355_v53, %s4266_s22  ;;  %v4214_v53 = vld [vmem:[%s8048_s2 + $0x40] sm:$0xff] }
 0xac6   :  { %v2275_v23 = vpop.permute.xlu0 %2274 }
 0xac7   :  { %v7451_v30 = vadd.f32 %v2275_v23, %v2267_v38  ;;  %v4215_v38 = vld [vmem:[%s8048_s2 + $0x38] sm:$0xff]  ;;  %v4216_v23 = vld [vmem:[%s8048_s2 + $0x20] sm:$0xff] }
 0xac9   :  { %3857 = vtanh.f32 %v7451_v30 }
 0xaca   :  { %3859 = vpow2.f32 %v3619_v33  ;;  %v4218_v33 = vld [vmem:[%s8048_s2] sm:$0xff] }
 0xacf   :  { %v3858_v27 = vpop.eup %3857 }
 0xad0   :  { %2280 = vrot.lane.b32.xlu2 %v3858_v27, %s4265_s6  ;;  %v3860_v6 = vpop.eup %3859  ;;  %v4217_v27 = vld [vmem:[%s8048_s2 + $0x18] sm:$0xff] }
 0xad1   :  { %v2235_v37 = vadd.f32 1.0, %v3860_v6  ;;  %v7565_v6 = vld [vmem:[%s8051_s5 + $0x78] sm:$0xff] }
 0xad3   :  { %3861 = vrcp.f32 %v2235_v37  ;;  %v2262_v8 = vand.u32 2147483648, %v2235_v37  ;;  %vm2256_vm7 = vweird.f32 %v2235_v37  ;;  %v2260_v49 = vand.u32 2147483647, %v2235_v37 }
 0xad5   :  { %v2263_v2 = vor.u32 1.1754944e-38, %v2262_v8  ;;  %vm2261_vm10 = vcmp.eq.f32.partialorder %v2260_v49, 8.507059e+37  ;;  %v7625_v8 = vld [vmem:[%s8054_s8 + $0x8] sm:$0xff]  ;;  %v7631_v49 = vld [vmem:[%s8054_s8] sm:$0xff] }
 0xad9   :  { %v3862_v10 = vpop.eup %3861 }
 0xada   :  { %v2252_v5 = vmul.f32 %v3862_v10, %v2235_v37  ;;  %vm2257_vm6 = vweird.f32 %v3862_v10  ;;  %v7571_v37 = vld [vmem:[%s8051_s5 + $0x68] sm:$0xff] }
 0xadb   :  { %vm2258_vm9 = vmor %vm2256_vm7, %vm2257_vm6 }
 0xadc   :  { %v2253_v45 = vsub.f32 1.0, %v2252_v5  ;;  %v7583_v5 = vld [vmem:[%s8051_s5 + $0x48] sm:$0xff] }
 0xade   :  { %v2254_v58 = vmul.f32 %v3862_v10, %v2253_v45  ;;  %v7601_v45 = vld [vmem:[%s8051_s5 + $0x18] sm:$0xff] }
 0xae0   :  { %v2255_v1 = vadd.f32 %v3862_v10, %v2254_v58  ;;  %v7607_v58 = vld [vmem:[%s8051_s5 + $0x8] sm:$0xff] }
 0xae2   :  { %v2259_v59 = vsel %vm2258_vm9, %v3862_v10, %v2255_v1  ;;  %v7577_v10 = vld [vmem:[%s8051_s5 + $0x58] sm:$0xff] }
 0xae3   :  { %v2264_v63 = vsel %vm2261_vm10, %v2263_v2, %v2259_v59  ;;  %v7613_v1 = vld [vmem:[%s8054_s8 + $0x18] sm:$0xff] }
 0xb1b   :  { %v2358_v24 = vpop.permute.xlu2 %2357 }
 0xb1c   :  { %v7458_v7 = vadd.f32 %v2358_v24, %v2350_v18  ;;  %v7589_v18 = vld [vmem:[%s8051_s5 + $0x38] sm:$0xff]  ;;  %v7595_v24 = vld [vmem:[%s8051_s5 + $0x28] sm:$0xff] }
 0xb1e   :  { %3863 = vtanh.f32 %v7458_v7 }
 0xb24   :  { %v3864_v48 = vpop.eup %3863 }
 0xb25   :  { %2363 = vrot.lane.b32.xlu1 %v3864_v48, %s4266_s22  ;;  %v7619_v48 = vld [vmem:[%s8054_s8 + $0x10] sm:$0xff] }
 0xb2a   :  { %v2281_v0 = vpop.permute.xlu2 %2280 }
 0xb2b   :  { %v2283_v62 = vmul.f32 %v2281_v0, %v2264_v63  ;;  %v2551_v63 = vpop.f32.mrf.mxu1 }
 0xb2d   :  { %3626 = vmatmul.msk.f32.vlgmr.msra.gmra.mxu2 %vm761_vm14, %v2283_v62  ;;  %3627 = vmatmul.msk.f32.vlgmr.msrb.gmra.mxu3 %vm761_vm14, %v2283_v62 }
 0xb2e   :  { %2802 = vmatpush.msra.mxu2 %v4187_v9  ;;  %2742 = vmatpush.msrb.mxu3 %v4188_v28 }
 0xb30   :  { %2803 = vmatpush.msra.mxu2 %v4189_v19  ;;  %2743 = vmatpush.msrb.mxu3 %v4190_v51  ;;  %v7651_v51 = vld [vmem:[%s8050_s4 + $0xe0] sm:$0xff] }
 0xb32   :  { %2804 = vmatpush.msra.mxu2 %v4191_v40  ;;  %2744 = vmatpush.msrb.mxu3 %v4192_v20  ;;  %v7657_v40 = vld [vmem:[%s8050_s4 + $0xd0] sm:$0xff]  ;;  %v7663_v20 = vld [vmem:[%s8050_s4 + $0xc0] sm:$0xff] }
 0xb34   :  { %2805 = vmatpush.msra.mxu2 %v4193_v57  ;;  %2745 = vmatpush.msrb.mxu3 %v4194_v26  ;;  %v7670_v57 = vld [vmem:[%s8050_s4 + $0xb0] sm:$0xff]  ;;  %v7676_v26 = vld [vmem:[%s8050_s4 + $0xa0] sm:$0xff] }
 0xb35   :  { %3630 = vmatmul.msk.f32.vlgmr.msrb.gmra.mxu2 %vm761_vm14, %v2283_v62 }
 0xb36   :  { %2806 = vmatpush.msra.mxu2 %v4195_v32  ;;  %2746 = vmatpush.msrb.mxu3 %v4196_v60  ;;  %v7682_v32 = vld [vmem:[%s8050_s4 + $0x90] sm:$0xff]  ;;  %v7688_v60 = vld [vmem:[%s8050_s4 + $0x80] sm:$0xff] }
 0xb38   :  { %2807 = vmatpush.msra.mxu2 %v4197_v52  ;;  %2747 = vmatpush.msrb.mxu3 %v4198_v12  ;;  %v7694_v52 = vld [vmem:[%s8050_s4 + $0x70] sm:$0xff]  ;;  %v7700_v12 = vld [vmem:[%s8050_s4 + $0x60] sm:$0xff] }
 0xb3a   :  { %2808 = vmatpush.msra.mxu2 %v4199_v43  ;;  %2748 = vmatpush.msrb.mxu3 %v4200_v3  ;;  %v7706_v43 = vld [vmem:[%s8050_s4 + $0x50] sm:$0xff]  ;;  %v7712_v3 = vld [vmem:[%s8050_s4 + $0x40] sm:$0xff] }
 0xb3c   :  { %2809 = vmatpush.msra.mxu2 %v4201_v36  ;;  %2749 = vmatpush.msrb.mxu3 %v4202_v25  ;;  %v7718_v36 = vld [vmem:[%s8050_s4 + $0x30] sm:$0xff]  ;;  %v7724_v25 = vld [vmem:[%s8050_s4 + $0x20] sm:$0xff] }
 0xb3e   :  { %2810 = vmatpush.msra.mxu2 %v4203_v55  ;;  %2750 = vmatpush.msrb.mxu3 %v4204_v46  ;;  %v7730_v55 = vld [vmem:[%s8050_s4 + $0x10] sm:$0xff]  ;;  %v7736_v46 = vld [vmem:[%s8050_s4] sm:$0xff] }
 0xb40   :  { %2811 = vmatpush.msra.mxu2 %v4205_v16  ;;  %2751 = vmatpush.msrb.mxu3 %v4206_v42  ;;  %v4247_v16 = vld [vmem:[%s8050_s4 + $0xf8] sm:$0xff]  ;;  %v4248_v42 = vld [vmem:[%s8050_s4 + $0xe8] sm:$0xff] }
 0xb42   :  { %2812 = vmatpush.msra.mxu2 %v4207_v39  ;;  %2752 = vmatpush.msrb.mxu3 %v4208_v34  ;;  %v4249_v39 = vld [vmem:[%s8050_s4 + $0xd8] sm:$0xff]  ;;  %v4250_v34 = vld [vmem:[%s8050_s4 + $0xc8] sm:$0xff] }
 0xb44   :  { %2813 = vmatpush.msra.mxu2 %v4209_v17  ;;  %2753 = vmatpush.msrb.mxu3 %v4210_v47  ;;  %v4252_v17 = vld [vmem:[%s8050_s4 + $0xa8] sm:$0xff]  ;;  %v4253_v47 = vld [vmem:[%s8050_s4 + $0x98] sm:$0xff] }
 0xb46   :  { %2814 = vmatpush.msra.mxu2 %v4211_v56  ;;  %2754 = vmatpush.msrb.mxu3 %v4212_v61  ;;  %v4254_v56 = vld [vmem:[%s8050_s4 + $0x88] sm:$0xff]  ;;  %v4255_v61 = vld [vmem:[%s8050_s4 + $0x78] sm:$0xff] }
 0xb48   :  { %2815 = vmatpush.msra.mxu2 %v4213_v35  ;;  %2755 = vmatpush.msrb.mxu3 %v4214_v53  ;;  %v4256_v35 = vld [vmem:[%s8050_s4 + $0x68] sm:$0xff]  ;;  %v4257_v53 = vld [vmem:[%s8050_s4 + $0x58] sm:$0xff] }
 0xb4a   :  { %2816 = vmatpush.msra.mxu2 %v4215_v38  ;;  %2756 = vmatpush.msrb.mxu3 %v4216_v23  ;;  %v4258_v38 = vld [vmem:[%s8050_s4 + $0x48] sm:$0xff]  ;;  %v4259_v23 = vld [vmem:[%s8050_s4 + $0x38] sm:$0xff] }
 0xb4c   :  { %2817 = vmatpush.msra.mxu2 %v4217_v27  ;;  %2757 = vmatpush.msrb.mxu3 %v4218_v33  ;;  %v4260_v27 = vld [vmem:[%s8050_s4 + $0x28] sm:$0xff]  ;;  %v4261_v33 = vld [vmem:[%s8050_s4 + $0x18] sm:$0xff] }
 0xb4d   :  { %2818 = vmatmul.f32.vlgmr.msra.gmra.mxu2 %v7375_v21 }
 0xb4e   :  { %2956 = vmatpush.msrb.mxu2 %v7565_v6 }
 0xb50   :  { %2957 = vmatpush.msrb.mxu2 %v7571_v37 }
 0xb52   :  { %2958 = vmatpush.msrb.mxu2 %v7577_v10 }
 0xb54   :  { %2959 = vmatpush.msrb.mxu2 %v7583_v5 }
 0xb56   :  { %2960 = vmatpush.msrb.mxu2 %v7589_v18 }
 0xb58   :  { %2961 = vmatpush.msrb.mxu2 %v7595_v24 }
 0xb5a   :  { %2962 = vmatpush.msrb.mxu2 %v7601_v45 }
 0xb5c   :  { %2963 = vmatpush.msrb.mxu2 %v7607_v58 }
 0xb5e   :  { %3063 = vmatpush.msra.mxu2 %v7613_v1 }
 0xb60   :  { %3064 = vmatpush.msra.mxu2 %v7619_v48 }
 0xb62   :  { %3065 = vmatpush.msra.mxu2 %v7625_v8 }
 0xb64   :  { %3066 = vmatpush.msra.mxu2 %v7631_v49 }
 0xb97   :  { %v2364_v59 = vpop.permute.xlu1 %2363 }
 0xb98   :  { %v2366_v2 = vmul.f32 %v2364_v59, %v7445_v22  ;;  %v7645_v22 = vld [vmem:[%s8050_s4 + $0xf0] sm:$0xff]  ;;  %v4262_v59 = vld [vmem:[%s8050_s4 + $0x8] sm:$0xff] }
 0xb9a   :  { %2676 = vrot.lane.b32.xlu0 %v2366_v2, %s4265_s6 }
 0xbb0   :  { %v2594_v0 = vpop.f32.mrf.mxu3  ;;  %v2574_v2 = vpop.f32.mrf.mxu2 }
 0xbb1   :  { %v2595_v62 = vadd.f32 %v2594_v0, %v2551_v63  ;;  %v2531_v63 = vpop.f32.mrf.mxu0 }
 0xbb2   :  { %v2575_v0 = vadd.f32 %v2574_v2, %v2531_v63  ;;  %v7794_v2 = vld [vmem:[%s8055_s9] ss:$0 sm:$0xff] }
 0xbb3   :  { %v7637_v9 = vadd.f32 %v2595_v62, %v8659_v13 }
 0xbb4   :  { %v2597_v62 = vadd.f32 %v2575_v0, %v8707_v4 }
 0xbb5   :  { %3865 = vtanh.f32 %v7637_v9 }
 0xbbb   :  { %v3866_v28 = vpop.eup %3865 }
 0xbbc   :  { %2640 = vrot.lane.b32.xlu2 %v3866_v28, %s4265_s6  ;;  %v3628_v28 = vmul.f32 -1.442695, %v2597_v62 }
 0xbbe   :  { %3867 = vpow2.f32 %v3628_v28 }
 0xc0c   :  { %v2677_v19 = vpop.permute.xlu0 %2676 }
 0xc0d   :  { %3631 = vmatmul.msk.f32.vlgmr.msra.gmra.mxu3 %vm1189_vm8, %v2677_v19  ;;  %v3868_v19 = vpop.eup %3867 }
 0xc0e   :  { %2885 = vmatpush.msra.mxu3 %v7645_v22 }
 0xc10   :  { %2886 = vmatpush.msra.mxu3 %v7651_v51 }
 0xc12   :  { %2887 = vmatpush.msra.mxu3 %v7657_v40 }
 0xc14   :  { %2888 = vmatpush.msra.mxu3 %v7663_v20 }
 0xc15   :  { %2758 = vmatmul.f32.vlgmr.msrb.gmra.mxu3 %v7375_v21 }
 0xc16   :  { %2889 = vmatpush.msra.mxu3 %v7670_v57 }
 0xc18   :  { %2890 = vmatpush.msra.mxu3 %v7676_v26 }
 0xc1a   :  { %2891 = vmatpush.msra.mxu3 %v7682_v32 }
 0xc1c   :  { %2892 = vmatpush.msra.mxu3 %v7688_v60 }
 0xc1e   :  { %2893 = vmatpush.msra.mxu3 %v7694_v52 }
 0xc20   :  { %2894 = vmatpush.msra.mxu3 %v7700_v12 }
 0xc22   :  { %2895 = vmatpush.msra.mxu3 %v7706_v43 }
 0xc24   :  { %2896 = vmatpush.msra.mxu3 %v7712_v3 }
 0xc26   :  { %2897 = vmatpush.msra.mxu3 %v7718_v36 }
 0xc28   :  { %2898 = vmatpush.msra.mxu3 %v7724_v25 }
 0xc2a   :  { %2899 = vmatpush.msra.mxu3 %v7730_v55 }
 0xc2c   :  { %2900 = vmatpush.msra.mxu3 %v7736_v46 }
 0xc2d   :  { %2901 = vmatmul.f32.vlgmr.msra.gmra.mxu3 %v7375_v21  ;;  %v4251_v21 = vld [vmem:[%s8050_s4 + $0xb8] sm:$0xff] }
 0xc2e   :  { %3129 = vmatpush.msrb.mxu3 %v4247_v16  ;;  %v2779_v16 = vpop.f32.mrf.mxu0 }
 0xc30   :  { %3130 = vmatpush.msrb.mxu3 %v4248_v42  ;;  %v2605_v42 = vadd.f32 1.0, %v3868_v19  ;;  %v8723_v19 = vld [vmem:[#allocation57_spill] sm:$0xff] }
 0xc32   :  { %3131 = vmatpush.msrb.mxu3 %v4249_v39  ;;  %v8721_v39 = vld [vmem:[#allocation58_spill] sm:$0xff]  ;;  %3869 = vrcp.f32 %v2605_v42  ;;  %vm2612_vm12 = vweird.f32 %v2605_v42 }
 0xc34   :  { %3132 = vmatpush.msrb.mxu3 %v4250_v34  ;;  %v2780_v34 = vadd.f32 %v2779_v16, %v8721_v39 }
 0xc36   :  { %3133 = vmatpush.msrb.mxu3 %v4251_v21  ;;  %v3634_v21 = vmul.f32 -1.442695, %v2780_v34 }
 0xc38   :  { %3134 = vmatpush.msrb.mxu3 %v4252_v17  ;;  %v3870_v17 = vpop.eup %3869  ;;  %3871 = vpow2.f32 %v3634_v21  ;;  %v2618_v21 = vand.u32 2147483648, %v2605_v42 }
 0xc39   :  { %vm2613_vm11 = vweird.f32 %v3870_v17 }
 0xc3a   :  { %3135 = vmatpush.msrb.mxu3 %v4253_v47  ;;  %v2799_v47 = vpop.f32.mrf.mxu1  ;;  %vm2614_vm13 = vmor %vm2612_vm12, %vm2613_vm11 }
 0xc3c   :  { %3136 = vmatpush.msrb.mxu3 %v4254_v56  ;;  %v2608_v56 = vmul.f32 %v3870_v17, %v2605_v42 }
 0xc3e   :  { %3137 = vmatpush.msrb.mxu3 %v4255_v61  ;;  %v8722_v61 = vld [vmem:[#allocation63_spill] sm:$0xff] }
 0xc40   :  { %3138 = vmatpush.msrb.mxu3 %v4256_v35  ;;  %v2800_v35 = vadd.f32 %v2799_v47, %v8722_v61 }
 0xc42   :  { %3139 = vmatpush.msrb.mxu3 %v4257_v53  ;;  %v2672_v53 = vpop.f32.mrf.mxu2 }
 0xc44   :  { %3140 = vmatpush.msrb.mxu3 %v4258_v38 }
 0xc46   :  { %3141 = vmatpush.msrb.mxu3 %v4259_v23  ;;  %v3872_v23 = vpop.eup %3871 }
 0xc47   :  { %v2832_v0 = vadd.f32 1.0, %v3872_v23  ;;  %v2619_v23 = vor.u32 1.1754944e-38, %v2618_v21 }
 0xc48   :  { %3142 = vmatpush.msrb.mxu3 %v4260_v27 }
 0xc49   :  { %vm2854_vm1 = vweird.f32 %v2832_v0 }
 0xc4a   :  { %3143 = vmatpush.msrb.mxu3 %v4261_v33  ;;  %v2609_v33 = vsub.f32 1.0, %v2608_v56  ;;  %v2616_v56 = vand.u32 2147483647, %v2605_v42 }
 0xc4c   :  { %3144 = vmatpush.msrb.mxu3 %v4262_v59  ;;  %v3635_v59 = vmul.f32 -1.442695, %v2800_v35  ;;  %v2610_v62 = vmul.f32 %v3870_v17, %v2609_v33  ;;  %vm2617_vm15 = vcmp.eq.f32.partialorder %v2616_v56, 8.507059e+37 }
 0xc4e   :  { %v2611_v39 = vadd.f32 %v3870_v17, %v2610_v62 }
 0xc90   :  { %v2697_v38 = vpop.f32.mrf.mxu3 }
 0xc91   :  { %v2698_v27 = vadd.f32 %v2697_v38, %v2672_v53  ;;  %v2615_v53 = vsel %vm2614_vm13, %v3870_v17, %v2611_v39  ;;  %v2641_v38 = vpop.permute.xlu2 %2640  ;;  %v8724_v39 = vld [vmem:[#allocation64_spill] sm:$0xff] }
 0xc93   :  { %v7797_v63 = vadd.f32 %v7794_v2, %v2698_v27 }
 0xc95   :  { %3873 = vtanh.f32 %v7797_v63 }
 0xc96   :  { %3875 = vpow2.f32 %v3635_v59  ;;  %v7802_v59 = vsel %vm2617_vm15, %v2619_v23, %v2615_v53  ;;  %v2860_v53 = vand.u32 2147483648, %v2832_v0 }
 0xc97   :  { %3877 = vrcp.f32 %v2832_v0  ;;  %v2643_v62 = vmul.f32 %v2641_v38, %v7802_v59  ;;  %v2858_v38 = vand.u32 2147483647, %v2832_v0 }
 0xc98   :  { %v2759_v28 = vpop.f32.mrf.mxu3  ;;  %v2861_v14 = vor.u32 1.1754944e-38, %v2860_v53 }
 0xc99   :  { %v2760_v16 = vadd.f32 %v2759_v28, %v8723_v19  ;;  %vm2859_vm4 = vcmp.eq.f32.partialorder %v2858_v38, 8.507059e+37 }
 0xc9b   :  { %v3874_v34 = vpop.eup %3873  ;;  %v3633_v47 = vmul.f32 -1.442695, %v2760_v16 }
 0xc9c   :  { %2723 = vrot.lane.b32.xlu1 %v3874_v34, %s4266_s22  ;;  %v3876_v61 = vpop.eup %3875  ;;  %v2819_v34 = vpop.f32.mrf.mxu2 }
 0xc9d   :  { %3879 = vpow2.f32 %v3633_v47  ;;  %v3878_v35 = vpop.eup %3877  ;;  %v2833_v33 = vadd.f32 1.0, %v3876_v61  ;;  %v2820_v21 = vadd.f32 %v2819_v34, %v8724_v39 }
 0xc9e   :  { %v2850_v27 = vmul.f32 %v3878_v35, %v2832_v0  ;;  %vm2855_vm0 = vweird.f32 %v3878_v35 }
 0xc9f   :  { %3881 = vrcp.f32 %v2833_v33  ;;  %vm2856_vm2 = vmor %vm2854_vm1, %vm2855_vm0  ;;  %vm2869_vm10 = vweird.f32 %v2833_v33  ;;  %v2873_v53 = vand.u32 2147483647, %v2833_v33 }
 0xca0   :  { %v2851_v42 = vsub.f32 1.0, %v2850_v27 }
 0xca1   :  { %vm2874_vm12 = vcmp.eq.f32.partialorder %v2873_v53, 8.507059e+37 }
 0xca2   :  { %v2852_v16 = vmul.f32 %v3878_v35, %v2851_v42 }
 0xca3   :  { %v3880_v28 = vpop.eup %3879 }
 0xca4   :  { %v2831_v19 = vadd.f32 1.0, %v3880_v28  ;;  %2645 = vrot.lane.b32.xlu1 %v2643_v62, %s4265_s6  ;;  %v2853_v56 = vadd.f32 %v3878_v35, %v2852_v16 }
 0xca5   :  { %v3882_v47 = vpop.eup %3881 }
 0xca6   :  { %3883 = vrcp.f32 %v2831_v19  ;;  %v2865_v23 = vmul.f32 %v3882_v47, %v2833_v33  ;;  %v2845_v62 = vand.u32 2147483648, %v2831_v19  ;;  %v2857_v27 = vsel %vm2856_vm2, %v3878_v35, %v2853_v56 }
 0xca7   :  { %3885 = vtanh.f32 %v2820_v21  ;;  %v2843_v42 = vand.u32 2147483647, %v2831_v19  ;;  %vm2839_vm5 = vweird.f32 %v2831_v19  ;;  %v2862_v16 = vsel %vm2859_vm4, %v2861_v14, %v2857_v27 }
 0xca8   :  { %v2866_v41 = vsub.f32 1.0, %v2865_v23  ;;  %v2846_v34 = vor.u32 1.1754944e-38, %v2845_v62  ;;  %v2880_v21 = vmul.f32 %v2862_v16, %v7372_v15  ;;  %vm2870_vm9 = vweird.f32 %v3882_v47 }
 0xca9   :  { %vm2844_vm7 = vcmp.eq.f32.partialorder %v2843_v42, 8.507059e+37  ;;  %v2875_v56 = vand.u32 2147483648, %v2833_v33  ;;  %vm2871_vm11 = vmor %vm2869_vm10, %vm2870_vm9  ;;  %v3632_v15 = vmul.f32 -1.442695, %v7797_v63 }
 0xcaa   :  { %v2867_v0 = vmul.f32 %v3882_v47, %v2866_v41 }
 0xcab   :  { %v2876_v14 = vor.u32 1.1754944e-38, %v2875_v56 }
 0xcac   :  { %v3884_v17 = vpop.eup %3883 }
 0xcad   :  { %v2835_v61 = vmul.f32 %v3884_v17, %v2831_v19  ;;  %vm2840_vm3 = vweird.f32 %v3884_v17  ;;  %v3886_v11 = vpop.eup %3885 }
 0xcae   :  { %vm2841_vm6 = vmor %vm2839_vm5, %vm2840_vm3 }
 0xcaf   :  { %v2836_v54 = vsub.f32 1.0, %v2835_v61 }
 0xcb1   :  { %v2837_v28 = vmul.f32 %v3884_v17, %v2836_v54  ;;  %v2868_v54 = vadd.f32 %v3882_v47, %v2867_v0  ;;  %v2638_v0 = vmul.f32 %v7802_v59, %v7451_v30 }
 0xcb3   :  { %v2838_v31 = vadd.f32 %v3884_v17, %v2837_v28  ;;  %v2872_v19 = vsel %vm2871_vm11, %v3882_v47, %v2868_v54  ;;  %v3629_v54 = vmul.f32 -1.442695, %v7637_v9 }
 0xcb5   :  { %v2842_v39 = vsel %vm2841_vm6, %v3884_v17, %v2838_v31  ;;  %v2877_v31 = vsel %vm2874_vm12, %v2876_v14, %v2872_v19 }
 0xcb6   :  { %v2847_v61 = vsel %vm2844_vm7, %v2846_v34, %v2842_v39 }
 0xcb7   :  { %v2881_v44 = vmul.f32 %v3886_v11, %v2847_v61 }
 0xcb9   :  { %v2882_v35 = vadd.f32 %v2881_v44, %v2880_v21 }
 0xcbb   :  { %3887 = vtanh.f32 %v2882_v35 }
 0xcbc   :  { %3889 = vpow2.f32 %v3632_v15 }
 0xcc1   :  { %v3888_v23 = vpop.eup %3887 }
 0xcc2   :  { %v7808_v17 = vmul.f32 %v3888_v23, %v2877_v31  ;;  %v3890_v44 = vpop.eup %3889 }
 0xcc3   :  { %v2704_v11 = vadd.f32 1.0, %v3890_v44 }
 0xcc4   :  { %3145 = vmatmul.f32.vlgmr.msrb.gmra.mxu3 %v7808_v17 }
 0xcc5   :  { %3891 = vrcp.f32 %v2704_v11  ;;  %v2716_v47 = vand.u32 2147483648, %v2704_v11  ;;  %vm2710_vm15 = vweird.f32 %v2704_v11  ;;  %v2714_v28 = vand.u32 2147483647, %v2704_v11 }
 0xcc7   :  { %v2717_v16 = vor.u32 1.1754944e-38, %v2716_v47  ;;  %vm2715_vm1 = vcmp.eq.f32.partialorder %v2714_v28, 8.507059e+37 }
 0xccb   :  { %v3892_v41 = vpop.eup %3891 }
 0xccc   :  { %v2706_v38 = vmul.f32 %v3892_v41, %v2704_v11  ;;  %vm2711_vm13 = vweird.f32 %v3892_v41 }
 0xccd   :  { %vm2712_vm0 = vmor %vm2710_vm15, %vm2711_vm13 }
 0xcce   :  { %v2707_v62 = vsub.f32 1.0, %v2706_v38 }
 0xcd0   :  { %v2708_v33 = vmul.f32 %v3892_v41, %v2707_v62 }
 0xcd2   :  { %v2709_v27 = vadd.f32 %v3892_v41, %v2708_v33 }
 0xcd4   :  { %v2713_v42 = vsel %vm2712_vm0, %v3892_v41, %v2709_v27 }
 0xcd5   :  { %v7812_v39 = vsel %vm2715_vm1, %v2717_v16, %v2713_v42 }
 0xcd6   :  { %v2721_v23 = vmul.f32 %v7812_v39, %v7458_v7 }
 0xd0e   :  { %v2724_v34 = vpop.permute.xlu1 %2723 }
 0xd0f   :  { %v2726_v63 = vmul.f32 %v2724_v34, %v7812_v39 }
 0xd11   :  { %2728 = vrot.lane.b32.xlu0 %v2726_v63, %s4266_s22 }
 0xd16   :  { %v2646_v61 = vpop.permute.xlu1 %2645 }
 0xd17   :  { %v7818_v21 = vadd.f32 %v2646_v61, %v2638_v0 }
 0xd19   :  { %3893 = vtanh.f32 %v7818_v21 }
 0xd1a   :  { %3895 = vpow2.f32 %v3629_v54 }
 0xd1f   :  { %v3894_v35 = vpop.eup %3893 }
 0xd20   :  { %2651 = vrot.lane.b32.xlu0 %v3894_v35, %s4265_s6  ;;  %v3896_v56 = vpop.eup %3895 }
 0xd21   :  { %v2606_v53 = vadd.f32 1.0, %v3896_v56 }
 0xd23   :  { %3897 = vrcp.f32 %v2606_v53  ;;  %v2633_v9 = vand.u32 2147483648, %v2606_v53  ;;  %vm2627_vm3 = vweird.f32 %v2606_v53  ;;  %v2631_v41 = vand.u32 2147483647, %v2606_v53 }
 0xd25   :  { %v2634_v62 = vor.u32 1.1754944e-38, %v2633_v9  ;;  %vm2632_vm5 = vcmp.eq.f32.partialorder %v2631_v41, 8.507059e+37 }
 0xd29   :  { %v3898_v19 = vpop.eup %3897 }
 0xd2a   :  { %v2623_v14 = vmul.f32 %v3898_v19, %v2606_v53  ;;  %vm2628_vm2 = vweird.f32 %v3898_v19 }
 0xd2b   :  { %vm2629_vm4 = vmor %vm2627_vm3, %vm2628_vm2 }
 0xd2c   :  { %v2624_v59 = vsub.f32 1.0, %v2623_v14 }
 0xd2e   :  { %v2625_v15 = vmul.f32 %v3898_v19, %v2624_v59 }
 0xd30   :  { %v2626_v44 = vadd.f32 %v3898_v19, %v2625_v15 }
 0xd32   :  { %v2630_v38 = vsel %vm2629_vm4, %v3898_v19, %v2626_v44 }
 0xd33   :  { %v2635_v7 = vsel %vm2632_vm5, %v2634_v62, %v2630_v38 }
 0xd83   :  { %v2729_v30 = vpop.permute.xlu0 %2728 }
 0xd84   :  { %v7825_v31 = vadd.f32 %v2729_v30, %v2721_v23 }
 0xd86   :  { %3899 = vtanh.f32 %v7825_v31 }
 0xd8c   :  { %v3900_v11 = vpop.eup %3899 }
 0xd8d   :  { %2734 = vrot.lane.b32.xlu2 %v3900_v11, %s4266_s22 }
 0xd92   :  { %v2652_v33 = vpop.permute.xlu0 %2651 }
 0xd93   :  { %v2654_v27 = vmul.f32 %v2652_v33, %v2635_v7 }
 0xd95   :  { %3636 = vmatmul.msk.f32.vlgmr.msrb.gmra.mxu1 %vm761_vm14, %v2654_v27  ;;  %3637 = vmatmul.msk.f32.vlgmr.msrb.gmra.mxu2 %vm761_vm14, %v2654_v27 }
 0xd96   :  { %3109 = vmatpush.msrb.mxu2 %v7645_v22  ;;  %3180 = vmatpush.msrb.mxu1 %v7565_v6 }
 0xd98   :  { %3110 = vmatpush.msrb.mxu2 %v7651_v51  ;;  %3181 = vmatpush.msrb.mxu1 %v7571_v37  ;;  %v2902_v51 = vpop.f32.mrf.mxu3 }
 0xd9a   :  { %3111 = vmatpush.msrb.mxu2 %v7657_v40  ;;  %3182 = vmatpush.msrb.mxu1 %v7577_v10  ;;  %v2922_v10 = vpop.f32.mrf.mxu0 }
 0xd9c   :  { %3112 = vmatpush.msrb.mxu2 %v7663_v20  ;;  %3183 = vmatpush.msrb.mxu1 %v7583_v5 }
 0xd9d   :  { %3640 = vmatmul.msk.f32.vlgmr.msra.gmra.mxu1 %vm761_vm14, %v2654_v27 }
 0xd9e   :  { %3113 = vmatpush.msrb.mxu2 %v7670_v57  ;;  %3184 = vmatpush.msrb.mxu1 %v7589_v18 }
 0xda0   :  { %3114 = vmatpush.msrb.mxu2 %v7676_v26  ;;  %3185 = vmatpush.msrb.mxu1 %v7595_v24 }
 0xda2   :  { %3115 = vmatpush.msrb.mxu2 %v7682_v32  ;;  %3186 = vmatpush.msrb.mxu1 %v7601_v45 }
 0xda4   :  { %3116 = vmatpush.msrb.mxu2 %v7688_v60  ;;  %3187 = vmatpush.msrb.mxu1 %v7607_v58 }
 0xda6   :  { %3287 = vmatpush.msra.mxu1 %v7613_v1  ;;  %3117 = vmatpush.msrb.mxu2 %v7694_v52 }
 0xda8   :  { %3288 = vmatpush.msra.mxu1 %v7619_v48  ;;  %3118 = vmatpush.msrb.mxu2 %v7700_v12 }
 0xdaa   :  { %3289 = vmatpush.msra.mxu1 %v7625_v8  ;;  %3119 = vmatpush.msrb.mxu2 %v7706_v43 }
 0xdac   :  { %3290 = vmatpush.msra.mxu1 %v7631_v49  ;;  %3120 = vmatpush.msrb.mxu2 %v7712_v3 }
 0xdae   :  { %3121 = vmatpush.msrb.mxu2 %v7718_v36 }
 0xdb0   :  { %3122 = vmatpush.msrb.mxu2 %v7724_v25 }
 0xdb2   :  { %3123 = vmatpush.msrb.mxu2 %v7730_v55 }
 0xdb4   :  { %3124 = vmatpush.msrb.mxu2 %v7736_v46 }
 0xde7   :  { %v2735_v6 = vpop.permute.xlu2 %2734 }
 0xde8   :  { %v2737_v37 = vmul.f32 %v2735_v6, %v7812_v39 }
 0xdea   :  { %3047 = vrot.lane.b32.xlu1 %v2737_v37, %s4265_s6 }
 0xe12   :  { %v2945_v22 = vpop.f32.mrf.mxu1 }
 0xe13   :  { %v2946_v40 = vadd.f32 %v2945_v22, %v2902_v51 }
 0xe15   :  { %v2968_v20 = vadd.f32 %v2946_v40, %v8707_v4 }
 0xe17   :  { %v3638_v57 = vmul.f32 -1.442695, %v2968_v20  ;;  %v8725_v20 = vld [vmem:[#allocation46_spill] sm:$0xff] }
 0xe18   :  { %v2965_v5 = vpop.f32.mrf.mxu2 }
 0xe19   :  { %v2966_v18 = vadd.f32 %v2965_v5, %v2922_v10 }
 0xe1a   :  { %v3043_v52 = vpop.f32.mrf.mxu1 }
 0xe1b   :  { %v7863_v24 = vadd.f32 %v2966_v18, %v8659_v13 }
 0xe1d   :  { %3901 = vtanh.f32 %v7863_v24  ;;  %v3639_v41 = vmul.f32 -1.442695, %v7863_v24 }
 0xe1e   :  { %3903 = vpow2.f32 %v3638_v57  ;;  %v8726_v57 = vld [vmem:[#allocation44_spill] sm:$0xff] }
 0xe23   :  { %v3902_v45 = vpop.eup %3901 }
 0xe24   :  { %3011 = vrot.lane.b32.xlu0 %v3902_v45, %s4265_s6  ;;  %v3904_v26 = vpop.eup %3903 }
 0xe25   :  { %v2976_v32 = vadd.f32 1.0, %v3904_v26  ;;  %v8727_v26 = vld [vmem:[#allocation47_spill] sm:$0xff] }
 0xe27   :  { %3905 = vrcp.f32 %v2976_v32  ;;  %v2989_v25 = vand.u32 2147483648, %v2976_v32  ;;  %vm2983_vm7 = vweird.f32 %v2976_v32  ;;  %v2987_v55 = vand.u32 2147483647, %v2976_v32 }
 0xe29   :  { %v2990_v47 = vor.u32 1.1754944e-38, %v2989_v25  ;;  %vm2988_vm10 = vcmp.eq.f32.partialorder %v2987_v55, 8.507059e+37 }
 0xe2d   :  { %v3906_v60 = vpop.eup %3905 }
 0xe2e   :  { %vm2984_vm6 = vweird.f32 %v3906_v60 }
 0xe2f   :  { %vm2985_vm9 = vmor %vm2983_vm7, %vm2984_vm6 }
 0xe5c   :  { %v3048_v58 = vpop.permute.xlu1 %3047 }
 0xe5d   :  { %3641 = vmatmul.msk.f32.vlgmr.msra.gmra.mxu2 %vm1189_vm8, %v3048_v58 }
 0xe5e   :  { %3373 = vmatpush.msra.mxu2 %v7613_v1  ;;  %v2979_v1 = vmul.f32 %v3906_v60, %v2976_v32  ;;  %v8728_v32 = vld [vmem:[#allocation26_spill] sm:$0xff] }
 0xe60   :  { %3374 = vmatpush.msra.mxu2 %v7619_v48 }
 0xe62   :  { %3375 = vmatpush.msra.mxu2 %v7625_v8  ;;  %v2980_v8 = vsub.f32 1.0, %v2979_v1  ;;  %v8730_v1 = vld [vmem:[#allocation30_spill] sm:$0xff] }
 0xe64   :  { %3376 = vmatpush.msra.mxu2 %v7631_v49  ;;  %v2981_v43 = vmul.f32 %v3906_v60, %v2980_v8 }
 0xe65   :  { %3125 = vmatmul.f32.vlgmr.msrb.gmra.mxu2 %v7808_v17 }
 0xe66   :  { %v2982_v3 = vadd.f32 %v3906_v60, %v2981_v43 }
 0xe68   :  { %v2986_v46 = vsel %vm2985_vm9, %v3906_v60, %v2982_v3  ;;  %v8729_v60 = vld [vmem:[#allocation27_spill] sm:$0xff] }
 0xe69   :  { %v2991_v28 = vsel %vm2988_vm10, %v2990_v47, %v2986_v46 }
 0xe6a   :  { %v3009_v15 = vmul.f32 %v2991_v28, %v7818_v21 }
 0xe96   :  { %v3012_v17 = vpop.permute.xlu0 %3011 }
 0xe97   :  { %v3014_v42 = vmul.f32 %v3012_v17, %v2991_v28 }
 0xee0   :  { %v3068_v48 = vpop.f32.mrf.mxu2 }
 0xee1   :  { %v3069_v12 = vadd.f32 %v3068_v48, %v3043_v52 }
 0xee3   :  { %v3071_v49 = vadd.f32 %v7794_v2, %v3069_v12 }
 0xee5   :  { %3907 = vtanh.f32 %v3071_v49  ;;  %v3642_v16 = vmul.f32 -1.442695, %v3071_v49 }
 0xee7   :  { %3909 = vpow2.f32 %v3642_v16 }
 0xeeb   :  { %v3908_v36 = vpop.eup %3907 }
 0xeec   :  { %3094 = vrot.lane.b32.xlu2 %v3908_v36, %s4266_s22  ;;  %v3126_v36 = vpop.f32.mrf.mxu2 }
 0xeed   :  { %v3910_v34 = vpop.eup %3909 }
 0xeee   :  { %v3075_v39 = vadd.f32 1.0, %v3910_v34 }
 0xef0   :  { %3911 = vrcp.f32 %v3075_v39  ;;  %v3087_v56 = vand.u32 2147483648, %v3075_v39  ;;  %vm3081_vm12 = vweird.f32 %v3075_v39  ;;  %v3085_v53 = vand.u32 2147483647, %v3075_v39 }
 0xef2   :  { %v3088_v14 = vor.u32 1.1754944e-38, %v3087_v56  ;;  %vm3086_vm15 = vcmp.eq.f32.partialorder %v3085_v53, 8.507059e+37 }
 0xef4   :  { %3016 = vrot.lane.b32.xlu2 %v3014_v42, %s4265_s6 }
 0xef6   :  { %v3912_v63 = vpop.eup %3911 }
 0xef7   :  { %v3077_v0 = vmul.f32 %v3912_v63, %v3075_v39  ;;  %vm3082_vm11 = vweird.f32 %v3912_v63 }
 0xef8   :  { %vm3083_vm13 = vmor %vm3081_vm12, %vm3082_vm11 }
 0xef9   :  { %v3078_v61 = vsub.f32 1.0, %v3077_v0 }
 0xefb   :  { %v3079_v35 = vmul.f32 %v3912_v63, %v3078_v61 }
 0xefd   :  { %v3080_v54 = vadd.f32 %v3912_v63, %v3079_v35 }
 0xeff   :  { %v3084_v19 = vsel %vm3083_vm13, %v3912_v63, %v3080_v54 }
 0xf00   :  { %v3089_v30 = vsel %vm3086_vm15, %v3088_v14, %v3084_v19 }
 0xf01   :  { %v3092_v27 = vmul.f32 %v3089_v30, %v7825_v31 }
 0xf46   :  { %v3095_v23 = vpop.permute.xlu2 %3094 }
 0xf47   :  { %v3097_v59 = vmul.f32 %v3095_v23, %v3089_v30 }
 0xf49   :  { %3099 = vrot.lane.b32.xlu1 %v3097_v59, %s4266_s22 }
 0xf4e   :  { %v3017_v44 = vpop.permute.xlu2 %3016 }
 0xf4f   :  { %v7879_v11 = vadd.f32 %v3017_v44, %v3009_v15 }
 0xf51   :  { %3913 = vtanh.f32 %v7879_v11 }
 0xf52   :  { %3915 = vpow2.f32 %v3639_v41 }
 0xf57   :  { %v3914_v9 = vpop.eup %3913 }
 0xf58   :  { %3022 = vrot.lane.b32.xlu1 %v3914_v9, %s4265_s6  ;;  %v3916_v38 = vpop.eup %3915 }
 0xf59   :  { %v2977_v62 = vadd.f32 1.0, %v3916_v38 }
 0xf5b   :  { %3917 = vrcp.f32 %v2977_v62  ;;  %v3004_v45 = vand.u32 2147483648, %v2977_v62  ;;  %vm2998_vm1 = vweird.f32 %v2977_v62  ;;  %v3002_v24 = vand.u32 2147483647, %v2977_v62 }
 0xf5d   :  { %v3005_v22 = vor.u32 1.1754944e-38, %v3004_v45  ;;  %vm3003_vm3 = vcmp.eq.f32.partialorder %v3002_v24, 8.507059e+37 }
 0xf61   :  { %v3918_v7 = vpop.eup %3917 }
 0xf62   :  { %v2994_v33 = vmul.f32 %v3918_v7, %v2977_v62  ;;  %vm2999_vm0 = vweird.f32 %v3918_v7 }
 0xf63   :  { %vm3000_vm2 = vmor %vm2998_vm1, %vm2999_vm0 }
 0xf64   :  { %v2995_v21 = vsub.f32 1.0, %v2994_v33 }
 0xf66   :  { %v2996_v10 = vmul.f32 %v3918_v7, %v2995_v21 }
 0xf68   :  { %v2997_v5 = vadd.f32 %v3918_v7, %v2996_v10 }
 0xf6a   :  { %v3001_v58 = vsel %vm3000_vm2, %v3918_v7, %v2997_v5 }
 0xf6b   :  { %v3006_v31 = vsel %vm3003_vm3, %v3005_v22, %v3001_v58 }
 0xfbb   :  { %v3100_v6 = vpop.permute.xlu1 %3099 }
 0xfbc   :  { %v7885_v37 = vadd.f32 %v3100_v6, %v3092_v27 }
 0xfbe   :  { %3919 = vtanh.f32 %v7885_v37 }
 0xfc4   :  { %v3920_v18 = vpop.eup %3919 }
 0xfc5   :  { %3105 = vrot.lane.b32.xlu0 %v3920_v18, %s4266_s22 }
 0xfca   :  { %v3023_v51 = vpop.permute.xlu1 %3022 }
 0xfcb   :  { %v3025_v40 = vmul.f32 %v3023_v51, %v3006_v31 }
 0xfcd   :  { %3643 = vmatmul.msk.f32.vlgmr.msrb.gmra.mxu0 %vm761_vm14, %v3025_v40  ;;  %3644 = vmatmul.msk.f32.vlgmr.msrb.gmra.mxu1 %vm761_vm14, %v3025_v40 }
 0xfce   :  { %3344 = vmatpush.msrb.mxu1 %v7382_v50  ;;  %v3146_v50 = vpop.f32.mrf.mxu3 }
 0xfd0   :  { %3345 = vmatpush.msrb.mxu1 %v7389_v29 }
 0xfd2   :  { %3346 = vmatpush.msrb.mxu1 %v8725_v20 }
 0xfd4   :  { %3347 = vmatpush.msrb.mxu1 %v8726_v57 }
 0xfd5   :  { %3647 = vmatmul.msk.f32.vlgmr.msra.gmra.mxu0 %vm761_vm14, %v3025_v40 }
 0xfd6   :  { %3348 = vmatpush.msrb.mxu1 %v8727_v26 }
 0xfd8   :  { %3349 = vmatpush.msrb.mxu1 %v8728_v32 }
 0xfda   :  { %3350 = vmatpush.msrb.mxu1 %v8729_v60 }
 0xfdc   :  { %3351 = vmatpush.msrb.mxu1 %v8730_v1 }
0x1037   :  { %v3106_v52 = vpop.permute.xlu0 %3105 }
0x1038   :  { %v3108_v48 = vmul.f32 %v3106_v52, %v3089_v30 }
0x103a   :  { %3271 = vrot.lane.b32.xlu2 %v3108_v48, %s4265_s6 }
0x104a   :  { %v3189_v29 = vpop.f32.mrf.mxu1  ;;  %v3169_v3 = vpop.f32.mrf.mxu0 }
0x104b   :  { %v3190_v12 = vadd.f32 %v3189_v29, %v3146_v50  ;;  %v3170_v25 = vadd.f32 %v3169_v3, %v3126_v36 }
0x104d   :  { %v7902_v8 = vadd.f32 %v3190_v12, %v8659_v13  ;;  %v3192_v55 = vadd.f32 %v3170_v25, %v8707_v4 }
0x104f   :  { %3921 = vtanh.f32 %v7902_v8  ;;  %v3645_v46 = vmul.f32 -1.442695, %v3192_v55  ;;  %v3646_v22 = vmul.f32 -1.442695, %v7902_v8 }
0x1051   :  { %3923 = vpow2.f32 %v3645_v46 }
0x1052   :  { %v3267_v42 = vpop.f32.mrf.mxu0 }
0x1055   :  { %v3922_v49 = vpop.eup %3921 }
0x1056   :  { %3235 = vrot.lane.b32.xlu2 %v3922_v49, %s4265_s6 }
0x1057   :  { %v3924_v17 = vpop.eup %3923 }
0x1058   :  { %v3200_v47 = vadd.f32 1.0, %v3924_v17 }
0x105a   :  { %3925 = vrcp.f32 %v3200_v47  ;;  %v3213_v54 = vand.u32 2147483648, %v3200_v47  ;;  %vm3207_vm5 = vweird.f32 %v3200_v47  ;;  %v3211_v4 = vand.u32 2147483647, %v3200_v47 }
0x105c   :  { %v3214_v19 = vor.u32 1.1754944e-38, %v3213_v54  ;;  %vm3212_vm7 = vcmp.eq.f32.partialorder %v3211_v4, 8.507059e+37 }
0x1060   :  { %v3926_v13 = vpop.eup %3925 }
0x1061   :  { %v3203_v28 = vmul.f32 %v3926_v13, %v3200_v47  ;;  %vm3208_vm4 = vweird.f32 %v3926_v13 }
0x1062   :  { %vm3209_vm6 = vmor %vm3207_vm5, %vm3208_vm4 }
0x1063   :  { %v3204_v39 = vsub.f32 1.0, %v3203_v28 }
0x1065   :  { %v3205_v0 = vmul.f32 %v3926_v13, %v3204_v39 }
0x1067   :  { %v3206_v61 = vadd.f32 %v3926_v13, %v3205_v0 }
0x1069   :  { %v3210_v56 = vsel %vm3209_vm6, %v3926_v13, %v3206_v61 }
0x106a   :  { %v3215_v14 = vsel %vm3212_vm7, %v3214_v19, %v3210_v56 }
0x106b   :  { %v3233_v18 = vmul.f32 %v3215_v14, %v7879_v11 }
0x1094   :  { %v3272_v43 = vpop.permute.xlu2 %3271 }
0x1095   :  { %3648 = vmatmul.msk.f32.vlgmr.msra.gmra.mxu1 %vm1189_vm8, %v3272_v43 }
0x10b0   :  { %v3236_v53 = vpop.permute.xlu2 %3235 }
0x10b1   :  { %v3238_v23 = vmul.f32 %v3236_v53, %v3215_v14 }
0x1112   :  { %v3292_v16 = vpop.f32.mrf.mxu1 }
0x1113   :  { %v3293_v34 = vadd.f32 %v3292_v16, %v3267_v42 }
0x1115   :  { %v3295_v63 = vadd.f32 %v7794_v2, %v3293_v34 }
0x1117   :  { %3927 = vtanh.f32 %v3295_v63  ;;  %v3649_v30 = vmul.f32 -1.442695, %v3295_v63 }
0x1119   :  { %3929 = vpow2.f32 %v3649_v30 }
0x111d   :  { %v3928_v35 = vpop.eup %3927 }
0x111e   :  { %3318 = vrot.lane.b32.xlu0 %v3928_v35, %s4266_s22 }
0x111f   :  { %v3930_v59 = vpop.eup %3929 }
0x1120   :  { %v3299_v15 = vadd.f32 1.0, %v3930_v59  ;;  %v3422_v59 = vld [vmem:[%s8056_s10 + $0x18] sm:$0xff] }
0x1121   :  { %3444 = vmatpush.msra.mxu3 %v3422_v59 }
0x1122   :  { %3931 = vrcp.f32 %v3299_v15  ;;  %v3311_v7 = vand.u32 2147483648, %v3299_v15  ;;  %vm3305_vm10 = vweird.f32 %v3299_v15  ;;  %v3309_v33 = vand.u32 2147483647, %v3299_v15 }
0x1124   :  { %v3312_v6 = vor.u32 1.1754944e-38, %v3311_v7  ;;  %vm3310_vm12 = vcmp.eq.f32.partialorder %v3309_v33, 8.507059e+37  ;;  %v3467_v7 = vld [vmem:[%s8058_s12 + $0x70] sm:$0xff]  ;;  %v3466_v33 = vld [vmem:[%s8058_s12 + $0x68] sm:$0xff] }
0x1126   :  { %3240 = vrot.lane.b32.xlu0 %v3238_v23, %s4265_s6 }
0x1128   :  { %v3932_v44 = vpop.eup %3931 }
0x1129   :  { %v3301_v9 = vmul.f32 %v3932_v44, %v3299_v15  ;;  %vm3306_vm9 = vweird.f32 %v3932_v44  ;;  %v3421_v15 = vld [vmem:[%s8056_s10 + $0x10] sm:$0xff] }
0x112a   :  { %vm3307_vm11 = vmor %vm3305_vm10, %vm3306_vm9  ;;  %3445 = vmatpush.msra.mxu3 %v3421_v15 }
0x112b   :  { %v3302_v41 = vsub.f32 1.0, %v3301_v9  ;;  %v3419_v9 = vld [vmem:[%s8056_s10] sm:$0xff] }
0x112d   :  { %v3303_v38 = vmul.f32 %v3932_v44, %v3302_v41 }
0x112f   :  { %v3304_v62 = vadd.f32 %v3932_v44, %v3303_v38 }
0x1131   :  { %v3308_v27 = vsel %vm3307_vm11, %v3932_v44, %v3304_v62  ;;  %v3420_v44 = vld [vmem:[%s8056_s10 + $0x8] sm:$0xff]  ;;  %v3468_v62 = vld [vmem:[%s8058_s12 + $0x78] sm:$0xff] }
0x1132   :  { %v3313_v10 = vsel %vm3310_vm12, %v3312_v6, %v3308_v27  ;;  %3446 = vmatpush.msra.mxu3 %v3420_v44  ;;  %3473 = vmatpush.msrb.mxu0 %v3468_v62  ;;  %v3465_v27 = vld [vmem:[%s8058_s12 + $0x60] sm:$0xff]  ;;  %v3464_v6 = vld [vmem:[%s8058_s12 + $0x58] sm:$0xff] }
0x1133   :  { %v3316_v57 = vmul.f32 %v3313_v10, %v7885_v37 }
0x1134   :  { %3447 = vmatpush.msra.mxu3 %v3419_v9  ;;  %3474 = vmatpush.msrb.mxu0 %v3467_v7 }
0x1136   :  { %3475 = vmatpush.msrb.mxu0 %v3466_v33 }
0x1138   :  { %3476 = vmatpush.msrb.mxu0 %v3465_v27 }
0x113a   :  { %3477 = vmatpush.msrb.mxu0 %v3464_v6 }
0x1190   :  { %v3319_v21 = vpop.permute.xlu0 %3318 }
0x1191   :  { %v3321_v5 = vmul.f32 %v3319_v21, %v3313_v10  ;;  %v3463_v21 = vld [vmem:[%s8058_s12 + $0x50] sm:$0xff] }
0x1192   :  { %3478 = vmatpush.msrb.mxu0 %v3463_v21 }
0x1193   :  { %3323 = vrot.lane.b32.xlu1 %v3321_v5, %s4266_s22  ;;  %v3461_v5 = vld [vmem:[%s8058_s12 + $0x40] sm:$0xff] }
0x1198   :  { %v3241_v45 = vpop.permute.xlu0 %3240 }
0x1199   :  { %v3243_v24 = vadd.f32 %v3241_v45, %v3233_v18  ;;  %v3460_v18 = vld [vmem:[%s8058_s12 + $0x38] sm:$0xff]  ;;  %v3459_v45 = vld [vmem:[%s8058_s12 + $0x30] sm:$0xff] }
0x119b   :  { %3933 = vtanh.f32 %v3243_v24  ;;  %v3458_v24 = vld [vmem:[%s8058_s12 + $0x28] sm:$0xff] }
0x119c   :  { %3935 = vpow2.f32 %v3646_v22  ;;  %v3456_v22 = vld [vmem:[%s8058_s12 + $0x18] sm:$0xff] }
0x11a1   :  { %v3934_v58 = vpop.eup %3933 }
0x11a2   :  { %3246 = vrot.lane.b32.xlu0 %v3934_v58, %s4265_s6  ;;  %v3936_v31 = vpop.eup %3935  ;;  %v3457_v58 = vld [vmem:[%s8058_s12 + $0x20] sm:$0xff] }
0x11a3   :  { %v3201_v51 = vadd.f32 1.0, %v3936_v31 }
0x11a5   :  { %3937 = vrcp.f32 %v3201_v51  ;;  %v3228_v48 = vand.u32 2147483648, %v3201_v51  ;;  %vm3222_vm15 = vweird.f32 %v3201_v51  ;;  %v3226_v50 = vand.u32 2147483647, %v3201_v51 }
0x11a7   :  { %v3229_v12 = vor.u32 1.1754944e-38, %v3228_v48  ;;  %vm3227_vm1 = vcmp.eq.f32.partialorder %v3226_v50, 8.507059e+37  ;;  %v3502_v48 = vld [vmem:[%s8060_s14 + $0x40] sm:$0xff]  ;;  %v3501_v50 = vld [vmem:[%s8060_s14 + $0x38] sm:$0xff] }
0x11ab   :  { %v3938_v40 = vpop.eup %3937 }
0x11ac   :  { %v3218_v20 = vmul.f32 %v3938_v40, %v3201_v51  ;;  %vm3223_vm13 = vweird.f32 %v3938_v40  ;;  %v3455_v51 = vld [vmem:[%s8058_s12 + $0x10] sm:$0xff] }
0x11ad   :  { %vm3224_vm0 = vmor %vm3222_vm15, %vm3223_vm13 }
0x11ae   :  { %v3219_v32 = vsub.f32 1.0, %v3218_v20  ;;  %v3453_v20 = vld [vmem:[%s8058_s12] sm:$0xff] }
0x11b0   :  { %v3220_v11 = vmul.f32 %v3938_v40, %v3219_v32  ;;  %v3507_v32 = vld [vmem:[%s8060_s14 + $0x68] sm:$0xff] }
0x11b2   :  { %v3221_v1 = vadd.f32 %v3938_v40, %v3220_v11  ;;  %v3505_v11 = vld [vmem:[%s8060_s14 + $0x58] sm:$0xff] }
0x11b4   :  { %v3225_v29 = vsel %vm3224_vm0, %v3938_v40, %v3221_v1  ;;  %v3454_v40 = vld [vmem:[%s8058_s12 + $0x8] sm:$0xff]  ;;  %v3504_v1 = vld [vmem:[%s8060_s14 + $0x50] sm:$0xff] }
0x11b5   :  { %v3230_v8 = vsel %vm3227_vm1, %v3229_v12, %v3225_v29  ;;  %v3500_v29 = vld [vmem:[%s8060_s14 + $0x30] sm:$0xff]  ;;  %v3499_v12 = vld [vmem:[%s8060_s14 + $0x28] sm:$0xff] }
0x1205   :  { %v3324_v26 = vpop.permute.xlu1 %3323 }
0x1206   :  { %v3326_v60 = vadd.f32 %v3324_v26, %v3316_v57  ;;  %v3509_v57 = vld [vmem:[%s8060_s14 + $0x78] sm:$0xff]  ;;  %v3508_v26 = vld [vmem:[%s8060_s14 + $0x70] sm:$0xff] }
0x1207   :  { %3514 = vmatpush.msrb.mxu2 %v3509_v57 }
0x1208   :  { %3939 = vtanh.f32 %v3326_v60 }
0x1209   :  { %3515 = vmatpush.msrb.mxu2 %v3508_v26 }
0x120b   :  { %3516 = vmatpush.msrb.mxu2 %v3507_v32 }
0x120e   :  { %v3940_v52 = vpop.eup %3939 }
0x120f   :  { %3329 = vrot.lane.b32.xlu1 %v3940_v52, %s4266_s22  ;;  %v3503_v52 = vld [vmem:[%s8060_s14 + $0x48] sm:$0xff] }
0x1214   :  { %v3247_v49 = vpop.permute.xlu0 %3246 }
0x1215   :  { %v3249_v37 = vmul.f32 %v3247_v49, %v3230_v8  ;;  %v3498_v8 = vld [vmem:[%s8060_s14 + $0x20] sm:$0xff]  ;;  %v3497_v49 = vld [vmem:[%s8060_s14 + $0x18] sm:$0xff] }
0x1217   :  { %3650 = vmatmul.msk.f32.vlgmr.msrb.gmra.mxu1 %vm761_vm14, %v3249_v37  ;;  %v3658_v37 = vld [vmem:[%s8057_s11] ss:$0 sm:$0xff] }
0x1281   :  { %v3330_v43 = vpop.permute.xlu1 %3329 }
0x1282   :  { %v3332_v3 = vmul.f32 %v3330_v43, %v3313_v10  ;;  %v3462_v10 = vld [vmem:[%s8058_s12 + $0x48] sm:$0xff] }
0x1283   :  { %3479 = vmatpush.msrb.mxu0 %v3462_v10 }
0x1284   :  { %3357 = vrot.lane.b32.xlu2 %v3332_v3, %s4265_s6 }
0x1285   :  { %3480 = vmatpush.msrb.mxu0 %v3461_v5 }
0x1287   :  { %3481 = vmatpush.msrb.mxu0 %v3460_v18 }
0x1289   :  { %3482 = vmatpush.msrb.mxu0 %v3459_v45 }
0x128b   :  { %3483 = vmatpush.msrb.mxu0 %v3458_v24 }
0x128d   :  { %3484 = vmatpush.msrb.mxu0 %v3457_v58 }
0x128f   :  { %3485 = vmatpush.msrb.mxu0 %v3456_v22 }
0x1291   :  { %3486 = vmatpush.msrb.mxu0 %v3455_v51 }
0x1293   :  { %3487 = vmatpush.msrb.mxu0 %v3454_v40 }
0x1294   :  { %v3353_v25 = vpop.f32.mrf.mxu1 }
0x1295   :  { %3488 = vmatpush.msrb.mxu0 %v3453_v20 }
0x12de   :  { %v3358_v36 = vpop.permute.xlu2 %3357 }
0x12df   :  { %3651 = vmatmul.msk.f32.vlgmr.msra.gmra.mxu2 %vm1189_vm8, %v3358_v36 }
0x1362   :  { %v3378_v55 = vpop.f32.mrf.mxu2 }
0x1363   :  { %v3379_v46 = vadd.f32 %v3378_v55, %v3353_v25  ;;  %v3496_v25 = vld [vmem:[%s8060_s14 + $0x10] sm:$0xff]  ;;  %v3495_v55 = vld [vmem:[%s8060_s14 + $0x8] sm:$0xff] }
0x1365   :  { %v3381_v17 = vadd.f32 %v7794_v2, %v3379_v46  ;;  %v3494_v46 = vld [vmem:[%s8060_s14] sm:$0xff] }
0x1367   :  { %3941 = vtanh.f32 %v3381_v17  ;;  %v3652_v13 = vmul.f32 -1.442695, %v3381_v17  ;;  %v21_v17 = vstv %s8061_s15 }
0x1368   :  { %22 = vst [vmem:[#allocation3] sm:$0x1] %v21_v17 }
0x1369   :  { %3943 = vpow2.f32 %v3652_v13 }
0x136d   :  { %v3942_v47 = vpop.eup %3941 }
0x136e   :  { %3404 = vrot.lane.b32.xlu1 %v3942_v47, %s4266_s22  ;;  %v3659_v47 = vld [vmem:[%s8059_s13] ss:$0 sm:$0xff] }
0x136f   :  { %v3944_v28 = vpop.eup %3943 }
0x1370   :  { %v3385_v42 = vadd.f32 1.0, %v3944_v28 }
0x1372   :  { %3945 = vrcp.f32 %v3385_v42  ;;  %v3397_v61 = vand.u32 2147483648, %v3385_v42  ;;  %vm3391_vm2 = vweird.f32 %v3385_v42  ;;  %v3395_v35 = vand.u32 2147483647, %v3385_v42 }
0x1374   :  { %v3398_v54 = vor.u32 1.1754944e-38, %v3397_v61  ;;  %vm3396_vm4 = vcmp.eq.f32.partialorder %v3395_v35, 8.507059e+37 }
0x1378   :  { %v3946_v16 = vpop.eup %3945 }
0x1379   :  { %v3387_v34 = vmul.f32 %v3946_v16, %v3385_v42  ;;  %vm3392_vm14 = vweird.f32 %v3946_v16 }
0x137a   :  { %vm3393_vm3 = vmor %vm3391_vm2, %vm3392_vm14 }
0x137b   :  { %v3388_v39 = vsub.f32 1.0, %v3387_v34 }
0x137d   :  { %v3389_v63 = vmul.f32 %v3946_v16, %v3388_v39 }
0x137f   :  { %v3390_v0 = vadd.f32 %v3946_v16, %v3389_v63 }
0x1381   :  { %v3394_v2 = vsel %vm3393_vm3, %v3946_v16, %v3390_v0  ;;  %v3660_v16 = vld [vmem:[#allocation3] ss:$0 sm:$0xff] }
0x1382   :  { %v3399_v56 = vsel %vm3396_vm4, %v3398_v54, %v3394_v2 }
0x1383   :  { %v3402_v19 = vmul.f32 %v3399_v56, %v3326_v60  ;;  %v3506_v60 = vld [vmem:[%s8060_s14 + $0x60] sm:$0xff] }
0x1384   :  { %3517 = vmatpush.msrb.mxu2 %v3506_v60 }
0x1386   :  { %3518 = vmatpush.msrb.mxu2 %v3505_v11 }
0x1388   :  { %3519 = vmatpush.msrb.mxu2 %v3504_v1 }
0x138a   :  { %3520 = vmatpush.msrb.mxu2 %v3503_v52 }
0x138c   :  { %3521 = vmatpush.msrb.mxu2 %v3502_v48 }
0x138e   :  { %3522 = vmatpush.msrb.mxu2 %v3501_v50 }
0x1390   :  { %3523 = vmatpush.msrb.mxu2 %v3500_v29 }
0x1392   :  { %3524 = vmatpush.msrb.mxu2 %v3499_v12 }
0x1394   :  { %3525 = vmatpush.msrb.mxu2 %v3498_v8 }
0x1396   :  { %3526 = vmatpush.msrb.mxu2 %v3497_v49 }
0x1398   :  { %3527 = vmatpush.msrb.mxu2 %v3496_v25 }
0x139a   :  { %3528 = vmatpush.msrb.mxu2 %v3495_v55 }
0x139c   :  { %3529 = vmatpush.msrb.mxu2 %v3494_v46 }
0x13e0   :  { %v3405_v4 = vpop.permute.xlu1 %3404 }
0x13e1   :  { %v3407_v53 = vmul.f32 %v3405_v4, %v3399_v56 }
0x13e3   :  { %3409 = vrot.lane.b32.xlu2 %v3407_v53, %s4266_s22 }
0x143d   :  { %v3410_v14 = vpop.permute.xlu2 %3409 }
0x143e   :  { %v3412_v23 = vadd.f32 %v3410_v14, %v3402_v19 }
0x1440   :  { %3947 = vtanh.f32 %v3412_v23 }
0x1446   :  { %v3948_v30 = vpop.eup %3947 }
0x1447   :  { %3415 = vrot.lane.b32.xlu0 %v3948_v30, %s4266_s22 }
0x14b9   :  { %v3416_v41 = vpop.permute.xlu0 %3415 }
0x14ba   :  { %v3418_v38 = vmul.f32 %v3416_v41, %v3399_v56 }
0x14bc   :  { %3428 = vrot.lane.b32.xlu1 %v3418_v38, %s4265_s6 }
0x152e   :  { %v3429_v31 = vpop.permute.xlu1 %3428 }
0x152f   :  { %3653 = vmatmul.msk.f32.vlgmr.msra.gmra.mxu3 %vm1189_vm8, %v3429_v31  ;;  %vm3534_vm8 = vcmask 7168  }
0x15b2   :  { %v3449_v43 = vpop.f32.mrf.mxu3 }
0x15b3   :  { %v3450_v3 = vadd.f32 %v3658_v37, %v3449_v43 }
0x15b5   :  { %v3452_v36 = vmax.f32 %v3450_v3, 0.0 }
0x15b7   :  { %3489 = vmatmul.f32.vlgmr.msrb.gmra.mxu0 %v3452_v36 }
0x1634   :  { %v3490_v13 = vpop.f32.mrf.mxu0 }
0x1635   :  { %v3491_v28 = vadd.f32 %v3659_v47, %v3490_v13 }
0x1637   :  { %v3493_v42 = vmax.f32 %v3491_v28, 0.0 }
0x1639   :  { %3530 = vmatmul.f32.vlgmr.msrb.gmra.mxu2 %v3493_v42 }
0x16bc   :  { %v3531_v34 = vpop.f32.mrf.mxu2 }
0x16bd   :  { %v3532_v39 = vadd.f32 %v3660_v16, %v3531_v34 }
0x16bf   :  { %3535 = vst.msk [vmem:[%s8062_s16] sm:$0xff] %vm3534_vm8, %v3532_v39 }

</bundles_post_ra>
